<compile_context>
chip_gen: v6e
topology: v6e:2x2x1
jax: 0.10.0
libtpu: 0.0.40
codegen_flags: <defaults>
</compile_context>

<pallas_src>
import functools

import jax
import jax.numpy as jnp
from jax import lax
from jax.experimental import pallas as pl
from jax.experimental.pallas import tpu as pltpu

LOG_SCALE = 32768.0
LOG_EPS = 1e-6
MAG_EPS = 1e-24          # keeps d|mag|/dx finite at silent/padded bins
_VMEM_LIMIT = 40 * 1024 * 1024


def _round_up(x, m):
    return ((x + m - 1) // m) * m


# --------------------------------------------------------------------------
# Pallas kernels
# --------------------------------------------------------------------------

def _stft_stats_kernel(ef_ref, cf_ref, w_ref, out_ref, acc_ref):
    """Fused windowed-DFT -> magnitude -> loss statistics.

    ef/cf : (tile_rows, n_fft) bf16 frames (enhanced / clean)
    w     : (n_fft, 256) bf16 = [cos tile (128) | sin tile (128)] for this q
    acc   : (8, 128) f32 VMEM scratch, accumulated over the q axis
            row 0 = sum (mag_e - mag_c)^2
            row 1 = sum |log(me*S+eps) - log(mc*S+eps)|
            row 2 = sum mag_c^2
    out   : (8, 128) per-(batch, frame-tile) partials, written at last q only.
    """
    q = pl.program_id(2)

    @pl.when(q == 0)
    def _():
        acc_ref[...] = jnp.zeros_like(acc_ref)

    w = w_ref[...]
    eo = jnp.dot(ef_ref[...], w, preferred_element_type=jnp.float32)   # [rows, 256]
    co = jnp.dot(cf_ref[...], w, preferred_element_type=jnp.float32)
    re_e, im_e = eo[:, :128], eo[:, 128:]
    re_c, im_c = co[:, :128], co[:, 128:]
    mag_e = jnp.sqrt(re_e * re_e + im_e * im_e + MAG_EPS)
    mag_c = jnp.sqrt(re_c * re_c + im_c * im_c + MAG_EPS)

    d = mag_e - mag_c
    log_d = jnp.abs(jnp.log((mag_e * LOG_SCALE + LOG_EPS) /
                            (mag_c * LOG_SCALE + LOG_EPS)))

    acc_ref[0:1, :] += jnp.sum(d * d, axis=0, keepdims=True)
    acc_ref[1:2, :] += jnp.sum(log_d, axis=0, keepdims=True)
    acc_ref[2:3, :] += jnp.sum(mag_c * mag_c, axis=0, keepdims=True)

    @pl.when(q == pl.num_programs(2) - 1)
    def _():
        out_ref[...] = acc_ref[...]


def stft_loss_stats(e_frames, c_frames, weights, tile_rows):
    """e/c frames [B, NF_pad, n_fft] bf16; weights [n_fft, 2*F_pad] bf16.

    Returns per-batch (sum d^2, sum |log diff|, sum c^2) over the spectrogram."""
    b, nf_pad, n_fft = e_frames.shape
    n_q = weights.shape[1] // 256
    n_i = nf_pad // tile_rows
    out = pl.pallas_call(
        _stft_stats_kernel,
        out_shape=jax.ShapeDtypeStruct((b, n_i, 8, 128), jnp.float32),
        grid=(b, n_i, n_q),
        in_specs=[
            pl.BlockSpec((None, tile_rows, n_fft), lambda bi, i, q: (bi, i, 0)),
            pl.BlockSpec((None, tile_rows, n_fft), lambda bi, i, q: (bi, i, 0)),
            pl.BlockSpec((n_fft, 256), lambda bi, i, q: (0, q)),
        ],
        out_specs=pl.BlockSpec((None, None, 8, 128),
                               lambda bi, i, q: (bi, i, 0, 0)),
        scratch_shapes=[pltpu.VMEM((8, 128), jnp.float32)],
        compiler_params=pltpu.CompilerParams(
            dimension_semantics=("parallel", "parallel", "arbitrary"),
            vmem_limit_bytes=_VMEM_LIMIT),
    )(e_frames, c_frames, weights)
    sums = jnp.sum(out[:, :, :3, :], axis=(1, 3))          # [B, 3]
    return sums[:, 0], sums[:, 1], sums[:, 2]


def _mel_stats_kernel(ef_ref, cf_ref, w_ref, fb_ref, out_ref,
                      mel_e_acc, mel_c_acc):
    """Fused windowed-DFT -> magnitude -> mel projection -> mel loss stats.

    fb : (128, 128) bf16 filterbank rows for this frequency tile.
    Mel accumulators hold the (tile_rows, 128) mel tile summed over the q
    axis; statistics are emitted at the last frequency tile.
    out rows: 0 = sum (mel_e - mel_c)^2, 1 = sum |log diff|."""
    q = pl.program_id(2)

    @pl.when(q == 0)
    def _():
        mel_e_acc[...] = jnp.zeros_like(mel_e_acc)
        mel_c_acc[...] = jnp.zeros_like(mel_c_acc)

    w = w_ref[...]
    eo = jnp.dot(ef_ref[...], w, preferred_element_type=jnp.float32)
    co = jnp.dot(cf_ref[...], w, preferred_element_type=jnp.float32)
    re_e, im_e = eo[:, :128], eo[:, 128:]
    re_c, im_c = co[:, :128], co[:, 128:]
    mag_e = jnp.sqrt(re_e * re_e + im_e * im_e + MAG_EPS)
    mag_c = jnp.sqrt(re_c * re_c + im_c * im_c + MAG_EPS)

    fb = fb_ref[...]
    mel_e_acc[...] += jnp.dot(mag_e.astype(fb.dtype), fb,
                              preferred_element_type=jnp.float32)
    mel_c_acc[...] += jnp.dot(mag_c.astype(fb.dtype), fb,
                              preferred_element_type=jnp.float32)

    @pl.when(q == pl.num_programs(2) - 1)
    def _():
        me = mel_e_acc[...]
        mc = mel_c_acc[...]
        d = me - mc
        log_d = jnp.abs(jnp.log((me * LOG_SCALE + LOG_EPS) /
                                (mc * LOG_SCALE + LOG_EPS)))
        out_ref[...] = jnp.zeros_like(out_ref)
        out_ref[0:1, :] = jnp.sum(d * d, axis=0, keepdims=True)
        out_ref[1:2, :] = jnp.sum(log_d, axis=0, keepdims=True)


def mel_loss_stats(e_frames, c_frames, weights, fb, tile_rows):
    """Returns per-batch (sum d^2, sum |log diff|) over the mel spectrogram."""
    b, nf_pad, n_fft = e_frames.shape
    n_q = weights.shape[1] // 256
    n_i = nf_pad // tile_rows
    out = pl.pallas_call(
        _mel_stats_kernel,
        out_shape=jax.ShapeDtypeStruct((b, n_i, 8, 128), jnp.float32),
        grid=(b, n_i, n_q),
        in_specs=[
            pl.BlockSpec((None, tile_rows, n_fft), lambda bi, i, q: (bi, i, 0)),
            pl.BlockSpec((None, tile_rows, n_fft), lambda bi, i, q: (bi, i, 0)),
            pl.BlockSpec((n_fft, 256), lambda bi, i, q: (0, q)),
            pl.BlockSpec((128, 128), lambda bi, i, q: (q, 0)),
        ],
        out_specs=pl.BlockSpec((None, None, 8, 128),
                               lambda bi, i, q: (bi, i, 0, 0)),
        scratch_shapes=[pltpu.VMEM((tile_rows, 128), jnp.float32),
                        pltpu.VMEM((tile_rows, 128), jnp.float32)],
        compiler_params=pltpu.CompilerParams(
            dimension_semantics=("parallel", "parallel", "arbitrary"),
            vmem_limit_bytes=_VMEM_LIMIT),
    )(e_frames, c_frames, weights, fb)
    sums = jnp.sum(out[:, :, :2, :], axis=(1, 3))
    return sums[:, 0], sums[:, 1]


def _wav_abs_sum_kernel(e_ref, c_ref, out_ref, *, tile_t, t_total):
    """Sum |e - c| over a [B, tile_t] column block; ragged tail masked."""
    i = pl.program_id(0)

    @pl.when(i == 0)
    def _():
        out_ref[...] = jnp.zeros_like(out_ref)

    col = i * tile_t + lax.broadcasted_iota(jnp.int32, e_ref.shape, 1)
    d = jnp.where(col < t_total, jnp.abs(e_ref[...] - c_ref[...]), 0.0)
    out_ref[...] += jnp.sum(d)          # scalar broadcast; total lives in [0, 0]


def wav_abs_sum(e, c):
    """Total sum |e - c| over all elements (waveform L1 numerator)."""
    b, t = e.shape
    cap = max(128, (4 * 1024 * 1024 // (max(b, 1) * 4)) // 128 * 128)
    tile_t = min(_round_up(t, 128), cap)
    kernel = functools.partial(_wav_abs_sum_kernel, tile_t=tile_t, t_total=t)
    out = pl.pallas_call(
        kernel,
        out_shape=jax.ShapeDtypeStruct((8, 128), jnp.float32),
        grid=(pl.cdiv(t, tile_t),),
        in_specs=[pl.BlockSpec((b, tile_t), lambda i: (0, i)),
                  pl.BlockSpec((b, tile_t), lambda i: (0, i))],
        out_specs=pl.BlockSpec((8, 128), lambda i: (0, 0)),
        compiler_params=pltpu.CompilerParams(
            dimension_semantics=("arbitrary",),
            vmem_limit_bytes=_VMEM_LIMIT),
    )(e.astype(jnp.float32), c.astype(jnp.float32))
    return out[0, 0]


# --------------------------------------------------------------------------
# JAX glue (constants + frame extraction)
# --------------------------------------------------------------------------

def hann_window(length):
    n = jnp.arange(length, dtype=jnp.float32)
    return 0.5 - 0.5 * jnp.cos(2.0 * jnp.pi * n / length)   # periodic hann


def fused_dft_weights(n_fft, window):
    """Window-folded real-DFT basis, laid out as per-frequency-tile [cos|sin]
    column groups: [n_fft, 2 * F_pad] bf16, F_pad = round_up(n_fft//2+1, 128)."""
    n_freqs = n_fft // 2 + 1
    f_pad = _round_up(n_freqs, 128)
    k = jnp.arange(n_fft, dtype=jnp.int32)[:, None]
    f = jnp.arange(n_freqs, dtype=jnp.int32)[None, :]
    phase = (k * f) % n_fft                       # exact integer phase
    ang = 2.0 * jnp.pi * phase.astype(jnp.float32) / n_fft
    cos_w = window[:, None] * jnp.cos(ang)
    sin_w = window[:, None] * jnp.sin(ang)
    cos_w = jnp.pad(cos_w, ((0, 0), (0, f_pad - n_freqs)))
    sin_w = jnp.pad(sin_w, ((0, 0), (0, f_pad - n_freqs)))
    n_q = f_pad // 128
    cos_t = cos_w.reshape(n_fft, n_q, 1, 128)
    sin_t = sin_w.reshape(n_fft, n_q, 1, 128)
    w = jnp.concatenate([cos_t, sin_t], axis=2)   # [n_fft, n_q, 2, 128]
    return w.reshape(n_fft, n_q * 256).astype(jnp.bfloat16)


def mel_filterbank(n_freqs, f_min, f_max, n_mels, sample_rate):
    """torchaudio melscale_fbanks(norm=None, mel_scale='htk') -> [n_freqs, n_mels]."""
    all_freqs = jnp.linspace(0.0, float(sample_rate // 2), n_freqs)

    def hz_to_mel(f):
        return 2595.0 * jnp.log10(1.0 + f / 700.0)

    def mel_to_hz(m):
        return 700.0 * (10.0 ** (m / 2595.0) - 1.0)

    m_min = hz_to_mel(jnp.float32(f_min))
    m_max = hz_to_mel(jnp.float32(f_max))
    m_pts = jnp.linspace(m_min, m_max, n_mels + 2)
    f_pts = mel_to_hz(m_pts)
    f_diff = f_pts[1:] - f_pts[:-1]
    slopes = f_pts[None, :] - all_freqs[:, None]
    down = -slopes[:, :-2] / f_diff[:-1]
    up = slopes[:, 2:] / f_diff[1:]
    fb = jnp.maximum(0.0, jnp.minimum(down, up))
    return fb.astype(jnp.float32)


def _pick_tile_rows(n_fft, n_frames, target_bytes=4 * 1024 * 1024):
    """Row tile for bf16 frames: big (raises AI of the weight-streaming
    matmul), multiple of 16 (bf16 sublane packing), capped at 512 rows so the
    double-buffered working set stays well inside v7x's 64 MiB VMEM."""
    cap = max(16, (target_bytes // (n_fft * 2)) // 16 * 16)
    cap = min(cap, 512)
    return min(cap, _round_up(n_frames, 16))


def _frame_params(t, n_fft, hop):
    n_frames = 1 + (t + 2 * (n_fft // 2) - n_fft) // hop
    tile_rows = _pick_tile_rows(n_fft, n_frames)
    nf_pad = _round_up(n_frames, tile_rows)
    return n_frames, tile_rows, nf_pad


def extract_frames(x, n_fft, hop, nf_pad):
    """x: [B, T] -> frames [B, NF_pad, n_fft] bf16 (center=True, reflect pad)."""
    pad = n_fft // 2
    xp = jnp.pad(x, ((0, 0), (pad, pad)), mode="reflect").astype(jnp.bfloat16)
    n_frames = 1 + (xp.shape[1] - n_fft) // hop
    idx = (jnp.arange(n_frames) * hop)[:, None] + jnp.arange(n_fft)[None, :]
    frames = xp[:, idx]                                        # [B, n_frames, n_fft]
    frames = jnp.pad(frames, ((0, 0), (0, nf_pad - n_frames), (0, 0)))
    return frames


# --------------------------------------------------------------------------
# Loss module
# --------------------------------------------------------------------------

class WavSpecConvergenceLossPallas:
    DEFAULT_SAMPLING_RATE = 48000

    def __init__(self, sampling_rate=48000, alpha_wav_l1=1.0, alpha_mag_l2=1.0,
                 alpha_mag_log=1.0, alpha_mag_norm_l2=1.0, alpha_mel_log=1.0,
                 alpha_mel_l2=1.0, enhanced_key="fake", loss_prefix="loss_G"):
        ratio = sampling_rate / self.DEFAULT_SAMPLING_RATE
        self.alpha_wav_l1 = alpha_wav_l1
        self.alpha_mag_l2 = alpha_mag_l2
        self.alpha_mag_log = alpha_mag_log
        self.alpha_mag_norm_l2 = alpha_mag_norm_l2
        self.alpha_mel_log = alpha_mel_log
        self.alpha_mel_l2 = alpha_mel_l2
        self.enhanced_key = enhanced_key
        self.loss_prefix = loss_prefix

        # Multi-resolution STFT transforms (win_length == n_fft, hann, power=1)
        self.stft_cfgs = []
        for base in (512, 1024, 2048, 4096):
            n_fft = int(base * ratio)
            hop = n_fft // 4
            w = fused_dft_weights(n_fft, hann_window(n_fft))
            self.stft_cfgs.append(dict(n_fft=n_fft, hop=hop,
                                       n_freqs=n_fft // 2 + 1, w=w))

        # Mel spectrogram transform (n_fft=2048, power=1, n_mels=128)
        mel_n_fft = 2048
        mel_win = int(0.025 * sampling_rate)
        mel_hop = int(0.01 * sampling_rate)
        n_mels = 128
        win = hann_window(mel_win)
        lpad = (mel_n_fft - mel_win) // 2
        win = jnp.pad(win, (lpad, mel_n_fft - mel_win - lpad))   # center-pad to n_fft
        w = fused_dft_weights(mel_n_fft, win)
        n_freqs = mel_n_fft // 2 + 1
        fb = mel_filterbank(n_freqs, 0.0, float(sampling_rate // 2), n_mels,
                            sampling_rate)
        fb = jnp.pad(fb, ((0, _round_up(n_freqs, 128) - n_freqs), (0, 0)))
        fb = fb.astype(jnp.bfloat16)
        assert n_mels == 128
        self.mel_cfg = dict(n_fft=mel_n_fft, hop=mel_hop, n_mels=n_mels, w=w, fb=fb)

        self._calc_jit = jax.jit(self.calc_convergence_loss)

    def calc_convergence_loss(self, clean, enhanced):
        b, t = clean.shape

        # waveform L1
        wav_l1 = wav_abs_sum(enhanced, clean) / (b * t)

        # multi-resolution magnitude losses (fully fused Pallas kernel per res)
        mag_l2 = jnp.float32(0.0)
        mag_log = jnp.float32(0.0)
        mag_norm = jnp.float32(0.0)
        for cfg in self.stft_cfgs:
            n_frames, tile_rows, nf_pad = _frame_params(t, cfg["n_fft"], cfg["hop"])
            ef = extract_frames(enhanced, cfg["n_fft"], cfg["hop"], nf_pad)
            cf = extract_frames(clean, cfg["n_fft"], cfg["hop"], nf_pad)
            d2, logd, c2 = stft_loss_stats(ef, cf, cfg["w"], tile_rows)
            count = b * n_frames * cfg["n_freqs"]
            mag_l2 = mag_l2 + jnp.sum(d2) / count
            mag_log = mag_log + jnp.sum(logd) / count
            mag_norm = mag_norm + jnp.mean(jnp.sqrt(d2) / (jnp.sqrt(c2) + 1e-6))
        mag_log = mag_log / len(self.stft_cfgs)
        mag_norm = mag_norm / len(self.stft_cfgs)

        # mel spectrogram losses (STFT + mel projection + stats fused)
        cfg = self.mel_cfg
        n_frames, tile_rows, nf_pad = _frame_params(t, cfg["n_fft"], cfg["hop"])
        ef = extract_frames(enhanced, cfg["n_fft"], cfg["hop"], nf_pad)
        cf = extract_frames(clean, cfg["n_fft"], cfg["hop"], nf_pad)
        d2, logd = mel_loss_stats(ef, cf, cfg["w"], cfg["fb"], tile_rows)
        count = b * n_frames * cfg["n_mels"]
        mel_l2 = jnp.sum(d2) / count
        mel_log = jnp.sum(logd) / count

        return (self.alpha_wav_l1 * wav_l1,
                self.alpha_mag_l2 * mag_l2,
                self.alpha_mag_log * mag_log,
                self.alpha_mag_norm_l2 * mag_norm,
                self.alpha_mel_log * mel_log,
                self.alpha_mel_l2 * mel_l2)

    def __call__(self, batch_data):
        clean = batch_data["clean"]
        enhanced = batch_data[self.enhanced_key]
        wav_l1, mag_l2, mag_log, mag_norm, mel_log, mel_l2 = \
            self._calc_jit(clean, enhanced)
        p = self.loss_prefix
        out = dict(batch_data)
        out[f"{p}_wav_l1"] = wav_l1
        out[f"{p}_mag_l2"] = mag_l2
        out[f"{p}_mag_log"] = mag_log
        out[f"{p}_mag_norm_l2"] = mag_norm
        out[f"{p}_mel_log"] = mel_log
        out[f"{p}_mel_l2"] = mel_l2
        out[f"{p}"] = wav_l1 + mag_l2 + mag_log + mag_norm + mel_log + mel_l2
        return out


if __name__ == "__main__":
    key = jax.random.PRNGKey(0)
    k1, k2 = jax.random.split(key)
    B, T = 2, 2048
    SR = 12000   # sampling_rate is a ctor arg; 12 kHz keeps the demo shapes small

    clean = 0.5 * jax.random.normal(k1, (B, T), dtype=jnp.float32)
    enhanced = clean + 0.05 * jax.random.normal(k2, (B, T), dtype=jnp.float32)

    loss_mod = WavSpecConvergenceLossPallas(sampling_rate=SR)
    batch = {"clean": clean, "fake": enhanced}
    out = loss_mod(batch)

    keys = ("loss_G_wav_l1", "loss_G_mag_l2", "loss_G_mag_log",
            "loss_G_mag_norm_l2", "loss_G_mel_log", "loss_G_mel_l2", "loss_G")
    for k in keys:
        jax.block_until_ready(out[k])
    assert bool(jnp.isfinite(out["loss_G"]))
    print("KERNEL_OK")
</pallas_src>

<mosaic_0001>
module attributes {stable_mosaic.version = 11 : i64} {
  func.func @_stft_stats_kernel(%arg0: i32, %arg1: i32, %arg2: i32, %arg3: memref<1x48x256xbf16, #tpu.memory_space<vmem>>, %arg4: memref<1x48x256xbf16, #tpu.memory_space<vmem>>, %arg5: memref<256x256xbf16, #tpu.memory_space<vmem>>, %arg6: memref<1x1x8x128xf32, #tpu.memory_space<vmem>>, %arg7: memref<8x128xf32, #tpu.memory_space<vmem>>) attributes {dimension_semantics = [#tpu.dimension_semantics<parallel>, #tpu.dimension_semantics<parallel>, #tpu.dimension_semantics<arbitrary>], iteration_bounds = array<i64: 2, 1, 2>, scalar_prefetch = 0 : i64, scratch_operands = 1 : i64, tpu.core_type = #tpu.core_type<tc>, window_params = [{transform_indices = @transform_0, window_bounds = array<i64: 1, 48, 256>}, {transform_indices = @transform_1, window_bounds = array<i64: 1, 48, 256>}, {transform_indices = @transform_2, window_bounds = array<i64: 256, 256>}, {transform_indices = @transform_3, window_bounds = array<i64: 1, 1, 8, 128>}]} {
    %c0_i32 = arith.constant 0 : i32
    %0 = arith.cmpi eq, %arg2, %c0_i32 : i32
    %1 = arith.extui %0 : i1 to i32
    %c0_i32_0 = arith.constant 0 : i32
    %2 = arith.cmpi ne, %1, %c0_i32_0 : i32
    scf.if %2 {
      %cst_29 = arith.constant 0.000000e+00 : f32
      %58 = vector.broadcast %cst_29 : f32 to vector<8x128xf32>
      %c0_30 = arith.constant 0 : index
      %c0_31 = arith.constant 0 : index
      %59 = vector.load %arg7[%c0_30, %c0_31] : memref<8x128xf32, #tpu.memory_space<vmem>>, vector<8x128xf32>
      tpu.vector_store %arg7[%c0_30, %c0_31], %58 {strides = array<i32>} : memref<8x128xf32, #tpu.memory_space<vmem>>, vector<8x128xf32>,
    } else {
    }
    %c0 = arith.constant 0 : index
    %c0_1 = arith.constant 0 : index
    %3 = vector.load %arg5[%c0, %c0_1] : memref<256x256xbf16, #tpu.memory_space<vmem>>, vector<256x256xbf16>
    %c0_2 = arith.constant 0 : index
    %c0_3 = arith.constant 0 : index
    %c0_4 = arith.constant 0 : index
    %4 = vector.load %arg3[%c0_2, %c0_3, %c0_4] : memref<1x48x256xbf16, #tpu.memory_space<vmem>>, vector<1x48x256xbf16>
    %5 = vector.shape_cast %4 : vector<1x48x256xbf16> to vector<48x256xbf16>
    %cst = arith.constant dense<0.000000e+00> : vector<48x256xf32>
    %6 = tpu.matmul %5, %3, %cst {dimension_numbers = #tpu.dot_dimension_numbers<[1], [0], [0], [1], [0, 0, 1, 1], [], []>} : vector<48x256xbf16>, vector<256x256xbf16>, vector<48x256xf32> -> vector<48x256xf32>
    %c0_5 = arith.constant 0 : index
    %c0_6 = arith.constant 0 : index
    %c0_7 = arith.constant 0 : index
    %7 = vector.load %arg4[%c0_5, %c0_6, %c0_7] : memref<1x48x256xbf16, #tpu.memory_space<vmem>>, vector<1x48x256xbf16>
    %8 = vector.shape_cast %7 : vector<1x48x256xbf16> to vector<48x256xbf16>
    %cst_8 = arith.constant dense<0.000000e+00> : vector<48x256xf32>
    %9 = tpu.matmul %8, %3, %cst_8 {dimension_numbers = #tpu.dot_dimension_numbers<[1], [0], [0], [1], [0, 0, 1, 1], [], []>} : vector<48x256xbf16>, vector<256x256xbf16>, vector<48x256xf32> -> vector<48x256xf32>
    %10 = vector.extract_strided_slice %6 {offsets = [0, 0], sizes = [48, 128], strides = [1, 1]} : vector<48x256xf32> to vector<48x128xf32>
    %11 = vector.extract_strided_slice %6 {offsets = [0, 128], sizes = [48, 128], strides = [1, 1]} : vector<48x256xf32> to vector<48x128xf32>
    %12 = vector.extract_strided_slice %9 {offsets = [0, 0], sizes = [48, 128], strides = [1, 1]} : vector<48x256xf32> to vector<48x128xf32>
    %13 = vector.extract_strided_slice %9 {offsets = [0, 128], sizes = [48, 128], strides = [1, 1]} : vector<48x256xf32> to vector<48x128xf32>
    %14 = arith.mulf %10, %10 : vector<48x128xf32>
    %15 = arith.mulf %11, %11 : vector<48x128xf32>
    %16 = arith.addf %14, %15 : vector<48x128xf32>
    %cst_9 = arith.constant 1.000000e-24 : f32
    %17 = vector.broadcast %cst_9 : f32 to vector<48x128xf32>
    %18 = arith.addf %16, %17 : vector<48x128xf32>
    %19 = math.sqrt %18 : vector<48x128xf32>
    %20 = arith.mulf %12, %12 : vector<48x128xf32>
    %21 = arith.mulf %13, %13 : vector<48x128xf32>
    %22 = arith.addf %20, %21 : vector<48x128xf32>
    %cst_10 = arith.constant 1.000000e-24 : f32
    %23 = vector.broadcast %cst_10 : f32 to vector<48x128xf32>
    %24 = arith.addf %22, %23 : vector<48x128xf32>
    %25 = math.sqrt %24 : vector<48x128xf32>
    %26 = arith.subf %19, %25 : vector<48x128xf32>
    %cst_11 = arith.constant 3.276800e+04 : f32
    %27 = vector.broadcast %cst_11 : f32 to vector<48x128xf32>
    %28 = arith.mulf %19, %27 : vector<48x128xf32>
    %cst_12 = arith.constant 9.99999997E-7 : f32
    %29 = vector.broadcast %cst_12 : f32 to vector<48x128xf32>
    %30 = arith.addf %28, %29 : vector<48x128xf32>
    %cst_13 = arith.constant 3.276800e+04 : f32
    %31 = vector.broadcast %cst_13 : f32 to vector<48x128xf32>
    %32 = arith.mulf %25, %31 : vector<48x128xf32>
    %cst_14 = arith.constant 9.99999997E-7 : f32
    %33 = vector.broadcast %cst_14 : f32 to vector<48x128xf32>
    %34 = arith.addf %32, %33 : vector<48x128xf32>
    %35 = arith.divf %30, %34 : vector<48x128xf32>
    %36 = math.log %35 : vector<48x128xf32>
    %37 = math.absf %36 : vector<48x128xf32>
    %c0_15 = arith.constant 0 : index
    %c0_16 = arith.constant 0 : index
    %38 = vector.load %arg7[%c0_15, %c0_16] : memref<8x128xf32, #tpu.memory_space<vmem>>, vector<1x128xf32>
    %39 = arith.mulf %26, %26 : vector<48x128xf32>
    %cst_17 = arith.constant dense<0.000000e+00> : vector<128xf32>
    %40 = vector.multi_reduction <add>, %39, %cst_17 [0] : vector<48x128xf32> to vector<128xf32>
    %41 = vector.shape_cast %40 : vector<128xf32> to vector<1x128xf32>
    %42 = arith.addf %38, %41 : vector<1x128xf32>
    %c0_18 = arith.constant 0 : index
    %c0_19 = arith.constant 0 : index
    %43 = vector.load %arg7[%c0_18, %c0_19] : memref<8x128xf32, #tpu.memory_space<vmem>>, vector<1x128xf32>
    tpu.vector_store %arg7[%c0_18, %c0_19], %42 {strides = array<i32>} : memref<8x128xf32, #tpu.memory_space<vmem>>, vector<1x128xf32>,
    %c1 = arith.constant 1 : index
    %c0_20 = arith.constant 0 : index
    %44 = vector.load %arg7[%c1, %c0_20] : memref<8x128xf32, #tpu.memory_space<vmem>>, vector<1x128xf32>
    %cst_21 = arith.constant dense<0.000000e+00> : vector<128xf32>
    %45 = vector.multi_reduction <add>, %37, %cst_21 [0] : vector<48x128xf32> to vector<128xf32>
    %46 = vector.shape_cast %45 : vector<128xf32> to vector<1x128xf32>
    %47 = arith.addf %44, %46 : vector<1x128xf32>
    %c1_22 = arith.constant 1 : index
    %c0_23 = arith.constant 0 : index
    %48 = vector.load %arg7[%c1_22, %c0_23] : memref<8x128xf32, #tpu.memory_space<vmem>>, vector<1x128xf32>
    tpu.vector_store %arg7[%c1_22, %c0_23], %47 {strides = array<i32>} : memref<8x128xf32, #tpu.memory_space<vmem>>, vector<1x128xf32>,
    %c2 = arith.constant 2 : index
    %c0_24 = arith.constant 0 : index
    %49 = vector.load %arg7[%c2, %c0_24] : memref<8x128xf32, #tpu.memory_space<vmem>>, vector<1x128xf32>
    %50 = arith.mulf %25, %25 : vector<48x128xf32>
    %cst_25 = arith.constant dense<0.000000e+00> : vector<128xf32>
    %51 = vector.multi_reduction <add>, %50, %cst_25 [0] : vector<48x128xf32> to vector<128xf32>
    %52 = vector.shape_cast %51 : vector<128xf32> to vector<1x128xf32>
    %53 = arith.addf %49, %52 : vector<1x128xf32>
    %c2_26 = arith.constant 2 : index
    %c0_27 = arith.constant 0 : index
    %54 = vector.load %arg7[%c2_26, %c0_27] : memref<8x128xf32, #tpu.memory_space<vmem>>, vector<1x128xf32>
    tpu.vector_store %arg7[%c2_26, %c0_27], %53 {strides = array<i32>} : memref<8x128xf32, #tpu.memory_space<vmem>>, vector<1x128xf32>,
    %c1_i32 = arith.constant 1 : i32
    %55 = arith.cmpi eq, %arg2, %c1_i32 : i32
    %56 = arith.extui %55 : i1 to i32
    %c0_i32_28 = arith.constant 0 : i32
    %57 = arith.cmpi ne, %56, %c0_i32_28 : i32
    scf.if %57 {
      %c0_29 = arith.constant 0 : index
      %c0_30 = arith.constant 0 : index
      %58 = vector.load %arg7[%c0_29, %c0_30] : memref<8x128xf32, #tpu.memory_space<vmem>>, vector<8x128xf32>
      %c0_31 = arith.constant 0 : index
      %c0_32 = arith.constant 0 : index
      %c0_33 = arith.constant 0 : index
      %c0_34 = arith.constant 0 : index
      %59 = vector.load %arg6[%c0_31, %c0_32, %c0_33, %c0_34] : memref<1x1x8x128xf32, #tpu.memory_space<vmem>>, vector<1x1x8x128xf32>
      %60 = vector.shape_cast %59 : vector<1x1x8x128xf32> to vector<8x128xf32>
      %61 = vector.shape_cast %58 : vector<8x128xf32> to vector<1x1x8x128xf32>
      tpu.vector_store %arg6[%c0_31, %c0_32, %c0_33, %c0_34], %61 {strides = array<i32>} : memref<1x1x8x128xf32, #tpu.memory_space<vmem>>, vector<1x1x8x128xf32>,
    } else {
    }
    return
  }
  func.func @transform_0(%arg0: i32, %arg1: i32, %arg2: i32) -> (i32, i32, i32) {
    %c0_i32 = arith.constant 0 : i32
    %c0_i32_0 = arith.constant 0 : i32
    return %arg0, %arg1, %c0_i32 : i32, i32, i32
  }
  func.func @transform_1(%arg0: i32, %arg1: i32, %arg2: i32) -> (i32, i32, i32) {
    %c0_i32 = arith.constant 0 : i32
    %c0_i32_0 = arith.constant 0 : i32
    return %arg0, %arg1, %c0_i32 : i32, i32, i32
  }
  func.func @transform_2(%arg0: i32, %arg1: i32, %arg2: i32) -> (i32, i32) {
    %c0_i32 = arith.constant 0 : i32
    %c0_i32_0 = arith.constant 0 : i32
    return %c0_i32, %arg2 : i32, i32
  }
  func.func @transform_3(%arg0: i32, %arg1: i32, %arg2: i32) -> (i32, i32, i32, i32) {
    %c0_i32 = arith.constant 0 : i32
    %c0_i32_0 = arith.constant 0 : i32
    %c0_i32_1 = arith.constant 0 : i32
    return %arg0, %arg1, %c0_i32, %c0_i32_0 : i32, i32, i32, i32
  }
}

module attributes {stable_mosaic.version = 11 : i64} {
  func.func @_stft_stats_kernel(%arg0: i32, %arg1: i32, %arg2: i32, %arg3: memref<1x80x128xbf16, #tpu.memory_space<vmem>>, %arg4: memref<1x80x128xbf16, #tpu.memory_space<vmem>>, %arg5: memref<128x256xbf16, #tpu.memory_space<vmem>>, %arg6: memref<1x1x8x128xf32, #tpu.memory_space<vmem>>, %arg7: memref<8x128xf32, #tpu.memory_space<vmem>>) attributes {dimension_semantics = [#tpu.dimension_semantics<parallel>, #tpu.dimension_semantics<parallel>, #tpu.dimension_semantics<arbitrary>], iteration_bounds = array<i64: 2, 1, 1>, scalar_prefetch = 0 : i64, scratch_operands = 1 : i64, tpu.core_type = #tpu.core_type<tc>, window_params = [{transform_indices = @transform_0, window_bounds = array<i64: 1, 80, 128>}, {transform_indices = @transform_1, window_bounds = array<i64: 1, 80, 128>}, {transform_indices = @transform_2, window_bounds = array<i64: 128, 256>}, {transform_indices = @transform_3, window_bounds = array<i64: 1, 1, 8, 128>}]} {
    %c0_i32 = arith.constant 0 : i32
    %0 = arith.cmpi eq, %arg2, %c0_i32 : i32
    %1 = arith.extui %0 : i1 to i32
    %c0_i32_0 = arith.constant 0 : i32
    %2 = arith.cmpi ne, %1, %c0_i32_0 : i32
    scf.if %2 {
      %cst_30 = arith.constant 0.000000e+00 : f32
      %58 = vector.broadcast %cst_30 : f32 to vector<8x128xf32>
      %c0_31 = arith.constant 0 : index
      %c0_32 = arith.constant 0 : index
      %59 = vector.load %arg7[%c0_31, %c0_32] : memref<8x128xf32, #tpu.memory_space<vmem>>, vector<8x128xf32>
      tpu.vector_store %arg7[%c0_31, %c0_32], %58 {strides = array<i32>} : memref<8x128xf32, #tpu.memory_space<vmem>>, vector<8x128xf32>,
    } else {
    }
    %c0 = arith.constant 0 : index
    %c0_1 = arith.constant 0 : index
    %3 = vector.load %arg5[%c0, %c0_1] : memref<128x256xbf16, #tpu.memory_space<vmem>>, vector<128x256xbf16>
    %c0_2 = arith.constant 0 : index
    %c0_3 = arith.constant 0 : index
    %c0_4 = arith.constant 0 : index
    %4 = vector.load %arg3[%c0_2, %c0_3, %c0_4] : memref<1x80x128xbf16, #tpu.memory_space<vmem>>, vector<1x80x128xbf16>
    %5 = vector.shape_cast %4 : vector<1x80x128xbf16> to vector<80x128xbf16>
    %cst = arith.constant dense<0.000000e+00> : vector<80x256xf32>
    %6 = tpu.matmul %5, %3, %cst {dimension_numbers = #tpu.dot_dimension_numbers<[1], [0], [0], [1], [0, 0, 1, 1], [], []>} : vector<80x128xbf16>, vector<128x256xbf16>, vector<80x256xf32> -> vector<80x256xf32>
    %c0_5 = arith.constant 0 : index
    %c0_6 = arith.constant 0 : index
    %c0_7 = arith.constant 0 : index
    %7 = vector.load %arg4[%c0_5, %c0_6, %c0_7] : memref<1x80x128xbf16, #tpu.memory_space<vmem>>, vector<1x80x128xbf16>
    %8 = vector.shape_cast %7 : vector<1x80x128xbf16> to vector<80x128xbf16>
    %cst_8 = arith.constant dense<0.000000e+00> : vector<80x256xf32>
    %9 = tpu.matmul %8, %3, %cst_8 {dimension_numbers = #tpu.dot_dimension_numbers<[1], [0], [0], [1], [0, 0, 1, 1], [], []>} : vector<80x128xbf16>, vector<128x256xbf16>, vector<80x256xf32> -> vector<80x256xf32>
    %10 = vector.extract_strided_slice %6 {offsets = [0, 0], sizes = [80, 128], strides = [1, 1]} : vector<80x256xf32> to vector<80x128xf32>
    %11 = vector.extract_strided_slice %6 {offsets = [0, 128], sizes = [80, 128], strides = [1, 1]} : vector<80x256xf32> to vector<80x128xf32>
    %12 = vector.extract_strided_slice %9 {offsets = [0, 0], sizes = [80, 128], strides = [1, 1]} : vector<80x256xf32> to vector<80x128xf32>
    %13 = vector.extract_strided_slice %9 {offsets = [0, 128], sizes = [80, 128], strides = [1, 1]} : vector<80x256xf32> to vector<80x128xf32>
    %14 = arith.mulf %10, %10 : vector<80x128xf32>
    %15 = arith.mulf %11, %11 : vector<80x128xf32>
    %16 = arith.addf %14, %15 : vector<80x128xf32>
    %cst_9 = arith.constant 1.000000e-24 : f32
    %17 = vector.broadcast %cst_9 : f32 to vector<80x128xf32>
    %18 = arith.addf %16, %17 : vector<80x128xf32>
    %19 = math.sqrt %18 : vector<80x128xf32>
    %20 = arith.mulf %12, %12 : vector<80x128xf32>
    %21 = arith.mulf %13, %13 : vector<80x128xf32>
    %22 = arith.addf %20, %21 : vector<80x128xf32>
    %cst_10 = arith.constant 1.000000e-24 : f32
    %23 = vector.broadcast %cst_10 : f32 to vector<80x128xf32>
    %24 = arith.addf %22, %23 : vector<80x128xf32>
    %25 = math.sqrt %24 : vector<80x128xf32>
    %26 = arith.subf %19, %25 : vector<80x128xf32>
    %cst_11 = arith.constant 3.276800e+04 : f32
    %27 = vector.broadcast %cst_11 : f32 to vector<80x128xf32>
    %28 = arith.mulf %19, %27 : vector<80x128xf32>
    %cst_12 = arith.constant 9.99999997E-7 : f32
    %29 = vector.broadcast %cst_12 : f32 to vector<80x128xf32>
    %30 = arith.addf %28, %29 : vector<80x128xf32>
    %cst_13 = arith.constant 3.276800e+04 : f32
    %31 = vector.broadcast %cst_13 : f32 to vector<80x128xf32>
    %32 = arith.mulf %25, %31 : vector<80x128xf32>
    %cst_14 = arith.constant 9.99999997E-7 : f32
    %33 = vector.broadcast %cst_14 : f32 to vector<80x128xf32>
    %34 = arith.addf %32, %33 : vector<80x128xf32>
    %35 = arith.divf %30, %34 : vector<80x128xf32>
    %36 = math.log %35 : vector<80x128xf32>
    %37 = math.absf %36 : vector<80x128xf32>
    %c0_15 = arith.constant 0 : index
    %c0_16 = arith.constant 0 : index
    %38 = vector.load %arg7[%c0_15, %c0_16] : memref<8x128xf32, #tpu.memory_space<vmem>>, vector<1x128xf32>
    %39 = arith.mulf %26, %26 : vector<80x128xf32>
    %cst_17 = arith.constant dense<0.000000e+00> : vector<128xf32>
    %40 = vector.multi_reduction <add>, %39, %cst_17 [0] : vector<80x128xf32> to vector<128xf32>
    %41 = vector.shape_cast %40 : vector<128xf32> to vector<1x128xf32>
    %42 = arith.addf %38, %41 : vector<1x128xf32>
    %c0_18 = arith.constant 0 : index
    %c0_19 = arith.constant 0 : index
    %43 = vector.load %arg7[%c0_18, %c0_19] : memref<8x128xf32, #tpu.memory_space<vmem>>, vector<1x128xf32>
    tpu.vector_store %arg7[%c0_18, %c0_19], %42 {strides = array<i32>} : memref<8x128xf32, #tpu.memory_space<vmem>>, vector<1x128xf32>,
    %c1 = arith.constant 1 : index
    %c0_20 = arith.constant 0 : index
    %44 = vector.load %arg7[%c1, %c0_20] : memref<8x128xf32, #tpu.memory_space<vmem>>, vector<1x128xf32>
    %cst_21 = arith.constant dense<0.000000e+00> : vector<128xf32>
    %45 = vector.multi_reduction <add>, %37, %cst_21 [0] : vector<80x128xf32> to vector<128xf32>
    %46 = vector.shape_cast %45 : vector<128xf32> to vector<1x128xf32>
    %47 = arith.addf %44, %46 : vector<1x128xf32>
    %c1_22 = arith.constant 1 : index
    %c0_23 = arith.constant 0 : index
    %48 = vector.load %arg7[%c1_22, %c0_23] : memref<8x128xf32, #tpu.memory_space<vmem>>, vector<1x128xf32>
    tpu.vector_store %arg7[%c1_22, %c0_23], %47 {strides = array<i32>} : memref<8x128xf32, #tpu.memory_space<vmem>>, vector<1x128xf32>,
    %c2 = arith.constant 2 : index
    %c0_24 = arith.constant 0 : index
    %49 = vector.load %arg7[%c2, %c0_24] : memref<8x128xf32, #tpu.memory_space<vmem>>, vector<1x128xf32>
    %50 = arith.mulf %25, %25 : vector<80x128xf32>
    %cst_25 = arith.constant dense<0.000000e+00> : vector<128xf32>
    %51 = vector.multi_reduction <add>, %50, %cst_25 [0] : vector<80x128xf32> to vector<128xf32>
    %52 = vector.shape_cast %51 : vector<128xf32> to vector<1x128xf32>
    %53 = arith.addf %49, %52 : vector<1x128xf32>
    %c2_26 = arith.constant 2 : index
    %c0_27 = arith.constant 0 : index
    %54 = vector.load %arg7[%c2_26, %c0_27] : memref<8x128xf32, #tpu.memory_space<vmem>>, vector<1x128xf32>
    tpu.vector_store %arg7[%c2_26, %c0_27], %53 {strides = array<i32>} : memref<8x128xf32, #tpu.memory_space<vmem>>, vector<1x128xf32>,
    %c0_i32_28 = arith.constant 0 : i32
    %55 = arith.cmpi eq, %arg2, %c0_i32_28 : i32
    %56 = arith.extui %55 : i1 to i32
    %c0_i32_29 = arith.constant 0 : i32
    %57 = arith.cmpi ne, %56, %c0_i32_29 : i32
    scf.if %57 {
      %c0_30 = arith.constant 0 : index
      %c0_31 = arith.constant 0 : index
      %58 = vector.load %arg7[%c0_30, %c0_31] : memref<8x128xf32, #tpu.memory_space<vmem>>, vector<8x128xf32>
      %c0_32 = arith.constant 0 : index
      %c0_33 = arith.constant 0 : index
      %c0_34 = arith.constant 0 : index
      %c0_35 = arith.constant 0 : index
      %59 = vector.load %arg6[%c0_32, %c0_33, %c0_34, %c0_35] : memref<1x1x8x128xf32, #tpu.memory_space<vmem>>, vector<1x1x8x128xf32>
      %60 = vector.shape_cast %59 : vector<1x1x8x128xf32> to vector<8x128xf32>
      %61 = vector.shape_cast %58 : vector<8x128xf32> to vector<1x1x8x128xf32>
      tpu.vector_store %arg6[%c0_32, %c0_33, %c0_34, %c0_35], %61 {strides = array<i32>} : memref<1x1x8x128xf32, #tpu.memory_space<vmem>>, vector<1x1x8x128xf32>,
    } else {
    }
    return
  }
  func.func @transform_0(%arg0: i32, %arg1: i32, %arg2: i32) -> (i32, i32, i32) {
    %c0_i32 = arith.constant 0 : i32
    %c0_i32_0 = arith.constant 0 : i32
    return %arg0, %arg1, %c0_i32 : i32, i32, i32
  }
  func.func @transform_1(%arg0: i32, %arg1: i32, %arg2: i32) -> (i32, i32, i32) {
    %c0_i32 = arith.constant 0 : i32
    %c0_i32_0 = arith.constant 0 : i32
    return %arg0, %arg1, %c0_i32 : i32, i32, i32
  }
  func.func @transform_2(%arg0: i32, %arg1: i32, %arg2: i32) -> (i32, i32) {
    %c0_i32 = arith.constant 0 : i32
    %c0_i32_0 = arith.constant 0 : i32
    return %c0_i32, %arg2 : i32, i32
  }
  func.func @transform_3(%arg0: i32, %arg1: i32, %arg2: i32) -> (i32, i32, i32, i32) {
    %c0_i32 = arith.constant 0 : i32
    %c0_i32_0 = arith.constant 0 : i32
    %c0_i32_1 = arith.constant 0 : i32
    return %arg0, %arg1, %c0_i32, %c0_i32_0 : i32, i32, i32, i32
  }
}

module attributes {stable_mosaic.version = 11 : i64} {
  func.func @_stft_stats_kernel(%arg0: i32, %arg1: i32, %arg2: i32, %arg3: memref<1x32x512xbf16, #tpu.memory_space<vmem>>, %arg4: memref<1x32x512xbf16, #tpu.memory_space<vmem>>, %arg5: memref<512x256xbf16, #tpu.memory_space<vmem>>, %arg6: memref<1x1x8x128xf32, #tpu.memory_space<vmem>>, %arg7: memref<8x128xf32, #tpu.memory_space<vmem>>) attributes {dimension_semantics = [#tpu.dimension_semantics<parallel>, #tpu.dimension_semantics<parallel>, #tpu.dimension_semantics<arbitrary>], iteration_bounds = array<i64: 2, 1, 3>, scalar_prefetch = 0 : i64, scratch_operands = 1 : i64, tpu.core_type = #tpu.core_type<tc>, window_params = [{transform_indices = @transform_0, window_bounds = array<i64: 1, 32, 512>}, {transform_indices = @transform_1, window_bounds = array<i64: 1, 32, 512>}, {transform_indices = @transform_2, window_bounds = array<i64: 512, 256>}, {transform_indices = @transform_3, window_bounds = array<i64: 1, 1, 8, 128>}]} {
    %c0_i32 = arith.constant 0 : i32
    %0 = arith.cmpi eq, %arg2, %c0_i32 : i32
    %1 = arith.extui %0 : i1 to i32
    %c0_i32_0 = arith.constant 0 : i32
    %2 = arith.cmpi ne, %1, %c0_i32_0 : i32
    scf.if %2 {
      %cst_29 = arith.constant 0.000000e+00 : f32
      %58 = vector.broadcast %cst_29 : f32 to vector<8x128xf32>
      %c0_30 = arith.constant 0 : index
      %c0_31 = arith.constant 0 : index
      %59 = vector.load %arg7[%c0_30, %c0_31] : memref<8x128xf32, #tpu.memory_space<vmem>>, vector<8x128xf32>
      tpu.vector_store %arg7[%c0_30, %c0_31], %58 {strides = array<i32>} : memref<8x128xf32, #tpu.memory_space<vmem>>, vector<8x128xf32>,
    } else {
    }
    %c0 = arith.constant 0 : index
    %c0_1 = arith.constant 0 : index
    %3 = vector.load %arg5[%c0, %c0_1] : memref<512x256xbf16, #tpu.memory_space<vmem>>, vector<512x256xbf16>
    %c0_2 = arith.constant 0 : index
    %c0_3 = arith.constant 0 : index
    %c0_4 = arith.constant 0 : index
    %4 = vector.load %arg3[%c0_2, %c0_3, %c0_4] : memref<1x32x512xbf16, #tpu.memory_space<vmem>>, vector<1x32x512xbf16>
    %5 = vector.shape_cast %4 : vector<1x32x512xbf16> to vector<32x512xbf16>
    %cst = arith.constant dense<0.000000e+00> : vector<32x256xf32>
    %6 = tpu.matmul %5, %3, %cst {dimension_numbers = #tpu.dot_dimension_numbers<[1], [0], [0], [1], [0, 0, 1, 1], [], []>} : vector<32x512xbf16>, vector<512x256xbf16>, vector<32x256xf32> -> vector<32x256xf32>
    %c0_5 = arith.constant 0 : index
    %c0_6 = arith.constant 0 : index
    %c0_7 = arith.constant 0 : index
    %7 = vector.load %arg4[%c0_5, %c0_6, %c0_7] : memref<1x32x512xbf16, #tpu.memory_space<vmem>>, vector<1x32x512xbf16>
    %8 = vector.shape_cast %7 : vector<1x32x512xbf16> to vector<32x512xbf16>
    %cst_8 = arith.constant dense<0.000000e+00> : vector<32x256xf32>
    %9 = tpu.matmul %8, %3, %cst_8 {dimension_numbers = #tpu.dot_dimension_numbers<[1], [0], [0], [1], [0, 0, 1, 1], [], []>} : vector<32x512xbf16>, vector<512x256xbf16>, vector<32x256xf32> -> vector<32x256xf32>
    %10 = vector.extract_strided_slice %6 {offsets = [0, 0], sizes = [32, 128], strides = [1, 1]} : vector<32x256xf32> to vector<32x128xf32>
    %11 = vector.extract_strided_slice %6 {offsets = [0, 128], sizes = [32, 128], strides = [1, 1]} : vector<32x256xf32> to vector<32x128xf32>
    %12 = vector.extract_strided_slice %9 {offsets = [0, 0], sizes = [32, 128], strides = [1, 1]} : vector<32x256xf32> to vector<32x128xf32>
    %13 = vector.extract_strided_slice %9 {offsets = [0, 128], sizes = [32, 128], strides = [1, 1]} : vector<32x256xf32> to vector<32x128xf32>
    %14 = arith.mulf %10, %10 : vector<32x128xf32>
    %15 = arith.mulf %11, %11 : vector<32x128xf32>
    %16 = arith.addf %14, %15 : vector<32x128xf32>
    %cst_9 = arith.constant 1.000000e-24 : f32
    %17 = vector.broadcast %cst_9 : f32 to vector<32x128xf32>
    %18 = arith.addf %16, %17 : vector<32x128xf32>
    %19 = math.sqrt %18 : vector<32x128xf32>
    %20 = arith.mulf %12, %12 : vector<32x128xf32>
    %21 = arith.mulf %13, %13 : vector<32x128xf32>
    %22 = arith.addf %20, %21 : vector<32x128xf32>
    %cst_10 = arith.constant 1.000000e-24 : f32
    %23 = vector.broadcast %cst_10 : f32 to vector<32x128xf32>
    %24 = arith.addf %22, %23 : vector<32x128xf32>
    %25 = math.sqrt %24 : vector<32x128xf32>
    %26 = arith.subf %19, %25 : vector<32x128xf32>
    %cst_11 = arith.constant 3.276800e+04 : f32
    %27 = vector.broadcast %cst_11 : f32 to vector<32x128xf32>
    %28 = arith.mulf %19, %27 : vector<32x128xf32>
    %cst_12 = arith.constant 9.99999997E-7 : f32
    %29 = vector.broadcast %cst_12 : f32 to vector<32x128xf32>
    %30 = arith.addf %28, %29 : vector<32x128xf32>
    %cst_13 = arith.constant 3.276800e+04 : f32
    %31 = vector.broadcast %cst_13 : f32 to vector<32x128xf32>
    %32 = arith.mulf %25, %31 : vector<32x128xf32>
    %cst_14 = arith.constant 9.99999997E-7 : f32
    %33 = vector.broadcast %cst_14 : f32 to vector<32x128xf32>
    %34 = arith.addf %32, %33 : vector<32x128xf32>
    %35 = arith.divf %30, %34 : vector<32x128xf32>
    %36 = math.log %35 : vector<32x128xf32>
    %37 = math.absf %36 : vector<32x128xf32>
    %c0_15 = arith.constant 0 : index
    %c0_16 = arith.constant 0 : index
    %38 = vector.load %arg7[%c0_15, %c0_16] : memref<8x128xf32, #tpu.memory_space<vmem>>, vector<1x128xf32>
    %39 = arith.mulf %26, %26 : vector<32x128xf32>
    %cst_17 = arith.constant dense<0.000000e+00> : vector<128xf32>
    %40 = vector.multi_reduction <add>, %39, %cst_17 [0] : vector<32x128xf32> to vector<128xf32>
    %41 = vector.shape_cast %40 : vector<128xf32> to vector<1x128xf32>
    %42 = arith.addf %38, %41 : vector<1x128xf32>
    %c0_18 = arith.constant 0 : index
    %c0_19 = arith.constant 0 : index
    %43 = vector.load %arg7[%c0_18, %c0_19] : memref<8x128xf32, #tpu.memory_space<vmem>>, vector<1x128xf32>
    tpu.vector_store %arg7[%c0_18, %c0_19], %42 {strides = array<i32>} : memref<8x128xf32, #tpu.memory_space<vmem>>, vector<1x128xf32>,
    %c1 = arith.constant 1 : index
    %c0_20 = arith.constant 0 : index
    %44 = vector.load %arg7[%c1, %c0_20] : memref<8x128xf32, #tpu.memory_space<vmem>>, vector<1x128xf32>
    %cst_21 = arith.constant dense<0.000000e+00> : vector<128xf32>
    %45 = vector.multi_reduction <add>, %37, %cst_21 [0] : vector<32x128xf32> to vector<128xf32>
    %46 = vector.shape_cast %45 : vector<128xf32> to vector<1x128xf32>
    %47 = arith.addf %44, %46 : vector<1x128xf32>
    %c1_22 = arith.constant 1 : index
    %c0_23 = arith.constant 0 : index
    %48 = vector.load %arg7[%c1_22, %c0_23] : memref<8x128xf32, #tpu.memory_space<vmem>>, vector<1x128xf32>
    tpu.vector_store %arg7[%c1_22, %c0_23], %47 {strides = array<i32>} : memref<8x128xf32, #tpu.memory_space<vmem>>, vector<1x128xf32>,
    %c2 = arith.constant 2 : index
    %c0_24 = arith.constant 0 : index
    %49 = vector.load %arg7[%c2, %c0_24] : memref<8x128xf32, #tpu.memory_space<vmem>>, vector<1x128xf32>
    %50 = arith.mulf %25, %25 : vector<32x128xf32>
    %cst_25 = arith.constant dense<0.000000e+00> : vector<128xf32>
    %51 = vector.multi_reduction <add>, %50, %cst_25 [0] : vector<32x128xf32> to vector<128xf32>
    %52 = vector.shape_cast %51 : vector<128xf32> to vector<1x128xf32>
    %53 = arith.addf %49, %52 : vector<1x128xf32>
    %c2_26 = arith.constant 2 : index
    %c0_27 = arith.constant 0 : index
    %54 = vector.load %arg7[%c2_26, %c0_27] : memref<8x128xf32, #tpu.memory_space<vmem>>, vector<1x128xf32>
    tpu.vector_store %arg7[%c2_26, %c0_27], %53 {strides = array<i32>} : memref<8x128xf32, #tpu.memory_space<vmem>>, vector<1x128xf32>,
    %c2_i32 = arith.constant 2 : i32
    %55 = arith.cmpi eq, %arg2, %c2_i32 : i32
    %56 = arith.extui %55 : i1 to i32
    %c0_i32_28 = arith.constant 0 : i32
    %57 = arith.cmpi ne, %56, %c0_i32_28 : i32
    scf.if %57 {
      %c0_29 = arith.constant 0 : index
      %c0_30 = arith.constant 0 : index
      %58 = vector.load %arg7[%c0_29, %c0_30] : memref<8x128xf32, #tpu.memory_space<vmem>>, vector<8x128xf32>
      %c0_31 = arith.constant 0 : index
      %c0_32 = arith.constant 0 : index
      %c0_33 = arith.constant 0 : index
      %c0_34 = arith.constant 0 : index
      %59 = vector.load %arg6[%c0_31, %c0_32, %c0_33, %c0_34] : memref<1x1x8x128xf32, #tpu.memory_space<vmem>>, vector<1x1x8x128xf32>
      %60 = vector.shape_cast %59 : vector<1x1x8x128xf32> to vector<8x128xf32>
      %61 = vector.shape_cast %58 : vector<8x128xf32> to vector<1x1x8x128xf32>
      tpu.vector_store %arg6[%c0_31, %c0_32, %c0_33, %c0_34], %61 {strides = array<i32>} : memref<1x1x8x128xf32, #tpu.memory_space<vmem>>, vector<1x1x8x128xf32>,
    } else {
    }
    return
  }
  func.func @transform_0(%arg0: i32, %arg1: i32, %arg2: i32) -> (i32, i32, i32) {
    %c0_i32 = arith.constant 0 : i32
    %c0_i32_0 = arith.constant 0 : i32
    return %arg0, %arg1, %c0_i32 : i32, i32, i32
  }
  func.func @transform_1(%arg0: i32, %arg1: i32, %arg2: i32) -> (i32, i32, i32) {
    %c0_i32 = arith.constant 0 : i32
    %c0_i32_0 = arith.constant 0 : i32
    return %arg0, %arg1, %c0_i32 : i32, i32, i32
  }
  func.func @transform_2(%arg0: i32, %arg1: i32, %arg2: i32) -> (i32, i32) {
    %c0_i32 = arith.constant 0 : i32
    %c0_i32_0 = arith.constant 0 : i32
    return %c0_i32, %arg2 : i32, i32
  }
  func.func @transform_3(%arg0: i32, %arg1: i32, %arg2: i32) -> (i32, i32, i32, i32) {
    %c0_i32 = arith.constant 0 : i32
    %c0_i32_0 = arith.constant 0 : i32
    %c0_i32_1 = arith.constant 0 : i32
    return %arg0, %arg1, %c0_i32, %c0_i32_0 : i32, i32, i32, i32
  }
}

module attributes {stable_mosaic.version = 11 : i64} {
  func.func @_stft_stats_kernel(%arg0: i32, %arg1: i32, %arg2: i32, %arg3: memref<1x16x1024xbf16, #tpu.memory_space<vmem>>, %arg4: memref<1x16x1024xbf16, #tpu.memory_space<vmem>>, %arg5: memref<1024x256xbf16, #tpu.memory_space<vmem>>, %arg6: memref<1x1x8x128xf32, #tpu.memory_space<vmem>>, %arg7: memref<8x128xf32, #tpu.memory_space<vmem>>) attributes {dimension_semantics = [#tpu.dimension_semantics<parallel>, #tpu.dimension_semantics<parallel>, #tpu.dimension_semantics<arbitrary>], iteration_bounds = array<i64: 2, 1, 5>, scalar_prefetch = 0 : i64, scratch_operands = 1 : i64, tpu.core_type = #tpu.core_type<tc>, window_params = [{transform_indices = @transform_0, window_bounds = array<i64: 1, 16, 1024>}, {transform_indices = @transform_1, window_bounds = array<i64: 1, 16, 1024>}, {transform_indices = @transform_2, window_bounds = array<i64: 1024, 256>}, {transform_indices = @transform_3, window_bounds = array<i64: 1, 1, 8, 128>}]} {
    %c0_i32 = arith.constant 0 : i32
    %0 = arith.cmpi eq, %arg2, %c0_i32 : i32
    %1 = arith.extui %0 : i1 to i32
    %c0_i32_0 = arith.constant 0 : i32
    %2 = arith.cmpi ne, %1, %c0_i32_0 : i32
    scf.if %2 {
      %cst_29 = arith.constant 0.000000e+00 : f32
      %58 = vector.broadcast %cst_29 : f32 to vector<8x128xf32>
      %c0_30 = arith.constant 0 : index
      %c0_31 = arith.constant 0 : index
      %59 = vector.load %arg7[%c0_30, %c0_31] : memref<8x128xf32, #tpu.memory_space<vmem>>, vector<8x128xf32>
      tpu.vector_store %arg7[%c0_30, %c0_31], %58 {strides = array<i32>} : memref<8x128xf32, #tpu.memory_space<vmem>>, vector<8x128xf32>,
    } else {
    }
    %c0 = arith.constant 0 : index
    %c0_1 = arith.constant 0 : index
    %3 = vector.load %arg5[%c0, %c0_1] : memref<1024x256xbf16, #tpu.memory_space<vmem>>, vector<1024x256xbf16>
    %c0_2 = arith.constant 0 : index
    %c0_3 = arith.constant 0 : index
    %c0_4 = arith.constant 0 : index
    %4 = vector.load %arg3[%c0_2, %c0_3, %c0_4] : memref<1x16x1024xbf16, #tpu.memory_space<vmem>>, vector<1x16x1024xbf16>
    %5 = vector.shape_cast %4 : vector<1x16x1024xbf16> to vector<16x1024xbf16>
    %cst = arith.constant dense<0.000000e+00> : vector<16x256xf32>
    %6 = tpu.matmul %5, %3, %cst {dimension_numbers = #tpu.dot_dimension_numbers<[1], [0], [0], [1], [0, 0, 1, 1], [], []>} : vector<16x1024xbf16>, vector<1024x256xbf16>, vector<16x256xf32> -> vector<16x256xf32>
    %c0_5 = arith.constant 0 : index
    %c0_6 = arith.constant 0 : index
    %c0_7 = arith.constant 0 : index
    %7 = vector.load %arg4[%c0_5, %c0_6, %c0_7] : memref<1x16x1024xbf16, #tpu.memory_space<vmem>>, vector<1x16x1024xbf16>
    %8 = vector.shape_cast %7 : vector<1x16x1024xbf16> to vector<16x1024xbf16>
    %cst_8 = arith.constant dense<0.000000e+00> : vector<16x256xf32>
    %9 = tpu.matmul %8, %3, %cst_8 {dimension_numbers = #tpu.dot_dimension_numbers<[1], [0], [0], [1], [0, 0, 1, 1], [], []>} : vector<16x1024xbf16>, vector<1024x256xbf16>, vector<16x256xf32> -> vector<16x256xf32>
    %10 = vector.extract_strided_slice %6 {offsets = [0, 0], sizes = [16, 128], strides = [1, 1]} : vector<16x256xf32> to vector<16x128xf32>
    %11 = vector.extract_strided_slice %6 {offsets = [0, 128], sizes = [16, 128], strides = [1, 1]} : vector<16x256xf32> to vector<16x128xf32>
    %12 = vector.extract_strided_slice %9 {offsets = [0, 0], sizes = [16, 128], strides = [1, 1]} : vector<16x256xf32> to vector<16x128xf32>
    %13 = vector.extract_strided_slice %9 {offsets = [0, 128], sizes = [16, 128], strides = [1, 1]} : vector<16x256xf32> to vector<16x128xf32>
    %14 = arith.mulf %10, %10 : vector<16x128xf32>
    %15 = arith.mulf %11, %11 : vector<16x128xf32>
    %16 = arith.addf %14, %15 : vector<16x128xf32>
    %cst_9 = arith.constant 1.000000e-24 : f32
    %17 = vector.broadcast %cst_9 : f32 to vector<16x128xf32>
    %18 = arith.addf %16, %17 : vector<16x128xf32>
    %19 = math.sqrt %18 : vector<16x128xf32>
    %20 = arith.mulf %12, %12 : vector<16x128xf32>
    %21 = arith.mulf %13, %13 : vector<16x128xf32>
    %22 = arith.addf %20, %21 : vector<16x128xf32>
    %cst_10 = arith.constant 1.000000e-24 : f32
    %23 = vector.broadcast %cst_10 : f32 to vector<16x128xf32>
    %24 = arith.addf %22, %23 : vector<16x128xf32>
    %25 = math.sqrt %24 : vector<16x128xf32>
    %26 = arith.subf %19, %25 : vector<16x128xf32>
    %cst_11 = arith.constant 3.276800e+04 : f32
    %27 = vector.broadcast %cst_11 : f32 to vector<16x128xf32>
    %28 = arith.mulf %19, %27 : vector<16x128xf32>
    %cst_12 = arith.constant 9.99999997E-7 : f32
    %29 = vector.broadcast %cst_12 : f32 to vector<16x128xf32>
    %30 = arith.addf %28, %29 : vector<16x128xf32>
    %cst_13 = arith.constant 3.276800e+04 : f32
    %31 = vector.broadcast %cst_13 : f32 to vector<16x128xf32>
    %32 = arith.mulf %25, %31 : vector<16x128xf32>
    %cst_14 = arith.constant 9.99999997E-7 : f32
    %33 = vector.broadcast %cst_14 : f32 to vector<16x128xf32>
    %34 = arith.addf %32, %33 : vector<16x128xf32>
    %35 = arith.divf %30, %34 : vector<16x128xf32>
    %36 = math.log %35 : vector<16x128xf32>
    %37 = math.absf %36 : vector<16x128xf32>
    %c0_15 = arith.constant 0 : index
    %c0_16 = arith.constant 0 : index
    %38 = vector.load %arg7[%c0_15, %c0_16] : memref<8x128xf32, #tpu.memory_space<vmem>>, vector<1x128xf32>
    %39 = arith.mulf %26, %26 : vector<16x128xf32>
    %cst_17 = arith.constant dense<0.000000e+00> : vector<128xf32>
    %40 = vector.multi_reduction <add>, %39, %cst_17 [0] : vector<16x128xf32> to vector<128xf32>
    %41 = vector.shape_cast %40 : vector<128xf32> to vector<1x128xf32>
    %42 = arith.addf %38, %41 : vector<1x128xf32>
    %c0_18 = arith.constant 0 : index
    %c0_19 = arith.constant 0 : index
    %43 = vector.load %arg7[%c0_18, %c0_19] : memref<8x128xf32, #tpu.memory_space<vmem>>, vector<1x128xf32>
    tpu.vector_store %arg7[%c0_18, %c0_19], %42 {strides = array<i32>} : memref<8x128xf32, #tpu.memory_space<vmem>>, vector<1x128xf32>,
    %c1 = arith.constant 1 : index
    %c0_20 = arith.constant 0 : index
    %44 = vector.load %arg7[%c1, %c0_20] : memref<8x128xf32, #tpu.memory_space<vmem>>, vector<1x128xf32>
    %cst_21 = arith.constant dense<0.000000e+00> : vector<128xf32>
    %45 = vector.multi_reduction <add>, %37, %cst_21 [0] : vector<16x128xf32> to vector<128xf32>
    %46 = vector.shape_cast %45 : vector<128xf32> to vector<1x128xf32>
    %47 = arith.addf %44, %46 : vector<1x128xf32>
    %c1_22 = arith.constant 1 : index
    %c0_23 = arith.constant 0 : index
    %48 = vector.load %arg7[%c1_22, %c0_23] : memref<8x128xf32, #tpu.memory_space<vmem>>, vector<1x128xf32>
    tpu.vector_store %arg7[%c1_22, %c0_23], %47 {strides = array<i32>} : memref<8x128xf32, #tpu.memory_space<vmem>>, vector<1x128xf32>,
    %c2 = arith.constant 2 : index
    %c0_24 = arith.constant 0 : index
    %49 = vector.load %arg7[%c2, %c0_24] : memref<8x128xf32, #tpu.memory_space<vmem>>, vector<1x128xf32>
    %50 = arith.mulf %25, %25 : vector<16x128xf32>
    %cst_25 = arith.constant dense<0.000000e+00> : vector<128xf32>
    %51 = vector.multi_reduction <add>, %50, %cst_25 [0] : vector<16x128xf32> to vector<128xf32>
    %52 = vector.shape_cast %51 : vector<128xf32> to vector<1x128xf32>
    %53 = arith.addf %49, %52 : vector<1x128xf32>
    %c2_26 = arith.constant 2 : index
    %c0_27 = arith.constant 0 : index
    %54 = vector.load %arg7[%c2_26, %c0_27] : memref<8x128xf32, #tpu.memory_space<vmem>>, vector<1x128xf32>
    tpu.vector_store %arg7[%c2_26, %c0_27], %53 {strides = array<i32>} : memref<8x128xf32, #tpu.memory_space<vmem>>, vector<1x128xf32>,
    %c4_i32 = arith.constant 4 : i32
    %55 = arith.cmpi eq, %arg2, %c4_i32 : i32
    %56 = arith.extui %55 : i1 to i32
    %c0_i32_28 = arith.constant 0 : i32
    %57 = arith.cmpi ne, %56, %c0_i32_28 : i32
    scf.if %57 {
      %c0_29 = arith.constant 0 : index
      %c0_30 = arith.constant 0 : index
      %58 = vector.load %arg7[%c0_29, %c0_30] : memref<8x128xf32, #tpu.memory_space<vmem>>, vector<8x128xf32>
      %c0_31 = arith.constant 0 : index
      %c0_32 = arith.constant 0 : index
      %c0_33 = arith.constant 0 : index
      %c0_34 = arith.constant 0 : index
      %59 = vector.load %arg6[%c0_31, %c0_32, %c0_33, %c0_34] : memref<1x1x8x128xf32, #tpu.memory_space<vmem>>, vector<1x1x8x128xf32>
      %60 = vector.shape_cast %59 : vector<1x1x8x128xf32> to vector<8x128xf32>
      %61 = vector.shape_cast %58 : vector<8x128xf32> to vector<1x1x8x128xf32>
      tpu.vector_store %arg6[%c0_31, %c0_32, %c0_33, %c0_34], %61 {strides = array<i32>} : memref<1x1x8x128xf32, #tpu.memory_space<vmem>>, vector<1x1x8x128xf32>,
    } else {
    }
    return
  }
  func.func @transform_0(%arg0: i32, %arg1: i32, %arg2: i32) -> (i32, i32, i32) {
    %c0_i32 = arith.constant 0 : i32
    %c0_i32_0 = arith.constant 0 : i32
    return %arg0, %arg1, %c0_i32 : i32, i32, i32
  }
  func.func @transform_1(%arg0: i32, %arg1: i32, %arg2: i32) -> (i32, i32, i32) {
    %c0_i32 = arith.constant 0 : i32
    %c0_i32_0 = arith.constant 0 : i32
    return %arg0, %arg1, %c0_i32 : i32, i32, i32
  }
  func.func @transform_2(%arg0: i32, %arg1: i32, %arg2: i32) -> (i32, i32) {
    %c0_i32 = arith.constant 0 : i32
    %c0_i32_0 = arith.constant 0 : i32
    return %c0_i32, %arg2 : i32, i32
  }
  func.func @transform_3(%arg0: i32, %arg1: i32, %arg2: i32) -> (i32, i32, i32, i32) {
    %c0_i32 = arith.constant 0 : i32
    %c0_i32_0 = arith.constant 0 : i32
    %c0_i32_1 = arith.constant 0 : i32
    return %arg0, %arg1, %c0_i32, %c0_i32_0 : i32, i32, i32, i32
  }
}

module attributes {stable_mosaic.version = 11 : i64} {
  func.func @_mel_stats_kernel(%arg0: i32, %arg1: i32, %arg2: i32, %arg3: memref<1x32x2048xbf16, #tpu.memory_space<vmem>>, %arg4: memref<1x32x2048xbf16, #tpu.memory_space<vmem>>, %arg5: memref<2048x256xbf16, #tpu.memory_space<vmem>>, %arg6: memref<128x128xbf16, #tpu.memory_space<vmem>>, %arg7: memref<1x1x8x128xf32, #tpu.memory_space<vmem>>, %arg8: memref<32x128xf32, #tpu.memory_space<vmem>>, %arg9: memref<32x128xf32, #tpu.memory_space<vmem>>) attributes {dimension_semantics = [#tpu.dimension_semantics<parallel>, #tpu.dimension_semantics<parallel>, #tpu.dimension_semantics<arbitrary>], iteration_bounds = array<i64: 2, 1, 9>, scalar_prefetch = 0 : i64, scratch_operands = 2 : i64, tpu.core_type = #tpu.core_type<tc>, window_params = [{transform_indices = @transform_0, window_bounds = array<i64: 1, 32, 2048>}, {transform_indices = @transform_1, window_bounds = array<i64: 1, 32, 2048>}, {transform_indices = @transform_2, window_bounds = array<i64: 2048, 256>}, {transform_indices = @transform_3, window_bounds = array<i64: 128, 128>}, {transform_indices = @transform_4, window_bounds = array<i64: 1, 1, 8, 128>}]} {
    %c0_i32 = arith.constant 0 : i32
    %0 = arith.cmpi eq, %arg2, %c0_i32 : i32
    %1 = arith.extui %0 : i1 to i32
    %c0_i32_0 = arith.constant 0 : i32
    %2 = arith.cmpi ne, %1, %c0_i32_0 : i32
    scf.if %2 {
      %cst_24 = arith.constant 0.000000e+00 : f32
      %40 = vector.broadcast %cst_24 : f32 to vector<32x128xf32>
      %c0_25 = arith.constant 0 : index
      %c0_26 = arith.constant 0 : index
      %41 = vector.load %arg8[%c0_25, %c0_26] : memref<32x128xf32, #tpu.memory_space<vmem>>, vector<32x128xf32>
      tpu.vector_store %arg8[%c0_25, %c0_26], %40 {strides = array<i32>} : memref<32x128xf32, #tpu.memory_space<vmem>>, vector<32x128xf32>,
      %cst_27 = arith.constant 0.000000e+00 : f32
      %42 = vector.broadcast %cst_27 : f32 to vector<32x128xf32>
      %c0_28 = arith.constant 0 : index
      %c0_29 = arith.constant 0 : index
      %43 = vector.load %arg9[%c0_28, %c0_29] : memref<32x128xf32, #tpu.memory_space<vmem>>, vector<32x128xf32>
      tpu.vector_store %arg9[%c0_28, %c0_29], %42 {strides = array<i32>} : memref<32x128xf32, #tpu.memory_space<vmem>>, vector<32x128xf32>,
    } else {
    }
    %c0 = arith.constant 0 : index
    %c0_1 = arith.constant 0 : index
    %3 = vector.load %arg5[%c0, %c0_1] : memref<2048x256xbf16, #tpu.memory_space<vmem>>, vector<2048x256xbf16>
    %c0_2 = arith.constant 0 : index
    %c0_3 = arith.constant 0 : index
    %c0_4 = arith.constant 0 : index
    %4 = vector.load %arg3[%c0_2, %c0_3, %c0_4] : memref<1x32x2048xbf16, #tpu.memory_space<vmem>>, vector<1x32x2048xbf16>
    %5 = vector.shape_cast %4 : vector<1x32x2048xbf16> to vector<32x2048xbf16>
    %cst = arith.constant dense<0.000000e+00> : vector<32x256xf32>
    %6 = tpu.matmul %5, %3, %cst {dimension_numbers = #tpu.dot_dimension_numbers<[1], [0], [0], [1], [0, 0, 1, 1], [], []>} : vector<32x2048xbf16>, vector<2048x256xbf16>, vector<32x256xf32> -> vector<32x256xf32>
    %c0_5 = arith.constant 0 : index
    %c0_6 = arith.constant 0 : index
    %c0_7 = arith.constant 0 : index
    %7 = vector.load %arg4[%c0_5, %c0_6, %c0_7] : memref<1x32x2048xbf16, #tpu.memory_space<vmem>>, vector<1x32x2048xbf16>
    %8 = vector.shape_cast %7 : vector<1x32x2048xbf16> to vector<32x2048xbf16>
    %cst_8 = arith.constant dense<0.000000e+00> : vector<32x256xf32>
    %9 = tpu.matmul %8, %3, %cst_8 {dimension_numbers = #tpu.dot_dimension_numbers<[1], [0], [0], [1], [0, 0, 1, 1], [], []>} : vector<32x2048xbf16>, vector<2048x256xbf16>, vector<32x256xf32> -> vector<32x256xf32>
    %10 = vector.extract_strided_slice %6 {offsets = [0, 0], sizes = [32, 128], strides = [1, 1]} : vector<32x256xf32> to vector<32x128xf32>
    %11 = vector.extract_strided_slice %6 {offsets = [0, 128], sizes = [32, 128], strides = [1, 1]} : vector<32x256xf32> to vector<32x128xf32>
    %12 = vector.extract_strided_slice %9 {offsets = [0, 0], sizes = [32, 128], strides = [1, 1]} : vector<32x256xf32> to vector<32x128xf32>
    %13 = vector.extract_strided_slice %9 {offsets = [0, 128], sizes = [32, 128], strides = [1, 1]} : vector<32x256xf32> to vector<32x128xf32>
    %14 = arith.mulf %10, %10 : vector<32x128xf32>
    %15 = arith.mulf %11, %11 : vector<32x128xf32>
    %16 = arith.addf %14, %15 : vector<32x128xf32>
    %cst_9 = arith.constant 1.000000e-24 : f32
    %17 = vector.broadcast %cst_9 : f32 to vector<32x128xf32>
    %18 = arith.addf %16, %17 : vector<32x128xf32>
    %19 = math.sqrt %18 : vector<32x128xf32>
    %20 = arith.mulf %12, %12 : vector<32x128xf32>
    %21 = arith.mulf %13, %13 : vector<32x128xf32>
    %22 = arith.addf %20, %21 : vector<32x128xf32>
    %cst_10 = arith.constant 1.000000e-24 : f32
    %23 = vector.broadcast %cst_10 : f32 to vector<32x128xf32>
    %24 = arith.addf %22, %23 : vector<32x128xf32>
    %25 = math.sqrt %24 : vector<32x128xf32>
    %c0_11 = arith.constant 0 : index
    %c0_12 = arith.constant 0 : index
    %26 = vector.load %arg6[%c0_11, %c0_12] : memref<128x128xbf16, #tpu.memory_space<vmem>>, vector<128x128xbf16>
    %c0_13 = arith.constant 0 : index
    %c0_14 = arith.constant 0 : index
    %27 = vector.load %arg8[%c0_13, %c0_14] : memref<32x128xf32, #tpu.memory_space<vmem>>, vector<32x128xf32>
    %28 = arith.truncf %19 : vector<32x128xf32> to vector<32x128xbf16>
    %cst_15 = arith.constant dense<0.000000e+00> : vector<32x128xf32>
    %29 = tpu.matmul %28, %26, %cst_15 {dimension_numbers = #tpu.dot_dimension_numbers<[1], [0], [0], [1], [0, 0, 1, 1], [], []>} : vector<32x128xbf16>, vector<128x128xbf16>, vector<32x128xf32> -> vector<32x128xf32>
    %30 = arith.addf %27, %29 : vector<32x128xf32>
    %c0_16 = arith.constant 0 : index
    %c0_17 = arith.constant 0 : index
    %31 = vector.load %arg8[%c0_16, %c0_17] : memref<32x128xf32, #tpu.memory_space<vmem>>, vector<32x128xf32>
    tpu.vector_store %arg8[%c0_16, %c0_17], %30 {strides = array<i32>} : memref<32x128xf32, #tpu.memory_space<vmem>>, vector<32x128xf32>,
    %c0_18 = arith.constant 0 : index
    %c0_19 = arith.constant 0 : index
    %32 = vector.load %arg9[%c0_18, %c0_19] : memref<32x128xf32, #tpu.memory_space<vmem>>, vector<32x128xf32>
    %33 = arith.truncf %25 : vector<32x128xf32> to vector<32x128xbf16>
    %cst_20 = arith.constant dense<0.000000e+00> : vector<32x128xf32>
    %34 = tpu.matmul %33, %26, %cst_20 {dimension_numbers = #tpu.dot_dimension_numbers<[1], [0], [0], [1], [0, 0, 1, 1], [], []>} : vector<32x128xbf16>, vector<128x128xbf16>, vector<32x128xf32> -> vector<32x128xf32>
    %35 = arith.addf %32, %34 : vector<32x128xf32>
    %c0_21 = arith.constant 0 : index
    %c0_22 = arith.constant 0 : index
    %36 = vector.load %arg9[%c0_21, %c0_22] : memref<32x128xf32, #tpu.memory_space<vmem>>, vector<32x128xf32>
    tpu.vector_store %arg9[%c0_21, %c0_22], %35 {strides = array<i32>} : memref<32x128xf32, #tpu.memory_space<vmem>>, vector<32x128xf32>,
    %c8_i32 = arith.constant 8 : i32
    %37 = arith.cmpi eq, %arg2, %c8_i32 : i32
    %38 = arith.extui %37 : i1 to i32
    %c0_i32_23 = arith.constant 0 : i32
    %39 = arith.cmpi ne, %38, %c0_i32_23 : i32
    scf.if %39 {
      %c0_24 = arith.constant 0 : index
      %c0_25 = arith.constant 0 : index
      %40 = vector.load %arg8[%c0_24, %c0_25] : memref<32x128xf32, #tpu.memory_space<vmem>>, vector<32x128xf32>
      %c0_26 = arith.constant 0 : index
      %c0_27 = arith.constant 0 : index
      %41 = vector.load %arg9[%c0_26, %c0_27] : memref<32x128xf32, #tpu.memory_space<vmem>>, vector<32x128xf32>
      %42 = arith.subf %40, %41 : vector<32x128xf32>
      %cst_28 = arith.constant 3.276800e+04 : f32
      %43 = vector.broadcast %cst_28 : f32 to vector<32x128xf32>
      %44 = arith.mulf %40, %43 : vector<32x128xf32>
      %cst_29 = arith.constant 9.99999997E-7 : f32
      %45 = vector.broadcast %cst_29 : f32 to vector<32x128xf32>
      %46 = arith.addf %44, %45 : vector<32x128xf32>
      %cst_30 = arith.constant 3.276800e+04 : f32
      %47 = vector.broadcast %cst_30 : f32 to vector<32x128xf32>
      %48 = arith.mulf %41, %47 : vector<32x128xf32>
      %cst_31 = arith.constant 9.99999997E-7 : f32
      %49 = vector.broadcast %cst_31 : f32 to vector<32x128xf32>
      %50 = arith.addf %48, %49 : vector<32x128xf32>
      %51 = arith.divf %46, %50 : vector<32x128xf32>
      %52 = math.log %51 : vector<32x128xf32>
      %53 = math.absf %52 : vector<32x128xf32>
      %cst_32 = arith.constant 0.000000e+00 : f32
      %54 = vector.broadcast %cst_32 : f32 to vector<8x128xf32>
      %c0_33 = arith.constant 0 : index
      %c0_34 = arith.constant 0 : index
      %c0_35 = arith.constant 0 : index
      %c0_36 = arith.constant 0 : index
      %55 = vector.load %arg7[%c0_33, %c0_34, %c0_35, %c0_36] : memref<1x1x8x128xf32, #tpu.memory_space<vmem>>, vector<1x1x8x128xf32>
      %56 = vector.shape_cast %55 : vector<1x1x8x128xf32> to vector<8x128xf32>
      %57 = vector.shape_cast %54 : vector<8x128xf32> to vector<1x1x8x128xf32>
      tpu.vector_store %arg7[%c0_33, %c0_34, %c0_35, %c0_36], %57 {strides = array<i32>} : memref<1x1x8x128xf32, #tpu.memory_space<vmem>>, vector<1x1x8x128xf32>,
      %58 = arith.mulf %42, %42 : vector<32x128xf32>
      %cst_37 = arith.constant dense<0.000000e+00> : vector<128xf32>
      %59 = vector.multi_reduction <add>, %58, %cst_37 [0] : vector<32x128xf32> to vector<128xf32>
      %60 = vector.shape_cast %59 : vector<128xf32> to vector<1x128xf32>
      %c0_38 = arith.constant 0 : index
      %c0_39 = arith.constant 0 : index
      %c0_40 = arith.constant 0 : index
      %c0_41 = arith.constant 0 : index
      %61 = vector.load %arg7[%c0_38, %c0_39, %c0_40, %c0_41] : memref<1x1x8x128xf32, #tpu.memory_space<vmem>>, vector<1x1x1x128xf32>
      %62 = vector.shape_cast %61 : vector<1x1x1x128xf32> to vector<1x128xf32>
      %63 = vector.shape_cast %60 : vector<1x128xf32> to vector<1x1x1x128xf32>
      tpu.vector_store %arg7[%c0_38, %c0_39, %c0_40, %c0_41], %63 {strides = array<i32>} : memref<1x1x8x128xf32, #tpu.memory_space<vmem>>, vector<1x1x1x128xf32>,
      %cst_42 = arith.constant dense<0.000000e+00> : vector<128xf32>
      %64 = vector.multi_reduction <add>, %53, %cst_42 [0] : vector<32x128xf32> to vector<128xf32>
      %65 = vector.shape_cast %64 : vector<128xf32> to vector<1x128xf32>
      %c0_43 = arith.constant 0 : index
      %c0_44 = arith.constant 0 : index
      %c1 = arith.constant 1 : index
      %c0_45 = arith.constant 0 : index
      %66 = vector.load %arg7[%c0_43, %c0_44, %c1, %c0_45] : memref<1x1x8x128xf32, #tpu.memory_space<vmem>>, vector<1x1x1x128xf32>
      %67 = vector.shape_cast %66 : vector<1x1x1x128xf32> to vector<1x128xf32>
      %68 = vector.shape_cast %65 : vector<1x128xf32> to vector<1x1x1x128xf32>
      tpu.vector_store %arg7[%c0_43, %c0_44, %c1, %c0_45], %68 {strides = array<i32>} : memref<1x1x8x128xf32, #tpu.memory_space<vmem>>, vector<1x1x1x128xf32>,
    } else {
    }
    return
  }
  func.func @transform_0(%arg0: i32, %arg1: i32, %arg2: i32) -> (i32, i32, i32) {
    %c0_i32 = arith.constant 0 : i32
    %c0_i32_0 = arith.constant 0 : i32
    return %arg0, %arg1, %c0_i32 : i32, i32, i32
  }
  func.func @transform_1(%arg0: i32, %arg1: i32, %arg2: i32) -> (i32, i32, i32) {
    %c0_i32 = arith.constant 0 : i32
    %c0_i32_0 = arith.constant 0 : i32
    return %arg0, %arg1, %c0_i32 : i32, i32, i32
  }
  func.func @transform_2(%arg0: i32, %arg1: i32, %arg2: i32) -> (i32, i32) {
    %c0_i32 = arith.constant 0 : i32
    %c0_i32_0 = arith.constant 0 : i32
    return %c0_i32, %arg2 : i32, i32
  }
  func.func @transform_3(%arg0: i32, %arg1: i32, %arg2: i32) -> (i32, i32) {
    %c0_i32 = arith.constant 0 : i32
    %c0_i32_0 = arith.constant 0 : i32
    return %arg2, %c0_i32 : i32, i32
  }
  func.func @transform_4(%arg0: i32, %arg1: i32, %arg2: i32) -> (i32, i32, i32, i32) {
    %c0_i32 = arith.constant 0 : i32
    %c0_i32_0 = arith.constant 0 : i32
    %c0_i32_1 = arith.constant 0 : i32
    return %arg0, %arg1, %c0_i32, %c0_i32_0 : i32, i32, i32, i32
  }
}

module attributes {stable_mosaic.version = 11 : i64} {
  func.func @_wav_abs_sum_kernel(%arg0: i32, %arg1: memref<2x2048xf32, #tpu.memory_space<vmem>>, %arg2: memref<2x2048xf32, #tpu.memory_space<vmem>>, %arg3: memref<8x128xf32, #tpu.memory_space<vmem>>) attributes {dimension_semantics = [#tpu.dimension_semantics<arbitrary>], iteration_bounds = array<i64: 1>, scalar_prefetch = 0 : i64, scratch_operands = 0 : i64, tpu.core_type = #tpu.core_type<tc>, window_params = [{transform_indices = @transform_0, window_bounds = array<i64: 2, 2048>}, {transform_indices = @transform_1, window_bounds = array<i64: 2, 2048>}, {pipeline_mode = #tpu.pipeline_mode<synchronous>, transform_indices = @transform_2, window_bounds = array<i64: 8, 128>}]} {
    %c0_i32 = arith.constant 0 : i32
    %0 = arith.cmpi eq, %arg0, %c0_i32 : i32
    %1 = arith.extui %0 : i1 to i32
    %c0_i32_0 = arith.constant 0 : i32
    %2 = arith.cmpi ne, %1, %c0_i32_0 : i32
    scf.if %2 {
      %cst_10 = arith.constant 0.000000e+00 : f32
      %23 = vector.broadcast %cst_10 : f32 to vector<8x128xf32>
      %c0_11 = arith.constant 0 : index
      %c0_12 = arith.constant 0 : index
      %24 = vector.load %arg3[%c0_11, %c0_12] : memref<8x128xf32, #tpu.memory_space<vmem>>, vector<8x128xf32>
      tpu.vector_store %arg3[%c0_11, %c0_12], %23 {strides = array<i32>} : memref<8x128xf32, #tpu.memory_space<vmem>>, vector<8x128xf32>,
    } else {
    }
    %c2048_i32 = arith.constant 2048 : i32
    %3 = arith.muli %arg0, %c2048_i32 : i32
    %4 = tpu.iota {dimensions = array<i32: 1>} : vector<2x2048xi32>
    %5 = vector.broadcast %3 : i32 to vector<2x2048xi32>
    %6 = arith.addi %5, %4 : vector<2x2048xi32>
    %c2048_i32_1 = arith.constant 2048 : i32
    %7 = vector.broadcast %c2048_i32_1 : i32 to vector<2x2048xi32>
    %8 = arith.cmpi slt, %6, %7 : vector<2x2048xi32>
    %c0 = arith.constant 0 : index
    %c0_2 = arith.constant 0 : index
    %9 = vector.load %arg1[%c0, %c0_2] : memref<2x2048xf32, #tpu.memory_space<vmem>>, vector<2x2048xf32>
    %c0_3 = arith.constant 0 : index
    %c0_4 = arith.constant 0 : index
    %10 = vector.load %arg2[%c0_3, %c0_4] : memref<2x2048xf32, #tpu.memory_space<vmem>>, vector<2x2048xf32>
    %11 = arith.subf %9, %10 : vector<2x2048xf32>
    %12 = math.absf %11 : vector<2x2048xf32>
    %cst = arith.constant 0.000000e+00 : f32
    %13 = vector.broadcast %cst : f32 to vector<2x2048xf32>
    %14 = arith.select %8, %12, %13 : vector<2x2048xi1>, vector<2x2048xf32>
    %c0_5 = arith.constant 0 : index
    %c0_6 = arith.constant 0 : index
    %15 = vector.load %arg3[%c0_5, %c0_6] : memref<8x128xf32, #tpu.memory_space<vmem>>, vector<8x128xf32>
    %16 = vector.shape_cast %14 : vector<2x2048xf32> to vector<1x2x2048xf32>
    %cst_7 = arith.constant dense<0.000000e+00> : vector<1xf32>
    %17 = vector.multi_reduction <add>, %16, %cst_7 [1, 2] : vector<1x2x2048xf32> to vector<1xf32>
    %18 = vector.shape_cast %17 : vector<1xf32> to vector<1x1x1xf32>
    %19 = vector.extract %18[0, 0, 0] : f32 from vector<1x1x1xf32>
    %20 = vector.broadcast %19 : f32 to vector<8x128xf32>
    %21 = arith.addf %15, %20 : vector<8x128xf32>
    %c0_8 = arith.constant 0 : index
    %c0_9 = arith.constant 0 : index
    %22 = vector.load %arg3[%c0_8, %c0_9] : memref<8x128xf32, #tpu.memory_space<vmem>>, vector<8x128xf32>
    tpu.vector_store %arg3[%c0_8, %c0_9], %21 {strides = array<i32>} : memref<8x128xf32, #tpu.memory_space<vmem>>, vector<8x128xf32>,
    return
  }
  func.func @transform_0(%arg0: i32) -> (i32, i32) {
    %c0_i32 = arith.constant 0 : i32
    %c0_i32_0 = arith.constant 0 : i32
    return %c0_i32, %arg0 : i32, i32
  }
  func.func @transform_1(%arg0: i32) -> (i32, i32) {
    %c0_i32 = arith.constant 0 : i32
    %c0_i32_0 = arith.constant 0 : i32
    return %c0_i32, %arg0 : i32, i32
  }
  func.func @transform_2(%arg0: i32) -> (i32, i32) {
    %c0_i32 = arith.constant 0 : i32
    %c0_i32_0 = arith.constant 0 : i32
    %c0_i32_1 = arith.constant 0 : i32
    return %c0_i32, %c0_i32_0 : i32, i32
  }
}

</mosaic_0001>

<bundles_post_ra>
// kernel: calc_convergence_loss.8
= control target key start
LH: loop header
LB: loop body
LE: loop exit
PB: predicated region body
PF: predicated region fallthrough
CT: control target
= control target key end

     0   :  { %s1517_s12 = smov 0   ;;  %s1519_s13 = smov 0   ;;  %s1862_s0 = inlined_call_operand.vmem [shape: bf16[2,48,256], index: 0, kind: input, shape index: {}]   ;;  %s1863_s1 = inlined_call_operand.vmem [shape: bf16[2,48,256], index: 1, kind: input, shape index: {}]   ;;  %s1864_s2 = inlined_call_operand.vmem [shape: bf16[256,512], index: 2, kind: input, shape index: {}]   ;;  %s1865_s3 = inlined_call_operand.vmem [shape: f32[2,1,8,128], index: 3, kind: output, shape index: {}]  }
   0x1   :  { %s1521_s14 = smov 0   ;;  %s1523_s15 = smov 0  }
   0x2   :  { %s1525_s16 = smov 0   ;;  %s1527_s17 = smov 0  }
   0x3   :  { %s1529_s18 = smov 0  }
   0x4 LB: > { %s25_s19 = sadd.s32 1, %s1486_s16  ;;  %s32_s20 = sadd.s32 1, %s1490_s17  ;;  %s1494_s18 = sphi %s1529_s18, %s13_s18   ;;  %s1490_s17 = sphi %s1527_s17, %s1871_s17   ;;  %s1486_s16 = sphi %s1525_s16, %s1870_s16   ;;  %s1482_s15 = sphi %s1523_s15, %s1869_s15   ;;  %s1478_s14 = sphi %s1521_s14, %s1868_s14   ;;  %s1474_s13 = sphi %s1519_s13, %s1867_s13   ;;  %s1470_s12 = sphi %s1517_s12, %s1866_s12  }
   0x5   : > { %p26_p0 = scmp.ge.s32.totalorder %s25_s19, 2  ;;  %s95_s21 = sadd.s32 1, %s1474_s13 }
   0x6   : > { %p102_p1 = scmp.ne.s32.totalorder %s1474_s13, %s1470_s12  ;;  %p103_p2 = scmp.eq.s32.totalorder %s1494_s18, 0 }
   0x7   : > { %s1873_s19 = smov (%p26_p0, %s25_s19), 0  ;;  %s1875_s20 = smov (!%p26_p0, %s32_s20), %s1490_s17 }
   0x8   : > { %s92_s22 = ssub.s32 %s1486_s16, %s1873_s19  ;;  %p104_p3 = por %p103_p2, %p102_p1 }
   0x9   : > { %p34_p4 = scmp.ge.s32.totalorder %s1875_s20, 2  ;;  %p93_p5 = scmp.eq.s32.totalorder %s92_s22, 0 }
   0xa   : > { %p1210_p6 = scmp.ge.s32.totalorder %s1494_s18, 4 }
   0xb   : > { %s1877_s20 = smov (%p34_p4, %s1875_s20), 0 }
   0xc   : > { %s1566_s23 = scalar_select %p93_p5, %s1474_s13, %s95_s21  }
   0xd   : > { %156 = sbr.rel (%p1210_p6) target bundleno = 38 (0x26), region = 16 }
  0x12   : > { %187 = sbr.rel (!%p104_p3) target bundleno = 38 (0x26), region = 28  ;;  %s189_s24 = sand.u32 (%p104_p3), 1, %s1474_s13  }
  0x13   : > { %s1267_s25 = sshll.u32 (%p104_p3), %s1486_s16, 3  ;;  %s1211_s26 = sshll.u32 (%p104_p3), %s189_s24, 8 }
  0x14   : > { %s1574_s29 = scalar_lea.vmem (%p104_p3), %s1864_s2, %s1267_s25  ;;  %s1579_s30 = scalar_lea.vmem (%p104_p3), [#allocation3], %s1211_s26 }
  0x15   : > { %v285_v0 = vld [vmem:[%s1574_s29] sm:$0xff] (%p104_p3)  ;;  %v287_v1 = vld [vmem:[%s1574_s29 + $0x10] sm:$0xff] (%p104_p3) }
  0x16   : > { %v289_v2 = vld [vmem:[%s1574_s29 + $0x20] sm:$0xff] (%p104_p3)  ;;  %286 = vst [vmem:[%s1579_s30] sm:$0xff] (%p104_p3), %v285_v0  ;;  %288 = vst [vmem:[%s1579_s30 + $0x8] sm:$0xff] (%p104_p3), %v287_v1  ;;  %v291_v3 = vld [vmem:[%s1574_s29 + $0x30] sm:$0xff] (%p104_p3) }
  0x17   : > { %290 = vst [vmem:[%s1579_s30 + $0x10] sm:$0xff] %v289_v2  ;;  %v293_v4 = vld [vmem:[%s1574_s29 + $0x40] sm:$0xff]  ;;  %v295_v5 = vld [vmem:[%s1574_s29 + $0x50] sm:$0xff]  ;;  %292 = vst [vmem:[%s1579_s30 + $0x18] sm:$0xff] %v291_v3 }
  0x18   : > { %294 = vst [vmem:[%s1579_s30 + $0x20] sm:$0xff] %v293_v4  ;;  %296 = vst [vmem:[%s1579_s30 + $0x28] sm:$0xff] %v295_v5  ;;  %v297_v6 = vld [vmem:[%s1574_s29 + $0x60] sm:$0xff]  ;;  %v299_v7 = vld [vmem:[%s1574_s29 + $0x70] sm:$0xff] }
  0x19   : > { %v301_v8 = vld [vmem:[%s1574_s29 + $0x80] sm:$0xff]  ;;  %298 = vst [vmem:[%s1579_s30 + $0x30] sm:$0xff] %v297_v6  ;;  %300 = vst [vmem:[%s1579_s30 + $0x38] sm:$0xff] %v299_v7  ;;  %v303_v9 = vld [vmem:[%s1574_s29 + $0x90] sm:$0xff] }
  0x1a   : > { %302 = vst [vmem:[%s1579_s30 + $0x40] sm:$0xff] %v301_v8  ;;  %v305_v10 = vld [vmem:[%s1574_s29 + $0xa0] sm:$0xff]  ;;  %v307_v11 = vld [vmem:[%s1574_s29 + $0xb0] sm:$0xff]  ;;  %304 = vst [vmem:[%s1579_s30 + $0x48] sm:$0xff] %v303_v9 }
  0x1b   : > { %306 = vst [vmem:[%s1579_s30 + $0x50] sm:$0xff] %v305_v10  ;;  %308 = vst [vmem:[%s1579_s30 + $0x58] sm:$0xff] %v307_v11  ;;  %v309_v12 = vld [vmem:[%s1574_s29 + $0xc0] sm:$0xff]  ;;  %v311_v13 = vld [vmem:[%s1574_s29 + $0xd0] sm:$0xff] }
  0x1c   : > { %v313_v14 = vld [vmem:[%s1574_s29 + $0xe0] sm:$0xff]  ;;  %310 = vst [vmem:[%s1579_s30 + $0x60] sm:$0xff] %v309_v12  ;;  %312 = vst [vmem:[%s1579_s30 + $0x68] sm:$0xff] %v311_v13  ;;  %v315_v15 = vld [vmem:[%s1574_s29 + $0xf0] sm:$0xff] }
  0x1d   : > { %314 = vst [vmem:[%s1579_s30 + $0x70] sm:$0xff] %v313_v14  ;;  %v317_v16 = vld [vmem:[%s1574_s29 + $0x100] sm:$0xff]  ;;  %v319_v17 = vld [vmem:[%s1574_s29 + $0x110] sm:$0xff]  ;;  %316 = vst [vmem:[%s1579_s30 + $0x78] sm:$0xff] %v315_v15 }
  0x1e   : > { %318 = vst [vmem:[%s1579_s30 + $0x80] sm:$0xff] %v317_v16  ;;  %320 = vst [vmem:[%s1579_s30 + $0x88] sm:$0xff] %v319_v17  ;;  %v321_v18 = vld [vmem:[%s1574_s29 + $0x120] sm:$0xff]  ;;  %v323_v19 = vld [vmem:[%s1574_s29 + $0x130] sm:$0xff] }
  0x1f   : > { %v325_v20 = vld [vmem:[%s1574_s29 + $0x140] sm:$0xff]  ;;  %322 = vst [vmem:[%s1579_s30 + $0x90] sm:$0xff] %v321_v18  ;;  %324 = vst [vmem:[%s1579_s30 + $0x98] sm:$0xff] %v323_v19  ;;  %v327_v21 = vld [vmem:[%s1574_s29 + $0x150] sm:$0xff] }
  0x20   : > { %326 = vst [vmem:[%s1579_s30 + $0xa0] sm:$0xff] %v325_v20  ;;  %v329_v22 = vld [vmem:[%s1574_s29 + $0x160] sm:$0xff]  ;;  %v331_v23 = vld [vmem:[%s1574_s29 + $0x170] sm:$0xff]  ;;  %328 = vst [vmem:[%s1579_s30 + $0xa8] sm:$0xff] %v327_v21 }
  0x21   : > { %330 = vst [vmem:[%s1579_s30 + $0xb0] sm:$0xff] %v329_v22  ;;  %332 = vst [vmem:[%s1579_s30 + $0xb8] sm:$0xff] %v331_v23  ;;  %v333_v24 = vld [vmem:[%s1574_s29 + $0x180] sm:$0xff]  ;;  %v335_v25 = vld [vmem:[%s1574_s29 + $0x190] sm:$0xff] }
  0x22   : > { %v337_v26 = vld [vmem:[%s1574_s29 + $0x1a0] sm:$0xff]  ;;  %334 = vst [vmem:[%s1579_s30 + $0xc0] sm:$0xff] %v333_v24  ;;  %336 = vst [vmem:[%s1579_s30 + $0xc8] sm:$0xff] %v335_v25  ;;  %v339_v27 = vld [vmem:[%s1574_s29 + $0x1b0] sm:$0xff] }
  0x23   : > { %338 = vst [vmem:[%s1579_s30 + $0xd0] sm:$0xff] %v337_v26  ;;  %v341_v28 = vld [vmem:[%s1574_s29 + $0x1c0] sm:$0xff]  ;;  %v343_v29 = vld [vmem:[%s1574_s29 + $0x1d0] sm:$0xff]  ;;  %340 = vst [vmem:[%s1579_s30 + $0xd8] sm:$0xff] %v339_v27 }
  0x24   : > { %342 = vst [vmem:[%s1579_s30 + $0xe0] sm:$0xff] %v341_v28  ;;  %344 = vst [vmem:[%s1579_s30 + $0xe8] sm:$0xff] %v343_v29  ;;  %v345_v30 = vld [vmem:[%s1574_s29 + $0x1e0] sm:$0xff]  ;;  %v347_v31 = vld [vmem:[%s1574_s29 + $0x1f0] sm:$0xff] }
  0x25   : > { %346 = vst [vmem:[%s1579_s30 + $0xf0] sm:$0xff] %v345_v30  ;;  %348 = vst [vmem:[%s1579_s30 + $0xf8] sm:$0xff] %v347_v31 }
  0x26 PF: > { %p1214_p7 = scmp.ge.s32.totalorder %s1494_s18, 1  ;;  %p353_p8 = scmp.lt.s32.totalorder %s1494_s18, 5 }
  0x28   : > { %p354_p9 = pnand %p1214_p7, %p353_p8 }
  0x29   : > { %s360_s4 = sand.u32 (!%p354_p9), 1, %s1470_s12   ;;  %p406_p10 = scmp.lt.s32.totalorder (!%p354_p9), %s1482_s15, 1 }
  0x2a   : > { %357 = sbr.rel (%p354_p9) target bundleno = 426 (0x1aa), region = 66  ;;  %s1215_s5 = sshll.u32 (!%p354_p9), %s360_s4, 8 }
  0x2b   : > { %s1662_s12 = scalar_lea.vmem (!%p354_p9), [#allocation3], %s1215_s5  ;;  %p1219_p11 = scmp.ne.s32.totalorder (!%p354_p9), %s1478_s14, 0 }
  0x2f   : > { %s1879_s15 = smov (!%p406_p10, %s1482_s15), 1  ;;  %438 = sbr.rel (%p1219_p11) target bundleno = 54 (0x36), region = 74 }
  0x30   : > { %s1268_s6 = smul.u32 48, %s1879_s15  ;;  %s1218_s7 = sshll.u32 %s1879_s15, 3 }
  0x31   : > { %s1650_s10 = scalar_lea.vmem %s1865_s3, %s1218_s7 }
  0x32   : > { %s1655_s22 = scalar_lea.vmem %s1862_s0, %s1268_s6  ;;  %s1660_s26 = scalar_lea.vmem %s1863_s1, %s1268_s6 }
  0x34   : > { %v1496_v32 = vmov 0.0  }
  0x35   : > { %439 = vst [vmem:[#allocation2] sm:$0xff] %v1496_v32 }
  0x36 PF: > { %v1326_v33 = vld [vmem:[%s1662_s12 + $0x74] ss:$8 sps:$4 sm:$0xff]   ;;  %v1328_v34 = vld [vmem:[%s1662_s12 + $0x70] ss:$8 sps:$4 sm:$0xff]   ;;  %v1329_v35 = vld [vmem:[%s1662_s12 + $0x64] ss:$8 sps:$4 sm:$0xff]  }
  0x37   : > { %668 = vmatprep.subr.bf16.mxu0 %v1326_v33  ;;  %767 = vmatprep.subr.bf16.mxu1 %v1326_v33  ;;  %v1331_v36 = vld [vmem:[%s1662_s12 + $0x60] ss:$8 sps:$4 sm:$0xff]   ;;  %v1332_v37 = vld [vmem:[%s1662_s12 + $0x54] ss:$8 sps:$4 sm:$0xff]   ;;  %v1334_v38 = vld [vmem:[%s1662_s12 + $0x50] ss:$8 sps:$4 sm:$0xff]  }
  0x38   : > { %669 = vmatpush1.bf16.msra.mxu0 %v1328_v34  ;;  %768 = vmatpush1.bf16.msra.mxu1 %v1328_v34  ;;  %v1335_v39 = vld [vmem:[%s1662_s12 + $0x44] ss:$8 sps:$4 sm:$0xff]   ;;  %v1337_v40 = vld [vmem:[%s1662_s12 + $0x40] ss:$8 sps:$4 sm:$0xff]   ;;  %v1338_v41 = vld [vmem:[%s1662_s12 + $0x34] ss:$8 sps:$4 sm:$0xff]  }
  0x39   : > { %670 = vmatprep.subr.bf16.mxu0 %v1329_v35  ;;  %769 = vmatprep.subr.bf16.mxu1 %v1329_v35  ;;  %v1340_v42 = vld [vmem:[%s1662_s12 + $0x30] ss:$8 sps:$4 sm:$0xff]   ;;  %v1341_v43 = vld [vmem:[%s1662_s12 + $0x24] ss:$8 sps:$4 sm:$0xff]   ;;  %v1343_v44 = vld [vmem:[%s1662_s12 + $0x20] ss:$8 sps:$4 sm:$0xff]  }
  0x3a   : > { %v1344_v45 = vld [vmem:[%s1662_s12 + $0x14] ss:$8 sps:$4 sm:$0xff]   ;;  %v1346_v47 = vld [vmem:[%s1662_s12 + $0x10] ss:$8 sps:$4 sm:$0xff]   ;;  %v1347_v49 = vld [vmem:[%s1662_s12 + $0x4] ss:$8 sps:$4 sm:$0xff]  }
  0x3b   : > { %v1376_v46 = vld [vmem:[%s1655_s22 + $0x4] ss:$8 sps:$4 sm:$0xff]   ;;  %v1349_v50 = vld [vmem:[%s1662_s12] ss:$8 sps:$4 sm:$0xff]   ;;  %v1352_v52 = vld [vmem:[%s1662_s12 + $0xf0] ss:$8 sps:$4 sm:$0xff]  }
  0x3c   : > { %671 = vmatpush1.bf16.msra.mxu0 %v1331_v36  ;;  %770 = vmatpush1.bf16.msra.mxu1 %v1331_v36  ;;  %v1379_v48 = vld [vmem:[%s1660_s26 + $0x4] ss:$8 sps:$4 sm:$0xff]   ;;  %v1355_v54 = vld [vmem:[%s1662_s12 + $0xe0] ss:$8 sps:$4 sm:$0xff]   ;;  %v1358_v56 = vld [vmem:[%s1662_s12 + $0xd0] ss:$8 sps:$4 sm:$0xff]  }
  0x3d   : > { %672 = vmatprep.subr.bf16.mxu0 %v1332_v37  ;;  %771 = vmatprep.subr.bf16.mxu1 %v1332_v37  ;;  %v1350_v51 = vld [vmem:[%s1662_s12 + $0xf4] ss:$8 sps:$4 sm:$0xff]   ;;  %v1353_v53 = vld [vmem:[%s1662_s12 + $0xe4] ss:$8 sps:$4 sm:$0xff]   ;;  %v1361_v58 = vld [vmem:[%s1662_s12 + $0xc0] ss:$8 sps:$4 sm:$0xff]  }
  0x3e   : > { %700 = vmatprep.mubr.bf16.mxu0 %v1376_v46  ;;  %799 = vmatprep.mubr.bf16.mxu1 %v1379_v48  ;;  %v1356_v55 = vld [vmem:[%s1662_s12 + $0xd4] ss:$8 sps:$4 sm:$0xff]   ;;  %v1359_v57 = vld [vmem:[%s1662_s12 + $0xc4] ss:$8 sps:$4 sm:$0xff]   ;;  %v1364_v60 = vld [vmem:[%s1662_s12 + $0xb0] ss:$8 sps:$4 sm:$0xff]  }
  0x3f   : > { %v1362_v59 = vld [vmem:[%s1662_s12 + $0xb4] ss:$8 sps:$4 sm:$0xff]   ;;  %v1365_v61 = vld [vmem:[%s1662_s12 + $0xa4] ss:$8 sps:$4 sm:$0xff]   ;;  %v1367_v62 = vld [vmem:[%s1662_s12 + $0xa0] ss:$8 sps:$4 sm:$0xff]  }
  0x40   : > { %673 = vmatpush1.bf16.msra.mxu0 %v1334_v38  ;;  %772 = vmatpush1.bf16.msra.mxu1 %v1334_v38  ;;  %v1368_v63 = vld [vmem:[%s1662_s12 + $0x94] ss:$8 sps:$4 sm:$0xff]   ;;  %v1370_v0 = vld [vmem:[%s1662_s12 + $0x90] ss:$8 sps:$4 sm:$0xff]   ;;  %v1371_v1 = vld [vmem:[%s1662_s12 + $0x84] ss:$8 sps:$4 sm:$0xff]  }
  0x41   : > { %674 = vmatprep.subr.bf16.mxu0 %v1335_v39  ;;  %773 = vmatprep.subr.bf16.mxu1 %v1335_v39  ;;  %v1373_v2 = vld [vmem:[%s1662_s12 + $0x80] ss:$8 sps:$4 sm:$0xff]   ;;  %v1380_v5 = vld [vmem:[%s1655_s22 + $0x14] ss:$8 sps:$4 sm:$0xff]   ;;  %v1386_v9 = vld [vmem:[%s1655_s22 + $0x24] ss:$8 sps:$4 sm:$0xff]  }
  0x42   : > { %v1374_v3 = vld [vmem:[%s1655_s22] ss:$8 sps:$4 sm:$0xff]   ;;  %v1382_v6 = vld [vmem:[%s1660_s26 + $0x14] ss:$8 sps:$4 sm:$0xff]   ;;  %v1384_v7 = vld [vmem:[%s1655_s22 + $0x10] ss:$8 sps:$4 sm:$0xff]  }
  0x43   : > { %v1377_v4 = vld [vmem:[%s1660_s26] ss:$8 sps:$4 sm:$0xff]   ;;  %v1385_v8 = vld [vmem:[%s1660_s26 + $0x10] ss:$8 sps:$4 sm:$0xff]   ;;  %v1388_v10 = vld [vmem:[%s1660_s26 + $0x24] ss:$8 sps:$4 sm:$0xff]  }
  0x44   : > { %675 = vmatpush1.bf16.msra.mxu0 %v1337_v40  ;;  %774 = vmatpush1.bf16.msra.mxu1 %v1337_v40  ;;  %v1390_v11 = vld [vmem:[%s1655_s22 + $0x20] ss:$8 sps:$4 sm:$0xff]   ;;  %p1264_p12 = scmp.ne.s32.totalorder %s1478_s14, 1 }
  0x45   : > { %676 = vmatprep.subr.bf16.mxu0 %v1338_v41  ;;  %775 = vmatprep.subr.bf16.mxu1 %v1338_v41  ;;  %v1391_v12 = vld [vmem:[%s1660_s26 + $0x20] ss:$8 sps:$4 sm:$0xff]  }
  0x48   : > { %677 = vmatpush1.bf16.msra.mxu0 %v1340_v42  ;;  %776 = vmatpush1.bf16.msra.mxu1 %v1340_v42 }
  0x49   : > { %678 = vmatprep.subr.bf16.mxu0 %v1341_v43  ;;  %777 = vmatprep.subr.bf16.mxu1 %v1341_v43 }
  0x4c   : > { %679 = vmatpush1.bf16.msra.mxu0 %v1343_v44  ;;  %778 = vmatpush1.bf16.msra.mxu1 %v1343_v44 }
  0x4d   : > { %680 = vmatprep.subr.bf16.mxu0 %v1344_v45  ;;  %779 = vmatprep.subr.bf16.mxu1 %v1344_v45 }
  0x50   : > { %681 = vmatpush1.bf16.msra.mxu0 %v1346_v47  ;;  %780 = vmatpush1.bf16.msra.mxu1 %v1346_v47 }
  0x51   : > { %682 = vmatprep.subr.bf16.mxu0 %v1347_v49  ;;  %781 = vmatprep.subr.bf16.mxu1 %v1347_v49 }
  0x54   : > { %683 = vmatpush1.bf16.msra.mxu0 %v1349_v50  ;;  %782 = vmatpush1.bf16.msra.mxu1 %v1349_v50 }
  0x55   : > { %684 = vmatprep.subr.bf16.mxu0 %v1350_v51  ;;  %783 = vmatprep.subr.bf16.mxu1 %v1350_v51 }
  0x58   : > { %685 = vmatpush2.bf16.msra.mxu0 %v1352_v52  ;;  %784 = vmatpush2.bf16.msra.mxu1 %v1352_v52 }
  0x59   : > { %686 = vmatprep.subr.bf16.mxu0 %v1353_v53  ;;  %785 = vmatprep.subr.bf16.mxu1 %v1353_v53 }
  0x5c   : > { %687 = vmatpush2.bf16.msra.mxu0 %v1355_v54  ;;  %786 = vmatpush2.bf16.msra.mxu1 %v1355_v54 }
  0x5d   : > { %688 = vmatprep.subr.bf16.mxu0 %v1356_v55  ;;  %787 = vmatprep.subr.bf16.mxu1 %v1356_v55 }
  0x60   : > { %689 = vmatpush2.bf16.msra.mxu0 %v1358_v56  ;;  %788 = vmatpush2.bf16.msra.mxu1 %v1358_v56 }
  0x61   : > { %690 = vmatprep.subr.bf16.mxu0 %v1359_v57  ;;  %789 = vmatprep.subr.bf16.mxu1 %v1359_v57 }
  0x64   : > { %691 = vmatpush2.bf16.msra.mxu0 %v1361_v58  ;;  %790 = vmatpush2.bf16.msra.mxu1 %v1361_v58 }
  0x65   : > { %692 = vmatprep.subr.bf16.mxu0 %v1362_v59  ;;  %791 = vmatprep.subr.bf16.mxu1 %v1362_v59 }
  0x68   : > { %693 = vmatpush2.bf16.msra.mxu0 %v1364_v60  ;;  %792 = vmatpush2.bf16.msra.mxu1 %v1364_v60 }
  0x69   : > { %694 = vmatprep.subr.bf16.mxu0 %v1365_v61  ;;  %793 = vmatprep.subr.bf16.mxu1 %v1365_v61 }
  0x6c   : > { %695 = vmatpush2.bf16.msra.mxu0 %v1367_v62  ;;  %794 = vmatpush2.bf16.msra.mxu1 %v1367_v62 }
  0x6d   : > { %696 = vmatprep.subr.bf16.mxu0 %v1368_v63  ;;  %795 = vmatprep.subr.bf16.mxu1 %v1368_v63 }
  0x70   : > { %697 = vmatpush2.bf16.msra.mxu0 %v1370_v0  ;;  %796 = vmatpush2.bf16.msra.mxu1 %v1370_v0 }
  0x71   : > { %698 = vmatprep.subr.bf16.mxu0 %v1371_v1  ;;  %797 = vmatprep.subr.bf16.mxu1 %v1371_v1 }
  0x74   : > { %699 = vmatpush2.bf16.msra.mxu0 %v1373_v2  ;;  %798 = vmatpush2.bf16.msra.mxu1 %v1373_v2 }
  0x77   : > { %701 = vmatmul.mubr.bf16.vlgmr.msra.gmra.mxu0 %v1374_v3  ;;  %800 = vmatmul.mubr.bf16.vlgmr.msra.gmra.mxu1 %v1377_v4 }
  0x78   : > { %710 = vmatprep.mubr.bf16.mxu0 %v1380_v5  ;;  %809 = vmatprep.mubr.bf16.mxu1 %v1382_v6 }
  0x7f   : > { %711 = vmatmul.mubr.bf16.gmra.mxu0 %v1384_v7  ;;  %810 = vmatmul.mubr.bf16.gmra.mxu1 %v1385_v8 }
  0x80   : > { %720 = vmatprep.mubr.bf16.mxu0 %v1386_v9  ;;  %819 = vmatprep.mubr.bf16.mxu1 %v1388_v10 }
  0x87   : > { %721 = vmatmul.mubr.bf16.gmra.mxu0 %v1390_v11  ;;  %820 = vmatmul.mubr.bf16.gmra.mxu1 %v1391_v12 }
 0x137   : > { %v702_v13 = vpop.f32.mrf.mxu0  ;;  %v801_v14 = vpop.f32.mrf.mxu1 }
 0x138   : > { %v896_v20 = vmul.f32 %v801_v14, %v801_v14  ;;  %v830_v28 = vmul.f32 %v702_v13, %v702_v13 }
 0x139   : > { %v704_v15 = vpop.f32.mrf.mxu0  ;;  %v803_v16 = vpop.f32.mrf.mxu1 }
 0x13a   : > { %v902_v17 = vmul.f32 %v803_v16, %v803_v16  ;;  %v836_v29 = vmul.f32 %v704_v15, %v704_v15 }
 0x13b   : > { %v706_v18 = vpop.f32.mrf.mxu0  ;;  %v805_v19 = vpop.f32.mrf.mxu1 }
 0x13c   : > { %v908_v23 = vadd.f32 %v902_v17, %v896_v20  ;;  %v897_v27 = vmul.f32 %v805_v19, %v805_v19  ;;  %v831_v33 = vmul.f32 %v706_v18, %v706_v18  ;;  %v842_v43 = vadd.f32 %v836_v29, %v830_v28 }
 0x13d   : > { %v708_v21 = vpop.f32.mrf.mxu0  ;;  %v807_v22 = vpop.f32.mrf.mxu1 }
 0x13e   : > { %v903_v24 = vmul.f32 %v807_v22, %v807_v22  ;;  %v1709_v32 = vadd.f32 1e-24, %v908_v23  ;;  %v837_v34 = vmul.f32 %v708_v21, %v708_v21  ;;  %v1717_v55 = vadd.f32 1e-24, %v842_v43 }
 0x13f   : > { %v712_v25 = vpop.f32.mrf.mxu0  ;;  %v811_v26 = vpop.f32.mrf.mxu1 }
 0x140   : > { %v909_v35 = vadd.f32 %v903_v24, %v897_v27  ;;  %v832_v36 = vmul.f32 %v712_v25, %v712_v25  ;;  %v898_v37 = vmul.f32 %v811_v26, %v811_v26  ;;  %1392 = vrsqrt.f32 %v1709_v32 }
 0x141   : > { %v714_v30 = vpop.f32.mrf.mxu0  ;;  %v813_v31 = vpop.f32.mrf.mxu1  ;;  %v843_v47 = vadd.f32 %v837_v34, %v831_v33  ;;  %vm856_vm1 = vcmp.eq.f32.partialorder %v1717_v55, inf  ;;  %v859_v21 = vand.u32 2147483648, %v1717_v55  ;;  %vm922_vm2 = vcmp.eq.f32.partialorder %v1709_v32, inf }
 0x142   : > { %v838_v38 = vmul.f32 %v714_v30, %v714_v30  ;;  %v904_v39 = vmul.f32 %v813_v31, %v813_v31  ;;  %v1711_v42 = vadd.f32 1e-24, %v909_v35  ;;  %vm924_vm3 = vcmp.eq.f32.partialorder %v1709_v32, 0.0 }
 0x143   : > { %v716_v40 = vpop.f32.mrf.mxu0  ;;  %v815_v41 = vpop.f32.mrf.mxu1  ;;  %v1719_v58 = vadd.f32 1e-24, %v843_v47  ;;  %v925_v26 = vand.u32 2147483648, %v1709_v32  ;;  %vm858_vm6 = vcmp.eq.f32.partialorder %v1717_v55, 0.0 }
 0x144   : > { %v910_v44 = vadd.f32 %v904_v39, %v898_v37  ;;  %1394 = vrsqrt.f32 %v1711_v42  ;;  %v844_v48 = vadd.f32 %v838_v38, %v832_v36  ;;  %v833_v52 = vmul.f32 %v716_v40, %v716_v40 }
 0x145   : > { %v718_v45 = vpop.f32.mrf.mxu0  ;;  %v817_v46 = vpop.f32.mrf.mxu1  ;;  %v899_v59 = vmul.f32 %v815_v41, %v815_v41  ;;  %vm929_vm0 = vcmp.eq.f32.partialorder %v1711_v42, inf  ;;  %v932_v27 = vand.u32 2147483648, %v1711_v42  ;;  %vm931_vm4 = vcmp.eq.f32.partialorder %v1711_v42, 0.0 }
 0x146   : > { %v1715_v51 = vadd.f32 1e-24, %v910_v44  ;;  %v839_v53 = vmul.f32 %v718_v45, %v718_v45  ;;  %v905_v54 = vmul.f32 %v817_v46, %v817_v46  ;;  %v1721_v60 = vadd.f32 1e-24, %v844_v48 }
 0x147   : > { %v722_v49 = vpop.f32.mrf.mxu0  ;;  %v821_v50 = vpop.f32.mrf.mxu1  ;;  %vm863_vm7 = vcmp.eq.f32.partialorder %v1719_v58, inf  ;;  %vm865_vm8 = vcmp.eq.f32.partialorder %v1719_v58, 0.0  ;;  %v866_v36 = vand.u32 2147483648, %v1719_v58 }
 0x148   : > { %1396 = vrsqrt.f32 %v1715_v51  ;;  %v834_v61 = vmul.f32 %v722_v49, %v722_v49  ;;  %v845_v62 = vadd.f32 %v839_v53, %v833_v52  ;;  %v911_v63 = vadd.f32 %v905_v54, %v899_v59 }
 0x149   : > { %v724_v56 = vpop.f32.mrf.mxu0  ;;  %v823_v57 = vpop.f32.mrf.mxu1  ;;  %1398 = vrsqrt.f32 %v1717_v55  ;;  %v900_v4 = vmul.f32 %v821_v50, %v821_v50  ;;  %vm936_vm5 = vcmp.eq.f32.partialorder %v1715_v51, inf  ;;  %v939_v37 = vand.u32 2147483648, %v1715_v51 }
 0x14a   : > { %v840_v0 = vmul.f32 %v724_v56, %v724_v56  ;;  %v906_v1 = vmul.f32 %v823_v57, %v823_v57  ;;  %1400 = vrsqrt.f32 %v1719_v58  ;;  %v1726_v3 = vadd.f32 1e-24, %v911_v63 }
 0x14b   : > { %v726_v2 = vpop.f32.mrf.mxu0  ;;  %v1728_v5 = vadd.f32 1e-24, %v845_v62  ;;  %1402 = vrsqrt.f32 %v1721_v60  ;;  %v825_v9 = vpop.f32.mrf.mxu1  ;;  %vm938_vm9 = vcmp.eq.f32.partialorder %v1715_v51, 0.0  ;;  %vm870_vm10 = vcmp.eq.f32.partialorder %v1721_v60, inf }
 0x14c   : > { %v846_v6 = vadd.f32 %v840_v0, %v834_v61  ;;  %v912_v7 = vadd.f32 %v906_v1, %v900_v4  ;;  %1404 = vrsqrt.f32 %v1726_v3  ;;  %v835_v14 = vmul.f32 %v726_v2, %v726_v2 }
 0x14d   : > { %v728_v8 = vpop.f32.mrf.mxu0  ;;  %v1393_v10 = vpop.eup %1392  ;;  %1406 = vrsqrt.f32 %v1728_v5  ;;  %v901_v30 = vmul.f32 %v825_v9, %v825_v9  ;;  %vm943_vm11 = vcmp.eq.f32.partialorder %v1726_v3, inf  ;;  %vm945_vm12 = vcmp.eq.f32.partialorder %v1726_v3, 0.0 }
 0x14e   : > { %v1733_v12 = vadd.f32 1e-24, %v846_v6  ;;  %v1735_v13 = vadd.f32 1e-24, %v912_v7  ;;  %v841_v15 = vmul.f32 %v728_v8, %v728_v8  ;;  %v827_v17 = vpop.f32.mrf.mxu1  ;;  %v921_v18 = vmul.f32 %v1393_v10, %v1709_v32 }
 0x14f   : > { %v907_v24 = vmul.f32 %v827_v17, %v827_v17  ;;  %vm872_vm13 = vcmp.eq.f32.partialorder %v1721_v60, 0.0  ;;  %v873_v59 = vand.u32 2147483648, %v1721_v60  ;;  %vm877_vm14 = vcmp.eq.f32.partialorder %v1728_v5, inf }
 0x150   : > { %1408 = vrsqrt.f32 %v1733_v12  ;;  %v847_v20 = vadd.f32 %v841_v15, %v835_v14  ;;  %v923_v29 = vsel %vm922_vm2, %v1709_v32, %v921_v18  ;;  %v946_v32 = vand.u32 2147483648, %v1726_v3 }
 0x151   : > { %v1395_v11 = vpop.eup %1394  ;;  %1410 = vrsqrt.f32 %v1735_v13  ;;  %v913_v38 = vadd.f32 %v907_v24, %v901_v30  ;;  %v1766_v41 = vsel %vm924_vm3, %v925_v26, %v923_v29  ;;  %vm879_vm15 = vcmp.eq.f32.partialorder %v1728_v5, 0.0 }
 0x152   : > { %v928_v16 = vmul.f32 %v1395_v11, %v1711_v42  ;;  %v1758_v34 = vadd.f32 1e-24, %v847_v20  ;;  %v980_v47 = vmul.f32 32768.0, %v1766_v41  ;;  %vm884_vm2 = vcmp.eq.f32.partialorder %v1733_v12, inf }
 0x153   : > { %v1782_v50 = vadd.f32 1e-24, %v913_v38  ;;  %v887_v20 = vand.u32 2147483648, %v1733_v12  ;;  %vm886_vm3 = vcmp.eq.f32.partialorder %v1733_v12, 0.0 }
 0x154   : > { %v930_v22 = vsel %vm929_vm0, %v1711_v42, %v928_v16  ;;  %1412 = vrsqrt.f32 %v1758_v34  ;;  %v986_v1 = vadd.f32 1e-06, %v980_v47  ;;  %vm950_vm0 = vcmp.eq.f32.partialorder %v1735_v13, inf }
 0x155   : > { %v1397_v19 = vpop.eup %1396  ;;  %v1755_v31 = vsel %vm931_vm4, %v932_v27, %v930_v22  ;;  %1414 = vrsqrt.f32 %v1782_v50  ;;  %v1057_v27 = vmul.f32 %v1766_v41, %v1766_v41  ;;  %vm891_vm4 = vcmp.eq.f32.partialorder %v1758_v34, inf }
 0x156   : > { %v935_v23 = vmul.f32 %v1397_v19, %v1715_v51  ;;  %v1399_v25 = vpop.eup %1398  ;;  %v981_v43 = vmul.f32 32768.0, %v1755_v31 }
 0x157   : > { %v1401_v28 = vpop.eup %1400  ;;  %v855_v40 = vmul.f32 %v1399_v25, %v1717_v55 }
 0x158   : > { %v937_v33 = vsel %vm936_vm5, %v1715_v51, %v935_v23  ;;  %v1403_v35 = vpop.eup %1402  ;;  %v862_v42 = vmul.f32 %v1401_v28, %v1719_v58  ;;  %v987_v57 = vadd.f32 1e-06, %v981_v43  ;;  %vm893_vm5 = vcmp.eq.f32.partialorder %v1758_v34, 0.0 }
 0x159   : > { %v1405_v39 = vpop.eup %1404  ;;  %v1771_v44 = vsel %vm938_vm9, %v939_v37, %v937_v33  ;;  %v869_v48 = vmul.f32 %v1403_v35, %v1721_v60  ;;  %v857_v51 = vsel %vm856_vm1, %v1717_v55, %v855_v40  ;;  %v953_v55 = vand.u32 2147483648, %v1735_v13 }
 0x15a   : > { %v942_v45 = vmul.f32 %v1405_v39, %v1726_v3  ;;  %v1407_v46 = vpop.eup %1406  ;;  %v982_v52 = vmul.f32 32768.0, %v1771_v44  ;;  %v864_v56 = vsel %vm863_vm7, %v1719_v58, %v862_v42  ;;  %v860_v0 = vsel %vm858_vm6, %v859_v21, %v857_v51 }
 0x15b   : > { %v876_v61 = vmul.f32 %v1407_v46, %v1728_v5  ;;  %v871_v2 = vsel %vm870_vm10, %v1721_v60, %v869_v48  ;;  %v867_v4 = vsel %vm865_vm8, %v866_v36, %v864_v56  ;;  %1416 = vrcp.f32 %v987_v57 }
 0x15c   : > { %v944_v49 = vsel %vm943_vm11, %v1726_v3, %v942_v45  ;;  %v880_v3 = vand.u32 2147483648, %v1728_v5  ;;  %v988_v6 = vadd.f32 1e-06, %v982_v52  ;;  %v874_v10 = vsel %vm872_vm13, %v873_v59, %v871_v2 }
 0x15d   : > { %v947_v53 = vsel %vm945_vm12, %v946_v32, %v944_v49  ;;  %v1409_v54 = vpop.eup %1408  ;;  %v878_v9 = vsel %vm877_vm14, %v1728_v5, %v876_v61  ;;  %vm952_vm1 = vcmp.eq.f32.partialorder %v1735_v13, 0.0  ;;  %1418 = vrcp.f32 %v986_v1 }
 0x15e   : > { %v983_v62 = vmul.f32 32768.0, %v947_v53  ;;  %v1411_v63 = vpop.eup %1410  ;;  %v883_v7 = vmul.f32 %v1409_v54, %v1733_v12  ;;  %v963_v58 = vsub.f32 %v867_v4, %v1755_v31  ;;  %1420 = vrcp.f32 %v988_v6 }
 0x15f   : > { %v949_v8 = vmul.f32 %v1411_v63, %v1735_v13  ;;  %v881_v16 = vsel %vm879_vm15, %v880_v3, %v878_v9  ;;  %v962_v60 = vsub.f32 %v860_v0, %v1766_v41  ;;  %v964_v19 = vsub.f32 %v874_v10, %v1771_v44 }
 0x160   : > { %v989_v11 = vadd.f32 1e-06, %v983_v62  ;;  %v885_v17 = vsel %vm884_vm2, %v1733_v12, %v883_v7  ;;  %v1058_v21 = vmul.f32 %v1755_v31, %v1755_v31  ;;  %v1024_v23 = vmul.f32 %v963_v58, %v963_v58 }
 0x161   : > { %v951_v14 = vsel %vm950_vm0, %v1735_v13, %v949_v8  ;;  %v1413_v13 = vpop.eup %1412  ;;  %v965_v5 = vsub.f32 %v881_v16, %v947_v53  ;;  %v888_v24 = vsel %vm886_vm3, %v887_v20, %v885_v17  ;;  %v968_v26 = vmul.f32 32768.0, %v860_v0 }
 0x162   : > { %v954_v15 = vsel %vm952_vm1, %v953_v55, %v951_v14  ;;  %1422 = vrcp.f32 %v989_v11  ;;  %v890_v25 = vmul.f32 %v1413_v13, %v1758_v34  ;;  %v1059_v28 = vmul.f32 %v1771_v44, %v1771_v44  ;;  %v1415_v37 = vpop.eup %1414 }
 0x163   : > { %v984_v18 = vmul.f32 32768.0, %v954_v15  ;;  %v1023_v29 = vmul.f32 %v962_v60, %v962_v60  ;;  %v969_v30 = vmul.f32 32768.0, %v867_v4  ;;  %v1025_v31 = vmul.f32 %v964_v19, %v964_v19 }
 0x164   : > { %v1063_v12 = vadd.f32 %v1058_v21, %v1057_v27  ;;  %v1060_v33 = vmul.f32 %v947_v53, %v947_v53  ;;  %v966_v35 = vsub.f32 %v888_v24, %v954_v15  ;;  %v892_v36 = vsel %vm891_vm4, %v1758_v34, %v890_v25  ;;  %v1022_v27 = vld [vmem:[#allocation2] sm:$0x1] }
 0x165   : > { %v990_v22 = vadd.f32 1e-06, %v984_v18  ;;  %v1029_v38 = vadd.f32 %v1024_v23, %v1023_v29  ;;  %v970_v39 = vmul.f32 32768.0, %v874_v10  ;;  %v1026_v40 = vmul.f32 %v965_v5, %v965_v5 }
 0x166   : > { %v894_v41 = vand.u32 2147483648, %v1758_v34  ;;  %v1064_v42 = vadd.f32 %v1063_v12, %v1059_v28  ;;  %v1061_v43 = vmul.f32 %v954_v15, %v954_v15  ;;  %v956_v44 = vmul.f32 %v1415_v37, %v1782_v50 }
 0x167   : > { %1424 = vrcp.f32 %v990_v22  ;;  %v1030_v45 = vadd.f32 %v1029_v38, %v1025_v31  ;;  %vm957_vm6 = vcmp.eq.f32.partialorder %v1782_v50, inf  ;;  %v960_v32 = vand.u32 2147483648, %v1782_v50 }
 0x168   : > { %v895_v46 = vsel %vm893_vm5, %v894_v41, %v892_v36  ;;  %v1417_v47 = vpop.eup %1416  ;;  %v1065_v48 = vadd.f32 %v1064_v42, %v1060_v33  ;;  %v1027_v49 = vmul.f32 %v966_v35, %v966_v35  ;;  %v958_v51 = vsel %vm957_vm6, %v1782_v50, %v956_v44 }
 0x169   : > { %vm959_vm7 = vcmp.eq.f32.partialorder %v1782_v50, 0.0  ;;  %v975_v52 = vadd.f32 1e-06, %v969_v30  ;;  %v971_v53 = vmul.f32 32768.0, %v881_v16  ;;  %v1031_v54 = vadd.f32 %v1030_v45, %v1026_v40 }
 0x16a   : > { %v961_v56 = vsel %vm959_vm7, %v960_v32, %v958_v51  ;;  %v1419_v34 = vpop.eup %1418  ;;  %v1066_v57 = vadd.f32 %v1065_v48, %v1061_v43  ;;  %v974_v0 = vadd.f32 1e-06, %v968_v26  ;;  %v976_v2 = vadd.f32 1e-06, %v970_v39 }
 0x16b   : > { %v967_v59 = vsub.f32 %v895_v46, %v961_v56  ;;  %v985_v61 = vmul.f32 32768.0, %v961_v56  ;;  %v1062_v62 = vmul.f32 %v961_v56, %v961_v56  ;;  %v1421_v63 = vpop.eup %1420  ;;  %v995_v1 = vmul.f32 %v1417_v47, %v975_v52 }
 0x16c   : > { %v972_v3 = vmul.f32 32768.0, %v888_v24  ;;  %v1032_v4 = vadd.f32 %v1031_v54, %v1027_v49  ;;  %v993_v50 = vmul.f32 %v1419_v34, %v974_v0  ;;  %v977_v55 = vadd.f32 1e-06, %v971_v53  ;;  %v1056_v24 = vld [vmem:[#allocation2 + $0x2] sm:$0x1] }
 0x16d   : > { %v991_v6 = vadd.f32 1e-06, %v985_v61  ;;  %v1028_v7 = vmul.f32 %v967_v59, %v967_v59  ;;  %v1067_v8 = vadd.f32 %v1066_v57, %v1062_v62  ;;  %v997_v10 = vmul.f32 %v1421_v63, %v976_v2 }
 0x16e   : > { %v978_v15 = vadd.f32 1e-06, %v972_v3  ;;  %v973_v22 = vmul.f32 32768.0, %v895_v46 }
 0x16f   : > { %v1423_v9 = vpop.eup %1422  ;;  %1426 = vrcp.f32 %v991_v6  ;;  %v1033_v11 = vadd.f32 %v1032_v4, %v1028_v7  ;;  %v1068_v14 = vrot.slane %v1067_v8, 4 }
 0x170   : > { %1428 = vlog2.f32 %v995_v1  ;;  %v999_v16 = vmul.f32 %v1423_v9, %v977_v55  ;;  %v979_v28 = vadd.f32 1e-06, %v973_v22  ;;  %v1042_v1 = vld [vmem:[#allocation2 + $0x1] sm:$0x1] }
 0x171   : > { %v1034_v17 = vrot.slane %v1033_v11, 4  ;;  %v1069_v18 = vadd.f32 %v1068_v14, %v1067_v8  ;;  %1430 = vlog2.f32 %v993_v50 }
 0x172   : > { %1432 = vlog2.f32 %v997_v10 }
 0x173   : > { %v1035_v19 = vadd.f32 %v1034_v17, %v1033_v11  ;;  %v1070_v20 = vrot.slane %v1069_v18, 2  ;;  %1434 = vlog2.f32 %v999_v16 }
 0x174   : > { %v1425_v58 = vpop.eup %1424 }
 0x175   : > { %v1001_v60 = vmul.f32 %v1425_v58, %v978_v15  ;;  %v1036_v13 = vrot.slane %v1035_v19, 2  ;;  %v1071_v21 = vadd.f32 %v1070_v20, %v1069_v18 }
 0x177   : > { %1436 = vlog2.f32 %v1001_v60  ;;  %v1037_v23 = vadd.f32 %v1036_v13, %v1035_v19  ;;  %v1072_v5 = vrot.slane %v1071_v21, 1 }
 0x179   : > { %v1038_v25 = vrot.slane %v1037_v23, 1  ;;  %v1073_v26 = vadd.f32 %v1072_v5, %v1071_v21 }
 0x17b   : > { %v1039_v29 = vadd.f32 %v1038_v25, %v1037_v23  ;;  %v1074_v30 = vadd.f32 %v1073_v26, %v1056_v24 }
 0x17c   : > { %v1427_v31 = vpop.eup %1426 }
 0x17d   : > { %v1003_v12 = vmul.f32 %v1427_v31, %v979_v28  ;;  %v1040_v33 = vadd.f32 %v1039_v29, %v1022_v27  ;;  %1075 = vst [vmem:[#allocation2 + $0x2] sm:$0x1] %v1074_v30  ;;  %v1429_v35 = vpop.eup %1428 }
 0x17e   : > { %v1431_v36 = vpop.eup %1430  ;;  %v1007_v38 = vmul.f32 0.6931472, %v1429_v35 }
 0x17f   : > { %1438 = vlog2.f32 %v1003_v12  ;;  %1041 = vst [vmem:[#allocation2] sm:$0x1] %v1040_v33  ;;  %v1433_v37 = vpop.eup %1432  ;;  %v1005_v40 = vmul.f32 0.6931472, %v1431_v36 }
 0x180   : > { %v1435_v39 = vpop.eup %1434  ;;  %v1009_v41 = vmul.f32 0.6931472, %v1433_v37  ;;  %v1017_v43 = vand.u32 2147483647, %v1007_v38 }
 0x181   : > { %v1011_v44 = vmul.f32 0.6931472, %v1435_v39  ;;  %v1016_v45 = vand.u32 2147483647, %v1005_v40 }
 0x182   : > { %v1018_v46 = vand.u32 2147483647, %v1009_v41 }
 0x183   : > { %v1043_v47 = vadd.f32 %v1017_v43, %v1016_v45  ;;  %v1019_v48 = vand.u32 2147483647, %v1011_v44 }
 0x184   : > { %v1437_v42 = vpop.eup %1436 }
 0x185   : > { %v1013_v32 = vmul.f32 0.6931472, %v1437_v42  ;;  %v1044_v49 = vadd.f32 %v1043_v47, %v1018_v46 }
 0x187   : > { %v1020_v51 = vand.u32 2147483647, %v1013_v32  ;;  %v1045_v53 = vadd.f32 %v1044_v49, %v1019_v48 }
 0x189   : > { %v1046_v56 = vadd.f32 %v1045_v53, %v1020_v51 }
 0x18c   : > { %v1439_v52 = vpop.eup %1438 }
 0x18d   : > { %v1015_v54 = vmul.f32 0.6931472, %v1439_v52 }
 0x18f   : > { %v1021_v34 = vand.u32 2147483647, %v1015_v54 }
 0x191   : > { %v1047_v57 = vadd.f32 %v1046_v56, %v1021_v34 }
 0x193   : > { %v1048_v59 = vrot.slane %v1047_v57, 4 }
 0x195   : > { %v1049_v61 = vadd.f32 %v1048_v59, %v1047_v57 }
 0x197   : > { %v1050_v62 = vrot.slane %v1049_v61, 2 }
 0x199   : > { %v1051_v63 = vadd.f32 %v1050_v62, %v1049_v61 }
 0x19b   : > { %v1052_v0 = vrot.slane %v1051_v63, 1 }
 0x19d   : > { %v1053_v2 = vadd.f32 %v1052_v0, %v1051_v63  ;;  %1079 = sbr.rel (%p1264_p12) target bundleno = 426 (0x1aa), region = 78 }
 0x19f   : > { %v1054_v3 = vadd.f32 %v1053_v2, %v1042_v1 }
 0x1a1   : > { %1055 = vst [vmem:[#allocation2 + $0x1] sm:$0x1] %v1054_v3 }
 0x1a8   : > { %v1080_v4 = vld [vmem:[#allocation2] sm:$0xff] }
 0x1a9   : > { %1081 = vst [vmem:[%s1650_s10] sm:$0xff] %v1080_v4 }
 0x1aa PF: > { %s13_s18 = sadd.s32 1, %s1494_s18   ;;  %s1866_s12 = smov %s1474_s13 }
 0x1ab   : > { %p10_p13 = scmp.ge.s32.totalorder %s13_s18, 6   ;;  %s1867_s13 = smov %s1566_s23 }
 0x1ac   : > { %s1868_s14 = smov %s1486_s16  ;;  %s1869_s15 = smov %s1490_s17 }
 0x1ad   : > { %s1870_s16 = smov %s1873_s19  ;;  %s1871_s17 = smov %s1877_s20 }
 0x1ae   :  { %12 = sbr.rel (!%p10_p13) target bundleno = 4 (0x4), region = 119 }

// kernel: calc_convergence_loss.7
= control target key start
LH: loop header
LB: loop body
LE: loop exit
PB: predicated region body
PF: predicated region fallthrough
CT: control target
= control target key end

     0   :  { %s1355_s12 = smov 0   ;;  %s1357_s13 = smov 0   ;;  %s1734_s0 = inlined_call_operand.vmem [shape: bf16[2,80,128], index: 0, kind: input, shape index: {}]   ;;  %s1735_s1 = inlined_call_operand.vmem [shape: bf16[2,80,128], index: 1, kind: input, shape index: {}]   ;;  %s1736_s2 = inlined_call_operand.vmem [shape: bf16[128,256], index: 2, kind: input, shape index: {}]   ;;  %s1737_s3 = inlined_call_operand.vmem [shape: f32[2,1,8,128], index: 3, kind: output, shape index: {}]  }
   0x1   :  { %s1359_s14 = smov 0  }
   0x2 LB: > { %s32_s15 = sadd.s32 1, %s1327_s13  ;;  %p1136_p0 = scmp.ge.s32.totalorder %s1331_s14, 1  ;;  %s1331_s14 = sphi %s1359_s14, %s13_s14   ;;  %s1327_s13 = sphi %s1357_s13, %s1739_s13   ;;  %s1323_s12 = sphi %s1355_s12, %s1738_s12  }
   0x3   : > { %p34_p1 = scmp.ge.s32.totalorder %s32_s15, 2  ;;  %p193_p2 = scmp.lt.s32.totalorder %s1331_s14, 3 }
   0x5   : > { %s1741_s15 = smov (%p34_p1, %s32_s15), 0  ;;  %p194_p3 = pnand %p1136_p0, %p193_p2 }
   0x6   : > { %p238_p4 = scmp.lt.s32.totalorder (!%p194_p3), %s1323_s12, 1 }
   0x7   : > { %197 = sbr.rel (%p194_p3) target bundleno = 385 (0x181), region = 32 }
   0xc   : > { %v1195_v0 = vld [vmem:[%s1736_s2 + $0x74] ss:$8 sps:$4 sm:$0xff]   ;;  %v1197_v1 = vld [vmem:[%s1736_s2 + $0x70] ss:$8 sps:$4 sm:$0xff]   ;;  %v1333_v2 = vmov 0   ;;  %s1743_s12 = smov (!%p238_p4, %s1323_s12), 1 }
   0xd   : > { %444 = vmatprep.mubr.bf16.mxu0 %v1333_v2  ;;  %567 = vmatprep.mubr.bf16.mxu1 %v1333_v2  ;;  %v1198_v3 = vld [vmem:[%s1736_s2 + $0x64] ss:$8 sps:$4 sm:$0xff]   ;;  %v1200_v4 = vld [vmem:[%s1736_s2 + $0x60] ss:$8 sps:$4 sm:$0xff]   ;;  %v1201_v5 = vld [vmem:[%s1736_s2 + $0x54] ss:$8 sps:$4 sm:$0xff]  }
   0xe   : > { %412 = vmatprep.subr.bf16.mxu0 %v1195_v0  ;;  %535 = vmatprep.subr.bf16.mxu1 %v1195_v0  ;;  %s1168_s26 = smul.u32 40, %s1743_s12  ;;  %v1203_v6 = vld [vmem:[%s1736_s2 + $0x50] ss:$8 sps:$4 sm:$0xff]   ;;  %v1204_v7 = vld [vmem:[%s1736_s2 + $0x44] ss:$8 sps:$4 sm:$0xff]   ;;  %v1334_v27 = vmov 0.0  }
   0xf   : > { %413 = vmatpush1.bf16.msra.mxu0 %v1197_v1  ;;  %536 = vmatpush1.bf16.msra.mxu1 %v1197_v1  ;;  %v1206_v8 = vld [vmem:[%s1736_s2 + $0x40] ss:$8 sps:$4 sm:$0xff]   ;;  %v1207_v9 = vld [vmem:[%s1736_s2 + $0x34] ss:$8 sps:$4 sm:$0xff]   ;;  %v1209_v10 = vld [vmem:[%s1736_s2 + $0x30] ss:$8 sps:$4 sm:$0xff]  }
  0x10   : > { %414 = vmatprep.subr.bf16.mxu0 %v1198_v3  ;;  %537 = vmatprep.subr.bf16.mxu1 %v1198_v3  ;;  %s1402_s6 = scalar_lea.vmem %s1734_s0, %s1168_s26  ;;  %s1407_s9 = scalar_lea.vmem %s1735_s1, %s1168_s26  ;;  %v1210_v11 = vld [vmem:[%s1736_s2 + $0x24] ss:$8 sps:$4 sm:$0xff]   ;;  %v1212_v12 = vld [vmem:[%s1736_s2 + $0x20] ss:$8 sps:$4 sm:$0xff]   ;;  %v1213_v13 = vld [vmem:[%s1736_s2 + $0x14] ss:$8 sps:$4 sm:$0xff]  }
  0x11   : > { %v1215_v14 = vld [vmem:[%s1736_s2 + $0x10] ss:$8 sps:$4 sm:$0xff]   ;;  %v1216_v15 = vld [vmem:[%s1736_s2 + $0x4] ss:$8 sps:$4 sm:$0xff]   ;;  %v1218_v16 = vld [vmem:[%s1736_s2] ss:$8 sps:$4 sm:$0xff]  }
  0x12   : > { %v1219_v17 = vld [vmem:[%s1402_s6] sm:$0xff]   ;;  %v1221_v19 = vld [vmem:[%s1402_s6 + $0x8] sm:$0xff]   ;;  %v1223_v21 = vld [vmem:[%s1402_s6 + $0x10] sm:$0xff]   ;;  %275 = vst [vmem:[#allocation2] sm:$0xff] %v1334_v27  ;;  %s1139_s5 = sshll.u32 %s1743_s12, 3 }
  0x13   : > { %415 = vmatpush1.bf16.msra.mxu0 %v1200_v4  ;;  %538 = vmatpush1.bf16.msra.mxu1 %v1200_v4  ;;  %v1220_v18 = vld [vmem:[%s1407_s9] sm:$0xff]   ;;  %v1222_v20 = vld [vmem:[%s1407_s9 + $0x8] sm:$0xff]   ;;  %v1224_v22 = vld [vmem:[%s1407_s9 + $0x10] sm:$0xff]   ;;  %s269_s8 = scalar_lea.vmem %s1737_s3, %s1139_s5 }
  0x14   : > { %416 = vmatprep.subr.bf16.mxu0 %v1201_v5  ;;  %539 = vmatprep.subr.bf16.mxu1 %v1201_v5  ;;  %v1225_v23 = vld [vmem:[%s1402_s6 + $0x18] sm:$0xff]   ;;  %v1227_v25 = vld [vmem:[%s1402_s6 + $0x20] sm:$0xff]  }
  0x15   : > { %v1226_v24 = vld [vmem:[%s1407_s9 + $0x18] sm:$0xff]   ;;  %v1228_v26 = vld [vmem:[%s1407_s9 + $0x20] sm:$0xff]  }
  0x17   : > { %417 = vmatpush1.bf16.msra.mxu0 %v1203_v6  ;;  %540 = vmatpush1.bf16.msra.mxu1 %v1203_v6 }
  0x18   : > { %418 = vmatprep.subr.bf16.mxu0 %v1204_v7  ;;  %541 = vmatprep.subr.bf16.mxu1 %v1204_v7 }
  0x1b   : > { %419 = vmatpush1.bf16.msra.mxu0 %v1206_v8  ;;  %542 = vmatpush1.bf16.msra.mxu1 %v1206_v8 }
  0x1c   : > { %420 = vmatprep.subr.bf16.mxu0 %v1207_v9  ;;  %543 = vmatprep.subr.bf16.mxu1 %v1207_v9 }
  0x1f   : > { %421 = vmatpush1.bf16.msra.mxu0 %v1209_v10  ;;  %544 = vmatpush1.bf16.msra.mxu1 %v1209_v10 }
  0x20   : > { %422 = vmatprep.subr.bf16.mxu0 %v1210_v11  ;;  %545 = vmatprep.subr.bf16.mxu1 %v1210_v11 }
  0x23   : > { %423 = vmatpush1.bf16.msra.mxu0 %v1212_v12  ;;  %546 = vmatpush1.bf16.msra.mxu1 %v1212_v12 }
  0x24   : > { %424 = vmatprep.subr.bf16.mxu0 %v1213_v13  ;;  %547 = vmatprep.subr.bf16.mxu1 %v1213_v13 }
  0x27   : > { %425 = vmatpush1.bf16.msra.mxu0 %v1215_v14  ;;  %548 = vmatpush1.bf16.msra.mxu1 %v1215_v14 }
  0x28   : > { %426 = vmatprep.subr.bf16.mxu0 %v1216_v15  ;;  %549 = vmatprep.subr.bf16.mxu1 %v1216_v15 }
  0x2b   : > { %427 = vmatpush1.bf16.msra.mxu0 %v1218_v16  ;;  %550 = vmatpush1.bf16.msra.mxu1 %v1218_v16 }
  0x2e   : > { %445 = vmatmul.mubr.bf16.vlgmr.msra.gmra.mxu0 %v1219_v17  ;;  %568 = vmatmul.mubr.bf16.vlgmr.msra.gmra.mxu1 %v1220_v18 }
  0x2f   : > { %454 = vmatprep.mubr.bf16.mxu0 %v1333_v2  ;;  %577 = vmatprep.mubr.bf16.mxu1 %v1333_v2 }
  0x36   : > { %455 = vmatmul.mubr.bf16.gmra.mxu0 %v1221_v19  ;;  %578 = vmatmul.mubr.bf16.gmra.mxu1 %v1222_v20 }
  0x37   : > { %464 = vmatprep.mubr.bf16.mxu0 %v1333_v2  ;;  %587 = vmatprep.mubr.bf16.mxu1 %v1333_v2 }
  0x3e   : > { %465 = vmatmul.mubr.bf16.gmra.mxu0 %v1223_v21  ;;  %588 = vmatmul.mubr.bf16.gmra.mxu1 %v1224_v22 }
  0x3f   : > { %474 = vmatprep.mubr.bf16.mxu0 %v1333_v2  ;;  %597 = vmatprep.mubr.bf16.mxu1 %v1333_v2 }
  0x46   : > { %475 = vmatmul.mubr.bf16.gmra.mxu0 %v1225_v23  ;;  %598 = vmatmul.mubr.bf16.gmra.mxu1 %v1226_v24 }
  0x47   : > { %484 = vmatprep.mubr.bf16.mxu0 %v1333_v2  ;;  %607 = vmatprep.mubr.bf16.mxu1 %v1333_v2 }
  0x4e   : > { %485 = vmatmul.mubr.bf16.gmra.mxu0 %v1227_v25  ;;  %608 = vmatmul.mubr.bf16.gmra.mxu1 %v1228_v26 }
  0xee   : > { %v446_v28 = vpop.f32.mrf.mxu0  ;;  %v569_v29 = vpop.f32.mrf.mxu1 }
  0xef   : > { %v618_v39 = vmul.f32 %v446_v28, %v446_v28  ;;  %v728_v42 = vmul.f32 %v569_v29, %v569_v29 }
  0xf0   : > { %v448_v30 = vpop.f32.mrf.mxu0  ;;  %v571_v31 = vpop.f32.mrf.mxu1 }
  0xf1   : > { %v738_v38 = vmul.f32 %v571_v31, %v571_v31  ;;  %v628_v40 = vmul.f32 %v448_v30, %v448_v30 }
  0xf2   : > { %v450_v32 = vpop.f32.mrf.mxu0  ;;  %v573_v33 = vpop.f32.mrf.mxu1 }
  0xf3   : > { %v748_v45 = vadd.f32 %v738_v38, %v728_v42  ;;  %v638_v46 = vadd.f32 %v628_v40, %v618_v39  ;;  %v619_v47 = vmul.f32 %v450_v32, %v450_v32  ;;  %v729_v54 = vmul.f32 %v573_v33, %v573_v33 }
  0xf4   : > { %v452_v34 = vpop.f32.mrf.mxu0  ;;  %v575_v35 = vpop.f32.mrf.mxu1 }
  0xf5   : > { %v629_v48 = vmul.f32 %v452_v34, %v452_v34  ;;  %v739_v49 = vmul.f32 %v575_v35, %v575_v35  ;;  %v1454_v52 = vadd.f32 1e-24, %v748_v45  ;;  %v1456_v53 = vadd.f32 1e-24, %v638_v46 }
  0xf6   : > { %v456_v36 = vpop.f32.mrf.mxu0  ;;  %v579_v37 = vpop.f32.mrf.mxu1 }
  0xf7   : > { %v639_v55 = vadd.f32 %v629_v48, %v619_v47  ;;  %v749_v56 = vadd.f32 %v739_v49, %v729_v54  ;;  %1229 = vrsqrt.f32 %v1454_v52  ;;  %v620_v61 = vmul.f32 %v456_v36, %v456_v36 }
  0xf8   : > { %v458_v41 = vpop.f32.mrf.mxu0  ;;  %v581_v43 = vpop.f32.mrf.mxu1  ;;  %1231 = vrsqrt.f32 %v1456_v53  ;;  %v730_v63 = vmul.f32 %v579_v37, %v579_v37  ;;  %vm660_vm0 = vcmp.eq.f32.partialorder %v1456_v53, inf  ;;  %vm662_vm1 = vcmp.eq.f32.partialorder %v1456_v53, 0.0 }
  0xf9   : > { %v740_v59 = vmul.f32 %v581_v43, %v581_v43  ;;  %v1460_v60 = vadd.f32 1e-24, %v639_v55  ;;  %v630_v62 = vmul.f32 %v458_v41, %v458_v41  ;;  %v1462_v0 = vadd.f32 1e-24, %v749_v56 }
  0xfa   : > { %v460_v44 = vpop.f32.mrf.mxu0  ;;  %v583_v50 = vpop.f32.mrf.mxu1  ;;  %v663_v28 = vand.u32 2147483648, %v1456_v53  ;;  %vm770_vm2 = vcmp.eq.f32.partialorder %v1454_v52, inf  ;;  %vm772_vm3 = vcmp.eq.f32.partialorder %v1454_v52, 0.0  ;;  %v773_v30 = vand.u32 2147483648, %v1454_v52 }
  0xfb   : > { %v750_v3 = vadd.f32 %v740_v59, %v730_v63  ;;  %1233 = vrsqrt.f32 %v1460_v60  ;;  %v640_v4 = vadd.f32 %v630_v62, %v620_v61  ;;  %v621_v10 = vmul.f32 %v460_v44, %v460_v44 }
  0xfc   : > { %v462_v51 = vpop.f32.mrf.mxu0  ;;  %v585_v57 = vpop.f32.mrf.mxu1  ;;  %1235 = vrsqrt.f32 %v1462_v0  ;;  %v731_v11 = vmul.f32 %v583_v50, %v583_v50  ;;  %vm667_vm4 = vcmp.eq.f32.partialorder %v1460_v60, inf  ;;  %vm669_vm5 = vcmp.eq.f32.partialorder %v1460_v60, 0.0 }
  0xfd   : > { %v1468_v7 = vadd.f32 1e-24, %v750_v3  ;;  %v1470_v8 = vadd.f32 1e-24, %v640_v4  ;;  %v741_v9 = vmul.f32 %v585_v57, %v585_v57  ;;  %v631_v12 = vmul.f32 %v462_v51, %v462_v51 }
  0xfe   : > { %v466_v58 = vpop.f32.mrf.mxu0  ;;  %v589_v1 = vpop.f32.mrf.mxu1  ;;  %v670_v41 = vand.u32 2147483648, %v1460_v60  ;;  %vm777_vm6 = vcmp.eq.f32.partialorder %v1462_v0, inf  ;;  %vm779_vm7 = vcmp.eq.f32.partialorder %v1462_v0, 0.0  ;;  %v780_v49 = vand.u32 2147483648, %v1462_v0 }
  0xff   : > { %1237 = vrsqrt.f32 %v1468_v7  ;;  %v751_v16 = vadd.f32 %v741_v9, %v731_v11  ;;  %v641_v18 = vadd.f32 %v631_v12, %v621_v10  ;;  %v622_v19 = vmul.f32 %v466_v58, %v466_v58 }
 0x100   : > { %v468_v2 = vpop.f32.mrf.mxu0  ;;  %v591_v5 = vpop.f32.mrf.mxu1  ;;  %1239 = vrsqrt.f32 %v1470_v8  ;;  %v732_v29 = vmul.f32 %v589_v1, %v589_v1  ;;  %vm674_vm8 = vcmp.eq.f32.partialorder %v1470_v8, inf  ;;  %v677_v54 = vand.u32 2147483648, %v1470_v8 }
 0x101   : > { %v632_v20 = vmul.f32 %v468_v2, %v468_v2  ;;  %v742_v24 = vmul.f32 %v591_v5, %v591_v5  ;;  %v1479_v26 = vadd.f32 1e-24, %v751_v16  ;;  %v1486_v31 = vadd.f32 1e-24, %v641_v18 }
 0x102   : > { %v1466_v6 = vpop.f32.mrf.mxu0  ;;  %v593_v13 = vpop.f32.mrf.mxu1  ;;  %vm784_vm9 = vcmp.eq.f32.partialorder %v1468_v7, inf  ;;  %vm786_vm10 = vcmp.eq.f32.partialorder %v1468_v7, 0.0  ;;  %vm676_vm11 = vcmp.eq.f32.partialorder %v1470_v8, 0.0 }
 0x103   : > { %v642_v32 = vadd.f32 %v632_v20, %v622_v19  ;;  %v752_v37 = vadd.f32 %v742_v24, %v732_v29  ;;  %1241 = vrsqrt.f32 %v1479_v26  ;;  %v733_v42 = vmul.f32 %v593_v13, %v593_v13 }
 0x104   : > { %v472_v14 = vpop.f32.mrf.mxu0  ;;  %v1230_v15 = vpop.eup %1229  ;;  %1243 = vrsqrt.f32 %v1486_v31  ;;  %v623_v58 = vmul.f32 %v1466_v6, %v1466_v6  ;;  %v684_v5 = vand.u32 2147483648, %v1486_v31  ;;  %vm791_vm12 = vcmp.eq.f32.partialorder %v1479_v26, inf }
 0x105   : > { %v1232_v17 = vpop.eup %1231  ;;  %v595_v21 = vpop.f32.mrf.mxu1  ;;  %v769_v23 = vmul.f32 %v1230_v15, %v1454_v52  ;;  %v1505_v45 = vadd.f32 1e-24, %v642_v32  ;;  %v1511_v50 = vadd.f32 1e-24, %v752_v37  ;;  %v633_v59 = vmul.f32 %v472_v14, %v472_v14 }
 0x106   : > { %v1474_v22 = vpop.f32.mrf.mxu0  ;;  %v659_v25 = vmul.f32 %v1232_v17, %v1456_v53  ;;  %v743_v40 = vmul.f32 %v595_v21, %v595_v21  ;;  %v794_v17 = vand.u32 2147483648, %v1479_v26  ;;  %vm681_vm13 = vcmp.eq.f32.partialorder %v1486_v31, inf }
 0x107   : > { %v599_v33 = vpop.f32.mrf.mxu1  ;;  %v771_v36 = vsel %vm770_vm2, %v1454_v52, %v769_v23  ;;  %1245 = vrsqrt.f32 %v1505_v45  ;;  %v643_v15 = vadd.f32 %v633_v59, %v623_v58  ;;  %vm793_vm14 = vcmp.eq.f32.partialorder %v1479_v26, 0.0 }
 0x108   : > { %v1234_v27 = vpop.eup %1233  ;;  %v1488_v34 = vpop.f32.mrf.mxu0  ;;  %v661_v38 = vsel %vm660_vm0, %v1456_v53, %v659_v25  ;;  %v774_v43 = vsel %vm772_vm3, %v773_v30, %v771_v36  ;;  %v753_v55 = vadd.f32 %v743_v40, %v733_v42  ;;  %v787_v53 = vand.u32 2147483648, %v1468_v7 }
 0x109   : > { %v1236_v35 = vpop.eup %1235  ;;  %v666_v39 = vmul.f32 %v1234_v27, %v1460_v60  ;;  %v601_v46 = vpop.f32.mrf.mxu1  ;;  %v664_v48 = vsel %vm662_vm1, %v663_v28, %v661_v38  ;;  %v868_v57 = vmul.f32 32768.0, %v774_v43  ;;  %1247 = vrsqrt.f32 %v1511_v50 }
 0x10a   : > { %v776_v44 = vmul.f32 %v1236_v35, %v1462_v0  ;;  %v480_v47 = vpop.f32.mrf.mxu0  ;;  %v848_v61 = vmul.f32 32768.0, %v664_v48  ;;  %v838_v62 = vsub.f32 %v664_v48, %v774_v43  ;;  %v1533_v9 = vadd.f32 1e-24, %v753_v55 }
 0x10b   : > { %v668_v52 = vsel %vm667_vm4, %v1460_v60, %v666_v39  ;;  %v603_v1 = vpop.f32.mrf.mxu1  ;;  %v734_v10 = vmul.f32 %v599_v33, %v599_v33  ;;  %v744_v11 = vmul.f32 %v601_v46, %v601_v46  ;;  %v878_v12 = vadd.f32 1e-06, %v868_v57 }
 0x10c   : > { %v1238_v51 = vpop.eup %1237  ;;  %v778_v63 = vsel %vm777_vm6, %v1462_v0, %v776_v44  ;;  %v482_v2 = vpop.f32.mrf.mxu0  ;;  %v671_v3 = vsel %vm669_vm5, %v670_v41, %v668_v52  ;;  %v985_v13 = vmul.f32 %v774_v43, %v774_v43  ;;  %v1537_v60 = vadd.f32 1e-06, %v848_v61 }
 0x10d   : > { %v1240_v56 = vpop.eup %1239  ;;  %v783_v4 = vmul.f32 %v1238_v51, %v1468_v7  ;;  %v781_v14 = vsel %vm779_vm7, %v780_v49, %v778_v63  ;;  %v939_v16 = vmul.f32 %v838_v62, %v838_v62  ;;  %v754_v18 = vadd.f32 %v744_v11, %v734_v10  ;;  %v605_v19 = vpop.f32.mrf.mxu1 }
 0x10e   : > { %v673_v6 = vmul.f32 %v1240_v56, %v1470_v8  ;;  %v486_v20 = vpop.f32.mrf.mxu0  ;;  %v849_v21 = vmul.f32 32768.0, %v671_v3  ;;  %v624_v0 = vmul.f32 %v1474_v22, %v1474_v22  ;;  %v634_v24 = vmul.f32 %v1488_v34, %v1488_v34 }
 0x10f   : > { %v785_v23 = vsel %vm784_vm9, %v1468_v7, %v783_v4  ;;  %v869_v25 = vmul.f32 32768.0, %v781_v14  ;;  %1249 = vrsqrt.f32 %v1533_v9  ;;  %v1552_v28 = vadd.f32 1e-24, %v754_v18  ;;  %v609_v46 = vpop.f32.mrf.mxu1 }
 0x110   : > { %v675_v27 = vsel %vm674_vm8, %v1470_v8, %v673_v6  ;;  %v1242_v29 = vpop.eup %1241  ;;  %1251 = vrcp.f32 %v878_v12  ;;  %v839_v30 = vsub.f32 %v671_v3, %v781_v14  ;;  %v1555_v32 = vadd.f32 1e-24, %v643_v15  ;;  %v488_v37 = vpop.f32.mrf.mxu0 }
 0x111   : > { %v745_v22 = vmul.f32 %v605_v19, %v605_v19  ;;  %v986_v33 = vmul.f32 %v781_v14, %v781_v14  ;;  %v788_v34 = vsel %vm786_vm10, %v787_v53, %v785_v23  ;;  %v625_v35 = vmul.f32 %v480_v47, %v480_v47  ;;  %v1244_v38 = vpop.eup %1243 }
 0x112   : > { %v635_v36 = vmul.f32 %v482_v2, %v482_v2  ;;  %v678_v39 = vsel %vm676_vm11, %v677_v54, %v675_v27  ;;  %v644_v40 = vadd.f32 %v634_v24, %v624_v0  ;;  %1253 = vrsqrt.f32 %v1552_v28  ;;  %v490_v54 = vpop.f32.mrf.mxu0  ;;  %v611_v2 = vpop.f32.mrf.mxu1 }
 0x113   : > { %v735_v41 = vmul.f32 %v603_v1, %v603_v1  ;;  %v1563_v42 = vadd.f32 1e-06, %v849_v21  ;;  %v879_v43 = vadd.f32 1e-06, %v869_v25  ;;  %vm683_vm15 = vcmp.eq.f32.partialorder %v1486_v31, 0.0 }
 0x114   : > { %v790_v7 = vmul.f32 %v1242_v29, %v1479_v26  ;;  %v691_v44 = vand.u32 2147483648, %v1505_v45  ;;  %v940_v47 = vmul.f32 %v839_v30, %v839_v30  ;;  %v870_v48 = vmul.f32 32768.0, %v788_v34  ;;  %v1246_v55 = vpop.eup %1245  ;;  %v613_v23 = vpop.f32.mrf.mxu1 }
 0x115   : > { %1255 = vrsqrt.f32 %v1555_v32  ;;  %v755_v8 = vadd.f32 %v745_v22, %v735_v41  ;;  %v840_v49 = vsub.f32 %v678_v39, %v788_v34  ;;  %v680_v51 = vmul.f32 %v1244_v38, %v1486_v31 }
 0x116   : > { %vm798_vm0 = vcmp.eq.f32.partialorder %v1511_v50, inf  ;;  %v645_v52 = vadd.f32 %v635_v36, %v625_v35  ;;  %v995_v56 = vadd.f32 %v986_v33, %v985_v13  ;;  %v850_v57 = vmul.f32 32768.0, %v678_v39  ;;  %v1248_v59 = vpop.eup %1247  ;;  %v492_v13 = vpop.f32.mrf.mxu0 }
 0x117   : > { %vm688_vm1 = vcmp.eq.f32.partialorder %v1505_v45, inf  ;;  %v801_v53 = vand.u32 2147483648, %v1511_v50  ;;  %v1573_v58 = vadd.f32 1e-24, %v644_v40  ;;  %v792_v61 = vsel %vm791_vm12, %v1479_v26, %v790_v7  ;;  %v615_v39 = vpop.f32.mrf.mxu1 }
 0x118   : > { %v1578_v62 = vadd.f32 1e-24, %v755_v8  ;;  %v626_v63 = vmul.f32 %v486_v20, %v486_v20  ;;  %v636_v1 = vmul.f32 %v488_v37, %v488_v37  ;;  %1257 = vrcp.f32 %v879_v43 }
 0x119   : > { %v949_v3 = vadd.f32 %v940_v47, %v939_v16  ;;  %v880_v4 = vadd.f32 1e-06, %v870_v48  ;;  %v987_v6 = vmul.f32 %v788_v34, %v788_v34  ;;  %vm800_vm2 = vcmp.eq.f32.partialorder %v1511_v50, 0.0 }
 0x11a   : > { %v941_v10 = vmul.f32 %v840_v49, %v840_v49  ;;  %v682_v11 = vsel %vm681_vm13, %v1486_v31, %v680_v51  ;;  %vm690_vm3 = vcmp.eq.f32.partialorder %v1505_v45, 0.0  ;;  %v1585_v12 = vadd.f32 1e-24, %v645_v52 }
 0x11b   : > { %1259 = vrsqrt.f32 %v1578_v62  ;;  %v795_v14 = vsel %vm793_vm14, %v794_v17, %v792_v61  ;;  %v687_v15 = vmul.f32 %v1246_v55, %v1505_v45  ;;  %v797_v16 = vmul.f32 %v1248_v59, %v1511_v50 }
 0x11c   : > { %1261 = vrsqrt.f32 %v1573_v58  ;;  %v736_v18 = vmul.f32 %v609_v46, %v609_v46  ;;  %v646_v19 = vadd.f32 %v636_v1, %v626_v63  ;;  %v746_v20 = vmul.f32 %v611_v2, %v611_v2  ;;  %v1250_v0 = vpop.eup %1249 }
 0x11d   : > { %v627_v21 = vmul.f32 %v490_v54, %v490_v54  ;;  %v1595_v24 = vadd.f32 1e-06, %v850_v57  ;;  %v1597_v25 = vadd.f32 %v995_v56, %v987_v6  ;;  %v685_v26 = vsel %vm683_vm15, %v684_v5, %v682_v11  ;;  %v1252_v27 = vpop.eup %1251 }
 0x11e   : > { %v637_v17 = vmul.f32 %v492_v13, %v492_v13  ;;  %v871_v29 = vmul.f32 32768.0, %v795_v14  ;;  %1263 = vrsqrt.f32 %v1585_v12  ;;  %v1604_v30 = vadd.f32 1e-24, %v646_v19 }
 0x11f   : > { %v756_v22 = vadd.f32 %v746_v20, %v736_v18  ;;  %1265 = vrcp.f32 %v880_v4  ;;  %v950_v33 = vadd.f32 %v949_v3, %v941_v10  ;;  %v799_v34 = vsel %vm798_vm0, %v1511_v50, %v797_v16  ;;  %v1254_v36 = vpop.eup %1253 }
 0x120   : > { %v698_v35 = vand.u32 2147483648, %v1555_v32  ;;  %v851_v37 = vmul.f32 32768.0, %v685_v26  ;;  %v689_v31 = vsel %vm688_vm1, %v1505_v45, %v687_v15  ;;  %vm695_vm4 = vcmp.eq.f32.partialorder %v1555_v32, inf }
 0x121   : > { %v804_v5 = vmul.f32 %v1250_v0, %v1533_v9  ;;  %v647_v38 = vadd.f32 %v637_v17, %v627_v21  ;;  %v841_v40 = vsub.f32 %v685_v26, %v795_v14  ;;  %v988_v41 = vmul.f32 %v795_v14, %v795_v14 }
 0x122   : > { %vm805_vm5 = vcmp.eq.f32.partialorder %v1533_v9, inf  ;;  %1267 = vrsqrt.f32 %v1604_v30  ;;  %v1256_v43 = vpop.eup %1255  ;;  %v881_v7 = vadd.f32 1e-06, %v871_v29  ;;  %v802_v46 = vsel %vm800_vm2, %v801_v53, %v799_v34 }
 0x123   : > { %vm807_vm6 = vcmp.eq.f32.partialorder %v1533_v9, 0.0  ;;  %v1620_v47 = vadd.f32 1e-24, %v756_v22  ;;  %v889_v48 = vmul.f32 %v1252_v27, %v1537_v60  ;;  %v692_v8 = vsel %vm690_vm3, %v691_v44, %v689_v31 }
 0x124   : > { %v811_v49 = vmul.f32 %v1254_v36, %v1552_v28  ;;  %v747_v51 = vmul.f32 %v615_v39, %v615_v39  ;;  %v1628_v52 = vadd.f32 1e-06, %v851_v37  ;;  %vm697_vm7 = vcmp.eq.f32.partialorder %v1555_v32, 0.0 }
 0x125   : > { %v806_v50 = vsel %vm805_vm5, %v1533_v9, %v804_v5  ;;  %1269 = vrsqrt.f32 %v1620_v47  ;;  %v1633_v54 = vadd.f32 1e-24, %v647_v38  ;;  %v872_v55 = vmul.f32 32768.0, %v802_v46  ;;  %v1258_v44 = vpop.eup %1257 }
 0x126   : > { %v694_v60 = vmul.f32 %v1256_v43, %v1555_v32  ;;  %v808_v56 = vand.u32 2147483648, %v1533_v9  ;;  %v737_v45 = vmul.f32 %v613_v23, %v613_v23  ;;  %1271 = vrcp.f32 %v881_v7 }
 0x127   : > { %v942_v57 = vmul.f32 %v841_v40, %v841_v40  ;;  %v852_v53 = vmul.f32 32768.0, %v692_v8  ;;  %vm812_vm8 = vcmp.eq.f32.partialorder %v1552_v28, inf  ;;  %v842_v61 = vsub.f32 %v692_v8, %v802_v46 }
 0x128   : > { %v1260_v59 = vpop.eup %1259  ;;  %v1640_v63 = vsel %vm807_vm6, %v808_v56, %v806_v50  ;;  %v813_v1 = vsel %vm812_vm8, %v1552_v28, %v811_v49  ;;  %v757_v2 = vadd.f32 %v747_v51, %v737_v45  ;;  %v989_v4 = vmul.f32 %v802_v46, %v802_v46 }
 0x129   : > { %v1262_v3 = vpop.eup %1261  ;;  %v815_v6 = vand.u32 2147483648, %v1552_v28  ;;  %v818_v10 = vmul.f32 %v1260_v59, %v1578_v62  ;;  %1273 = vrsqrt.f32 %v1633_v54  ;;  %v882_v11 = vadd.f32 1e-06, %v872_v55 }
 0x12a   : > { %v696_v13 = vsel %vm695_vm4, %v1555_v32, %v694_v60  ;;  %vm814_vm9 = vcmp.eq.f32.partialorder %v1552_v28, 0.0  ;;  %vm819_vm10 = vcmp.eq.f32.partialorder %v1578_v62, inf  ;;  %v873_v9 = vmul.f32 32768.0, %v1640_v63 }
 0x12b   : > { %v1652_v14 = vsel %vm814_vm9, %v815_v6, %v813_v1  ;;  %v820_v15 = vsel %vm819_vm10, %v1578_v62, %v818_v10  ;;  %v822_v16 = vand.u32 2147483648, %v1578_v62  ;;  %v1264_v18 = vpop.eup %1263  ;;  %1275 = vlog2.f32 %v889_v48 }
 0x12c   : > { %v997_v19 = vadd.f32 %v1597_v25, %v988_v41  ;;  %vm821_vm11 = vcmp.eq.f32.partialorder %v1578_v62, 0.0  ;;  %v1658_v20 = vadd.f32 1e-24, %v757_v2  ;;  %v1266_v21 = vpop.eup %1265  ;;  %v951_v28 = vadd.f32 %v950_v33, %v942_v57 }
 0x12d   : > { %v1660_v23 = vadd.f32 1e-06, %v852_v53  ;;  %v701_v0 = vmul.f32 %v1262_v3, %v1573_v58  ;;  %v1663_v26 = vsel %vm821_vm11, %v822_v16, %v820_v15  ;;  %v891_v17 = vmul.f32 %v1258_v44, %v1563_v42 }
 0x12e   : > { %v943_v27 = vmul.f32 %v842_v61, %v842_v61  ;;  %v699_v25 = vsel %vm697_vm7, %v698_v35, %v696_v13  ;;  %v874_v62 = vmul.f32 32768.0, %v1652_v14  ;;  %1277 = vrcp.f32 %v882_v11 }
 0x12f   : > { %v1268_v29 = vpop.eup %1267  ;;  %v998_v22 = vadd.f32 %v997_v19, %v989_v4  ;;  %v883_v33 = vadd.f32 1e-06, %v873_v9  ;;  %v708_v34 = vmul.f32 %v1264_v18, %v1585_v12  ;;  %vm702_vm12 = vcmp.eq.f32.partialorder %v1573_v58, inf }
 0x130   : > { %vm704_vm13 = vcmp.eq.f32.partialorder %v1573_v58, 0.0  ;;  %v875_v42 = vmul.f32 32768.0, %v1663_v26  ;;  %1279 = vrsqrt.f32 %v1658_v20  ;;  %v893_v36 = vmul.f32 %v1266_v21, %v1595_v24 }
 0x131   : > { %v853_v32 = vmul.f32 32768.0, %v699_v25  ;;  %v703_v35 = vsel %vm702_vm12, %v1573_v58, %v701_v0  ;;  %v705_v37 = vand.u32 2147483648, %v1573_v58  ;;  %v884_v5 = vadd.f32 1e-06, %v874_v62 }
 0x132   : > { %v1270_v31 = vpop.eup %1269  ;;  %vm709_vm14 = vcmp.eq.f32.partialorder %v1585_v12, inf  ;;  %vm711_vm15 = vcmp.eq.f32.partialorder %v1585_v12, 0.0  ;;  %v715_v38 = vmul.f32 %v1268_v29, %v1604_v30  ;;  %1281 = vrcp.f32 %v883_v33 }
 0x133   : > { %v710_v39 = vsel %vm709_vm14, %v1585_v12, %v708_v34  ;;  %v712_v40 = vand.u32 2147483648, %v1585_v12  ;;  %v825_v24 = vmul.f32 %v1270_v31, %v1620_v47  ;;  %v1272_v41 = vpop.eup %1271  ;;  %v706_v43 = vsel %vm704_vm13, %v705_v37, %v703_v35 }
 0x134   : > { %v885_v7 = vadd.f32 1e-06, %v875_v42  ;;  %vm826_vm0 = vcmp.eq.f32.partialorder %v1620_v47, inf  ;;  %v829_v46 = vand.u32 2147483648, %v1620_v47  ;;  %v843_v48 = vsub.f32 %v699_v25, %v1640_v63 }
 0x135   : > { %vm716_vm1 = vcmp.eq.f32.partialorder %v1604_v30, inf  ;;  %v827_v8 = vsel %vm826_vm0, %v1620_v47, %v825_v24  ;;  %vm828_vm2 = vcmp.eq.f32.partialorder %v1620_v47, 0.0  ;;  %1283 = vrcp.f32 %v884_v5 }
 0x136   : > { %v1274_v49 = vpop.eup %1273  ;;  %v713_v51 = vsel %vm711_vm15, %v712_v40, %v710_v39  ;;  %v717_v58 = vsel %vm716_vm1, %v1604_v30, %v715_v38  ;;  %v830_v50 = vsel %vm828_vm2, %v829_v46, %v827_v8  ;;  %1285 = vlog2.f32 %v891_v17 }
 0x137   : > { %v844_v55 = vsub.f32 %v706_v43, %v1652_v14  ;;  %v719_v60 = vand.u32 2147483648, %v1604_v30  ;;  %v876_v56 = vmul.f32 32768.0, %v830_v50  ;;  %v990_v45 = vmul.f32 %v1640_v63, %v1640_v63 }
 0x138   : > { %1287 = vrcp.f32 %v885_v7  ;;  %vm718_vm3 = vcmp.eq.f32.partialorder %v1604_v30, 0.0  ;;  %v722_v47 = vmul.f32 %v1274_v49, %v1633_v54  ;;  %v1702_v44 = vpop.eup %1275  ;;  %v944_v12 = vmul.f32 %v843_v48, %v843_v48 }
 0x139   : > { %v845_v57 = vsub.f32 %v713_v51, %v1663_v26  ;;  %v720_v53 = vsel %vm718_vm3, %v719_v60, %v717_v58  ;;  %v886_v59 = vadd.f32 1e-06, %v876_v56  ;;  %1289 = vlog2.f32 %v893_v36 }
 0x13a   : > { %v952_v61 = vadd.f32 %v951_v28, %v943_v27  ;;  %v863_v1 = vadd.f32 1e-06, %v853_v32  ;;  %v991_v2 = vmul.f32 %v1652_v14, %v1652_v14  ;;  %v895_v63 = vmul.f32 %v1272_v41, %v1628_v52 }
 0x13b   : > { %v945_v3 = vmul.f32 %v844_v55, %v844_v55  ;;  %1291 = vrcp.f32 %v886_v59  ;;  %vm723_vm4 = vcmp.eq.f32.partialorder %v1633_v54, inf  ;;  %v1278_v30 = vpop.eup %1277  ;;  %v999_v4 = vadd.f32 %v998_v22, %v990_v45 }
 0x13c   : > { %v992_v6 = vmul.f32 %v1663_v26, %v1663_v26  ;;  %v846_v10 = vsub.f32 %v720_v53, %v830_v50  ;;  %v724_v11 = vsel %vm723_vm4, %v1633_v54, %v722_v47  ;;  %v953_v9 = vadd.f32 %v952_v61, %v944_v12 }
 0x13d   : > { %v1280_v13 = vpop.eup %1279  ;;  %v854_v15 = vmul.f32 32768.0, %v706_v43  ;;  %v946_v16 = vmul.f32 %v845_v57, %v845_v57  ;;  %v726_v14 = vand.u32 2147483648, %v1633_v54  ;;  %v1000_v18 = vadd.f32 %v999_v4, %v991_v2 }
 0x13e   : > { %v993_v52 = vmul.f32 %v830_v50, %v830_v50  ;;  %vm725_vm5 = vcmp.eq.f32.partialorder %v1633_v54, 0.0  ;;  %v832_v19 = vmul.f32 %v1280_v13, %v1658_v20  ;;  %v954_v21 = vadd.f32 %v953_v9, %v945_v3  ;;  %v938_v3 = vld [vmem:[#allocation2] sm:$0x1] }
 0x13f   : > { %v727_v28 = vsel %vm725_vm5, %v726_v14, %v724_v11  ;;  %vm833_vm6 = vcmp.eq.f32.partialorder %v1658_v20, inf  ;;  %v836_v0 = vand.u32 2147483648, %v1658_v20  ;;  %v1282_v26 = vpop.eup %1281  ;;  %v1001_v17 = vadd.f32 %v1000_v18, %v992_v6 }
 0x140   : > { %v947_v27 = vmul.f32 %v846_v10, %v846_v10  ;;  %v834_v25 = vsel %vm833_vm6, %v1658_v20, %v832_v19  ;;  %vm835_vm7 = vcmp.eq.f32.partialorder %v1658_v20, 0.0  ;;  %v897_v62 = vmul.f32 %v1278_v30, %v1660_v23 }
 0x141   : > { %v855_v29 = vmul.f32 32768.0, %v713_v51  ;;  %v955_v22 = vadd.f32 %v954_v21, %v946_v16  ;;  %v837_v54 = vsel %vm835_vm7, %v836_v0, %v834_v25  ;;  %v1002_v33 = vadd.f32 %v1001_v17, %v993_v52 }
 0x142   : > { %v847_v34 = vsub.f32 %v727_v28, %v837_v54  ;;  %v877_v42 = vmul.f32 32768.0, %v837_v54  ;;  %v994_v36 = vmul.f32 %v837_v54, %v837_v54  ;;  %v1284_v32 = vpop.eup %1283  ;;  %1293 = vlog2.f32 %v895_v63 }
 0x143   : > { %v899_v35 = vmul.f32 %v1282_v26, %v863_v1  ;;  %v864_v37 = vadd.f32 1e-06, %v854_v15  ;;  %v856_v31 = vmul.f32 32768.0, %v720_v53  ;;  %v1286_v5 = vpop.eup %1285  ;;  %v956_v38 = vadd.f32 %v955_v22, %v947_v27  ;;  %v984_v53 = vld [vmem:[#allocation2 + $0x2] sm:$0x1] }
 0x144   : > { %v887_v39 = vadd.f32 1e-06, %v877_v42  ;;  %v948_v40 = vmul.f32 %v847_v34, %v847_v34  ;;  %v1003_v24 = vadd.f32 %v1002_v33, %v994_v36  ;;  %1295 = vlog2.f32 %v897_v62 }
 0x145   : > { %v1288_v20 = vpop.eup %1287  ;;  %v865_v23 = vadd.f32 1e-06, %v855_v29  ;;  %v901_v41 = vmul.f32 %v1284_v32, %v864_v37  ;;  %v866_v49 = vadd.f32 1e-06, %v856_v31  ;;  %v857_v47 = vmul.f32 32768.0, %v727_v28 }
 0x146   : > { %1297 = vrcp.f32 %v887_v39  ;;  %v957_v43 = vadd.f32 %v956_v38, %v948_v40  ;;  %v1004_v7 = vrot.slane %v1003_v24, 4  ;;  %v1290_v46 = vpop.eup %1289  ;;  %v911_v61 = vmul.f32 0.6931472, %v1286_v5 }
 0x147   : > { %1299 = vlog2.f32 %v899_v35  ;;  %v903_v8 = vmul.f32 %v1288_v20, %v865_v23  ;;  %v909_v63 = vmul.f32 0.6931472, %v1702_v44  ;;  %v913_v4 = vmul.f32 0.6931472, %v1290_v46 }
 0x148   : > { %v1292_v48 = vpop.eup %1291  ;;  %v958_v51 = vrot.slane %v957_v43, 4  ;;  %v1005_v58 = vadd.f32 %v1004_v7, %v1003_v24  ;;  %1301 = vlog2.f32 %v901_v41  ;;  %v867_v6 = vadd.f32 1e-06, %v857_v47 }
 0x149   : > { %v905_v50 = vmul.f32 %v1292_v48, %v866_v49  ;;  %1303 = vlog2.f32 %v903_v8  ;;  %v929_v15 = vand.u32 2147483647, %v911_v61  ;;  %v928_v52 = vand.u32 2147483647, %v909_v63  ;;  %v966_v48 = vld [vmem:[#allocation2 + $0x1] sm:$0x1] }
 0x14a   : > { %v959_v55 = vadd.f32 %v958_v51, %v957_v43  ;;  %v1006_v60 = vrot.slane %v1005_v58, 2  ;;  %v930_v19 = vand.u32 2147483647, %v913_v4 }
 0x14b   : > { %1305 = vlog2.f32 %v905_v50  ;;  %v967_v44 = vadd.f32 %v929_v15, %v928_v52 }
 0x14c   : > { %v960_v56 = vrot.slane %v959_v55, 2  ;;  %v1007_v45 = vadd.f32 %v1006_v60, %v1005_v58 }
 0x14d   : > { %v968_v27 = vadd.f32 %v967_v44, %v930_v19 }
 0x14e   : > { %v961_v12 = vadd.f32 %v960_v56, %v959_v55  ;;  %v1008_v57 = vrot.slane %v1007_v45, 1 }
 0x14f   : > { %v1294_v59 = vpop.eup %1293 }
 0x150   : > { %v962_v1 = vrot.slane %v961_v12, 1  ;;  %v1009_v2 = vadd.f32 %v1008_v57, %v1007_v45  ;;  %v915_v16 = vmul.f32 0.6931472, %v1294_v59 }
 0x151   : > { %v1296_v30 = vpop.eup %1295 }
 0x152   : > { %v963_v10 = vadd.f32 %v962_v1, %v961_v12  ;;  %v1010_v11 = vadd.f32 %v1009_v2, %v984_v53  ;;  %v917_v21 = vmul.f32 0.6931472, %v1296_v30  ;;  %v931_v0 = vand.u32 2147483647, %v915_v16 }
 0x153   : > { %v1298_v13 = vpop.eup %1297 }
 0x154   : > { %v1300_v9 = vpop.eup %1299  ;;  %v907_v14 = vmul.f32 %v1298_v13, %v867_v6  ;;  %v964_v18 = vadd.f32 %v963_v10, %v938_v3  ;;  %1011 = vst [vmem:[#allocation2 + $0x2] sm:$0x1] %v1010_v11  ;;  %v932_v25 = vand.u32 2147483647, %v917_v21  ;;  %v969_v22 = vadd.f32 %v968_v27, %v931_v0 }
 0x155   : > { %v1302_v28 = vpop.eup %1301  ;;  %v919_v26 = vmul.f32 0.6931472, %v1300_v9 }
 0x156   : > { %1307 = vlog2.f32 %v907_v14  ;;  %965 = vst [vmem:[#allocation2] sm:$0x1] %v964_v18  ;;  %v1304_v17 = vpop.eup %1303  ;;  %v921_v62 = vmul.f32 0.6931472, %v1302_v28  ;;  %v970_v34 = vadd.f32 %v969_v22, %v932_v25 }
 0x157   : > { %v933_v54 = vand.u32 2147483647, %v919_v26  ;;  %v923_v33 = vmul.f32 0.6931472, %v1304_v17 }
 0x158   : > { %v1306_v29 = vpop.eup %1305  ;;  %v934_v42 = vand.u32 2147483647, %v921_v62 }
 0x159   : > { %v925_v36 = vmul.f32 0.6931472, %v1306_v29  ;;  %v971_v32 = vadd.f32 %v970_v34, %v933_v54  ;;  %v935_v35 = vand.u32 2147483647, %v923_v33 }
 0x15b   : > { %v972_v37 = vadd.f32 %v971_v32, %v934_v42  ;;  %v936_v31 = vand.u32 2147483647, %v925_v36 }
 0x15d   : > { %v973_v38 = vadd.f32 %v972_v37, %v935_v35 }
 0x15f   : > { %v974_v40 = vadd.f32 %v973_v38, %v936_v31 }
 0x163   : > { %v1308_v5 = vpop.eup %1307 }
 0x164   : > { %v927_v39 = vmul.f32 0.6931472, %v1308_v5 }
 0x166   : > { %v937_v24 = vand.u32 2147483647, %v927_v39 }
 0x168   : > { %v975_v20 = vadd.f32 %v974_v40, %v937_v24 }
 0x16a   : > { %v976_v23 = vrot.slane %v975_v20, 4 }
 0x16c   : > { %v977_v41 = vadd.f32 %v976_v23, %v975_v20 }
 0x16e   : > { %v978_v43 = vrot.slane %v977_v41, 2 }
 0x170   : > { %v979_v7 = vadd.f32 %v978_v43, %v977_v41 }
 0x172   : > { %v980_v46 = vrot.slane %v979_v7, 1 }
 0x174   : > { %v981_v8 = vadd.f32 %v980_v46, %v979_v7 }
 0x176   : > { %v982_v49 = vadd.f32 %v981_v8, %v966_v48 }
 0x178   : > { %983 = vst [vmem:[#allocation2 + $0x1] sm:$0x1] %v982_v49 }
 0x17f   : > { %v1015_v51 = vld [vmem:[#allocation2] sm:$0xff] }
 0x180   : > { %1016 = vst [vmem:[%s269_s8] sm:$0xff] %v1015_v51 }
 0x181 PF: > { %s13_s14 = sadd.s32 1, %s1331_s14   ;;  %s1738_s12 = smov %s1327_s13 }
 0x182   : > { %p10_p5 = scmp.ge.s32.totalorder %s13_s14, 4   ;;  %s1739_s13 = smov %s1741_s15 }
 0x184   :  { %12 = sbr.rel (!%p10_p5) target bundleno = 2 (0x2), region = 76 }

// kernel: calc_convergence_loss.9
= control target key start
LH: loop header
LB: loop body
LE: loop exit
PB: predicated region body
PF: predicated region fallthrough
CT: control target
= control target key end

     0   :  { %s1950_s12 = smov 0   ;;  %s1952_s13 = smov 0   ;;  %s2579_s0 = inlined_call_operand.vmem [shape: bf16[2,32,512], index: 0, kind: input, shape index: {}]   ;;  %s2580_s1 = inlined_call_operand.vmem [shape: bf16[2,32,512], index: 1, kind: input, shape index: {}]   ;;  %s2581_s2 = inlined_call_operand.vmem [shape: bf16[512,768], index: 2, kind: input, shape index: {}]   ;;  %s2582_s3 = inlined_call_operand.vmem [shape: f32[2,1,8,128], index: 3, kind: output, shape index: {}]  }
   0x1   :  { %s1954_s14 = smov 0   ;;  %s1956_s15 = smov 0  }
   0x2   :  { %s1958_s16 = smov 0   ;;  %s1960_s17 = smov 0  }
   0x3   :  { %s1962_s18 = smov 0  }
   0x4 LB: > { %s25_s19 = sadd.s32 1, %s1919_s16  ;;  %s32_s20 = sadd.s32 1, %s1923_s17  ;;  %s1927_s18 = sphi %s1962_s18, %s13_s18   ;;  %s1923_s17 = sphi %s1960_s17, %s2603_s17   ;;  %s1919_s16 = sphi %s1958_s16, %s2602_s16   ;;  %s1915_s15 = sphi %s1956_s15, %s2601_s15   ;;  %s1911_s14 = sphi %s1954_s14, %s2600_s14   ;;  %s1907_s13 = sphi %s1952_s13, %s2599_s13   ;;  %s1903_s12 = sphi %s1950_s12, %s2598_s12  }
   0x5   : > { %p26_p0 = scmp.ge.s32.totalorder %s25_s19, 3  ;;  %s95_s21 = sadd.s32 1, %s1907_s13 }
   0x6   : > { %p102_p1 = scmp.ne.s32.totalorder %s1907_s13, %s1903_s12  ;;  %p103_p2 = scmp.eq.s32.totalorder %s1927_s18, 0 }
   0x7   : > { %s2605_s19 = smov (%p26_p0, %s25_s19), 0  ;;  %s2607_s20 = smov (!%p26_p0, %s32_s20), %s1923_s17 }
   0x8   : > { %s92_s22 = ssub.s32 %s1919_s16, %s2605_s19  ;;  %p104_p3 = por %p103_p2, %p102_p1 }
   0x9   : > { %p34_p4 = scmp.ge.s32.totalorder %s2607_s20, 2  ;;  %p93_p5 = scmp.eq.s32.totalorder %s92_s22, 0 }
   0xa   : > { %p1566_p6 = scmp.ge.s32.totalorder %s1927_s18, 6 }
   0xb   : > { %s2609_s20 = smov (%p34_p4, %s2607_s20), 0 }
   0xc   : > { %s1999_s23 = scalar_select %p93_p5, %s1907_s13, %s95_s21  }
   0xd   : > { %156 = sbr.rel (%p1566_p6) target bundleno = 54 (0x36), region = 16 }
  0x12   : > { %187 = sbr.rel (!%p104_p3) target bundleno = 54 (0x36), region = 28  ;;  %s189_s24 = sand.u32 (%p104_p3), 1, %s1907_s13  }
  0x13   : > { %s1661_s25 = sshll.u32 (%p104_p3), %s1919_s16, 3  ;;  %s1567_s26 = sshll.u32 (%p104_p3), %s189_s24, 9 }
  0x14   : > { %s2007_s29 = scalar_lea.vmem (%p104_p3), %s2581_s2, %s1661_s25  ;;  %s2012_s30 = scalar_lea.vmem (%p104_p3), [#allocation3], %s1567_s26 }
  0x15   : > { %v349_v0 = vld [vmem:[%s2007_s29] sm:$0xff] (%p104_p3)  ;;  %v351_v1 = vld [vmem:[%s2007_s29 + $0x18] sm:$0xff] (%p104_p3)  ;;  %v353_v2 = vld [vmem:[%s2007_s29 + $0x30] sm:$0xff] (%p104_p3) }
  0x16   : > { %350 = vst [vmem:[%s2012_s30] sm:$0xff] (%p104_p3), %v349_v0  ;;  %352 = vst [vmem:[%s2012_s30 + $0x8] sm:$0xff] (%p104_p3), %v351_v1  ;;  %v355_v3 = vld [vmem:[%s2007_s29 + $0x48] sm:$0xff] (%p104_p3)  ;;  %v357_v4 = vld [vmem:[%s2007_s29 + $0x60] sm:$0xff] (%p104_p3) }
  0x17   : > { %354 = vst [vmem:[%s2012_s30 + $0x10] sm:$0xff] %v353_v2  ;;  %v359_v5 = vld [vmem:[%s2007_s29 + $0x78] sm:$0xff]  ;;  %356 = vst [vmem:[%s2012_s30 + $0x18] sm:$0xff] %v355_v3  ;;  %v361_v6 = vld [vmem:[%s2007_s29 + $0x90] sm:$0xff] }
  0x18   : > { %358 = vst [vmem:[%s2012_s30 + $0x20] sm:$0xff] %v357_v4  ;;  %360 = vst [vmem:[%s2012_s30 + $0x28] sm:$0xff] %v359_v5  ;;  %v363_v7 = vld [vmem:[%s2007_s29 + $0xa8] sm:$0xff]  ;;  %v365_v8 = vld [vmem:[%s2007_s29 + $0xc0] sm:$0xff] }
  0x19   : > { %362 = vst [vmem:[%s2012_s30 + $0x30] sm:$0xff] %v361_v6  ;;  %364 = vst [vmem:[%s2012_s30 + $0x38] sm:$0xff] %v363_v7  ;;  %v367_v9 = vld [vmem:[%s2007_s29 + $0xd8] sm:$0xff]  ;;  %v369_v10 = vld [vmem:[%s2007_s29 + $0xf0] sm:$0xff] }
  0x1a   : > { %366 = vst [vmem:[%s2012_s30 + $0x40] sm:$0xff] %v365_v8  ;;  %v371_v11 = vld [vmem:[%s2007_s29 + $0x108] sm:$0xff]  ;;  %368 = vst [vmem:[%s2012_s30 + $0x48] sm:$0xff] %v367_v9  ;;  %v373_v12 = vld [vmem:[%s2007_s29 + $0x120] sm:$0xff] }
  0x1b   : > { %370 = vst [vmem:[%s2012_s30 + $0x50] sm:$0xff] %v369_v10  ;;  %372 = vst [vmem:[%s2012_s30 + $0x58] sm:$0xff] %v371_v11  ;;  %v375_v13 = vld [vmem:[%s2007_s29 + $0x138] sm:$0xff]  ;;  %v377_v14 = vld [vmem:[%s2007_s29 + $0x150] sm:$0xff] }
  0x1c   : > { %374 = vst [vmem:[%s2012_s30 + $0x60] sm:$0xff] %v373_v12  ;;  %376 = vst [vmem:[%s2012_s30 + $0x68] sm:$0xff] %v375_v13  ;;  %v379_v15 = vld [vmem:[%s2007_s29 + $0x168] sm:$0xff]  ;;  %v381_v16 = vld [vmem:[%s2007_s29 + $0x180] sm:$0xff] }
  0x1d   : > { %378 = vst [vmem:[%s2012_s30 + $0x70] sm:$0xff] %v377_v14  ;;  %v383_v17 = vld [vmem:[%s2007_s29 + $0x198] sm:$0xff]  ;;  %380 = vst [vmem:[%s2012_s30 + $0x78] sm:$0xff] %v379_v15  ;;  %v385_v18 = vld [vmem:[%s2007_s29 + $0x1b0] sm:$0xff] }
  0x1e   : > { %382 = vst [vmem:[%s2012_s30 + $0x80] sm:$0xff] %v381_v16  ;;  %384 = vst [vmem:[%s2012_s30 + $0x88] sm:$0xff] %v383_v17  ;;  %v387_v19 = vld [vmem:[%s2007_s29 + $0x1c8] sm:$0xff]  ;;  %v389_v20 = vld [vmem:[%s2007_s29 + $0x1e0] sm:$0xff] }
  0x1f   : > { %386 = vst [vmem:[%s2012_s30 + $0x90] sm:$0xff] %v385_v18  ;;  %388 = vst [vmem:[%s2012_s30 + $0x98] sm:$0xff] %v387_v19  ;;  %v391_v21 = vld [vmem:[%s2007_s29 + $0x1f8] sm:$0xff]  ;;  %v393_v22 = vld [vmem:[%s2007_s29 + $0x210] sm:$0xff] }
  0x20   : > { %390 = vst [vmem:[%s2012_s30 + $0xa0] sm:$0xff] %v389_v20  ;;  %v395_v23 = vld [vmem:[%s2007_s29 + $0x228] sm:$0xff]  ;;  %392 = vst [vmem:[%s2012_s30 + $0xa8] sm:$0xff] %v391_v21  ;;  %v397_v24 = vld [vmem:[%s2007_s29 + $0x240] sm:$0xff] }
  0x21   : > { %394 = vst [vmem:[%s2012_s30 + $0xb0] sm:$0xff] %v393_v22  ;;  %396 = vst [vmem:[%s2012_s30 + $0xb8] sm:$0xff] %v395_v23  ;;  %v399_v25 = vld [vmem:[%s2007_s29 + $0x258] sm:$0xff]  ;;  %v401_v26 = vld [vmem:[%s2007_s29 + $0x270] sm:$0xff] }
  0x22   : > { %398 = vst [vmem:[%s2012_s30 + $0xc0] sm:$0xff] %v397_v24  ;;  %400 = vst [vmem:[%s2012_s30 + $0xc8] sm:$0xff] %v399_v25  ;;  %v403_v27 = vld [vmem:[%s2007_s29 + $0x288] sm:$0xff]  ;;  %v405_v28 = vld [vmem:[%s2007_s29 + $0x2a0] sm:$0xff] }
  0x23   : > { %402 = vst [vmem:[%s2012_s30 + $0xd0] sm:$0xff] %v401_v26  ;;  %v407_v29 = vld [vmem:[%s2007_s29 + $0x2b8] sm:$0xff]  ;;  %404 = vst [vmem:[%s2012_s30 + $0xd8] sm:$0xff] %v403_v27  ;;  %v409_v30 = vld [vmem:[%s2007_s29 + $0x2d0] sm:$0xff] }
  0x24   : > { %406 = vst [vmem:[%s2012_s30 + $0xe0] sm:$0xff] %v405_v28  ;;  %408 = vst [vmem:[%s2012_s30 + $0xe8] sm:$0xff] %v407_v29  ;;  %v411_v31 = vld [vmem:[%s2007_s29 + $0x2e8] sm:$0xff]  ;;  %v413_v32 = vld [vmem:[%s2007_s29 + $0x300] sm:$0xff] }
  0x25   : > { %410 = vst [vmem:[%s2012_s30 + $0xf0] sm:$0xff] %v409_v30  ;;  %412 = vst [vmem:[%s2012_s30 + $0xf8] sm:$0xff] %v411_v31  ;;  %v415_v33 = vld [vmem:[%s2007_s29 + $0x318] sm:$0xff]  ;;  %v417_v34 = vld [vmem:[%s2007_s29 + $0x330] sm:$0xff] }
  0x26   : > { %414 = vst [vmem:[%s2012_s30 + $0x100] sm:$0xff] %v413_v32  ;;  %v419_v35 = vld [vmem:[%s2007_s29 + $0x348] sm:$0xff]  ;;  %416 = vst [vmem:[%s2012_s30 + $0x108] sm:$0xff] %v415_v33  ;;  %v421_v36 = vld [vmem:[%s2007_s29 + $0x360] sm:$0xff] }
  0x27   : > { %418 = vst [vmem:[%s2012_s30 + $0x110] sm:$0xff] %v417_v34  ;;  %420 = vst [vmem:[%s2012_s30 + $0x118] sm:$0xff] %v419_v35  ;;  %v423_v37 = vld [vmem:[%s2007_s29 + $0x378] sm:$0xff]  ;;  %v425_v38 = vld [vmem:[%s2007_s29 + $0x390] sm:$0xff] }
  0x28   : > { %422 = vst [vmem:[%s2012_s30 + $0x120] sm:$0xff] %v421_v36  ;;  %424 = vst [vmem:[%s2012_s30 + $0x128] sm:$0xff] %v423_v37  ;;  %v427_v39 = vld [vmem:[%s2007_s29 + $0x3a8] sm:$0xff]  ;;  %v429_v40 = vld [vmem:[%s2007_s29 + $0x3c0] sm:$0xff] }
  0x29   : > { %426 = vst [vmem:[%s2012_s30 + $0x130] sm:$0xff] %v425_v38  ;;  %v431_v41 = vld [vmem:[%s2007_s29 + $0x3d8] sm:$0xff]  ;;  %428 = vst [vmem:[%s2012_s30 + $0x138] sm:$0xff] %v427_v39  ;;  %v433_v42 = vld [vmem:[%s2007_s29 + $0x3f0] sm:$0xff] }
  0x2a   : > { %430 = vst [vmem:[%s2012_s30 + $0x140] sm:$0xff] %v429_v40  ;;  %432 = vst [vmem:[%s2012_s30 + $0x148] sm:$0xff] %v431_v41  ;;  %v435_v43 = vld [vmem:[%s2007_s29 + $0x408] sm:$0xff]  ;;  %v437_v44 = vld [vmem:[%s2007_s29 + $0x420] sm:$0xff] }
  0x2b   : > { %434 = vst [vmem:[%s2012_s30 + $0x150] sm:$0xff] %v433_v42  ;;  %436 = vst [vmem:[%s2012_s30 + $0x158] sm:$0xff] %v435_v43  ;;  %v439_v45 = vld [vmem:[%s2007_s29 + $0x438] sm:$0xff]  ;;  %v441_v46 = vld [vmem:[%s2007_s29 + $0x450] sm:$0xff] }
  0x2c   : > { %438 = vst [vmem:[%s2012_s30 + $0x160] sm:$0xff] %v437_v44  ;;  %v443_v47 = vld [vmem:[%s2007_s29 + $0x468] sm:$0xff]  ;;  %440 = vst [vmem:[%s2012_s30 + $0x168] sm:$0xff] %v439_v45  ;;  %v445_v48 = vld [vmem:[%s2007_s29 + $0x480] sm:$0xff] }
  0x2d   : > { %442 = vst [vmem:[%s2012_s30 + $0x170] sm:$0xff] %v441_v46  ;;  %444 = vst [vmem:[%s2012_s30 + $0x178] sm:$0xff] %v443_v47  ;;  %v447_v49 = vld [vmem:[%s2007_s29 + $0x498] sm:$0xff]  ;;  %v449_v50 = vld [vmem:[%s2007_s29 + $0x4b0] sm:$0xff] }
  0x2e   : > { %446 = vst [vmem:[%s2012_s30 + $0x180] sm:$0xff] %v445_v48  ;;  %448 = vst [vmem:[%s2012_s30 + $0x188] sm:$0xff] %v447_v49  ;;  %v451_v51 = vld [vmem:[%s2007_s29 + $0x4c8] sm:$0xff]  ;;  %v453_v52 = vld [vmem:[%s2007_s29 + $0x4e0] sm:$0xff] }
  0x2f   : > { %450 = vst [vmem:[%s2012_s30 + $0x190] sm:$0xff] %v449_v50  ;;  %v455_v53 = vld [vmem:[%s2007_s29 + $0x4f8] sm:$0xff]  ;;  %452 = vst [vmem:[%s2012_s30 + $0x198] sm:$0xff] %v451_v51  ;;  %v457_v54 = vld [vmem:[%s2007_s29 + $0x510] sm:$0xff] }
  0x30   : > { %454 = vst [vmem:[%s2012_s30 + $0x1a0] sm:$0xff] %v453_v52  ;;  %456 = vst [vmem:[%s2012_s30 + $0x1a8] sm:$0xff] %v455_v53  ;;  %v459_v55 = vld [vmem:[%s2007_s29 + $0x528] sm:$0xff]  ;;  %v461_v56 = vld [vmem:[%s2007_s29 + $0x540] sm:$0xff] }
  0x31   : > { %458 = vst [vmem:[%s2012_s30 + $0x1b0] sm:$0xff] %v457_v54  ;;  %460 = vst [vmem:[%s2012_s30 + $0x1b8] sm:$0xff] %v459_v55  ;;  %v463_v57 = vld [vmem:[%s2007_s29 + $0x558] sm:$0xff]  ;;  %v465_v58 = vld [vmem:[%s2007_s29 + $0x570] sm:$0xff] }
  0x32   : > { %462 = vst [vmem:[%s2012_s30 + $0x1c0] sm:$0xff] %v461_v56  ;;  %v467_v59 = vld [vmem:[%s2007_s29 + $0x588] sm:$0xff]  ;;  %464 = vst [vmem:[%s2012_s30 + $0x1c8] sm:$0xff] %v463_v57  ;;  %v469_v60 = vld [vmem:[%s2007_s29 + $0x5a0] sm:$0xff] }
  0x33   : > { %466 = vst [vmem:[%s2012_s30 + $0x1d0] sm:$0xff] %v465_v58  ;;  %468 = vst [vmem:[%s2012_s30 + $0x1d8] sm:$0xff] %v467_v59  ;;  %v471_v61 = vld [vmem:[%s2007_s29 + $0x5b8] sm:$0xff]  ;;  %v473_v62 = vld [vmem:[%s2007_s29 + $0x5d0] sm:$0xff] }
  0x34   : > { %470 = vst [vmem:[%s2012_s30 + $0x1e0] sm:$0xff] %v469_v60  ;;  %472 = vst [vmem:[%s2012_s30 + $0x1e8] sm:$0xff] %v471_v61  ;;  %v475_v63 = vld [vmem:[%s2007_s29 + $0x5e8] sm:$0xff] }
  0x35   : > { %474 = vst [vmem:[%s2012_s30 + $0x1f0] sm:$0xff] %v473_v62  ;;  %476 = vst [vmem:[%s2012_s30 + $0x1f8] sm:$0xff] %v475_v63 }
  0x36 PF: > { %p1570_p7 = scmp.ge.s32.totalorder %s1927_s18, 1  ;;  %p481_p8 = scmp.lt.s32.totalorder %s1927_s18, 7 }
  0x38   : > { %p482_p9 = pnand %p1570_p7, %p481_p8 }
  0x3a   : > { %485 = sbr.rel (%p482_p9) target bundleno = 501 (0x1f5), region = 66 }
  0x3f   : > { %s488_s4 = sand.u32 1, %s1903_s12   ;;  %p534_p10 = scmp.lt.s32.totalorder %s1915_s15, 1 }
  0x40   : > { %s1571_s5 = sshll.u32 %s488_s4, 9  ;;  %p1577_p11 = scmp.ne.s32.totalorder %s1911_s14, 0 }
  0x41   : > { %s2611_s15 = smov (!%p534_p10, %s1915_s15), 1  ;;  %s2159_s12 = scalar_lea.vmem [#allocation3], %s1571_s5 }
  0x42   : > { %s1662_s6 = sshll.u32 %s2611_s15, 6  ;;  %s1576_s7 = sshll.u32 %s2611_s15, 3 }
  0x43   : > { %s2147_s10 = scalar_lea.vmem %s2579_s0, %s1662_s6  ;;  %s2152_s22 = scalar_lea.vmem %s2580_s1, %s1662_s6 }
  0x44   : > { %s2157_s26 = scalar_lea.vmem %s2582_s3, %s1576_s7  ;;  %566 = sbr.rel (%p1577_p11) target bundleno = 75 (0x4b), region = 74 }
  0x49   : > { %v1929_v0 = vmov 0.0  }
  0x4a   : > { %567 = vst [vmem:[#allocation2] sm:$0xff] %v1929_v0 }
  0x4b PF: > { %v2163_v1 = vld [vmem:[%s2159_s12 + $0x74] ss:$8 sps:$4 sm:$0xff]   ;;  %v2170_v3 = vld [vmem:[%s2159_s12 + $0x70] ss:$8 sps:$4 sm:$0xff]   ;;  %v2177_v5 = vld [vmem:[%s2159_s12 + $0x64] ss:$8 sps:$4 sm:$0xff]  }
  0x4c   : > { %v2166_v2 = vld [vmem:[%s2159_s12 + $0x174] ss:$8 sps:$4 sm:$0xff]   ;;  %1000 = vmatprep.subr.bf16.mxu0 %v2163_v1  ;;  %v2173_v4 = vld [vmem:[%s2159_s12 + $0x170] ss:$8 sps:$4 sm:$0xff]   ;;  %v2182_v6 = vld [vmem:[%s2159_s12 + $0x164] ss:$8 sps:$4 sm:$0xff]  }
  0x4d   : > { %1053 = vmatprep.subr.bf16.mxu1 %v2166_v2  ;;  %1001 = vmatpush1.bf16.msra.mxu0 %v2170_v3  ;;  %v2185_v7 = vld [vmem:[%s2159_s12 + $0x60] ss:$8 sps:$4 sm:$0xff]   ;;  %v2193_v9 = vld [vmem:[%s2159_s12 + $0x54] ss:$8 sps:$4 sm:$0xff]   ;;  %v2199_v11 = vld [vmem:[%s2159_s12 + $0x50] ss:$8 sps:$4 sm:$0xff]  }
  0x4e   : > { %1054 = vmatpush1.bf16.msra.mxu1 %v2173_v4  ;;  %1002 = vmatprep.subr.bf16.mxu0 %v2177_v5  ;;  %v2189_v8 = vld [vmem:[%s2159_s12 + $0x160] ss:$8 sps:$4 sm:$0xff]   ;;  %v2196_v10 = vld [vmem:[%s2159_s12 + $0x154] ss:$8 sps:$4 sm:$0xff]   ;;  %v2202_v12 = vld [vmem:[%s2159_s12 + $0x150] ss:$8 sps:$4 sm:$0xff]  }
  0x4f   : > { %1055 = vmatprep.subr.bf16.mxu1 %v2182_v6  ;;  %v2207_v13 = vld [vmem:[%s2159_s12 + $0x44] ss:$8 sps:$4 sm:$0xff]   ;;  %v2215_v15 = vld [vmem:[%s2159_s12 + $0x40] ss:$8 sps:$4 sm:$0xff]   ;;  %v2223_v17 = vld [vmem:[%s2159_s12 + $0x34] ss:$8 sps:$4 sm:$0xff]  }
  0x50   : > { %v2212_v14 = vld [vmem:[%s2159_s12 + $0x144] ss:$8 sps:$4 sm:$0xff]   ;;  %v2220_v16 = vld [vmem:[%s2159_s12 + $0x140] ss:$8 sps:$4 sm:$0xff]   ;;  %v2228_v18 = vld [vmem:[%s2159_s12 + $0x134] ss:$8 sps:$4 sm:$0xff]  }
  0x51   : > { %1003 = vmatpush1.bf16.msra.mxu0 %v2185_v7  ;;  %v2231_v19 = vld [vmem:[%s2159_s12 + $0x30] ss:$8 sps:$4 sm:$0xff]   ;;  %v2239_v21 = vld [vmem:[%s2159_s12 + $0x24] ss:$8 sps:$4 sm:$0xff]   ;;  %v2247_v23 = vld [vmem:[%s2159_s12 + $0x20] ss:$8 sps:$4 sm:$0xff]  }
  0x52   : > { %1056 = vmatpush1.bf16.msra.mxu1 %v2189_v8  ;;  %1004 = vmatprep.subr.bf16.mxu0 %v2193_v9  ;;  %v2234_v20 = vld [vmem:[%s2159_s12 + $0x130] ss:$8 sps:$4 sm:$0xff]   ;;  %v2244_v22 = vld [vmem:[%s2159_s12 + $0x124] ss:$8 sps:$4 sm:$0xff]   ;;  %v2252_v24 = vld [vmem:[%s2159_s12 + $0x120] ss:$8 sps:$4 sm:$0xff]  }
  0x53   : > { %1057 = vmatprep.subr.bf16.mxu1 %v2196_v10  ;;  %v2255_v25 = vld [vmem:[%s2159_s12 + $0x14] ss:$8 sps:$4 sm:$0xff]   ;;  %v2263_v27 = vld [vmem:[%s2159_s12 + $0x10] ss:$8 sps:$4 sm:$0xff]   ;;  %v2271_v29 = vld [vmem:[%s2159_s12 + $0x4] ss:$8 sps:$4 sm:$0xff]  }
  0x54   : > { %v2260_v26 = vld [vmem:[%s2159_s12 + $0x114] ss:$8 sps:$4 sm:$0xff]   ;;  %v2266_v28 = vld [vmem:[%s2159_s12 + $0x110] ss:$8 sps:$4 sm:$0xff]   ;;  %v2276_v30 = vld [vmem:[%s2159_s12 + $0x104] ss:$8 sps:$4 sm:$0xff]  }
  0x55   : > { %1005 = vmatpush1.bf16.msra.mxu0 %v2199_v11  ;;  %v2279_v31 = vld [vmem:[%s2159_s12] ss:$8 sps:$4 sm:$0xff]   ;;  %v2287_v33 = vld [vmem:[%s2159_s12 + $0xf4] ss:$8 sps:$4 sm:$0xff]   ;;  %v2295_v35 = vld [vmem:[%s2159_s12 + $0xf0] ss:$8 sps:$4 sm:$0xff]  }
  0x56   : > { %1058 = vmatpush1.bf16.msra.mxu1 %v2202_v12  ;;  %1006 = vmatprep.subr.bf16.mxu0 %v2207_v13  ;;  %v2284_v32 = vld [vmem:[%s2159_s12 + $0x100] ss:$8 sps:$4 sm:$0xff]   ;;  %v2292_v34 = vld [vmem:[%s2159_s12 + $0x1f4] ss:$8 sps:$4 sm:$0xff]   ;;  %v2298_v36 = vld [vmem:[%s2159_s12 + $0x1f0] ss:$8 sps:$4 sm:$0xff]  }
  0x57   : > { %1059 = vmatprep.subr.bf16.mxu1 %v2212_v14  ;;  %v2303_v37 = vld [vmem:[%s2159_s12 + $0xe4] ss:$8 sps:$4 sm:$0xff]   ;;  %v2311_v39 = vld [vmem:[%s2159_s12 + $0xe0] ss:$8 sps:$4 sm:$0xff]   ;;  %v2319_v41 = vld [vmem:[%s2159_s12 + $0xd4] ss:$8 sps:$4 sm:$0xff]  }
  0x58   : > { %v2308_v38 = vld [vmem:[%s2159_s12 + $0x1e4] ss:$8 sps:$4 sm:$0xff]   ;;  %v2316_v40 = vld [vmem:[%s2159_s12 + $0x1e0] ss:$8 sps:$4 sm:$0xff]   ;;  %v2324_v42 = vld [vmem:[%s2159_s12 + $0x1d4] ss:$8 sps:$4 sm:$0xff]  }
  0x59   : > { %1007 = vmatpush1.bf16.msra.mxu0 %v2215_v15  ;;  %v2327_v43 = vld [vmem:[%s2159_s12 + $0xd0] ss:$8 sps:$4 sm:$0xff]   ;;  %v2335_v45 = vld [vmem:[%s2159_s12 + $0xc4] ss:$8 sps:$4 sm:$0xff]   ;;  %v2343_v47 = vld [vmem:[%s2159_s12 + $0xc0] ss:$8 sps:$4 sm:$0xff]  }
  0x5a   : > { %1060 = vmatpush1.bf16.msra.mxu1 %v2220_v16  ;;  %1008 = vmatprep.subr.bf16.mxu0 %v2223_v17  ;;  %v2330_v44 = vld [vmem:[%s2159_s12 + $0x1d0] ss:$8 sps:$4 sm:$0xff]   ;;  %v2340_v46 = vld [vmem:[%s2159_s12 + $0x1c4] ss:$8 sps:$4 sm:$0xff]   ;;  %v2346_v48 = vld [vmem:[%s2159_s12 + $0x1c0] ss:$8 sps:$4 sm:$0xff]  }
  0x5b   : > { %1061 = vmatprep.subr.bf16.mxu1 %v2228_v18  ;;  %v2349_v49 = vld [vmem:[%s2159_s12 + $0xb4] ss:$8 sps:$4 sm:$0xff]   ;;  %v2361_v53 = vld [vmem:[%s2159_s12 + $0xb0] ss:$8 sps:$4 sm:$0xff]   ;;  %v2369_v55 = vld [vmem:[%s2159_s12 + $0xa4] ss:$8 sps:$4 sm:$0xff]  }
  0x5c   : > { %v1819_v50 = vld [vmem:[%s2147_s10 + $0x4] ss:$16 sps:$4 sm:$0xff]   ;;  %v1822_v52 = vld [vmem:[%s2147_s10 + $0xc] ss:$16 sps:$4 sm:$0xff]   ;;  %v2364_v54 = vld [vmem:[%s2159_s12 + $0x1b0] ss:$8 sps:$4 sm:$0xff]  }
  0x5d   : > { %1009 = vmatpush1.bf16.msra.mxu0 %v2231_v19  ;;  %v2355_v51 = vld [vmem:[%s2159_s12 + $0x1b4] ss:$8 sps:$4 sm:$0xff]   ;;  %1032 = vmatprep.mubr.bf16.mxu0 %v1819_v50  ;;  %v2374_v56 = vld [vmem:[%s2159_s12 + $0x1a4] ss:$8 sps:$4 sm:$0xff]   ;;  %v2379_v57 = vld [vmem:[%s2159_s12 + $0xa0] ss:$8 sps:$4 sm:$0xff]  }
  0x5e   : > { %1062 = vmatpush1.bf16.msra.mxu1 %v2234_v20  ;;  %1010 = vmatprep.subr.bf16.mxu0 %v2239_v21  ;;  %v2382_v58 = vld [vmem:[%s2159_s12 + $0x1a0] ss:$8 sps:$4 sm:$0xff]   ;;  %v2387_v59 = vld [vmem:[%s2159_s12 + $0x94] ss:$8 sps:$4 sm:$0xff]   ;;  %v2395_v61 = vld [vmem:[%s2159_s12 + $0x90] ss:$8 sps:$4 sm:$0xff]  }
  0x5f   : > { %1063 = vmatprep.subr.bf16.mxu1 %v2244_v22  ;;  %1085 = vmatprep.mubr.bf16.mxu1 %v1822_v52  ;;  %2588 = vst [vmem:[#allocation4_spill] sm:$0xff] %v2387_v59  ;;  %v2390_v60 = vld [vmem:[%s2159_s12 + $0x194] ss:$8 sps:$4 sm:$0xff]   ;;  %2590 = vst [vmem:[#allocation6_spill] sm:$0xff] %v2395_v61  ;;  %v2398_v62 = vld [vmem:[%s2159_s12 + $0x190] ss:$8 sps:$4 sm:$0xff]  }
  0x60   : > { %2589 = vst [vmem:[#allocation5_spill] sm:$0xff] %v2390_v60  ;;  %2591 = vst [vmem:[#allocation7_spill] sm:$0xff] %v2398_v62  ;;  %v2403_v63 = vld [vmem:[%s2159_s12 + $0x84] ss:$8 sps:$4 sm:$0xff]   ;;  %v2411_v50 = vld [vmem:[%s2159_s12 + $0x80] ss:$8 sps:$4 sm:$0xff]  }
  0x61   : > { %1011 = vmatpush1.bf16.msra.mxu0 %v2247_v23  ;;  %v2406_v0 = vld [vmem:[%s2159_s12 + $0x184] ss:$8 sps:$4 sm:$0xff]   ;;  %v2414_v52 = vld [vmem:[%s2159_s12 + $0x180] ss:$8 sps:$4 sm:$0xff]   ;;  %p1658_p12 = scmp.ne.s32.totalorder %s1911_s14, 2 }
  0x62   : > { %1064 = vmatpush1.bf16.msra.mxu1 %v2252_v24  ;;  %1012 = vmatprep.subr.bf16.mxu0 %v2255_v25  ;;  %2592 = vst [vmem:[#allocation8_spill] sm:$0xff] %v2414_v52 }
  0x63   : > { %1065 = vmatprep.subr.bf16.mxu1 %v2260_v26 }
  0x65   : > { %1013 = vmatpush1.bf16.msra.mxu0 %v2263_v27 }
  0x66   : > { %1066 = vmatpush1.bf16.msra.mxu1 %v2266_v28  ;;  %1014 = vmatprep.subr.bf16.mxu0 %v2271_v29 }
  0x67   : > { %1067 = vmatprep.subr.bf16.mxu1 %v2276_v30 }
  0x69   : > { %1015 = vmatpush1.bf16.msra.mxu0 %v2279_v31 }
  0x6a   : > { %1068 = vmatpush1.bf16.msra.mxu1 %v2284_v32  ;;  %1016 = vmatprep.subr.bf16.mxu0 %v2287_v33 }
  0x6b   : > { %1069 = vmatprep.subr.bf16.mxu1 %v2292_v34 }
  0x6d   : > { %1017 = vmatpush2.bf16.msra.mxu0 %v2295_v35 }
  0x6e   : > { %1070 = vmatpush2.bf16.msra.mxu1 %v2298_v36  ;;  %1018 = vmatprep.subr.bf16.mxu0 %v2303_v37 }
  0x6f   : > { %1071 = vmatprep.subr.bf16.mxu1 %v2308_v38 }
  0x71   : > { %1019 = vmatpush2.bf16.msra.mxu0 %v2311_v39 }
  0x72   : > { %1072 = vmatpush2.bf16.msra.mxu1 %v2316_v40  ;;  %1020 = vmatprep.subr.bf16.mxu0 %v2319_v41 }
  0x73   : > { %1073 = vmatprep.subr.bf16.mxu1 %v2324_v42 }
  0x75   : > { %1021 = vmatpush2.bf16.msra.mxu0 %v2327_v43 }
  0x76   : > { %1074 = vmatpush2.bf16.msra.mxu1 %v2330_v44  ;;  %1022 = vmatprep.subr.bf16.mxu0 %v2335_v45 }
  0x77   : > { %1075 = vmatprep.subr.bf16.mxu1 %v2340_v46 }
  0x79   : > { %1023 = vmatpush2.bf16.msra.mxu0 %v2343_v47 }
  0x7a   : > { %1076 = vmatpush2.bf16.msra.mxu1 %v2346_v48  ;;  %1024 = vmatprep.subr.bf16.mxu0 %v2349_v49 }
  0x7b   : > { %1077 = vmatprep.subr.bf16.mxu1 %v2355_v51 }
  0x7d   : > { %1025 = vmatpush2.bf16.msra.mxu0 %v2361_v53 }
  0x7e   : > { %1078 = vmatpush2.bf16.msra.mxu1 %v2364_v54  ;;  %1026 = vmatprep.subr.bf16.mxu0 %v2369_v55 }
  0x7f   : > { %1079 = vmatprep.subr.bf16.mxu1 %v2374_v56 }
  0x81   : > { %1027 = vmatpush2.bf16.msra.mxu0 %v2379_v57 }
  0x82   : > { %1080 = vmatpush2.bf16.msra.mxu1 %v2382_v58  ;;  %1028 = vmatprep.subr.bf16.mxu0 %v2387_v59  ;;  %v1817_v59 = vld [vmem:[%s2147_s10] ss:$16 sps:$4 sm:$0xff]  }
  0x83   : > { %1081 = vmatprep.subr.bf16.mxu1 %v2390_v60  ;;  %v1820_v60 = vld [vmem:[%s2147_s10 + $0x8] ss:$16 sps:$4 sm:$0xff]  }
  0x85   : > { %1029 = vmatpush2.bf16.msra.mxu0 %v2395_v61  ;;  %v1825_v61 = vld [vmem:[%s2147_s10 + $0x2c] ss:$16 sps:$4 sm:$0xff]  }
  0x86   : > { %1082 = vmatpush2.bf16.msra.mxu1 %v2398_v62  ;;  %1030 = vmatprep.subr.bf16.mxu0 %v2403_v63  ;;  %v1823_v62 = vld [vmem:[%s2147_s10 + $0x24] ss:$16 sps:$4 sm:$0xff]  }
  0x87   : > { %1083 = vmatprep.subr.bf16.mxu1 %v2406_v0 }
  0x89   : > { %1031 = vmatpush2.bf16.msra.mxu0 %v2411_v50 }
  0x8a   : > { %1084 = vmatpush2.bf16.msra.mxu1 %v2414_v52  ;;  %1154 = vmatprep.subr.bf16.mxu0 %v2163_v1  ;;  %v1827_v52 = vld [vmem:[%s2147_s10 + $0x20] ss:$16 sps:$4 sm:$0xff]   ;;  %v1828_v1 = vld [vmem:[%s2147_s10 + $0x28] ss:$16 sps:$4 sm:$0xff]  }
  0x8b   : > { %1207 = vmatprep.subr.bf16.mxu1 %v2166_v2  ;;  %v1831_v2 = vld [vmem:[%s2152_s22 + $0x4] ss:$16 sps:$4 sm:$0xff]  }
  0x8c   : > { %1033 = vmatmul.mubr.bf16.vlgmr.msra.gmra.mxu0 %v1817_v59 }
  0x8d   : > { %1086 = vmatmul.mubr.bf16.vlgmr.msra.gmra.mxu1 %v1820_v60  ;;  %1155 = vmatpush1.bf16.msra.mxu0 %v2170_v3  ;;  %v1834_v3 = vld [vmem:[%s2152_s22 + $0xc] ss:$16 sps:$4 sm:$0xff]  }
  0x8e   : > { %1208 = vmatpush1.bf16.msra.mxu1 %v2173_v4  ;;  %1156 = vmatprep.subr.bf16.mxu0 %v2177_v5  ;;  %v2593_v4 = vld [vmem:[#allocation4_spill] sm:$0xff]  ;;  %v2594_v5 = vld [vmem:[#allocation5_spill] sm:$0xff] }
  0x8f   : > { %1209 = vmatprep.subr.bf16.mxu1 %v2182_v6  ;;  %1042 = vmatprep.mubr.bf16.mxu0 %v1823_v62  ;;  %v2595_v6 = vld [vmem:[#allocation6_spill] sm:$0xff] }
  0x90   : > { %1095 = vmatprep.mubr.bf16.mxu1 %v1825_v61 }
  0x91   : > { %1157 = vmatpush1.bf16.msra.mxu0 %v2185_v7  ;;  %v2596_v7 = vld [vmem:[#allocation7_spill] sm:$0xff] }
  0x92   : > { %1210 = vmatpush1.bf16.msra.mxu1 %v2189_v8  ;;  %1158 = vmatprep.subr.bf16.mxu0 %v2193_v9  ;;  %v1829_v8 = vld [vmem:[%s2152_s22] ss:$16 sps:$4 sm:$0xff]   ;;  %v1832_v9 = vld [vmem:[%s2152_s22 + $0x8] ss:$16 sps:$4 sm:$0xff]  }
  0x93   : > { %1211 = vmatprep.subr.bf16.mxu1 %v2196_v10  ;;  %v2597_v10 = vld [vmem:[#allocation8_spill] sm:$0xff] }
  0x94   : > { %1043 = vmatmul.mubr.bf16.gmra.mxu0 %v1827_v52 }
  0x95   : > { %1096 = vmatmul.mubr.bf16.gmra.mxu1 %v1828_v1  ;;  %1159 = vmatpush1.bf16.msra.mxu0 %v2199_v11  ;;  %v1835_v11 = vld [vmem:[%s2152_s22 + $0x24] ss:$16 sps:$4 sm:$0xff]  }
  0x96   : > { %1212 = vmatpush1.bf16.msra.mxu1 %v2202_v12  ;;  %1160 = vmatprep.subr.bf16.mxu0 %v2207_v13  ;;  %v1837_v12 = vld [vmem:[%s2152_s22 + $0x2c] ss:$16 sps:$4 sm:$0xff]   ;;  %v1839_v13 = vld [vmem:[%s2152_s22 + $0x20] ss:$16 sps:$4 sm:$0xff]  }
  0x97   : > { %1213 = vmatprep.subr.bf16.mxu1 %v2212_v14  ;;  %1186 = vmatprep.mubr.bf16.mxu0 %v1831_v2  ;;  %v1840_v14 = vld [vmem:[%s2152_s22 + $0x28] ss:$16 sps:$4 sm:$0xff]  }
  0x98   : > { %1239 = vmatprep.mubr.bf16.mxu1 %v1834_v3 }
  0x99   : > { %1161 = vmatpush1.bf16.msra.mxu0 %v2215_v15 }
  0x9a   : > { %1214 = vmatpush1.bf16.msra.mxu1 %v2220_v16  ;;  %1162 = vmatprep.subr.bf16.mxu0 %v2223_v17 }
  0x9b   : > { %1215 = vmatprep.subr.bf16.mxu1 %v2228_v18 }
  0x9d   : > { %1163 = vmatpush1.bf16.msra.mxu0 %v2231_v19 }
  0x9e   : > { %1216 = vmatpush1.bf16.msra.mxu1 %v2234_v20  ;;  %1164 = vmatprep.subr.bf16.mxu0 %v2239_v21 }
  0x9f   : > { %1217 = vmatprep.subr.bf16.mxu1 %v2244_v22 }
  0xa1   : > { %1165 = vmatpush1.bf16.msra.mxu0 %v2247_v23 }
  0xa2   : > { %1218 = vmatpush1.bf16.msra.mxu1 %v2252_v24  ;;  %1166 = vmatprep.subr.bf16.mxu0 %v2255_v25 }
  0xa3   : > { %1219 = vmatprep.subr.bf16.mxu1 %v2260_v26 }
  0xa5   : > { %1167 = vmatpush1.bf16.msra.mxu0 %v2263_v27 }
  0xa6   : > { %1220 = vmatpush1.bf16.msra.mxu1 %v2266_v28  ;;  %1168 = vmatprep.subr.bf16.mxu0 %v2271_v29 }
  0xa7   : > { %1221 = vmatprep.subr.bf16.mxu1 %v2276_v30 }
  0xa9   : > { %1169 = vmatpush1.bf16.msra.mxu0 %v2279_v31 }
  0xaa   : > { %1222 = vmatpush1.bf16.msra.mxu1 %v2284_v32  ;;  %1170 = vmatprep.subr.bf16.mxu0 %v2287_v33 }
  0xab   : > { %1223 = vmatprep.subr.bf16.mxu1 %v2292_v34 }
  0xad   : > { %1171 = vmatpush2.bf16.msra.mxu0 %v2295_v35 }
  0xae   : > { %1224 = vmatpush2.bf16.msra.mxu1 %v2298_v36  ;;  %1172 = vmatprep.subr.bf16.mxu0 %v2303_v37 }
  0xaf   : > { %1225 = vmatprep.subr.bf16.mxu1 %v2308_v38 }
  0xb1   : > { %1173 = vmatpush2.bf16.msra.mxu0 %v2311_v39 }
  0xb2   : > { %1226 = vmatpush2.bf16.msra.mxu1 %v2316_v40  ;;  %1174 = vmatprep.subr.bf16.mxu0 %v2319_v41 }
  0xb3   : > { %1227 = vmatprep.subr.bf16.mxu1 %v2324_v42 }
  0xb5   : > { %1175 = vmatpush2.bf16.msra.mxu0 %v2327_v43 }
  0xb6   : > { %1228 = vmatpush2.bf16.msra.mxu1 %v2330_v44  ;;  %1176 = vmatprep.subr.bf16.mxu0 %v2335_v45 }
  0xb7   : > { %1229 = vmatprep.subr.bf16.mxu1 %v2340_v46 }
  0xb9   : > { %1177 = vmatpush2.bf16.msra.mxu0 %v2343_v47 }
  0xba   : > { %1230 = vmatpush2.bf16.msra.mxu1 %v2346_v48  ;;  %1178 = vmatprep.subr.bf16.mxu0 %v2349_v49 }
  0xbb   : > { %1231 = vmatprep.subr.bf16.mxu1 %v2355_v51 }
  0xbd   : > { %1179 = vmatpush2.bf16.msra.mxu0 %v2361_v53 }
  0xbe   : > { %1232 = vmatpush2.bf16.msra.mxu1 %v2364_v54  ;;  %1180 = vmatprep.subr.bf16.mxu0 %v2369_v55 }
  0xbf   : > { %1233 = vmatprep.subr.bf16.mxu1 %v2374_v56 }
  0xc1   : > { %1181 = vmatpush2.bf16.msra.mxu0 %v2379_v57 }
  0xc2   : > { %1234 = vmatpush2.bf16.msra.mxu1 %v2382_v58  ;;  %1182 = vmatprep.subr.bf16.mxu0 %v2593_v4 }
  0xc3   : > { %1235 = vmatprep.subr.bf16.mxu1 %v2594_v5 }
  0xc5   : > { %1183 = vmatpush2.bf16.msra.mxu0 %v2595_v6 }
  0xc6   : > { %1236 = vmatpush2.bf16.msra.mxu1 %v2596_v7  ;;  %1184 = vmatprep.subr.bf16.mxu0 %v2403_v63 }
  0xc7   : > { %1237 = vmatprep.subr.bf16.mxu1 %v2406_v0 }
  0xc9   : > { %1185 = vmatpush2.bf16.msra.mxu0 %v2411_v50 }
  0xca   : > { %1238 = vmatpush2.bf16.msra.mxu1 %v2597_v10 }
  0xcc   : > { %1187 = vmatmul.mubr.bf16.vlgmr.msra.gmra.mxu0 %v1829_v8 }
  0xcd   : > { %1240 = vmatmul.mubr.bf16.vlgmr.msra.gmra.mxu1 %v1832_v9  ;;  %1196 = vmatprep.mubr.bf16.mxu0 %v1835_v11 }
  0xce   : > { %1249 = vmatprep.mubr.bf16.mxu1 %v1837_v12 }
  0xd4   : > { %1197 = vmatmul.mubr.bf16.gmra.mxu0 %v1839_v13 }
  0xd5   : > { %1250 = vmatmul.mubr.bf16.gmra.mxu1 %v1840_v14 }
 0x14c   : > { %v1034_v15 = vpop.f32.mrf.mxu0 }
 0x14d   : > { %v1087_v16 = vpop.f32.mrf.mxu1 }
 0x14e   : > { %v1036_v17 = vpop.f32.mrf.mxu0  ;;  %v1088_v27 = vadd.f32 %v1087_v16, %v1034_v15 }
 0x14f   : > { %v1089_v18 = vpop.f32.mrf.mxu1 }
 0x150   : > { %v1038_v19 = vpop.f32.mrf.mxu0  ;;  %v1090_v28 = vadd.f32 %v1089_v18, %v1036_v17  ;;  %v1260_v35 = vmul.f32 %v1088_v27, %v1088_v27 }
 0x151   : > { %v1091_v20 = vpop.f32.mrf.mxu1 }
 0x152   : > { %v1040_v21 = vpop.f32.mrf.mxu0  ;;  %v1092_v34 = vadd.f32 %v1091_v20, %v1038_v19  ;;  %v1264_v36 = vmul.f32 %v1090_v28, %v1090_v28 }
 0x153   : > { %v1093_v22 = vpop.f32.mrf.mxu1 }
 0x154   : > { %v1044_v23 = vpop.f32.mrf.mxu0  ;;  %v1094_v31 = vadd.f32 %v1093_v22, %v1040_v21  ;;  %v1261_v42 = vmul.f32 %v1092_v34, %v1092_v34  ;;  %v1268_v45 = vadd.f32 %v1264_v36, %v1260_v35 }
 0x155   : > { %v1097_v24 = vpop.f32.mrf.mxu1 }
 0x156   : > { %v1046_v25 = vpop.f32.mrf.mxu0  ;;  %v1098_v32 = vadd.f32 %v1097_v24, %v1044_v23  ;;  %v1265_v39 = vmul.f32 %v1094_v31, %v1094_v31  ;;  %v2498_v58 = vadd.f32 1e-24, %v1268_v45 }
 0x157   : > { %v1099_v26 = vpop.f32.mrf.mxu1 }
 0x158   : > { %v1048_v29 = vpop.f32.mrf.mxu0  ;;  %v1100_v33 = vadd.f32 %v1099_v26, %v1046_v25  ;;  %v1262_v40 = vmul.f32 %v1098_v32, %v1098_v32  ;;  %v1269_v48 = vadd.f32 %v1265_v39, %v1261_v42  ;;  %1841 = vrsqrt.f32 %v2498_v58 }
 0x159   : > { %v1101_v30 = vpop.f32.mrf.mxu1  ;;  %vm1278_vm0 = vcmp.eq.f32.partialorder %v2498_v58, inf  ;;  %vm1280_vm2 = vcmp.eq.f32.partialorder %v2498_v58, 0.0  ;;  %v1281_v42 = vand.u32 2147483648, %v2498_v58 }
 0x15a   : > { %v1050_v37 = vpop.f32.mrf.mxu0  ;;  %v1266_v41 = vmul.f32 %v1100_v33, %v1100_v33  ;;  %v1102_v43 = vadd.f32 %v1101_v30, %v1048_v29  ;;  %v2500_v61 = vadd.f32 1e-24, %v1269_v48 }
 0x15b   : > { %v1103_v38 = vpop.f32.mrf.mxu1 }
 0x15c   : > { %v1104_v44 = vadd.f32 %v1103_v38, %v1050_v37  ;;  %v1270_v51 = vadd.f32 %v1266_v41, %v1262_v40  ;;  %v1263_v55 = vmul.f32 %v1102_v43, %v1102_v43  ;;  %1843 = vrsqrt.f32 %v2500_v61 }
 0x15d   : > { %vm1285_vm5 = vcmp.eq.f32.partialorder %v2500_v61, inf  ;;  %vm1287_vm6 = vcmp.eq.f32.partialorder %v2500_v61, 0.0  ;;  %v1288_v45 = vand.u32 2147483648, %v2500_v61 }
 0x15e   : > { %v1267_v56 = vmul.f32 %v1104_v44, %v1104_v44  ;;  %v2502_v0 = vadd.f32 1e-24, %v1270_v51 }
 0x160   : > { %v1271_v2 = vadd.f32 %v1267_v56, %v1263_v55  ;;  %1845 = vrsqrt.f32 %v2502_v0  ;;  %vm1292_vm3 = vcmp.eq.f32.partialorder %v2502_v0, inf  ;;  %vm1294_vm7 = vcmp.eq.f32.partialorder %v2502_v0, 0.0 }
 0x162   : > { %v2507_v12 = vadd.f32 1e-24, %v1271_v2 }
 0x164   : > { %vm1299_vm9 = vcmp.eq.f32.partialorder %v2507_v12, inf  ;;  %vm1301_vm10 = vcmp.eq.f32.partialorder %v2507_v12, 0.0 }
 0x165   : > { %v1842_v30 = vpop.eup %1841 }
 0x166   : > { %v1277_v35 = vmul.f32 %v1842_v30, %v2498_v58 }
 0x168   : > { %v1279_v48 = vsel %vm1278_vm0, %v2498_v58, %v1277_v35 }
 0x169   : > { %v1844_v31 = vpop.eup %1843 }
 0x16a   : > { %v1284_v37 = vmul.f32 %v1844_v31, %v2500_v61 }
 0x16d   : > { %v1846_v33 = vpop.eup %1845 }
 0x16e   : > { %v1291_v38 = vmul.f32 %v1846_v33, %v2502_v0 }
 0x170   : > { %v1293_v51 = vsel %vm1292_vm3, %v2502_v0, %v1291_v38 }
 0x18c   : > { %v1188_v46 = vpop.f32.mrf.mxu0 }
 0x18d   : > { %v1241_v47 = vpop.f32.mrf.mxu1 }
 0x18e   : > { %v1242_v49 = vadd.f32 %v1241_v47, %v1188_v46  ;;  %v1190_v53 = vpop.f32.mrf.mxu0  ;;  %v1295_v46 = vand.u32 2147483648, %v2502_v0 }
 0x18f   : > { %v1243_v54 = vpop.f32.mrf.mxu1 }
 0x190   : > { %v1244_v57 = vadd.f32 %v1243_v54, %v1190_v53  ;;  %v1192_v59 = vpop.f32.mrf.mxu0  ;;  %v1304_v62 = vmul.f32 %v1242_v49, %v1242_v49  ;;  %v1286_v49 = vsel %vm1285_vm5, %v2500_v61, %v1284_v37 }
 0x191   : > { %v1245_v60 = vpop.f32.mrf.mxu1 }
 0x192   : > { %v1308_v63 = vmul.f32 %v1244_v57, %v1244_v57  ;;  %v1246_v50 = vadd.f32 %v1245_v60, %v1192_v59  ;;  %v1194_v52 = vpop.f32.mrf.mxu0  ;;  %v1289_v59 = vsel %vm1287_vm6, %v1288_v45, %v1286_v49  ;;  %v1302_v60 = vand.u32 2147483648, %v2507_v12 }
 0x193   : > { %v1247_v1 = vpop.f32.mrf.mxu1  ;;  %v1353_v35 = vmul.f32 32768.0, %v1289_v59 }
 0x194   : > { %v1312_v3 = vadd.f32 %v1308_v63, %v1304_v62  ;;  %v1248_v4 = vadd.f32 %v1247_v1, %v1194_v52  ;;  %v1198_v5 = vpop.f32.mrf.mxu0  ;;  %v1305_v9 = vmul.f32 %v1246_v50, %v1246_v50  ;;  %v1282_v50 = vsel %vm1280_vm2, %v1281_v42, %v1279_v48 }
 0x195   : > { %v1251_v6 = vpop.f32.mrf.mxu1  ;;  %v1296_v52 = vsel %vm1294_vm7, %v1295_v46, %v1293_v51 }
 0x196   : > { %v1316_v7 = vadd.f32 1e-24, %v1312_v3  ;;  %v1309_v8 = vmul.f32 %v1248_v4, %v1248_v4  ;;  %v1200_v10 = vpop.f32.mrf.mxu0  ;;  %v1252_v13 = vadd.f32 %v1251_v6, %v1198_v5  ;;  %v1354_v45 = vmul.f32 32768.0, %v1296_v52 }
 0x197   : > { %v1253_v11 = vpop.f32.mrf.mxu1 }
 0x198   : > { %1847 = vrsqrt.f32 %v1316_v7  ;;  %v1313_v14 = vadd.f32 %v1309_v8, %v1305_v9  ;;  %v1254_v15 = vadd.f32 %v1253_v11, %v1200_v10  ;;  %v1202_v16 = vpop.f32.mrf.mxu0  ;;  %v1306_v23 = vmul.f32 %v1252_v13, %v1252_v13 }
 0x199   : > { %v1255_v17 = vpop.f32.mrf.mxu1  ;;  %1849 = vrsqrt.f32 %v2507_v12  ;;  %vm1322_vm1 = vcmp.eq.f32.partialorder %v1316_v7, inf  ;;  %v1325_v39 = vand.u32 2147483648, %v1316_v7  ;;  %vm1324_vm4 = vcmp.eq.f32.partialorder %v1316_v7, 0.0 }
 0x19a   : > { %v1256_v18 = vadd.f32 %v1255_v17, %v1202_v16  ;;  %v1317_v19 = vadd.f32 1e-24, %v1313_v14  ;;  %v1310_v20 = vmul.f32 %v1254_v15, %v1254_v15  ;;  %v1204_v21 = vpop.f32.mrf.mxu0 }
 0x19b   : > { %v1257_v22 = vpop.f32.mrf.mxu1 }
 0x19c   : > { %v1258_v24 = vadd.f32 %v1257_v22, %v1204_v21  ;;  %1851 = vrsqrt.f32 %v1317_v19  ;;  %v1314_v25 = vadd.f32 %v1310_v20, %v1306_v23  ;;  %v1307_v26 = vmul.f32 %v1256_v18, %v1256_v18 }
 0x19d   : > { %vm1329_vm8 = vcmp.eq.f32.partialorder %v1317_v19, inf  ;;  %v1332_v56 = vand.u32 2147483648, %v1317_v19  ;;  %vm1331_vm11 = vcmp.eq.f32.partialorder %v1317_v19, 0.0 }
 0x19e   : > { %v1311_v27 = vmul.f32 %v1258_v24, %v1258_v24  ;;  %v2510_v28 = vadd.f32 1e-24, %v1314_v25 }
 0x1a0   : > { %v1315_v29 = vadd.f32 %v1311_v27, %v1307_v26  ;;  %1853 = vrsqrt.f32 %v2510_v28  ;;  %vm1336_vm12 = vcmp.eq.f32.partialorder %v2510_v28, inf  ;;  %vm1338_vm13 = vcmp.eq.f32.partialorder %v2510_v28, 0.0 }
 0x1a2   : > { %v2513_v32 = vadd.f32 1e-24, %v1315_v29  ;;  %v1352_v29 = vmul.f32 32768.0, %v1282_v50 }
 0x1a4   : > { %1855 = vrsqrt.f32 %v2513_v32  ;;  %vm1343_vm14 = vcmp.eq.f32.partialorder %v2513_v32, inf  ;;  %v1346_v9 = vand.u32 2147483648, %v2513_v32  ;;  %vm1345_vm15 = vcmp.eq.f32.partialorder %v2513_v32, 0.0 }
 0x1a5   : > { %v1848_v34 = vpop.eup %1847 }
 0x1a6   : > { %v1321_v36 = vmul.f32 %v1848_v34, %v1316_v7  ;;  %v1850_v41 = vpop.eup %1849 }
 0x1a7   : > { %v1298_v54 = vmul.f32 %v1850_v41, %v2507_v12  ;;  %v1357_v41 = vadd.f32 1e-06, %v1353_v35 }
 0x1a8   : > { %v1323_v40 = vsel %vm1322_vm1, %v1316_v7, %v1321_v36  ;;  %v1339_v7 = vand.u32 2147483648, %v2510_v28 }
 0x1a9   : > { %v1326_v43 = vsel %vm1324_vm4, %v1325_v39, %v1323_v40  ;;  %v1852_v44 = vpop.eup %1851  ;;  %v1300_v3 = vsel %vm1299_vm9, %v2507_v12, %v1298_v54  ;;  %v1358_v54 = vadd.f32 1e-06, %v1354_v45 }
 0x1aa   : > { %v1360_v47 = vmul.f32 32768.0, %v1326_v43  ;;  %v1328_v53 = vmul.f32 %v1852_v44, %v1317_v19  ;;  %v1348_v4 = vsub.f32 %v1282_v50, %v1326_v43  ;;  %v1417_v10 = vmul.f32 %v1326_v43, %v1326_v43 }
 0x1ab   : > { %v1303_v18 = vsel %vm1301_vm10, %v1302_v60, %v1300_v3 }
 0x1ac   : > { %v1364_v55 = vadd.f32 1e-06, %v1360_v47  ;;  %v1330_v57 = vsel %vm1329_vm8, %v1317_v19, %v1328_v53  ;;  %v1389_v14 = vmul.f32 %v1348_v4, %v1348_v4  ;;  %v1355_v49 = vmul.f32 32768.0, %v1303_v18 }
 0x1ad   : > { %v1333_v62 = vsel %vm1331_vm11, %v1332_v56, %v1330_v57  ;;  %v1854_v63 = vpop.eup %1853 }
 0x1ae   : > { %1857 = vrcp.f32 %v1364_v55  ;;  %v1349_v1 = vsub.f32 %v1289_v59, %v1333_v62  ;;  %v1361_v2 = vmul.f32 32768.0, %v1333_v62  ;;  %v1335_v5 = vmul.f32 %v1854_v63, %v2510_v28  ;;  %v1416_v55 = vld [vmem:[#allocation2 + $0x2] sm:$0x1] }
 0x1af   : > { %v1418_v6 = vmul.f32 %v1333_v62, %v1333_v62  ;;  %v1388_v62 = vld [vmem:[#allocation2] sm:$0x1]  ;;  %v1359_v63 = vadd.f32 1e-06, %v1355_v49 }
 0x1b0   : > { %v1365_v61 = vadd.f32 1e-06, %v1361_v2  ;;  %v1390_v8 = vmul.f32 %v1349_v1, %v1349_v1  ;;  %v1337_v0 = vsel %vm1336_vm12, %v2510_v28, %v1335_v5 }
 0x1b1   : > { %v1856_v58 = vpop.eup %1855  ;;  %v1340_v11 = vsel %vm1338_vm13, %v1339_v7, %v1337_v0  ;;  %v1421_v19 = vadd.f32 %v1418_v6, %v1417_v10 }
 0x1b2   : > { %1859 = vrcp.f32 %v1365_v61  ;;  %v1342_v13 = vmul.f32 %v1856_v58, %v2513_v32  ;;  %v1350_v15 = vsub.f32 %v1296_v52, %v1340_v11  ;;  %v1362_v16 = vmul.f32 32768.0, %v1340_v11 }
 0x1b3   : > { %v1419_v17 = vmul.f32 %v1340_v11, %v1340_v11  ;;  %v1393_v21 = vadd.f32 %v1390_v8, %v1389_v14 }
 0x1b4   : > { %v1344_v20 = vsel %vm1343_vm14, %v2513_v32, %v1342_v13  ;;  %v1366_v22 = vadd.f32 1e-06, %v1362_v16  ;;  %v1391_v23 = vmul.f32 %v1350_v15, %v1350_v15  ;;  %v1356_v32 = vadd.f32 1e-06, %v1352_v29 }
 0x1b5   : > { %v1347_v24 = vsel %vm1345_vm15, %v1346_v9, %v1344_v20  ;;  %v1422_v25 = vadd.f32 %v1421_v19, %v1419_v17 }
 0x1b6   : > { %v1351_v26 = vsub.f32 %v1303_v18, %v1347_v24  ;;  %v1363_v27 = vmul.f32 32768.0, %v1347_v24  ;;  %v1420_v28 = vmul.f32 %v1347_v24, %v1347_v24  ;;  %1861 = vrcp.f32 %v1366_v22  ;;  %v1404_v22 = vld [vmem:[#allocation2 + $0x1] sm:$0x1] }
 0x1b7   : > { %v1394_v30 = vadd.f32 %v1393_v21, %v1391_v23 }
 0x1b8   : > { %v1367_v31 = vadd.f32 1e-06, %v1363_v27  ;;  %v1392_v33 = vmul.f32 %v1351_v26, %v1351_v26  ;;  %v1423_v12 = vadd.f32 %v1422_v25, %v1420_v28 }
 0x1ba   : > { %1863 = vrcp.f32 %v1367_v31  ;;  %v1395_v36 = vadd.f32 %v1394_v30, %v1392_v33  ;;  %v1424_v37 = vrot.slane %v1423_v12, 4 }
 0x1bb   : > { %v1858_v34 = vpop.eup %1857 }
 0x1bc   : > { %v1396_v38 = vrot.slane %v1395_v36, 4  ;;  %v1425_v39 = vadd.f32 %v1424_v37, %v1423_v12  ;;  %v1369_v40 = vmul.f32 %v1858_v34, %v1356_v32 }
 0x1be   : > { %v1397_v42 = vadd.f32 %v1396_v38, %v1395_v36  ;;  %v1426_v43 = vrot.slane %v1425_v39, 2  ;;  %1865 = vlog2.f32 %v1369_v40 }
 0x1bf   : > { %v1860_v44 = vpop.eup %1859 }
 0x1c0   : > { %v1371_v46 = vmul.f32 %v1860_v44, %v1357_v41  ;;  %v1398_v47 = vrot.slane %v1397_v42, 2  ;;  %v1427_v48 = vadd.f32 %v1426_v43, %v1425_v39 }
 0x1c2   : > { %1867 = vlog2.f32 %v1371_v46  ;;  %v1399_v51 = vadd.f32 %v1398_v47, %v1397_v42  ;;  %v1428_v53 = vrot.slane %v1427_v48, 1 }
 0x1c3   : > { %v1862_v56 = vpop.eup %1861 }
 0x1c4   : > { %v1400_v57 = vrot.slane %v1399_v51, 1  ;;  %v1429_v59 = vadd.f32 %v1428_v53, %v1427_v48  ;;  %v1373_v60 = vmul.f32 %v1862_v56, %v1358_v54 }
 0x1c6   : > { %v1401_v50 = vadd.f32 %v1400_v57, %v1399_v51  ;;  %v1430_v1 = vadd.f32 %v1429_v59, %v1416_v55  ;;  %1869 = vlog2.f32 %v1373_v60 }
 0x1c7   : > { %v1864_v2 = vpop.eup %1863 }
 0x1c8   : > { %v1375_v52 = vmul.f32 %v1864_v2, %v1359_v63  ;;  %v1402_v3 = vadd.f32 %v1401_v50, %v1388_v62  ;;  %1431 = vst [vmem:[#allocation2 + $0x2] sm:$0x1] %v1430_v1 }
 0x1ca   : > { %1871 = vlog2.f32 %v1375_v52  ;;  %1403 = vst [vmem:[#allocation2] sm:$0x1] %v1402_v3 }
 0x1cb   : > { %v1866_v4 = vpop.eup %1865 }
 0x1cc   : > { %v1377_v6 = vmul.f32 0.6931472, %v1866_v4 }
 0x1ce   : > { %v1384_v0 = vand.u32 2147483647, %v1377_v6 }
 0x1cf   : > { %v1868_v5 = vpop.eup %1867 }
 0x1d0   : > { %v1379_v61 = vmul.f32 0.6931472, %v1868_v5 }
 0x1d2   : > { %v1385_v58 = vand.u32 2147483647, %v1379_v61 }
 0x1d3   : > { %v1870_v7 = vpop.eup %1869 }
 0x1d4   : > { %v1381_v8 = vmul.f32 0.6931472, %v1870_v7  ;;  %v1405_v11 = vadd.f32 %v1385_v58, %v1384_v0 }
 0x1d6   : > { %v1386_v10 = vand.u32 2147483647, %v1381_v8 }
 0x1d7   : > { %v1872_v9 = vpop.eup %1871 }
 0x1d8   : > { %v1383_v13 = vmul.f32 0.6931472, %v1872_v9  ;;  %v1406_v14 = vadd.f32 %v1405_v11, %v1386_v10 }
 0x1da   : > { %v1387_v15 = vand.u32 2147483647, %v1383_v13 }
 0x1dc   : > { %v1407_v16 = vadd.f32 %v1406_v14, %v1387_v15 }
 0x1de   : > { %v1408_v17 = vrot.slane %v1407_v16, 4 }
 0x1e0   : > { %v1409_v18 = vadd.f32 %v1408_v17, %v1407_v16 }
 0x1e2   : > { %v1410_v19 = vrot.slane %v1409_v18, 2 }
 0x1e4   : > { %v1411_v20 = vadd.f32 %v1410_v19, %v1409_v18 }
 0x1e6   : > { %v1412_v21 = vrot.slane %v1411_v20, 1 }
 0x1e8   : > { %v1413_v23 = vadd.f32 %v1412_v21, %v1411_v20  ;;  %1435 = sbr.rel (%p1658_p12) target bundleno = 501 (0x1f5), region = 78 }
 0x1ea   : > { %v1414_v24 = vadd.f32 %v1413_v23, %v1404_v22 }
 0x1ec   : > { %1415 = vst [vmem:[#allocation2 + $0x1] sm:$0x1] %v1414_v24 }
 0x1f3   : > { %v1436_v25 = vld [vmem:[#allocation2] sm:$0xff] }
 0x1f4   : > { %1437 = vst [vmem:[%s2157_s26] sm:$0xff] %v1436_v25 }
 0x1f5 PF: > { %s13_s18 = sadd.s32 1, %s1927_s18   ;;  %s2598_s12 = smov %s1907_s13 }
 0x1f6   : > { %p10_p13 = scmp.ge.s32.totalorder %s13_s18, 8   ;;  %s2599_s13 = smov %s1999_s23 }
 0x1f7   : > { %s2600_s14 = smov %s1919_s16  ;;  %s2601_s15 = smov %s1923_s17 }
 0x1f8   : > { %s2602_s16 = smov %s2605_s19  ;;  %s2603_s17 = smov %s2609_s20 }
 0x1f9   :  { %12 = sbr.rel (!%p10_p13) target bundleno = 4 (0x4), region = 119 }

// kernel: calc_convergence_loss.10
= control target key start
LH: loop header
LB: loop body
LE: loop exit
PB: predicated region body
PF: predicated region fallthrough
CT: control target
= control target key end

     0   :  { %s2768_s12 = smov 0   ;;  %s2770_s13 = smov 0   ;;  %s3835_s0 = inlined_call_operand.vmem [shape: bf16[2,16,1024], index: 0, kind: input, shape index: {}]   ;;  %s3836_s1 = inlined_call_operand.vmem [shape: bf16[2,16,1024], index: 1, kind: input, shape index: {}]   ;;  %s3837_s2 = inlined_call_operand.vmem [shape: bf16[1024,1280], index: 2, kind: input, shape index: {}]   ;;  %s3838_s3 = inlined_call_operand.vmem [shape: f32[2,1,8,128], index: 3, kind: output, shape index: {}]  }
   0x1   :  { %s2772_s14 = smov 0   ;;  %s2774_s15 = smov 0  }
   0x2   :  { %s2776_s16 = smov 0   ;;  %s2778_s17 = smov 0  }
   0x3   :  { %s2780_s18 = smov 0  }
   0x4 LB: > { %s25_s19 = sadd.s32 1, %s2737_s16  ;;  %s32_s20 = sadd.s32 1, %s2741_s17  ;;  %s2745_s18 = sphi %s2780_s18, %s13_s18   ;;  %s2741_s17 = sphi %s2778_s17, %s4066_s17   ;;  %s2737_s16 = sphi %s2776_s16, %s4065_s16   ;;  %s2733_s15 = sphi %s2774_s15, %s4064_s15   ;;  %s2729_s14 = sphi %s2772_s14, %s4063_s14   ;;  %s2725_s13 = sphi %s2770_s13, %s4062_s13   ;;  %s2721_s12 = sphi %s2768_s12, %s4061_s12  }
   0x5   : > { %p26_p0 = scmp.ge.s32.totalorder %s25_s19, 5  ;;  %s95_s21 = sadd.s32 1, %s2725_s13 }
   0x6   : > { %p102_p1 = scmp.ne.s32.totalorder %s2725_s13, %s2721_s12  ;;  %p103_p2 = scmp.eq.s32.totalorder %s2745_s18, 0 }
   0x7   : > { %s4068_s19 = smov (%p26_p0, %s25_s19), 0  ;;  %s4070_s20 = smov (!%p26_p0, %s32_s20), %s2741_s17 }
   0x8   : > { %s92_s22 = ssub.s32 %s2737_s16, %s4068_s19  ;;  %p104_p3 = por %p103_p2, %p102_p1 }
   0x9   : > { %p34_p4 = scmp.ge.s32.totalorder %s4070_s20, 2  ;;  %p93_p5 = scmp.eq.s32.totalorder %s92_s22, 0 }
   0xa   : > { %p2264_p6 = scmp.ge.s32.totalorder %s2745_s18, 10 }
   0xb   : > { %s4072_s20 = smov (%p34_p4, %s4070_s20), 0 }
   0xc   : > { %s2817_s23 = scalar_select %p93_p5, %s2725_s13, %s95_s21  }
   0xd   : > { %156 = sbr.rel (%p2264_p6) target bundleno = 86 (0x56), region = 16 }
  0x12   : > { %187 = sbr.rel (!%p104_p3) target bundleno = 86 (0x56), region = 28  ;;  %s189_s24 = sand.u32 (%p104_p3), 1, %s2725_s13  }
  0x13   : > { %s2423_s25 = sshll.u32 (%p104_p3), %s2737_s16, 3  ;;  %s2265_s26 = sshll.u32 (%p104_p3), %s189_s24, 10 }
  0x14   : > { %s2825_s29 = scalar_lea.vmem (%p104_p3), %s3837_s2, %s2423_s25  ;;  %s2830_s30 = scalar_lea.vmem (%p104_p3), [#allocation3], %s2265_s26 }
  0x15   : > { %v477_v0 = vld [vmem:[%s2825_s29] sm:$0xff] (%p104_p3)  ;;  %v479_v1 = vld [vmem:[%s2825_s29 + $0x28] sm:$0xff] (%p104_p3)  ;;  %v481_v2 = vld [vmem:[%s2825_s29 + $0x50] sm:$0xff] (%p104_p3) }
  0x16   : > { %478 = vst [vmem:[%s2830_s30] sm:$0xff] (%p104_p3), %v477_v0  ;;  %480 = vst [vmem:[%s2830_s30 + $0x8] sm:$0xff] (%p104_p3), %v479_v1  ;;  %v483_v3 = vld [vmem:[%s2825_s29 + $0x78] sm:$0xff] (%p104_p3)  ;;  %v485_v4 = vld [vmem:[%s2825_s29 + $0xa0] sm:$0xff] (%p104_p3) }
  0x17   : > { %482 = vst [vmem:[%s2830_s30 + $0x10] sm:$0xff] %v481_v2  ;;  %v487_v5 = vld [vmem:[%s2825_s29 + $0xc8] sm:$0xff]  ;;  %484 = vst [vmem:[%s2830_s30 + $0x18] sm:$0xff] %v483_v3  ;;  %v489_v6 = vld [vmem:[%s2825_s29 + $0xf0] sm:$0xff] }
  0x18   : > { %486 = vst [vmem:[%s2830_s30 + $0x20] sm:$0xff] %v485_v4  ;;  %488 = vst [vmem:[%s2830_s30 + $0x28] sm:$0xff] %v487_v5  ;;  %v491_v7 = vld [vmem:[%s2825_s29 + $0x118] sm:$0xff]  ;;  %v493_v8 = vld [vmem:[%s2825_s29 + $0x140] sm:$0xff] }
  0x19   : > { %490 = vst [vmem:[%s2830_s30 + $0x30] sm:$0xff] %v489_v6  ;;  %492 = vst [vmem:[%s2830_s30 + $0x38] sm:$0xff] %v491_v7  ;;  %v495_v9 = vld [vmem:[%s2825_s29 + $0x168] sm:$0xff]  ;;  %v497_v10 = vld [vmem:[%s2825_s29 + $0x190] sm:$0xff] }
  0x1a   : > { %494 = vst [vmem:[%s2830_s30 + $0x40] sm:$0xff] %v493_v8  ;;  %v499_v11 = vld [vmem:[%s2825_s29 + $0x1b8] sm:$0xff]  ;;  %496 = vst [vmem:[%s2830_s30 + $0x48] sm:$0xff] %v495_v9  ;;  %v501_v12 = vld [vmem:[%s2825_s29 + $0x1e0] sm:$0xff] }
  0x1b   : > { %498 = vst [vmem:[%s2830_s30 + $0x50] sm:$0xff] %v497_v10  ;;  %500 = vst [vmem:[%s2830_s30 + $0x58] sm:$0xff] %v499_v11  ;;  %v503_v13 = vld [vmem:[%s2825_s29 + $0x208] sm:$0xff]  ;;  %v505_v14 = vld [vmem:[%s2825_s29 + $0x230] sm:$0xff] }
  0x1c   : > { %502 = vst [vmem:[%s2830_s30 + $0x60] sm:$0xff] %v501_v12  ;;  %504 = vst [vmem:[%s2830_s30 + $0x68] sm:$0xff] %v503_v13  ;;  %v507_v15 = vld [vmem:[%s2825_s29 + $0x258] sm:$0xff]  ;;  %v509_v16 = vld [vmem:[%s2825_s29 + $0x280] sm:$0xff] }
  0x1d   : > { %506 = vst [vmem:[%s2830_s30 + $0x70] sm:$0xff] %v505_v14  ;;  %v511_v17 = vld [vmem:[%s2825_s29 + $0x2a8] sm:$0xff]  ;;  %508 = vst [vmem:[%s2830_s30 + $0x78] sm:$0xff] %v507_v15  ;;  %v513_v18 = vld [vmem:[%s2825_s29 + $0x2d0] sm:$0xff] }
  0x1e   : > { %510 = vst [vmem:[%s2830_s30 + $0x80] sm:$0xff] %v509_v16  ;;  %512 = vst [vmem:[%s2830_s30 + $0x88] sm:$0xff] %v511_v17  ;;  %v515_v19 = vld [vmem:[%s2825_s29 + $0x2f8] sm:$0xff]  ;;  %v517_v20 = vld [vmem:[%s2825_s29 + $0x320] sm:$0xff] }
  0x1f   : > { %514 = vst [vmem:[%s2830_s30 + $0x90] sm:$0xff] %v513_v18  ;;  %516 = vst [vmem:[%s2830_s30 + $0x98] sm:$0xff] %v515_v19  ;;  %v519_v21 = vld [vmem:[%s2825_s29 + $0x348] sm:$0xff]  ;;  %v521_v22 = vld [vmem:[%s2825_s29 + $0x370] sm:$0xff] }
  0x20   : > { %518 = vst [vmem:[%s2830_s30 + $0xa0] sm:$0xff] %v517_v20  ;;  %v523_v23 = vld [vmem:[%s2825_s29 + $0x398] sm:$0xff]  ;;  %520 = vst [vmem:[%s2830_s30 + $0xa8] sm:$0xff] %v519_v21  ;;  %v525_v24 = vld [vmem:[%s2825_s29 + $0x3c0] sm:$0xff] }
  0x21   : > { %522 = vst [vmem:[%s2830_s30 + $0xb0] sm:$0xff] %v521_v22  ;;  %524 = vst [vmem:[%s2830_s30 + $0xb8] sm:$0xff] %v523_v23  ;;  %v527_v25 = vld [vmem:[%s2825_s29 + $0x3e8] sm:$0xff]  ;;  %v529_v26 = vld [vmem:[%s2825_s29 + $0x410] sm:$0xff] }
  0x22   : > { %526 = vst [vmem:[%s2830_s30 + $0xc0] sm:$0xff] %v525_v24  ;;  %528 = vst [vmem:[%s2830_s30 + $0xc8] sm:$0xff] %v527_v25  ;;  %v531_v27 = vld [vmem:[%s2825_s29 + $0x438] sm:$0xff]  ;;  %v533_v28 = vld [vmem:[%s2825_s29 + $0x460] sm:$0xff] }
  0x23   : > { %530 = vst [vmem:[%s2830_s30 + $0xd0] sm:$0xff] %v529_v26  ;;  %v535_v29 = vld [vmem:[%s2825_s29 + $0x488] sm:$0xff]  ;;  %532 = vst [vmem:[%s2830_s30 + $0xd8] sm:$0xff] %v531_v27  ;;  %v537_v30 = vld [vmem:[%s2825_s29 + $0x4b0] sm:$0xff] }
  0x24   : > { %534 = vst [vmem:[%s2830_s30 + $0xe0] sm:$0xff] %v533_v28  ;;  %536 = vst [vmem:[%s2830_s30 + $0xe8] sm:$0xff] %v535_v29  ;;  %v539_v31 = vld [vmem:[%s2825_s29 + $0x4d8] sm:$0xff]  ;;  %v541_v32 = vld [vmem:[%s2825_s29 + $0x500] sm:$0xff] }
  0x25   : > { %538 = vst [vmem:[%s2830_s30 + $0xf0] sm:$0xff] %v537_v30  ;;  %540 = vst [vmem:[%s2830_s30 + $0xf8] sm:$0xff] %v539_v31  ;;  %v543_v33 = vld [vmem:[%s2825_s29 + $0x528] sm:$0xff]  ;;  %v545_v34 = vld [vmem:[%s2825_s29 + $0x550] sm:$0xff] }
  0x26   : > { %542 = vst [vmem:[%s2830_s30 + $0x100] sm:$0xff] %v541_v32  ;;  %v547_v35 = vld [vmem:[%s2825_s29 + $0x578] sm:$0xff]  ;;  %544 = vst [vmem:[%s2830_s30 + $0x108] sm:$0xff] %v543_v33  ;;  %v549_v36 = vld [vmem:[%s2825_s29 + $0x5a0] sm:$0xff] }
  0x27   : > { %546 = vst [vmem:[%s2830_s30 + $0x110] sm:$0xff] %v545_v34  ;;  %548 = vst [vmem:[%s2830_s30 + $0x118] sm:$0xff] %v547_v35  ;;  %v551_v37 = vld [vmem:[%s2825_s29 + $0x5c8] sm:$0xff]  ;;  %v553_v38 = vld [vmem:[%s2825_s29 + $0x5f0] sm:$0xff] }
  0x28   : > { %550 = vst [vmem:[%s2830_s30 + $0x120] sm:$0xff] %v549_v36  ;;  %552 = vst [vmem:[%s2830_s30 + $0x128] sm:$0xff] %v551_v37  ;;  %v555_v39 = vld [vmem:[%s2825_s29 + $0x618] sm:$0xff]  ;;  %v557_v40 = vld [vmem:[%s2825_s29 + $0x640] sm:$0xff] }
  0x29   : > { %554 = vst [vmem:[%s2830_s30 + $0x130] sm:$0xff] %v553_v38  ;;  %v559_v41 = vld [vmem:[%s2825_s29 + $0x668] sm:$0xff]  ;;  %556 = vst [vmem:[%s2830_s30 + $0x138] sm:$0xff] %v555_v39  ;;  %v561_v42 = vld [vmem:[%s2825_s29 + $0x690] sm:$0xff] }
  0x2a   : > { %558 = vst [vmem:[%s2830_s30 + $0x140] sm:$0xff] %v557_v40  ;;  %560 = vst [vmem:[%s2830_s30 + $0x148] sm:$0xff] %v559_v41  ;;  %v563_v43 = vld [vmem:[%s2825_s29 + $0x6b8] sm:$0xff]  ;;  %v565_v44 = vld [vmem:[%s2825_s29 + $0x6e0] sm:$0xff] }
  0x2b   : > { %562 = vst [vmem:[%s2830_s30 + $0x150] sm:$0xff] %v561_v42  ;;  %564 = vst [vmem:[%s2830_s30 + $0x158] sm:$0xff] %v563_v43  ;;  %v567_v45 = vld [vmem:[%s2825_s29 + $0x708] sm:$0xff]  ;;  %v569_v46 = vld [vmem:[%s2825_s29 + $0x730] sm:$0xff] }
  0x2c   : > { %566 = vst [vmem:[%s2830_s30 + $0x160] sm:$0xff] %v565_v44  ;;  %v571_v47 = vld [vmem:[%s2825_s29 + $0x758] sm:$0xff]  ;;  %568 = vst [vmem:[%s2830_s30 + $0x168] sm:$0xff] %v567_v45  ;;  %v573_v48 = vld [vmem:[%s2825_s29 + $0x780] sm:$0xff] }
  0x2d   : > { %570 = vst [vmem:[%s2830_s30 + $0x170] sm:$0xff] %v569_v46  ;;  %572 = vst [vmem:[%s2830_s30 + $0x178] sm:$0xff] %v571_v47  ;;  %v575_v49 = vld [vmem:[%s2825_s29 + $0x7a8] sm:$0xff]  ;;  %v577_v50 = vld [vmem:[%s2825_s29 + $0x7d0] sm:$0xff] }
  0x2e   : > { %574 = vst [vmem:[%s2830_s30 + $0x180] sm:$0xff] %v573_v48  ;;  %576 = vst [vmem:[%s2830_s30 + $0x188] sm:$0xff] %v575_v49  ;;  %v579_v51 = vld [vmem:[%s2825_s29 + $0x7f8] sm:$0xff]  ;;  %v581_v52 = vld [vmem:[%s2825_s29 + $0x820] sm:$0xff] }
  0x2f   : > { %578 = vst [vmem:[%s2830_s30 + $0x190] sm:$0xff] %v577_v50  ;;  %v583_v53 = vld [vmem:[%s2825_s29 + $0x848] sm:$0xff]  ;;  %580 = vst [vmem:[%s2830_s30 + $0x198] sm:$0xff] %v579_v51  ;;  %v585_v54 = vld [vmem:[%s2825_s29 + $0x870] sm:$0xff] }
  0x30   : > { %582 = vst [vmem:[%s2830_s30 + $0x1a0] sm:$0xff] %v581_v52  ;;  %584 = vst [vmem:[%s2830_s30 + $0x1a8] sm:$0xff] %v583_v53  ;;  %v587_v55 = vld [vmem:[%s2825_s29 + $0x898] sm:$0xff]  ;;  %v589_v56 = vld [vmem:[%s2825_s29 + $0x8c0] sm:$0xff] }
  0x31   : > { %586 = vst [vmem:[%s2830_s30 + $0x1b0] sm:$0xff] %v585_v54  ;;  %588 = vst [vmem:[%s2830_s30 + $0x1b8] sm:$0xff] %v587_v55  ;;  %v591_v57 = vld [vmem:[%s2825_s29 + $0x8e8] sm:$0xff]  ;;  %v593_v58 = vld [vmem:[%s2825_s29 + $0x910] sm:$0xff] }
  0x32   : > { %590 = vst [vmem:[%s2830_s30 + $0x1c0] sm:$0xff] %v589_v56  ;;  %v595_v59 = vld [vmem:[%s2825_s29 + $0x938] sm:$0xff]  ;;  %592 = vst [vmem:[%s2830_s30 + $0x1c8] sm:$0xff] %v591_v57  ;;  %v597_v60 = vld [vmem:[%s2825_s29 + $0x960] sm:$0xff] }
  0x33   : > { %594 = vst [vmem:[%s2830_s30 + $0x1d0] sm:$0xff] %v593_v58  ;;  %596 = vst [vmem:[%s2830_s30 + $0x1d8] sm:$0xff] %v595_v59  ;;  %v599_v61 = vld [vmem:[%s2825_s29 + $0x988] sm:$0xff]  ;;  %v601_v62 = vld [vmem:[%s2825_s29 + $0x9b0] sm:$0xff] }
  0x34   : > { %598 = vst [vmem:[%s2830_s30 + $0x1e0] sm:$0xff] %v597_v60  ;;  %600 = vst [vmem:[%s2830_s30 + $0x1e8] sm:$0xff] %v599_v61  ;;  %v603_v63 = vld [vmem:[%s2825_s29 + $0x9d8] sm:$0xff]  ;;  %v605_v0 = vld [vmem:[%s2825_s29 + $0xa00] sm:$0xff] }
  0x35   : > { %602 = vst [vmem:[%s2830_s30 + $0x1f0] sm:$0xff] %v601_v62  ;;  %v607_v1 = vld [vmem:[%s2825_s29 + $0xa28] sm:$0xff]  ;;  %604 = vst [vmem:[%s2830_s30 + $0x1f8] sm:$0xff] %v603_v63  ;;  %v609_v2 = vld [vmem:[%s2825_s29 + $0xa50] sm:$0xff] }
  0x36   : > { %606 = vst [vmem:[%s2830_s30 + $0x200] sm:$0xff] %v605_v0  ;;  %608 = vst [vmem:[%s2830_s30 + $0x208] sm:$0xff] %v607_v1  ;;  %v611_v3 = vld [vmem:[%s2825_s29 + $0xa78] sm:$0xff]  ;;  %v613_v4 = vld [vmem:[%s2825_s29 + $0xaa0] sm:$0xff] }
  0x37   : > { %610 = vst [vmem:[%s2830_s30 + $0x210] sm:$0xff] %v609_v2  ;;  %612 = vst [vmem:[%s2830_s30 + $0x218] sm:$0xff] %v611_v3  ;;  %v615_v5 = vld [vmem:[%s2825_s29 + $0xac8] sm:$0xff]  ;;  %v617_v6 = vld [vmem:[%s2825_s29 + $0xaf0] sm:$0xff] }
  0x38   : > { %614 = vst [vmem:[%s2830_s30 + $0x220] sm:$0xff] %v613_v4  ;;  %v619_v7 = vld [vmem:[%s2825_s29 + $0xb18] sm:$0xff]  ;;  %616 = vst [vmem:[%s2830_s30 + $0x228] sm:$0xff] %v615_v5  ;;  %v621_v8 = vld [vmem:[%s2825_s29 + $0xb40] sm:$0xff] }
  0x39   : > { %618 = vst [vmem:[%s2830_s30 + $0x230] sm:$0xff] %v617_v6  ;;  %620 = vst [vmem:[%s2830_s30 + $0x238] sm:$0xff] %v619_v7  ;;  %v623_v9 = vld [vmem:[%s2825_s29 + $0xb68] sm:$0xff]  ;;  %v625_v10 = vld [vmem:[%s2825_s29 + $0xb90] sm:$0xff] }
  0x3a   : > { %622 = vst [vmem:[%s2830_s30 + $0x240] sm:$0xff] %v621_v8  ;;  %624 = vst [vmem:[%s2830_s30 + $0x248] sm:$0xff] %v623_v9  ;;  %v627_v11 = vld [vmem:[%s2825_s29 + $0xbb8] sm:$0xff]  ;;  %v629_v12 = vld [vmem:[%s2825_s29 + $0xbe0] sm:$0xff] }
  0x3b   : > { %626 = vst [vmem:[%s2830_s30 + $0x250] sm:$0xff] %v625_v10  ;;  %v631_v13 = vld [vmem:[%s2825_s29 + $0xc08] sm:$0xff]  ;;  %628 = vst [vmem:[%s2830_s30 + $0x258] sm:$0xff] %v627_v11  ;;  %v633_v14 = vld [vmem:[%s2825_s29 + $0xc30] sm:$0xff] }
  0x3c   : > { %630 = vst [vmem:[%s2830_s30 + $0x260] sm:$0xff] %v629_v12  ;;  %632 = vst [vmem:[%s2830_s30 + $0x268] sm:$0xff] %v631_v13  ;;  %v635_v15 = vld [vmem:[%s2825_s29 + $0xc58] sm:$0xff]  ;;  %v637_v16 = vld [vmem:[%s2825_s29 + $0xc80] sm:$0xff] }
  0x3d   : > { %634 = vst [vmem:[%s2830_s30 + $0x270] sm:$0xff] %v633_v14  ;;  %636 = vst [vmem:[%s2830_s30 + $0x278] sm:$0xff] %v635_v15  ;;  %v639_v17 = vld [vmem:[%s2825_s29 + $0xca8] sm:$0xff]  ;;  %v641_v18 = vld [vmem:[%s2825_s29 + $0xcd0] sm:$0xff] }
  0x3e   : > { %638 = vst [vmem:[%s2830_s30 + $0x280] sm:$0xff] %v637_v16  ;;  %v643_v19 = vld [vmem:[%s2825_s29 + $0xcf8] sm:$0xff]  ;;  %640 = vst [vmem:[%s2830_s30 + $0x288] sm:$0xff] %v639_v17  ;;  %v645_v20 = vld [vmem:[%s2825_s29 + $0xd20] sm:$0xff] }
  0x3f   : > { %642 = vst [vmem:[%s2830_s30 + $0x290] sm:$0xff] %v641_v18  ;;  %644 = vst [vmem:[%s2830_s30 + $0x298] sm:$0xff] %v643_v19  ;;  %v647_v21 = vld [vmem:[%s2825_s29 + $0xd48] sm:$0xff]  ;;  %v649_v22 = vld [vmem:[%s2825_s29 + $0xd70] sm:$0xff] }
  0x40   : > { %646 = vst [vmem:[%s2830_s30 + $0x2a0] sm:$0xff] %v645_v20  ;;  %648 = vst [vmem:[%s2830_s30 + $0x2a8] sm:$0xff] %v647_v21  ;;  %v651_v23 = vld [vmem:[%s2825_s29 + $0xd98] sm:$0xff]  ;;  %v653_v24 = vld [vmem:[%s2825_s29 + $0xdc0] sm:$0xff] }
  0x41   : > { %650 = vst [vmem:[%s2830_s30 + $0x2b0] sm:$0xff] %v649_v22  ;;  %v655_v25 = vld [vmem:[%s2825_s29 + $0xde8] sm:$0xff]  ;;  %652 = vst [vmem:[%s2830_s30 + $0x2b8] sm:$0xff] %v651_v23  ;;  %v657_v26 = vld [vmem:[%s2825_s29 + $0xe10] sm:$0xff] }
  0x42   : > { %654 = vst [vmem:[%s2830_s30 + $0x2c0] sm:$0xff] %v653_v24  ;;  %656 = vst [vmem:[%s2830_s30 + $0x2c8] sm:$0xff] %v655_v25  ;;  %v659_v27 = vld [vmem:[%s2825_s29 + $0xe38] sm:$0xff]  ;;  %v661_v28 = vld [vmem:[%s2825_s29 + $0xe60] sm:$0xff] }
  0x43   : > { %658 = vst [vmem:[%s2830_s30 + $0x2d0] sm:$0xff] %v657_v26  ;;  %660 = vst [vmem:[%s2830_s30 + $0x2d8] sm:$0xff] %v659_v27  ;;  %v663_v29 = vld [vmem:[%s2825_s29 + $0xe88] sm:$0xff]  ;;  %v665_v30 = vld [vmem:[%s2825_s29 + $0xeb0] sm:$0xff] }
  0x44   : > { %662 = vst [vmem:[%s2830_s30 + $0x2e0] sm:$0xff] %v661_v28  ;;  %v667_v31 = vld [vmem:[%s2825_s29 + $0xed8] sm:$0xff]  ;;  %664 = vst [vmem:[%s2830_s30 + $0x2e8] sm:$0xff] %v663_v29  ;;  %v669_v32 = vld [vmem:[%s2825_s29 + $0xf00] sm:$0xff] }
  0x45   : > { %666 = vst [vmem:[%s2830_s30 + $0x2f0] sm:$0xff] %v665_v30  ;;  %668 = vst [vmem:[%s2830_s30 + $0x2f8] sm:$0xff] %v667_v31  ;;  %v671_v33 = vld [vmem:[%s2825_s29 + $0xf28] sm:$0xff]  ;;  %v673_v34 = vld [vmem:[%s2825_s29 + $0xf50] sm:$0xff] }
  0x46   : > { %670 = vst [vmem:[%s2830_s30 + $0x300] sm:$0xff] %v669_v32  ;;  %672 = vst [vmem:[%s2830_s30 + $0x308] sm:$0xff] %v671_v33  ;;  %v675_v35 = vld [vmem:[%s2825_s29 + $0xf78] sm:$0xff]  ;;  %v677_v36 = vld [vmem:[%s2825_s29 + $0xfa0] sm:$0xff] }
  0x47   : > { %674 = vst [vmem:[%s2830_s30 + $0x310] sm:$0xff] %v673_v34  ;;  %v679_v37 = vld [vmem:[%s2825_s29 + $0xfc8] sm:$0xff]  ;;  %676 = vst [vmem:[%s2830_s30 + $0x318] sm:$0xff] %v675_v35  ;;  %v681_v38 = vld [vmem:[%s2825_s29 + $0xff0] sm:$0xff] }
  0x48   : > { %678 = vst [vmem:[%s2830_s30 + $0x320] sm:$0xff] %v677_v36  ;;  %680 = vst [vmem:[%s2830_s30 + $0x328] sm:$0xff] %v679_v37  ;;  %v683_v39 = vld [vmem:[%s2825_s29 + $0x1018] sm:$0xff]  ;;  %v685_v40 = vld [vmem:[%s2825_s29 + $0x1040] sm:$0xff] }
  0x49   : > { %682 = vst [vmem:[%s2830_s30 + $0x330] sm:$0xff] %v681_v38  ;;  %684 = vst [vmem:[%s2830_s30 + $0x338] sm:$0xff] %v683_v39  ;;  %v687_v41 = vld [vmem:[%s2825_s29 + $0x1068] sm:$0xff]  ;;  %v689_v42 = vld [vmem:[%s2825_s29 + $0x1090] sm:$0xff] }
  0x4a   : > { %686 = vst [vmem:[%s2830_s30 + $0x340] sm:$0xff] %v685_v40  ;;  %v691_v43 = vld [vmem:[%s2825_s29 + $0x10b8] sm:$0xff]  ;;  %688 = vst [vmem:[%s2830_s30 + $0x348] sm:$0xff] %v687_v41  ;;  %v693_v44 = vld [vmem:[%s2825_s29 + $0x10e0] sm:$0xff] }
  0x4b   : > { %690 = vst [vmem:[%s2830_s30 + $0x350] sm:$0xff] %v689_v42  ;;  %692 = vst [vmem:[%s2830_s30 + $0x358] sm:$0xff] %v691_v43  ;;  %v695_v45 = vld [vmem:[%s2825_s29 + $0x1108] sm:$0xff]  ;;  %v697_v46 = vld [vmem:[%s2825_s29 + $0x1130] sm:$0xff] }
  0x4c   : > { %694 = vst [vmem:[%s2830_s30 + $0x360] sm:$0xff] %v693_v44  ;;  %696 = vst [vmem:[%s2830_s30 + $0x368] sm:$0xff] %v695_v45  ;;  %v699_v47 = vld [vmem:[%s2825_s29 + $0x1158] sm:$0xff]  ;;  %v701_v48 = vld [vmem:[%s2825_s29 + $0x1180] sm:$0xff] }
  0x4d   : > { %698 = vst [vmem:[%s2830_s30 + $0x370] sm:$0xff] %v697_v46  ;;  %v703_v49 = vld [vmem:[%s2825_s29 + $0x11a8] sm:$0xff]  ;;  %700 = vst [vmem:[%s2830_s30 + $0x378] sm:$0xff] %v699_v47  ;;  %v705_v50 = vld [vmem:[%s2825_s29 + $0x11d0] sm:$0xff] }
  0x4e   : > { %702 = vst [vmem:[%s2830_s30 + $0x380] sm:$0xff] %v701_v48  ;;  %704 = vst [vmem:[%s2830_s30 + $0x388] sm:$0xff] %v703_v49  ;;  %v707_v51 = vld [vmem:[%s2825_s29 + $0x11f8] sm:$0xff]  ;;  %v709_v52 = vld [vmem:[%s2825_s29 + $0x1220] sm:$0xff] }
  0x4f   : > { %706 = vst [vmem:[%s2830_s30 + $0x390] sm:$0xff] %v705_v50  ;;  %708 = vst [vmem:[%s2830_s30 + $0x398] sm:$0xff] %v707_v51  ;;  %v711_v53 = vld [vmem:[%s2825_s29 + $0x1248] sm:$0xff]  ;;  %v713_v54 = vld [vmem:[%s2825_s29 + $0x1270] sm:$0xff] }
  0x50   : > { %710 = vst [vmem:[%s2830_s30 + $0x3a0] sm:$0xff] %v709_v52  ;;  %v715_v55 = vld [vmem:[%s2825_s29 + $0x1298] sm:$0xff]  ;;  %712 = vst [vmem:[%s2830_s30 + $0x3a8] sm:$0xff] %v711_v53  ;;  %v717_v56 = vld [vmem:[%s2825_s29 + $0x12c0] sm:$0xff] }
  0x51   : > { %714 = vst [vmem:[%s2830_s30 + $0x3b0] sm:$0xff] %v713_v54  ;;  %716 = vst [vmem:[%s2830_s30 + $0x3b8] sm:$0xff] %v715_v55  ;;  %v719_v57 = vld [vmem:[%s2825_s29 + $0x12e8] sm:$0xff]  ;;  %v721_v58 = vld [vmem:[%s2825_s29 + $0x1310] sm:$0xff] }
  0x52   : > { %718 = vst [vmem:[%s2830_s30 + $0x3c0] sm:$0xff] %v717_v56  ;;  %720 = vst [vmem:[%s2830_s30 + $0x3c8] sm:$0xff] %v719_v57  ;;  %v723_v59 = vld [vmem:[%s2825_s29 + $0x1338] sm:$0xff]  ;;  %v725_v60 = vld [vmem:[%s2825_s29 + $0x1360] sm:$0xff] }
  0x53   : > { %722 = vst [vmem:[%s2830_s30 + $0x3d0] sm:$0xff] %v721_v58  ;;  %v727_v61 = vld [vmem:[%s2825_s29 + $0x1388] sm:$0xff]  ;;  %724 = vst [vmem:[%s2830_s30 + $0x3d8] sm:$0xff] %v723_v59  ;;  %v729_v62 = vld [vmem:[%s2825_s29 + $0x13b0] sm:$0xff] }
  0x54   : > { %726 = vst [vmem:[%s2830_s30 + $0x3e0] sm:$0xff] %v725_v60  ;;  %728 = vst [vmem:[%s2830_s30 + $0x3e8] sm:$0xff] %v727_v61  ;;  %v731_v63 = vld [vmem:[%s2825_s29 + $0x13d8] sm:$0xff] }
  0x55   : > { %730 = vst [vmem:[%s2830_s30 + $0x3f0] sm:$0xff] %v729_v62  ;;  %732 = vst [vmem:[%s2830_s30 + $0x3f8] sm:$0xff] %v731_v63 }
  0x56 PF: > { %p2268_p7 = scmp.ge.s32.totalorder %s2745_s18, 1  ;;  %p737_p8 = scmp.lt.s32.totalorder %s2745_s18, 11 }
  0x58   : > { %p738_p9 = pnand %p2268_p7, %p737_p8 }
  0x5a   : > { %741 = sbr.rel (%p738_p9) target bundleno = 654 (0x28e), region = 66 }
  0x5f   : > { %s744_s4 = sand.u32 1, %s2721_s12   ;;  %p790_p10 = scmp.lt.s32.totalorder %s2733_s15, 1 }
  0x60   : > { %s2269_s5 = sshll.u32 %s744_s4, 10  ;;  %p2275_p11 = scmp.ne.s32.totalorder %s2729_s14, 0 }
  0x61   : > { %s4074_s15 = smov (!%p790_p10, %s2733_s15), 1  ;;  %s3105_s12 = scalar_lea.vmem [#allocation3], %s2269_s5 }
  0x62   : > { %s2424_s6 = sshll.u32 %s4074_s15, 6  ;;  %s2274_s7 = sshll.u32 %s4074_s15, 3 }
  0x63   : > { %s3093_s10 = scalar_lea.vmem %s3835_s0, %s2424_s6  ;;  %s3098_s22 = scalar_lea.vmem %s3836_s1, %s2424_s6 }
  0x64   : > { %s3103_s26 = scalar_lea.vmem %s3838_s3, %s2274_s7  ;;  %822 = sbr.rel (%p2275_p11) target bundleno = 107 (0x6b), region = 74 }
  0x69   : > { %v2747_v0 = vmov 0.0  }
  0x6a   : > { %823 = vst [vmem:[#allocation2] sm:$0xff] %v2747_v0 }
  0x6b PF: > { %v3109_v1 = vld [vmem:[%s3105_s12 + $0x74] ss:$8 sps:$4 sm:$0xff]   ;;  %v3116_v3 = vld [vmem:[%s3105_s12 + $0x70] ss:$8 sps:$4 sm:$0xff]   ;;  %v3123_v5 = vld [vmem:[%s3105_s12 + $0x64] ss:$8 sps:$4 sm:$0xff]  }
  0x6c   : > { %v3112_v2 = vld [vmem:[%s3105_s12 + $0x174] ss:$8 sps:$4 sm:$0xff]   ;;  %1640 = vmatprep.subr.bf16.mxu0 %v3109_v1  ;;  %v3119_v4 = vld [vmem:[%s3105_s12 + $0x170] ss:$8 sps:$4 sm:$0xff]   ;;  %v3128_v6 = vld [vmem:[%s3105_s12 + $0x164] ss:$8 sps:$4 sm:$0xff]  }
  0x6d   : > { %1683 = vmatprep.subr.bf16.mxu1 %v3112_v2  ;;  %1641 = vmatpush1.bf16.msra.mxu0 %v3116_v3  ;;  %v3131_v7 = vld [vmem:[%s3105_s12 + $0x60] ss:$8 sps:$4 sm:$0xff]   ;;  %v3139_v9 = vld [vmem:[%s3105_s12 + $0x54] ss:$8 sps:$4 sm:$0xff]   ;;  %v3145_v11 = vld [vmem:[%s3105_s12 + $0x50] ss:$8 sps:$4 sm:$0xff]  }
  0x6e   : > { %1684 = vmatpush1.bf16.msra.mxu1 %v3119_v4  ;;  %1642 = vmatprep.subr.bf16.mxu0 %v3123_v5  ;;  %v3135_v8 = vld [vmem:[%s3105_s12 + $0x160] ss:$8 sps:$4 sm:$0xff]   ;;  %v3142_v10 = vld [vmem:[%s3105_s12 + $0x154] ss:$8 sps:$4 sm:$0xff]   ;;  %v3148_v12 = vld [vmem:[%s3105_s12 + $0x150] ss:$8 sps:$4 sm:$0xff]  }
  0x6f   : > { %1685 = vmatprep.subr.bf16.mxu1 %v3128_v6  ;;  %v3153_v13 = vld [vmem:[%s3105_s12 + $0x44] ss:$8 sps:$4 sm:$0xff]   ;;  %v3161_v15 = vld [vmem:[%s3105_s12 + $0x40] ss:$8 sps:$4 sm:$0xff]   ;;  %v3169_v17 = vld [vmem:[%s3105_s12 + $0x34] ss:$8 sps:$4 sm:$0xff]  }
  0x70   : > { %v3158_v14 = vld [vmem:[%s3105_s12 + $0x144] ss:$8 sps:$4 sm:$0xff]   ;;  %v3166_v16 = vld [vmem:[%s3105_s12 + $0x140] ss:$8 sps:$4 sm:$0xff]   ;;  %v3174_v18 = vld [vmem:[%s3105_s12 + $0x134] ss:$8 sps:$4 sm:$0xff]  }
  0x71   : > { %1643 = vmatpush1.bf16.msra.mxu0 %v3131_v7  ;;  %v3177_v19 = vld [vmem:[%s3105_s12 + $0x30] ss:$8 sps:$4 sm:$0xff]   ;;  %v3185_v21 = vld [vmem:[%s3105_s12 + $0x24] ss:$8 sps:$4 sm:$0xff]   ;;  %v3193_v23 = vld [vmem:[%s3105_s12 + $0x20] ss:$8 sps:$4 sm:$0xff]  }
  0x72   : > { %1686 = vmatpush1.bf16.msra.mxu1 %v3135_v8  ;;  %1644 = vmatprep.subr.bf16.mxu0 %v3139_v9  ;;  %v3180_v20 = vld [vmem:[%s3105_s12 + $0x130] ss:$8 sps:$4 sm:$0xff]   ;;  %v3190_v22 = vld [vmem:[%s3105_s12 + $0x124] ss:$8 sps:$4 sm:$0xff]   ;;  %v3198_v24 = vld [vmem:[%s3105_s12 + $0x120] ss:$8 sps:$4 sm:$0xff]  }
  0x73   : > { %1687 = vmatprep.subr.bf16.mxu1 %v3142_v10  ;;  %v3201_v25 = vld [vmem:[%s3105_s12 + $0x14] ss:$8 sps:$4 sm:$0xff]   ;;  %v3209_v27 = vld [vmem:[%s3105_s12 + $0x10] ss:$8 sps:$4 sm:$0xff]   ;;  %v3217_v29 = vld [vmem:[%s3105_s12 + $0x4] ss:$8 sps:$4 sm:$0xff]  }
  0x74   : > { %v3206_v26 = vld [vmem:[%s3105_s12 + $0x114] ss:$8 sps:$4 sm:$0xff]   ;;  %v3212_v28 = vld [vmem:[%s3105_s12 + $0x110] ss:$8 sps:$4 sm:$0xff]   ;;  %v3222_v30 = vld [vmem:[%s3105_s12 + $0x104] ss:$8 sps:$4 sm:$0xff]  }
  0x75   : > { %1645 = vmatpush1.bf16.msra.mxu0 %v3145_v11  ;;  %v3225_v31 = vld [vmem:[%s3105_s12] ss:$8 sps:$4 sm:$0xff]   ;;  %v3233_v33 = vld [vmem:[%s3105_s12 + $0xf4] ss:$8 sps:$4 sm:$0xff]   ;;  %v3241_v35 = vld [vmem:[%s3105_s12 + $0xf0] ss:$8 sps:$4 sm:$0xff]  }
  0x76   : > { %1688 = vmatpush1.bf16.msra.mxu1 %v3148_v12  ;;  %1646 = vmatprep.subr.bf16.mxu0 %v3153_v13  ;;  %v3230_v32 = vld [vmem:[%s3105_s12 + $0x100] ss:$8 sps:$4 sm:$0xff]   ;;  %v3238_v34 = vld [vmem:[%s3105_s12 + $0x1f4] ss:$8 sps:$4 sm:$0xff]   ;;  %v3244_v36 = vld [vmem:[%s3105_s12 + $0x1f0] ss:$8 sps:$4 sm:$0xff]  }
  0x77   : > { %1689 = vmatprep.subr.bf16.mxu1 %v3158_v14  ;;  %v3249_v37 = vld [vmem:[%s3105_s12 + $0xe4] ss:$8 sps:$4 sm:$0xff]   ;;  %v3257_v39 = vld [vmem:[%s3105_s12 + $0xe0] ss:$8 sps:$4 sm:$0xff]   ;;  %v3265_v41 = vld [vmem:[%s3105_s12 + $0xd4] ss:$8 sps:$4 sm:$0xff]  }
  0x78   : > { %v3254_v38 = vld [vmem:[%s3105_s12 + $0x1e4] ss:$8 sps:$4 sm:$0xff]   ;;  %v3262_v40 = vld [vmem:[%s3105_s12 + $0x1e0] ss:$8 sps:$4 sm:$0xff]   ;;  %v3270_v42 = vld [vmem:[%s3105_s12 + $0x1d4] ss:$8 sps:$4 sm:$0xff]  }
  0x79   : > { %1647 = vmatpush1.bf16.msra.mxu0 %v3161_v15  ;;  %v3273_v43 = vld [vmem:[%s3105_s12 + $0xd0] ss:$8 sps:$4 sm:$0xff]   ;;  %v3281_v45 = vld [vmem:[%s3105_s12 + $0xc4] ss:$8 sps:$4 sm:$0xff]   ;;  %v3289_v47 = vld [vmem:[%s3105_s12 + $0xc0] ss:$8 sps:$4 sm:$0xff]  }
  0x7a   : > { %1690 = vmatpush1.bf16.msra.mxu1 %v3166_v16  ;;  %1648 = vmatprep.subr.bf16.mxu0 %v3169_v17  ;;  %v3276_v44 = vld [vmem:[%s3105_s12 + $0x1d0] ss:$8 sps:$4 sm:$0xff]   ;;  %v3286_v46 = vld [vmem:[%s3105_s12 + $0x1c4] ss:$8 sps:$4 sm:$0xff]   ;;  %v3292_v48 = vld [vmem:[%s3105_s12 + $0x1c0] ss:$8 sps:$4 sm:$0xff]  }
  0x7b   : > { %1691 = vmatprep.subr.bf16.mxu1 %v3174_v18  ;;  %v952_v49 = vld [vmem:[%s3093_s10] sm:$0xff]  ;;  %v953_v51 = vld [vmem:[%s3093_s10 + $0x8] sm:$0xff]  ;;  %p2420_p12 = scmp.ne.s32.totalorder %s2729_s14, 4 }
  0x7c   : > { %v956_v50 = vld [vmem:[%s3093_s10 + $0x20] sm:$0xff]  ;;  %v957_v52 = vld [vmem:[%s3093_s10 + $0x28] sm:$0xff] }
  0x7d   : > { %1649 = vmatpush1.bf16.msra.mxu0 %v3177_v19  ;;  %v3301_v53 = vld [vmem:[%s3105_s12 + $0xb4] ss:$8 sps:$4 sm:$0xff]   ;;  %v2277_v54 = vcombine.high %v952_v49, %v956_v50  ;;  %v2279_v56 = vcombine.high %v953_v51, %v957_v52  ;;  %v3309_v57 = vld [vmem:[%s3105_s12 + $0xb0] ss:$8 sps:$4 sm:$0xff]   ;;  %v3317_v59 = vld [vmem:[%s3105_s12 + $0xa4] ss:$8 sps:$4 sm:$0xff]  }
  0x7e   : > { %1692 = vmatpush1.bf16.msra.mxu1 %v3180_v20  ;;  %1650 = vmatprep.subr.bf16.mxu0 %v3185_v21  ;;  %3913 = vst [vmem:[#allocation4_spill] sm:$0xff] %v3301_v53  ;;  %v3306_v55 = vld [vmem:[%s3105_s12 + $0x1b4] ss:$8 sps:$4 sm:$0xff]   ;;  %3915 = vst [vmem:[#allocation6_spill] sm:$0xff] %v3309_v57  ;;  %v3312_v58 = vld [vmem:[%s3105_s12 + $0x1b0] ss:$8 sps:$4 sm:$0xff]  }
  0x7f   : > { %1693 = vmatprep.subr.bf16.mxu1 %v3190_v22  ;;  %3914 = vst [vmem:[#allocation5_spill] sm:$0xff] %v3306_v55  ;;  %1672 = vmatprep.mubr.bf16.mxu0 %v2277_v54  ;;  %3916 = vst [vmem:[#allocation7_spill] sm:$0xff] %v3312_v58  ;;  %v3322_v60 = vld [vmem:[%s3105_s12 + $0x1a4] ss:$8 sps:$4 sm:$0xff]   ;;  %v3325_v61 = vld [vmem:[%s3105_s12 + $0xa0] ss:$8 sps:$4 sm:$0xff]  }
  0x80   : > { %1715 = vmatprep.mubr.bf16.mxu1 %v2279_v56  ;;  %3917 = vst [vmem:[#allocation8_spill] sm:$0xff] %v3317_v59  ;;  %3918 = vst [vmem:[#allocation9_spill] sm:$0xff] %v3322_v60  ;;  %v3328_v62 = vld [vmem:[%s3105_s12 + $0x1a0] ss:$8 sps:$4 sm:$0xff]   ;;  %v3333_v63 = vld [vmem:[%s3105_s12 + $0x94] ss:$8 sps:$4 sm:$0xff]  }
  0x81   : > { %1651 = vmatpush1.bf16.msra.mxu0 %v3193_v23  ;;  %3919 = vst [vmem:[#allocation10_spill] sm:$0xff] %v3325_v61  ;;  %3920 = vst [vmem:[#allocation11_spill] sm:$0xff] %v3328_v62  ;;  %v3338_v0 = vld [vmem:[%s3105_s12 + $0x194] ss:$8 sps:$4 sm:$0xff]   ;;  %v3341_v54 = vld [vmem:[%s3105_s12 + $0x90] ss:$8 sps:$4 sm:$0xff]  }
  0x82   : > { %1694 = vmatpush1.bf16.msra.mxu1 %v3198_v24  ;;  %1652 = vmatprep.subr.bf16.mxu0 %v3201_v25  ;;  %3921 = vst [vmem:[#allocation12_spill] sm:$0xff] %v3333_v63  ;;  %3922 = vst [vmem:[#allocation13_spill] sm:$0xff] %v3338_v0  ;;  %v3344_v56 = vld [vmem:[%s3105_s12 + $0x190] ss:$8 sps:$4 sm:$0xff]  }
  0x83   : > { %1695 = vmatprep.subr.bf16.mxu1 %v3206_v26 }
  0x85   : > { %1653 = vmatpush1.bf16.msra.mxu0 %v3209_v27 }
  0x86   : > { %1696 = vmatpush1.bf16.msra.mxu1 %v3212_v28  ;;  %1654 = vmatprep.subr.bf16.mxu0 %v3217_v29 }
  0x87   : > { %1697 = vmatprep.subr.bf16.mxu1 %v3222_v30 }
  0x89   : > { %1655 = vmatpush1.bf16.msra.mxu0 %v3225_v31 }
  0x8a   : > { %1698 = vmatpush1.bf16.msra.mxu1 %v3230_v32  ;;  %1656 = vmatprep.subr.bf16.mxu0 %v3233_v33 }
  0x8b   : > { %1699 = vmatprep.subr.bf16.mxu1 %v3238_v34 }
  0x8d   : > { %1657 = vmatpush2.bf16.msra.mxu0 %v3241_v35 }
  0x8e   : > { %1700 = vmatpush2.bf16.msra.mxu1 %v3244_v36  ;;  %1658 = vmatprep.subr.bf16.mxu0 %v3249_v37 }
  0x8f   : > { %1701 = vmatprep.subr.bf16.mxu1 %v3254_v38 }
  0x91   : > { %1659 = vmatpush2.bf16.msra.mxu0 %v3257_v39 }
  0x92   : > { %1702 = vmatpush2.bf16.msra.mxu1 %v3262_v40  ;;  %1660 = vmatprep.subr.bf16.mxu0 %v3265_v41 }
  0x93   : > { %1703 = vmatprep.subr.bf16.mxu1 %v3270_v42 }
  0x95   : > { %1661 = vmatpush2.bf16.msra.mxu0 %v3273_v43 }
  0x96   : > { %1704 = vmatpush2.bf16.msra.mxu1 %v3276_v44  ;;  %1662 = vmatprep.subr.bf16.mxu0 %v3281_v45 }
  0x97   : > { %1705 = vmatprep.subr.bf16.mxu1 %v3286_v46 }
  0x99   : > { %1663 = vmatpush2.bf16.msra.mxu0 %v3289_v47 }
  0x9a   : > { %1706 = vmatpush2.bf16.msra.mxu1 %v3292_v48  ;;  %1664 = vmatprep.subr.bf16.mxu0 %v3301_v53  ;;  %v3376_v53 = vld [vmem:[%s3105_s12 + $0x370] ss:$8 sps:$4 sm:$0xff]  }
  0x9b   : > { %1707 = vmatprep.subr.bf16.mxu1 %v3306_v55  ;;  %v3373_v55 = vld [vmem:[%s3105_s12 + $0x270] ss:$8 sps:$4 sm:$0xff]   ;;  %3930 = vst [vmem:[#allocation21_spill] sm:$0xff] %v3376_v53 }
  0x9c   : > { %3929 = vst [vmem:[#allocation20_spill] sm:$0xff] %v3373_v55 }
  0x9d   : > { %1665 = vmatpush2.bf16.msra.mxu0 %v3309_v57  ;;  %v3360_v57 = vld [vmem:[%s3105_s12 + $0x180] ss:$8 sps:$4 sm:$0xff]  }
  0x9e   : > { %1708 = vmatpush2.bf16.msra.mxu1 %v3312_v58  ;;  %1666 = vmatprep.subr.bf16.mxu0 %v3317_v59  ;;  %v3349_v58 = vld [vmem:[%s3105_s12 + $0x84] ss:$8 sps:$4 sm:$0xff]   ;;  %v3357_v59 = vld [vmem:[%s3105_s12 + $0x80] ss:$8 sps:$4 sm:$0xff]   ;;  %3926 = vst [vmem:[#allocation17_spill] sm:$0xff] %v3360_v57 }
  0x9f   : > { %1709 = vmatprep.subr.bf16.mxu1 %v3322_v60  ;;  %3923 = vst [vmem:[#allocation14_spill] sm:$0xff] %v3349_v58  ;;  %v3354_v60 = vld [vmem:[%s3105_s12 + $0x184] ss:$8 sps:$4 sm:$0xff]   ;;  %3925 = vst [vmem:[#allocation16_spill] sm:$0xff] %v3357_v59 }
  0xa0   : > { %3924 = vst [vmem:[#allocation15_spill] sm:$0xff] %v3354_v60 }
  0xa1   : > { %1667 = vmatpush2.bf16.msra.mxu0 %v3325_v61  ;;  %v2278_v61 = vcombine.low %v953_v51, %v957_v52  ;;  %v3392_v51 = vld [vmem:[%s3105_s12 + $0x360] ss:$8 sps:$4 sm:$0xff]   ;;  %v3397_v52 = vld [vmem:[%s3105_s12 + $0x254] ss:$8 sps:$4 sm:$0xff]  }
  0xa2   : > { %1710 = vmatpush2.bf16.msra.mxu1 %v3328_v62  ;;  %1668 = vmatprep.subr.bf16.mxu0 %v3333_v63  ;;  %v3365_v62 = vld [vmem:[%s3105_s12 + $0x274] ss:$8 sps:$4 sm:$0xff]   ;;  %v2276_v63 = vcombine.low %v952_v49, %v956_v50  ;;  %v3386_v49 = vld [vmem:[%s3105_s12 + $0x364] ss:$8 sps:$4 sm:$0xff]   ;;  %v3389_v50 = vld [vmem:[%s3105_s12 + $0x260] ss:$8 sps:$4 sm:$0xff]  }
  0xa3   : > { %1711 = vmatprep.subr.bf16.mxu1 %v3338_v0  ;;  %3927 = vst [vmem:[#allocation18_spill] sm:$0xff] %v3365_v62  ;;  %v3370_v0 = vld [vmem:[%s3105_s12 + $0x374] ss:$8 sps:$4 sm:$0xff]   ;;  %3932 = vst [vmem:[#allocation23_spill] sm:$0xff] %v3386_v49 }
  0xa4   : > { %3928 = vst [vmem:[#allocation19_spill] sm:$0xff] %v3370_v0  ;;  %3933 = vst [vmem:[#allocation24_spill] sm:$0xff] %v3389_v50 }
  0xa5   : > { %1669 = vmatpush2.bf16.msra.mxu0 %v3341_v54  ;;  %3934 = vst [vmem:[#allocation25_spill] sm:$0xff] %v3392_v51  ;;  %3935 = vst [vmem:[#allocation26_spill] sm:$0xff] %v3397_v52 }
  0xa6   : > { %1712 = vmatpush2.bf16.msra.mxu1 %v3344_v56  ;;  %1670 = vmatprep.subr.bf16.mxu0 %v3349_v58  ;;  %v3381_v58 = vld [vmem:[%s3105_s12 + $0x264] ss:$8 sps:$4 sm:$0xff]  }
  0xa7   : > { %1713 = vmatprep.subr.bf16.mxu1 %v3354_v60  ;;  %3931 = vst [vmem:[#allocation22_spill] sm:$0xff] %v3381_v58  ;;  %v3646_v60 = vld [vmem:[%s3098_s22 + $0x20] sm:$0xff] }
  0xa9   : > { %1671 = vmatpush2.bf16.msra.mxu0 %v3357_v59  ;;  %v3511_v59 = vld [vmem:[%s3105_s12 + $0x2f4] ss:$8 sps:$4 sm:$0xff]  }
  0xaa   : > { %1714 = vmatpush2.bf16.msra.mxu1 %v3360_v57  ;;  %1726 = vmatprep.subr.bf16.mxu0 %v3365_v62  ;;  %v3475_v62 = vld [vmem:[%s3093_s10 + $0x18] sm:$0xff]  ;;  %v3493_v57 = vld [vmem:[%s3105_s12 + $0x204] ss:$8 sps:$4 sm:$0xff]   ;;  %3959 = vst [vmem:[#allocation50_spill] sm:$0xff] %v3511_v59 }
  0xab   : > { %1769 = vmatprep.subr.bf16.mxu1 %v3370_v0  ;;  %v3408_v0 = vld [vmem:[%s3105_s12 + $0x350] ss:$8 sps:$4 sm:$0xff]   ;;  %3955 = vst [vmem:[#allocation46_spill] sm:$0xff] %v3493_v57 }
  0xac   : > { %1673 = vmatmul.mubr.bf16.vlgmr.msra.gmra.mxu0 %v2276_v63  ;;  %v3402_v63 = vld [vmem:[%s3105_s12 + $0x354] ss:$8 sps:$4 sm:$0xff]   ;;  %3938 = vst [vmem:[#allocation29_spill] sm:$0xff] %v3408_v0 }
  0xad   : > { %1716 = vmatmul.mubr.bf16.vlgmr.msra.gmra.mxu1 %v2278_v61  ;;  %1727 = vmatpush1.bf16.msra.mxu0 %v3373_v55  ;;  %3936 = vst [vmem:[#allocation27_spill] sm:$0xff] %v3402_v63  ;;  %v3405_v61 = vld [vmem:[%s3105_s12 + $0x250] ss:$8 sps:$4 sm:$0xff]   ;;  %v3424_v55 = vld [vmem:[%s3105_s12 + $0x340] ss:$8 sps:$4 sm:$0xff]  }
  0xae   : > { %1770 = vmatpush1.bf16.msra.mxu1 %v3376_v53  ;;  %1728 = vmatprep.subr.bf16.mxu0 %v3381_v58  ;;  %3937 = vst [vmem:[#allocation28_spill] sm:$0xff] %v3405_v61  ;;  %v3413_v53 = vld [vmem:[%s3105_s12 + $0x244] ss:$8 sps:$4 sm:$0xff]   ;;  %v3421_v58 = vld [vmem:[%s3105_s12 + $0x240] ss:$8 sps:$4 sm:$0xff]   ;;  %3942 = vst [vmem:[#allocation33_spill] sm:$0xff] %v3424_v55 }
  0xaf   : > { %1771 = vmatprep.subr.bf16.mxu1 %v3386_v49  ;;  %3939 = vst [vmem:[#allocation30_spill] sm:$0xff] %v3413_v53  ;;  %v3418_v49 = vld [vmem:[%s3105_s12 + $0x344] ss:$8 sps:$4 sm:$0xff]   ;;  %3941 = vst [vmem:[#allocation32_spill] sm:$0xff] %v3421_v58 }
  0xb0   : > { %3940 = vst [vmem:[#allocation31_spill] sm:$0xff] %v3418_v49 }
  0xb1   : > { %1729 = vmatpush1.bf16.msra.mxu0 %v3389_v50  ;;  %v3440_v50 = vld [vmem:[%s3105_s12 + $0x330] ss:$8 sps:$4 sm:$0xff]  }
  0xb2   : > { %1772 = vmatpush1.bf16.msra.mxu1 %v3392_v51  ;;  %1730 = vmatprep.subr.bf16.mxu0 %v3397_v52  ;;  %v3429_v51 = vld [vmem:[%s3105_s12 + $0x234] ss:$8 sps:$4 sm:$0xff]   ;;  %v3437_v52 = vld [vmem:[%s3105_s12 + $0x230] ss:$8 sps:$4 sm:$0xff]   ;;  %3946 = vst [vmem:[#allocation37_spill] sm:$0xff] %v3440_v50 }
  0xb3   : > { %1773 = vmatprep.subr.bf16.mxu1 %v3402_v63  ;;  %3943 = vst [vmem:[#allocation34_spill] sm:$0xff] %v3429_v51  ;;  %v3434_v63 = vld [vmem:[%s3105_s12 + $0x334] ss:$8 sps:$4 sm:$0xff]   ;;  %3945 = vst [vmem:[#allocation36_spill] sm:$0xff] %v3437_v52 }
  0xb4   : > { %3944 = vst [vmem:[#allocation35_spill] sm:$0xff] %v3434_v63 }
  0xb5   : > { %1731 = vmatpush1.bf16.msra.mxu0 %v3405_v61  ;;  %v3456_v61 = vld [vmem:[%s3105_s12 + $0x320] ss:$8 sps:$4 sm:$0xff]  }
  0xb6   : > { %1774 = vmatpush1.bf16.msra.mxu1 %v3408_v0  ;;  %1732 = vmatprep.subr.bf16.mxu0 %v3413_v53  ;;  %v3445_v0 = vld [vmem:[%s3105_s12 + $0x224] ss:$8 sps:$4 sm:$0xff]   ;;  %v3453_v53 = vld [vmem:[%s3105_s12 + $0x220] ss:$8 sps:$4 sm:$0xff]   ;;  %3950 = vst [vmem:[#allocation41_spill] sm:$0xff] %v3456_v61 }
  0xb7   : > { %1775 = vmatprep.subr.bf16.mxu1 %v3418_v49  ;;  %3947 = vst [vmem:[#allocation38_spill] sm:$0xff] %v3445_v0  ;;  %v3450_v49 = vld [vmem:[%s3105_s12 + $0x324] ss:$8 sps:$4 sm:$0xff]   ;;  %3949 = vst [vmem:[#allocation40_spill] sm:$0xff] %v3453_v53 }
  0xb8   : > { %3948 = vst [vmem:[#allocation39_spill] sm:$0xff] %v3450_v49 }
  0xb9   : > { %1733 = vmatpush1.bf16.msra.mxu0 %v3421_v58  ;;  %v3472_v58 = vld [vmem:[%s3093_s10 + $0x30] sm:$0xff] }
  0xba   : > { %1776 = vmatpush1.bf16.msra.mxu1 %v3424_v55  ;;  %1734 = vmatprep.subr.bf16.mxu0 %v3429_v51  ;;  %v3461_v55 = vld [vmem:[%s3105_s12 + $0x214] ss:$8 sps:$4 sm:$0xff]   ;;  %v3469_v51 = vld [vmem:[%s3093_s10 + $0x10] sm:$0xff] }
  0xbb   : > { %1777 = vmatprep.subr.bf16.mxu1 %v3434_v63  ;;  %3951 = vst [vmem:[#allocation42_spill] sm:$0xff] %v3461_v55  ;;  %v3466_v63 = vld [vmem:[%s3105_s12 + $0x314] ss:$8 sps:$4 sm:$0xff]  }
  0xbc   : > { %3952 = vst [vmem:[#allocation43_spill] sm:$0xff] %v3466_v63 }
  0xbd   : > { %1735 = vmatpush1.bf16.msra.mxu0 %v3437_v52  ;;  %v3478_v52 = vld [vmem:[%s3093_s10 + $0x38] sm:$0xff] }
  0xbe   : > { %1778 = vmatpush1.bf16.msra.mxu1 %v3440_v50  ;;  %1736 = vmatprep.subr.bf16.mxu0 %v3445_v0  ;;  %v3483_v50 = vld [vmem:[%s3105_s12 + $0x210] ss:$8 sps:$4 sm:$0xff]   ;;  %v2281_v0 = vcombine.high %v3469_v51, %v3472_v58 }
  0xbf   : > { %1779 = vmatprep.subr.bf16.mxu1 %v3450_v49  ;;  %3953 = vst [vmem:[#allocation44_spill] sm:$0xff] %v3483_v50  ;;  %v3486_v49 = vld [vmem:[%s3105_s12 + $0x310] ss:$8 sps:$4 sm:$0xff]  }
  0xc0   : > { %3954 = vst [vmem:[#allocation45_spill] sm:$0xff] %v3486_v49  ;;  %1758 = vmatprep.mubr.bf16.mxu0 %v2281_v0  ;;  %v3514_v0 = vld [vmem:[%s3105_s12 + $0x3f4] ss:$8 sps:$4 sm:$0xff]  }
  0xc1   : > { %1737 = vmatpush1.bf16.msra.mxu0 %v3453_v53  ;;  %v3496_v53 = vld [vmem:[%s3105_s12 + $0x304] ss:$8 sps:$4 sm:$0xff]   ;;  %3960 = vst [vmem:[#allocation51_spill] sm:$0xff] %v3514_v0 }
  0xc2   : > { %1780 = vmatpush1.bf16.msra.mxu1 %v3456_v61  ;;  %1738 = vmatprep.subr.bf16.mxu0 %v3461_v55  ;;  %3956 = vst [vmem:[#allocation47_spill] sm:$0xff] %v3496_v53  ;;  %v2283_v61 = vcombine.high %v3475_v62, %v3478_v52  ;;  %v3503_v55 = vld [vmem:[%s3105_s12 + $0x200] ss:$8 sps:$4 sm:$0xff]  }
  0xc3   : > { %1781 = vmatprep.subr.bf16.mxu1 %v3466_v63  ;;  %3957 = vst [vmem:[#allocation48_spill] sm:$0xff] %v3503_v55  ;;  %v3506_v63 = vld [vmem:[%s3105_s12 + $0x300] ss:$8 sps:$4 sm:$0xff]  }
  0xc4   : > { %1801 = vmatprep.mubr.bf16.mxu1 %v2283_v61  ;;  %3958 = vst [vmem:[#allocation49_spill] sm:$0xff] %v3506_v63  ;;  %v3519_v61 = vld [vmem:[%s3105_s12 + $0x2f0] ss:$8 sps:$4 sm:$0xff]  }
  0xc5   : > { %1739 = vmatpush1.bf16.msra.mxu0 %v3483_v50  ;;  %3961 = vst [vmem:[#allocation52_spill] sm:$0xff] %v3519_v61  ;;  %v3639_v50 = vld [vmem:[%s3098_s22] sm:$0xff] }
  0xc6   : > { %1782 = vmatpush1.bf16.msra.mxu1 %v3486_v49  ;;  %1740 = vmatprep.subr.bf16.mxu0 %v3493_v57  ;;  %v3522_v49 = vld [vmem:[%s3105_s12 + $0x3f0] ss:$8 sps:$4 sm:$0xff]   ;;  %v3530_v57 = vld [vmem:[%s3105_s12 + $0x3e4] ss:$8 sps:$4 sm:$0xff]  }
  0xc7   : > { %1783 = vmatprep.subr.bf16.mxu1 %v3496_v53  ;;  %3962 = vst [vmem:[#allocation53_spill] sm:$0xff] %v3522_v49  ;;  %v3527_v53 = vld [vmem:[%s3105_s12 + $0x2e4] ss:$8 sps:$4 sm:$0xff]   ;;  %3964 = vst [vmem:[#allocation55_spill] sm:$0xff] %v3530_v57 }
  0xc8   : > { %3963 = vst [vmem:[#allocation54_spill] sm:$0xff] %v3527_v53 }
  0xc9   : > { %1741 = vmatpush1.bf16.msra.mxu0 %v3503_v55  ;;  %v3538_v55 = vld [vmem:[%s3105_s12 + $0x3e0] ss:$8 sps:$4 sm:$0xff]  }
  0xca   : > { %1784 = vmatpush1.bf16.msra.mxu1 %v3506_v63  ;;  %1742 = vmatprep.subr.bf16.mxu0 %v3511_v59  ;;  %v3535_v63 = vld [vmem:[%s3105_s12 + $0x2e0] ss:$8 sps:$4 sm:$0xff]   ;;  %3966 = vst [vmem:[#allocation57_spill] sm:$0xff] %v3538_v55  ;;  %v3546_v59 = vld [vmem:[%s3105_s12 + $0x3d4] ss:$8 sps:$4 sm:$0xff]  }
  0xcb   : > { %1785 = vmatprep.subr.bf16.mxu1 %v3514_v0  ;;  %3965 = vst [vmem:[#allocation56_spill] sm:$0xff] %v3535_v63  ;;  %v3543_v0 = vld [vmem:[%s3105_s12 + $0x2d4] ss:$8 sps:$4 sm:$0xff]   ;;  %3968 = vst [vmem:[#allocation59_spill] sm:$0xff] %v3546_v59 }
  0xcc   : > { %3967 = vst [vmem:[#allocation58_spill] sm:$0xff] %v3543_v0 }
  0xcd   : > { %1743 = vmatpush2.bf16.msra.mxu0 %v3519_v61  ;;  %v3554_v61 = vld [vmem:[%s3105_s12 + $0x3d0] ss:$8 sps:$4 sm:$0xff]  }
  0xce   : > { %1786 = vmatpush2.bf16.msra.mxu1 %v3522_v49  ;;  %1744 = vmatprep.subr.bf16.mxu0 %v3527_v53  ;;  %v3551_v49 = vld [vmem:[%s3105_s12 + $0x2d0] ss:$8 sps:$4 sm:$0xff]   ;;  %3970 = vst [vmem:[#allocation61_spill] sm:$0xff] %v3554_v61  ;;  %v3562_v53 = vld [vmem:[%s3105_s12 + $0x3c4] ss:$8 sps:$4 sm:$0xff]  }
  0xcf   : > { %1787 = vmatprep.subr.bf16.mxu1 %v3530_v57  ;;  %3969 = vst [vmem:[#allocation60_spill] sm:$0xff] %v3551_v49  ;;  %v3559_v57 = vld [vmem:[%s3105_s12 + $0x2c4] ss:$8 sps:$4 sm:$0xff]   ;;  %3972 = vst [vmem:[#allocation63_spill] sm:$0xff] %v3562_v53 }
  0xd0   : > { %3971 = vst [vmem:[#allocation62_spill] sm:$0xff] %v3559_v57 }
  0xd1   : > { %1745 = vmatpush2.bf16.msra.mxu0 %v3535_v63  ;;  %v3570_v63 = vld [vmem:[%s3105_s12 + $0x3c0] ss:$8 sps:$4 sm:$0xff]  }
  0xd2   : > { %1788 = vmatpush2.bf16.msra.mxu1 %v3538_v55  ;;  %1746 = vmatprep.subr.bf16.mxu0 %v3543_v0  ;;  %v3567_v55 = vld [vmem:[%s3105_s12 + $0x2c0] ss:$8 sps:$4 sm:$0xff]   ;;  %3974 = vst [vmem:[#allocation65_spill] sm:$0xff] %v3570_v63  ;;  %v3578_v0 = vld [vmem:[%s3105_s12 + $0x3b4] ss:$8 sps:$4 sm:$0xff]  }
  0xd3   : > { %1789 = vmatprep.subr.bf16.mxu1 %v3546_v59  ;;  %3973 = vst [vmem:[#allocation64_spill] sm:$0xff] %v3567_v55  ;;  %v3575_v59 = vld [vmem:[%s3105_s12 + $0x2b4] ss:$8 sps:$4 sm:$0xff]   ;;  %3976 = vst [vmem:[#allocation67_spill] sm:$0xff] %v3578_v0 }
  0xd4   : > { %3975 = vst [vmem:[#allocation66_spill] sm:$0xff] %v3575_v59 }
  0xd5   : > { %1747 = vmatpush2.bf16.msra.mxu0 %v3551_v49  ;;  %v3586_v49 = vld [vmem:[%s3105_s12 + $0x3b0] ss:$8 sps:$4 sm:$0xff]  }
  0xd6   : > { %1790 = vmatpush2.bf16.msra.mxu1 %v3554_v61  ;;  %1748 = vmatprep.subr.bf16.mxu0 %v3559_v57  ;;  %v3583_v61 = vld [vmem:[%s3105_s12 + $0x2b0] ss:$8 sps:$4 sm:$0xff]   ;;  %3978 = vst [vmem:[#allocation69_spill] sm:$0xff] %v3586_v49  ;;  %v3594_v57 = vld [vmem:[%s3105_s12 + $0x3a4] ss:$8 sps:$4 sm:$0xff]  }
  0xd7   : > { %1791 = vmatprep.subr.bf16.mxu1 %v3562_v53  ;;  %3977 = vst [vmem:[#allocation68_spill] sm:$0xff] %v3583_v61  ;;  %v3591_v53 = vld [vmem:[%s3105_s12 + $0x2a4] ss:$8 sps:$4 sm:$0xff]   ;;  %3980 = vst [vmem:[#allocation71_spill] sm:$0xff] %v3594_v57 }
  0xd8   : > { %3979 = vst [vmem:[#allocation70_spill] sm:$0xff] %v3591_v53 }
  0xd9   : > { %1749 = vmatpush2.bf16.msra.mxu0 %v3567_v55  ;;  %v3602_v55 = vld [vmem:[%s3105_s12 + $0x3a0] ss:$8 sps:$4 sm:$0xff]  }
  0xda   : > { %1792 = vmatpush2.bf16.msra.mxu1 %v3570_v63  ;;  %1750 = vmatprep.subr.bf16.mxu0 %v3575_v59  ;;  %v3599_v63 = vld [vmem:[%s3105_s12 + $0x2a0] ss:$8 sps:$4 sm:$0xff]   ;;  %3982 = vst [vmem:[#allocation73_spill] sm:$0xff] %v3602_v55  ;;  %v3610_v59 = vld [vmem:[%s3105_s12 + $0x394] ss:$8 sps:$4 sm:$0xff]  }
  0xdb   : > { %1793 = vmatprep.subr.bf16.mxu1 %v3578_v0  ;;  %3981 = vst [vmem:[#allocation72_spill] sm:$0xff] %v3599_v63  ;;  %v3607_v0 = vld [vmem:[%s3105_s12 + $0x294] ss:$8 sps:$4 sm:$0xff]   ;;  %3984 = vst [vmem:[#allocation75_spill] sm:$0xff] %v3610_v59 }
  0xdc   : > { %3983 = vst [vmem:[#allocation74_spill] sm:$0xff] %v3607_v0 }
  0xdd   : > { %1751 = vmatpush2.bf16.msra.mxu0 %v3583_v61  ;;  %v3618_v61 = vld [vmem:[%s3105_s12 + $0x390] ss:$8 sps:$4 sm:$0xff]  }
  0xde   : > { %1794 = vmatpush2.bf16.msra.mxu1 %v3586_v49  ;;  %1752 = vmatprep.subr.bf16.mxu0 %v3591_v53  ;;  %v3615_v49 = vld [vmem:[%s3105_s12 + $0x290] ss:$8 sps:$4 sm:$0xff]   ;;  %3986 = vst [vmem:[#allocation77_spill] sm:$0xff] %v3618_v61  ;;  %v3626_v53 = vld [vmem:[%s3105_s12 + $0x384] ss:$8 sps:$4 sm:$0xff]  }
  0xdf   : > { %1795 = vmatprep.subr.bf16.mxu1 %v3594_v57  ;;  %3985 = vst [vmem:[#allocation76_spill] sm:$0xff] %v3615_v49  ;;  %v3623_v57 = vld [vmem:[%s3105_s12 + $0x284] ss:$8 sps:$4 sm:$0xff]  }
  0xe1   : > { %1753 = vmatpush2.bf16.msra.mxu0 %v3599_v63  ;;  %v3634_v63 = vld [vmem:[%s3105_s12 + $0x380] ss:$8 sps:$4 sm:$0xff]  }
  0xe2   : > { %1796 = vmatpush2.bf16.msra.mxu1 %v3602_v55  ;;  %1754 = vmatprep.subr.bf16.mxu0 %v3607_v0  ;;  %v3631_v55 = vld [vmem:[%s3105_s12 + $0x280] ss:$8 sps:$4 sm:$0xff]   ;;  %v2282_v0 = vcombine.low %v3475_v62, %v3478_v52  ;;  %v4034_v52 = vld [vmem:[#allocation51_spill] sm:$0xff] }
  0xe3   : > { %1797 = vmatprep.subr.bf16.mxu1 %v3610_v59  ;;  %v2280_v59 = vcombine.low %v3469_v51, %v3472_v58  ;;  %v2413_v58 = vcombine.high %v3639_v50, %v3646_v60  ;;  %v4033_v51 = vld [vmem:[#allocation50_spill] sm:$0xff] }
  0xe5   : > { %1755 = vmatpush2.bf16.msra.mxu0 %v3615_v49  ;;  %v3649_v49 = vld [vmem:[%s3098_s22 + $0x8] sm:$0xff] }
  0xe6   : > { %1798 = vmatpush2.bf16.msra.mxu1 %v3618_v61  ;;  %1756 = vmatprep.subr.bf16.mxu0 %v3623_v57  ;;  %v3652_v61 = vld [vmem:[%s3098_s22 + $0x28] sm:$0xff] }
  0xe7   : > { %1799 = vmatprep.subr.bf16.mxu1 %v3626_v53  ;;  %v2415_v62 = vcombine.high %v3649_v49, %v3652_v61 }
  0xe9   : > { %1757 = vmatpush2.bf16.msra.mxu0 %v3631_v55 }
  0xea   : > { %1800 = vmatpush2.bf16.msra.mxu1 %v3634_v63  ;;  %1860 = vmatprep.subr.bf16.mxu0 %v3109_v1  ;;  %v3987_v1 = vld [vmem:[#allocation4_spill] sm:$0xff] }
  0xeb   : > { %1903 = vmatprep.subr.bf16.mxu1 %v3112_v2  ;;  %v3988_v2 = vld [vmem:[#allocation5_spill] sm:$0xff] }
  0xec   : > { %1759 = vmatmul.mubr.bf16.vlgmr.msra.gmra.mxu0 %v2280_v59  ;;  %v4027_v59 = vld [vmem:[#allocation44_spill] sm:$0xff] }
  0xed   : > { %1802 = vmatmul.mubr.bf16.vlgmr.msra.gmra.mxu1 %v2282_v0  ;;  %1861 = vmatpush1.bf16.msra.mxu0 %v3116_v3  ;;  %v3989_v3 = vld [vmem:[#allocation6_spill] sm:$0xff]  ;;  %v4035_v0 = vld [vmem:[#allocation52_spill] sm:$0xff] }
  0xee   : > { %1904 = vmatpush1.bf16.msra.mxu1 %v3119_v4  ;;  %1862 = vmatprep.subr.bf16.mxu0 %v3123_v5  ;;  %v3990_v4 = vld [vmem:[#allocation7_spill] sm:$0xff]  ;;  %v3991_v5 = vld [vmem:[#allocation8_spill] sm:$0xff] }
  0xef   : > { %1905 = vmatprep.subr.bf16.mxu1 %v3128_v6  ;;  %1892 = vmatprep.mubr.bf16.mxu0 %v2413_v58  ;;  %v3992_v6 = vld [vmem:[#allocation9_spill] sm:$0xff]  ;;  %v4037_v58 = vld [vmem:[#allocation54_spill] sm:$0xff] }
  0xf0   : > { %1935 = vmatprep.mubr.bf16.mxu1 %v2415_v62  ;;  %v4038_v62 = vld [vmem:[#allocation55_spill] sm:$0xff] }
  0xf1   : > { %1863 = vmatpush1.bf16.msra.mxu0 %v3131_v7  ;;  %v3993_v7 = vld [vmem:[#allocation10_spill] sm:$0xff] }
  0xf2   : > { %1906 = vmatpush1.bf16.msra.mxu1 %v3135_v8  ;;  %1864 = vmatprep.subr.bf16.mxu0 %v3139_v9  ;;  %v3994_v8 = vld [vmem:[#allocation11_spill] sm:$0xff]  ;;  %v3995_v9 = vld [vmem:[#allocation12_spill] sm:$0xff] }
  0xf3   : > { %1907 = vmatprep.subr.bf16.mxu1 %v3142_v10  ;;  %v3996_v10 = vld [vmem:[#allocation13_spill] sm:$0xff] }
  0xf5   : > { %1865 = vmatpush1.bf16.msra.mxu0 %v3145_v11  ;;  %v3997_v11 = vld [vmem:[#allocation14_spill] sm:$0xff] }
  0xf6   : > { %1908 = vmatpush1.bf16.msra.mxu1 %v3148_v12  ;;  %1866 = vmatprep.subr.bf16.mxu0 %v3153_v13  ;;  %v3998_v12 = vld [vmem:[#allocation15_spill] sm:$0xff]  ;;  %v3723_v13 = vld [vmem:[%s3098_s22 + $0x10] sm:$0xff] }
  0xf7   : > { %1909 = vmatprep.subr.bf16.mxu1 %v3158_v14  ;;  %v2412_v14 = vcombine.low %v3639_v50, %v3646_v60  ;;  %v4028_v60 = vld [vmem:[#allocation45_spill] sm:$0xff] }
  0xf8   : > { %v4032_v50 = vld [vmem:[#allocation49_spill] sm:$0xff] }
  0xf9   : > { %1867 = vmatpush1.bf16.msra.mxu0 %v3161_v15  ;;  %v2414_v15 = vcombine.low %v3649_v49, %v3652_v61  ;;  %v4031_v49 = vld [vmem:[#allocation48_spill] sm:$0xff]  ;;  %v4036_v61 = vld [vmem:[#allocation53_spill] sm:$0xff] }
  0xfa   : > { %1910 = vmatpush1.bf16.msra.mxu1 %v3166_v16  ;;  %1868 = vmatprep.subr.bf16.mxu0 %v3169_v17  ;;  %v3730_v16 = vld [vmem:[%s3098_s22 + $0x30] sm:$0xff]  ;;  %v3733_v17 = vld [vmem:[%s3098_s22 + $0x18] sm:$0xff] }
  0xfb   : > { %1911 = vmatprep.subr.bf16.mxu1 %v3174_v18  ;;  %v3736_v18 = vld [vmem:[%s3098_s22 + $0x38] sm:$0xff] }
  0xfd   : > { %1869 = vmatpush1.bf16.msra.mxu0 %v3177_v19  ;;  %v3999_v19 = vld [vmem:[#allocation16_spill] sm:$0xff] }
  0xfe   : > { %1912 = vmatpush1.bf16.msra.mxu1 %v3180_v20  ;;  %1870 = vmatprep.subr.bf16.mxu0 %v3185_v21  ;;  %v4000_v20 = vld [vmem:[#allocation17_spill] sm:$0xff]  ;;  %v4001_v21 = vld [vmem:[#allocation18_spill] sm:$0xff] }
  0xff   : > { %1913 = vmatprep.subr.bf16.mxu1 %v3190_v22  ;;  %v4002_v22 = vld [vmem:[#allocation19_spill] sm:$0xff] }
 0x101   : > { %1871 = vmatpush1.bf16.msra.mxu0 %v3193_v23  ;;  %v2417_v23 = vcombine.high %v3723_v13, %v3730_v16 }
 0x102   : > { %1914 = vmatpush1.bf16.msra.mxu1 %v3198_v24  ;;  %1872 = vmatprep.subr.bf16.mxu0 %v3201_v25  ;;  %v2419_v24 = vcombine.high %v3733_v17, %v3736_v18  ;;  %v4003_v25 = vld [vmem:[#allocation20_spill] sm:$0xff] }
 0x103   : > { %1915 = vmatprep.subr.bf16.mxu1 %v3206_v26  ;;  %v4004_v26 = vld [vmem:[#allocation21_spill] sm:$0xff] }
 0x105   : > { %1873 = vmatpush1.bf16.msra.mxu0 %v3209_v27  ;;  %v4005_v27 = vld [vmem:[#allocation22_spill] sm:$0xff] }
 0x106   : > { %1916 = vmatpush1.bf16.msra.mxu1 %v3212_v28  ;;  %1874 = vmatprep.subr.bf16.mxu0 %v3217_v29  ;;  %v4006_v28 = vld [vmem:[#allocation23_spill] sm:$0xff]  ;;  %v4007_v29 = vld [vmem:[#allocation24_spill] sm:$0xff] }
 0x107   : > { %1917 = vmatprep.subr.bf16.mxu1 %v3222_v30  ;;  %v4008_v30 = vld [vmem:[#allocation25_spill] sm:$0xff] }
 0x109   : > { %1875 = vmatpush1.bf16.msra.mxu0 %v3225_v31  ;;  %v4009_v31 = vld [vmem:[#allocation26_spill] sm:$0xff] }
 0x10a   : > { %1918 = vmatpush1.bf16.msra.mxu1 %v3230_v32  ;;  %1876 = vmatprep.subr.bf16.mxu0 %v3233_v33  ;;  %v4010_v32 = vld [vmem:[#allocation27_spill] sm:$0xff]  ;;  %v4011_v33 = vld [vmem:[#allocation28_spill] sm:$0xff] }
 0x10b   : > { %1919 = vmatprep.subr.bf16.mxu1 %v3238_v34  ;;  %v4012_v34 = vld [vmem:[#allocation29_spill] sm:$0xff] }
 0x10d   : > { %1877 = vmatpush2.bf16.msra.mxu0 %v3241_v35  ;;  %v4013_v35 = vld [vmem:[#allocation30_spill] sm:$0xff] }
 0x10e   : > { %1920 = vmatpush2.bf16.msra.mxu1 %v3244_v36  ;;  %1878 = vmatprep.subr.bf16.mxu0 %v3249_v37  ;;  %v4014_v36 = vld [vmem:[#allocation31_spill] sm:$0xff]  ;;  %v4015_v37 = vld [vmem:[#allocation32_spill] sm:$0xff] }
 0x10f   : > { %1921 = vmatprep.subr.bf16.mxu1 %v3254_v38  ;;  %v4016_v38 = vld [vmem:[#allocation33_spill] sm:$0xff] }
 0x111   : > { %1879 = vmatpush2.bf16.msra.mxu0 %v3257_v39  ;;  %v4017_v39 = vld [vmem:[#allocation34_spill] sm:$0xff] }
 0x112   : > { %1922 = vmatpush2.bf16.msra.mxu1 %v3262_v40  ;;  %1880 = vmatprep.subr.bf16.mxu0 %v3265_v41  ;;  %v4018_v40 = vld [vmem:[#allocation35_spill] sm:$0xff]  ;;  %v4019_v41 = vld [vmem:[#allocation36_spill] sm:$0xff] }
 0x113   : > { %1923 = vmatprep.subr.bf16.mxu1 %v3270_v42  ;;  %v4020_v42 = vld [vmem:[#allocation37_spill] sm:$0xff] }
 0x115   : > { %1881 = vmatpush2.bf16.msra.mxu0 %v3273_v43  ;;  %v4021_v43 = vld [vmem:[#allocation38_spill] sm:$0xff] }
 0x116   : > { %1924 = vmatpush2.bf16.msra.mxu1 %v3276_v44  ;;  %1882 = vmatprep.subr.bf16.mxu0 %v3281_v45  ;;  %v4022_v44 = vld [vmem:[#allocation39_spill] sm:$0xff]  ;;  %v4023_v45 = vld [vmem:[#allocation40_spill] sm:$0xff] }
 0x117   : > { %1925 = vmatprep.subr.bf16.mxu1 %v3286_v46  ;;  %v4024_v46 = vld [vmem:[#allocation41_spill] sm:$0xff] }
 0x119   : > { %1883 = vmatpush2.bf16.msra.mxu0 %v3289_v47  ;;  %v4025_v47 = vld [vmem:[#allocation42_spill] sm:$0xff] }
 0x11a   : > { %1926 = vmatpush2.bf16.msra.mxu1 %v3292_v48  ;;  %1884 = vmatprep.subr.bf16.mxu0 %v3987_v1  ;;  %v4026_v48 = vld [vmem:[#allocation43_spill] sm:$0xff]  ;;  %v4039_v1 = vld [vmem:[#allocation56_spill] sm:$0xff] }
 0x11b   : > { %1927 = vmatprep.subr.bf16.mxu1 %v3988_v2  ;;  %v4040_v2 = vld [vmem:[#allocation57_spill] sm:$0xff] }
 0x11d   : > { %1885 = vmatpush2.bf16.msra.mxu0 %v3989_v3  ;;  %v4041_v3 = vld [vmem:[#allocation58_spill] sm:$0xff] }
 0x11e   : > { %1928 = vmatpush2.bf16.msra.mxu1 %v3990_v4  ;;  %1886 = vmatprep.subr.bf16.mxu0 %v3991_v5  ;;  %v4042_v4 = vld [vmem:[#allocation59_spill] sm:$0xff]  ;;  %v4043_v5 = vld [vmem:[#allocation60_spill] sm:$0xff] }
 0x11f   : > { %1929 = vmatprep.subr.bf16.mxu1 %v3992_v6  ;;  %v4044_v6 = vld [vmem:[#allocation61_spill] sm:$0xff] }
 0x121   : > { %1887 = vmatpush2.bf16.msra.mxu0 %v3993_v7  ;;  %v4045_v7 = vld [vmem:[#allocation62_spill] sm:$0xff] }
 0x122   : > { %1930 = vmatpush2.bf16.msra.mxu1 %v3994_v8  ;;  %1888 = vmatprep.subr.bf16.mxu0 %v3995_v9  ;;  %v4046_v8 = vld [vmem:[#allocation63_spill] sm:$0xff]  ;;  %v4047_v9 = vld [vmem:[#allocation64_spill] sm:$0xff] }
 0x123   : > { %1931 = vmatprep.subr.bf16.mxu1 %v3996_v10  ;;  %v4048_v10 = vld [vmem:[#allocation65_spill] sm:$0xff] }
 0x125   : > { %1889 = vmatpush2.bf16.msra.mxu0 %v3341_v54  ;;  %v4029_v54 = vld [vmem:[#allocation46_spill] sm:$0xff] }
 0x126   : > { %1932 = vmatpush2.bf16.msra.mxu1 %v3344_v56  ;;  %1890 = vmatprep.subr.bf16.mxu0 %v3997_v11  ;;  %v4030_v56 = vld [vmem:[#allocation47_spill] sm:$0xff]  ;;  %v4049_v11 = vld [vmem:[#allocation66_spill] sm:$0xff] }
 0x127   : > { %1933 = vmatprep.subr.bf16.mxu1 %v3998_v12  ;;  %v4050_v12 = vld [vmem:[#allocation67_spill] sm:$0xff] }
 0x129   : > { %1891 = vmatpush2.bf16.msra.mxu0 %v3999_v19  ;;  %v4053_v19 = vld [vmem:[#allocation70_spill] sm:$0xff] }
 0x12a   : > { %1934 = vmatpush2.bf16.msra.mxu1 %v4000_v20  ;;  %1946 = vmatprep.subr.bf16.mxu0 %v4001_v21  ;;  %v4054_v20 = vld [vmem:[#allocation71_spill] sm:$0xff]  ;;  %v4055_v21 = vld [vmem:[#allocation72_spill] sm:$0xff] }
 0x12b   : > { %1989 = vmatprep.subr.bf16.mxu1 %v4002_v22  ;;  %v4056_v22 = vld [vmem:[#allocation73_spill] sm:$0xff] }
 0x12c   : > { %1893 = vmatmul.mubr.bf16.vlgmr.msra.gmra.mxu0 %v2412_v14  ;;  %v4051_v14 = vld [vmem:[#allocation68_spill] sm:$0xff] }
 0x12d   : > { %1936 = vmatmul.mubr.bf16.vlgmr.msra.gmra.mxu1 %v2414_v15  ;;  %1947 = vmatpush1.bf16.msra.mxu0 %v4003_v25  ;;  %v4052_v15 = vld [vmem:[#allocation69_spill] sm:$0xff]  ;;  %v4059_v25 = vld [vmem:[#allocation76_spill] sm:$0xff] }
 0x12e   : > { %1990 = vmatpush1.bf16.msra.mxu1 %v4004_v26  ;;  %1948 = vmatprep.subr.bf16.mxu0 %v4005_v27  ;;  %v4060_v26 = vld [vmem:[#allocation77_spill] sm:$0xff]  ;;  %v2416_v27 = vcombine.low %v3723_v13, %v3730_v16 }
 0x12f   : > { %1991 = vmatprep.subr.bf16.mxu1 %v4006_v28  ;;  %1978 = vmatprep.mubr.bf16.mxu0 %v2417_v23  ;;  %v4057_v23 = vld [vmem:[#allocation74_spill] sm:$0xff]  ;;  %v2418_v28 = vcombine.low %v3733_v17, %v3736_v18 }
 0x130   : > { %2021 = vmatprep.mubr.bf16.mxu1 %v2419_v24  ;;  %v4058_v24 = vld [vmem:[#allocation75_spill] sm:$0xff] }
 0x131   : > { %1949 = vmatpush1.bf16.msra.mxu0 %v4007_v29 }
 0x132   : > { %1992 = vmatpush1.bf16.msra.mxu1 %v4008_v30  ;;  %1950 = vmatprep.subr.bf16.mxu0 %v4009_v31 }
 0x133   : > { %1993 = vmatprep.subr.bf16.mxu1 %v4010_v32 }
 0x135   : > { %1951 = vmatpush1.bf16.msra.mxu0 %v4011_v33 }
 0x136   : > { %1994 = vmatpush1.bf16.msra.mxu1 %v4012_v34  ;;  %1952 = vmatprep.subr.bf16.mxu0 %v4013_v35 }
 0x137   : > { %1995 = vmatprep.subr.bf16.mxu1 %v4014_v36 }
 0x139   : > { %1953 = vmatpush1.bf16.msra.mxu0 %v4015_v37 }
 0x13a   : > { %1996 = vmatpush1.bf16.msra.mxu1 %v4016_v38  ;;  %1954 = vmatprep.subr.bf16.mxu0 %v4017_v39 }
 0x13b   : > { %1997 = vmatprep.subr.bf16.mxu1 %v4018_v40 }
 0x13d   : > { %1955 = vmatpush1.bf16.msra.mxu0 %v4019_v41 }
 0x13e   : > { %1998 = vmatpush1.bf16.msra.mxu1 %v4020_v42  ;;  %1956 = vmatprep.subr.bf16.mxu0 %v4021_v43 }
 0x13f   : > { %1999 = vmatprep.subr.bf16.mxu1 %v4022_v44 }
 0x141   : > { %1957 = vmatpush1.bf16.msra.mxu0 %v4023_v45 }
 0x142   : > { %2000 = vmatpush1.bf16.msra.mxu1 %v4024_v46  ;;  %1958 = vmatprep.subr.bf16.mxu0 %v4025_v47 }
 0x143   : > { %2001 = vmatprep.subr.bf16.mxu1 %v4026_v48 }
 0x145   : > { %1959 = vmatpush1.bf16.msra.mxu0 %v4027_v59 }
 0x146   : > { %2002 = vmatpush1.bf16.msra.mxu1 %v4028_v60  ;;  %1960 = vmatprep.subr.bf16.mxu0 %v4029_v54 }
 0x147   : > { %2003 = vmatprep.subr.bf16.mxu1 %v4030_v56 }
 0x149   : > { %1961 = vmatpush1.bf16.msra.mxu0 %v4031_v49 }
 0x14a   : > { %2004 = vmatpush1.bf16.msra.mxu1 %v4032_v50  ;;  %1962 = vmatprep.subr.bf16.mxu0 %v4033_v51 }
 0x14b   : > { %2005 = vmatprep.subr.bf16.mxu1 %v4034_v52 }
 0x14d   : > { %1963 = vmatpush2.bf16.msra.mxu0 %v4035_v0 }
 0x14e   : > { %2006 = vmatpush2.bf16.msra.mxu1 %v4036_v61  ;;  %1964 = vmatprep.subr.bf16.mxu0 %v4037_v58 }
 0x14f   : > { %2007 = vmatprep.subr.bf16.mxu1 %v4038_v62 }
 0x151   : > { %1965 = vmatpush2.bf16.msra.mxu0 %v4039_v1 }
 0x152   : > { %2008 = vmatpush2.bf16.msra.mxu1 %v4040_v2  ;;  %1966 = vmatprep.subr.bf16.mxu0 %v4041_v3 }
 0x153   : > { %2009 = vmatprep.subr.bf16.mxu1 %v4042_v4 }
 0x155   : > { %1967 = vmatpush2.bf16.msra.mxu0 %v4043_v5 }
 0x156   : > { %2010 = vmatpush2.bf16.msra.mxu1 %v4044_v6  ;;  %1968 = vmatprep.subr.bf16.mxu0 %v4045_v7 }
 0x157   : > { %2011 = vmatprep.subr.bf16.mxu1 %v4046_v8 }
 0x159   : > { %1969 = vmatpush2.bf16.msra.mxu0 %v4047_v9 }
 0x15a   : > { %2012 = vmatpush2.bf16.msra.mxu1 %v4048_v10  ;;  %1970 = vmatprep.subr.bf16.mxu0 %v4049_v11 }
 0x15b   : > { %2013 = vmatprep.subr.bf16.mxu1 %v4050_v12 }
 0x15d   : > { %1971 = vmatpush2.bf16.msra.mxu0 %v4051_v14 }
 0x15e   : > { %2014 = vmatpush2.bf16.msra.mxu1 %v4052_v15  ;;  %1972 = vmatprep.subr.bf16.mxu0 %v4053_v19 }
 0x15f   : > { %2015 = vmatprep.subr.bf16.mxu1 %v4054_v20 }
 0x161   : > { %1973 = vmatpush2.bf16.msra.mxu0 %v4055_v21 }
 0x162   : > { %2016 = vmatpush2.bf16.msra.mxu1 %v4056_v22  ;;  %1974 = vmatprep.subr.bf16.mxu0 %v4057_v23 }
 0x163   : > { %2017 = vmatprep.subr.bf16.mxu1 %v4058_v24 }
 0x165   : > { %1975 = vmatpush2.bf16.msra.mxu0 %v4059_v25 }
 0x166   : > { %2018 = vmatpush2.bf16.msra.mxu1 %v4060_v26  ;;  %1976 = vmatprep.subr.bf16.mxu0 %v3623_v57 }
 0x167   : > { %2019 = vmatprep.subr.bf16.mxu1 %v3626_v53 }
 0x169   : > { %1977 = vmatpush2.bf16.msra.mxu0 %v3631_v55 }
 0x16a   : > { %2020 = vmatpush2.bf16.msra.mxu1 %v3634_v63 }
 0x16c   : > { %1979 = vmatmul.mubr.bf16.vlgmr.msra.gmra.mxu0 %v2416_v27  ;;  %v1674_v29 = vpop.f32.mrf.mxu0 }
 0x16d   : > { %2022 = vmatmul.mubr.bf16.vlgmr.msra.gmra.mxu1 %v2418_v28  ;;  %v1717_v30 = vpop.f32.mrf.mxu1 }
 0x16e   : > { %v1676_v31 = vpop.f32.mrf.mxu0  ;;  %v1718_v40 = vadd.f32 %v1717_v30, %v1674_v29 }
 0x16f   : > { %v1719_v32 = vpop.f32.mrf.mxu1 }
 0x170   : > { %v1678_v33 = vpop.f32.mrf.mxu0  ;;  %v1720_v39 = vadd.f32 %v1719_v32, %v1676_v31 }
 0x171   : > { %v1721_v57 = vpop.f32.mrf.mxu1 }
 0x172   : > { %v1680_v34 = vpop.f32.mrf.mxu0  ;;  %v1722_v45 = vadd.f32 %v1721_v57, %v1678_v33 }
 0x173   : > { %v1723_v53 = vpop.f32.mrf.mxu1 }
 0x174   : > { %v1724_v41 = vadd.f32 %v1723_v53, %v1680_v34 }
 0x1ac   : > { %v1760_v35 = vpop.f32.mrf.mxu0 }
 0x1ad   : > { %v1803_v36 = vpop.f32.mrf.mxu1  ;;  %v1761_v46 = vadd.f32 %v1760_v35, %v1718_v40 }
 0x1ae   : > { %v1762_v13 = vpop.f32.mrf.mxu0 }
 0x1af   : > { %v1805_v16 = vpop.f32.mrf.mxu1  ;;  %v1763_v42 = vadd.f32 %v1762_v13, %v1720_v39  ;;  %v1804_v56 = vadd.f32 %v1803_v36, %v1761_v46 }
 0x1b0   : > { %v1764_v37 = vpop.f32.mrf.mxu0 }
 0x1b1   : > { %v1807_v17 = vpop.f32.mrf.mxu1  ;;  %v1806_v48 = vadd.f32 %v1805_v16, %v1763_v42  ;;  %v1765_v59 = vadd.f32 %v1764_v37, %v1722_v45  ;;  %v2032_v58 = vmul.f32 %v1804_v56, %v1804_v56 }
 0x1b2   : > { %v1766_v18 = vpop.f32.mrf.mxu0 }
 0x1b3   : > { %v1809_v55 = vpop.f32.mrf.mxu1  ;;  %v1767_v47 = vadd.f32 %v1766_v18, %v1724_v41  ;;  %v2034_v50 = vmul.f32 %v1806_v48, %v1806_v48  ;;  %v1808_v51 = vadd.f32 %v1807_v17, %v1765_v59 }
 0x1b5   : > { %v1810_v49 = vadd.f32 %v1809_v55, %v1767_v47  ;;  %v2036_v5 = vadd.f32 %v2034_v50, %v2032_v58  ;;  %v2033_v6 = vmul.f32 %v1808_v51, %v1808_v51 }
 0x1b7   : > { %v2035_v62 = vmul.f32 %v1810_v49, %v1810_v49  ;;  %v2038_v22 = vadd.f32 1e-24, %v2036_v5 }
 0x1b9   : > { %v2037_v12 = vadd.f32 %v2035_v62, %v2033_v6  ;;  %2675 = vrsqrt.f32 %v2038_v22  ;;  %vm2042_vm1 = vcmp.eq.f32.partialorder %v2038_v22, inf  ;;  %v2045_v40 = vand.u32 2147483648, %v2038_v22 }
 0x1ba   : > { %vm2044_vm4 = vcmp.eq.f32.partialorder %v2038_v22, 0.0 }
 0x1bb   : > { %v2039_v27 = vadd.f32 1e-24, %v2037_v12 }
 0x1bd   : > { %2677 = vrsqrt.f32 %v2039_v27  ;;  %vm2049_vm3 = vcmp.eq.f32.partialorder %v2039_v27, inf  ;;  %vm2051_vm6 = vcmp.eq.f32.partialorder %v2039_v27, 0.0 }
 0x1c6   : > { %v2676_v35 = vpop.eup %2675 }
 0x1c7   : > { %v2041_v16 = vmul.f32 %v2676_v35, %v2038_v22 }
 0x1ca   : > { %v2678_v36 = vpop.eup %2677 }
 0x1cb   : > { %v2048_v17 = vmul.f32 %v2678_v36, %v2039_v27 }
 0x1cd   : > { %v2050_v42 = vsel %vm2049_vm3, %v2039_v27, %v2048_v17 }
 0x1ec   : > { %v1894_v38 = vpop.f32.mrf.mxu0 }
 0x1ed   : > { %v1937_v63 = vpop.f32.mrf.mxu1 }
 0x1ee   : > { %v1896_v43 = vpop.f32.mrf.mxu0  ;;  %v1938_v61 = vadd.f32 %v1937_v63, %v1894_v38  ;;  %v2043_v38 = vsel %vm2042_vm1, %v2038_v22, %v2041_v16  ;;  %v2096_v22 = vld [vmem:[#allocation2] sm:$0x1] }
 0x1ef   : > { %v1939_v44 = vpop.f32.mrf.mxu1  ;;  %v2046_v45 = vsel %vm2044_vm4, %v2045_v40, %v2043_v38 }
 0x1f0   : > { %v1898_v60 = vpop.f32.mrf.mxu0  ;;  %v1940_v3 = vadd.f32 %v1939_v44, %v1896_v43  ;;  %v2052_v43 = vand.u32 2147483648, %v2039_v27 }
 0x1f1   : > { %v1941_v54 = vpop.f32.mrf.mxu1 }
 0x1f2   : > { %v1900_v52 = vpop.f32.mrf.mxu0  ;;  %v1942_v9 = vadd.f32 %v1941_v54, %v1898_v60  ;;  %v2053_v60 = vsel %vm2051_vm6, %v2052_v43, %v2050_v42 }
 0x1f3   : > { %v1943_v0 = vpop.f32.mrf.mxu1 }
 0x1f4   : > { %v1944_v19 = vadd.f32 %v1943_v0, %v1900_v52 }
 0x22c   : > { %v1980_v1 = vpop.f32.mrf.mxu0 }
 0x22d   : > { %v2023_v2 = vpop.f32.mrf.mxu1  ;;  %v1981_v4 = vadd.f32 %v1980_v1, %v1938_v61 }
 0x22e   : > { %v1982_v7 = vpop.f32.mrf.mxu0 }
 0x22f   : > { %v2025_v8 = vpop.f32.mrf.mxu1  ;;  %v2024_v10 = vadd.f32 %v2023_v2, %v1981_v4  ;;  %v1983_v11 = vadd.f32 %v1982_v7, %v1940_v3  ;;  %v2078_v4 = vmul.f32 32768.0, %v2046_v45 }
 0x230   : > { %v1984_v14 = vpop.f32.mrf.mxu0 }
 0x231   : > { %v2027_v15 = vpop.f32.mrf.mxu1  ;;  %v2026_v20 = vadd.f32 %v2025_v8, %v1983_v11  ;;  %v1985_v21 = vadd.f32 %v1984_v14, %v1942_v9  ;;  %v2054_v24 = vmul.f32 %v2024_v10, %v2024_v10  ;;  %v2080_v9 = vadd.f32 1e-06, %v2078_v4 }
 0x232   : > { %v1986_v23 = vpop.f32.mrf.mxu0  ;;  %v2079_v11 = vmul.f32 32768.0, %v2053_v60 }
 0x233   : > { %v2056_v25 = vmul.f32 %v2026_v20, %v2026_v20  ;;  %v1987_v26 = vadd.f32 %v1986_v23, %v1944_v19  ;;  %v2028_v28 = vadd.f32 %v2027_v15, %v1985_v21  ;;  %v2029_v29 = vpop.f32.mrf.mxu1  ;;  %v2118_v19 = vld [vmem:[#allocation2 + $0x2] sm:$0x1] }
 0x234   : > { %v2081_v23 = vadd.f32 1e-06, %v2079_v11 }
 0x235   : > { %v2058_v30 = vadd.f32 %v2056_v25, %v2054_v24  ;;  %v2030_v31 = vadd.f32 %v2029_v29, %v1987_v26  ;;  %v2055_v57 = vmul.f32 %v2028_v28, %v2028_v28 }
 0x237   : > { %v2060_v32 = vadd.f32 1e-24, %v2058_v30  ;;  %v2057_v33 = vmul.f32 %v2030_v31, %v2030_v31 }
 0x239   : > { %2679 = vrsqrt.f32 %v2060_v32  ;;  %v2059_v34 = vadd.f32 %v2057_v33, %v2055_v57  ;;  %vm2064_vm0 = vcmp.eq.f32.partialorder %v2060_v32, inf  ;;  %v2067_v18 = vand.u32 2147483648, %v2060_v32 }
 0x23a   : > { %vm2066_vm2 = vcmp.eq.f32.partialorder %v2060_v32, 0.0 }
 0x23b   : > { %v2061_v53 = vadd.f32 1e-24, %v2059_v34 }
 0x23d   : > { %2681 = vrsqrt.f32 %v2061_v53  ;;  %vm2071_vm5 = vcmp.eq.f32.partialorder %v2061_v53, inf  ;;  %v2074_v47 = vand.u32 2147483648, %v2061_v53  ;;  %vm2073_vm7 = vcmp.eq.f32.partialorder %v2061_v53, 0.0 }
 0x246   : > { %v2680_v13 = vpop.eup %2679 }
 0x247   : > { %v2063_v37 = vmul.f32 %v2680_v13, %v2060_v32 }
 0x249   : > { %v2065_v55 = vsel %vm2064_vm0, %v2060_v32, %v2063_v37  ;;  %v2108_v37 = vld [vmem:[#allocation2 + $0x1] sm:$0x1] }
 0x24a   : > { %v2068_v63 = vsel %vm2066_vm2, %v2067_v18, %v2065_v55  ;;  %v2682_v39 = vpop.eup %2681 }
 0x24b   : > { %v2082_v41 = vmul.f32 32768.0, %v2068_v63  ;;  %v2070_v44 = vmul.f32 %v2682_v39, %v2061_v53  ;;  %v2076_v48 = vsub.f32 %v2046_v45, %v2068_v63  ;;  %v2119_v56 = vmul.f32 %v2068_v63, %v2068_v63 }
 0x24d   : > { %v2084_v46 = vadd.f32 1e-06, %v2082_v41  ;;  %v2072_v59 = vsel %vm2071_vm5, %v2061_v53, %v2070_v44  ;;  %v2097_v52 = vmul.f32 %v2076_v48, %v2076_v48 }
 0x24e   : > { %v2075_v54 = vsel %vm2073_vm7, %v2074_v47, %v2072_v59 }
 0x24f   : > { %2683 = vrcp.f32 %v2084_v46  ;;  %v2077_v49 = vsub.f32 %v2053_v60, %v2075_v54  ;;  %v2083_v50 = vmul.f32 32768.0, %v2075_v54  ;;  %v2120_v51 = vmul.f32 %v2075_v54, %v2075_v54 }
 0x251   : > { %v2085_v0 = vadd.f32 1e-06, %v2083_v50  ;;  %v2098_v61 = vmul.f32 %v2077_v49, %v2077_v49  ;;  %v2121_v58 = vadd.f32 %v2120_v51, %v2119_v56 }
 0x253   : > { %2685 = vrcp.f32 %v2085_v0  ;;  %v2099_v62 = vadd.f32 %v2098_v61, %v2097_v52  ;;  %v2122_v1 = vrot.slane %v2121_v58, 4 }
 0x255   : > { %v2100_v2 = vrot.slane %v2099_v62, 4  ;;  %v2123_v3 = vadd.f32 %v2122_v1, %v2121_v58 }
 0x257   : > { %v2101_v5 = vadd.f32 %v2100_v2, %v2099_v62  ;;  %v2124_v6 = vrot.slane %v2123_v3, 2 }
 0x259   : > { %v2102_v7 = vrot.slane %v2101_v5, 2  ;;  %v2125_v8 = vadd.f32 %v2124_v6, %v2123_v3 }
 0x25b   : > { %v2103_v12 = vadd.f32 %v2102_v7, %v2101_v5  ;;  %v2126_v14 = vrot.slane %v2125_v8, 1 }
 0x25c   : > { %v2684_v10 = vpop.eup %2683 }
 0x25d   : > { %v2087_v15 = vmul.f32 %v2684_v10, %v2080_v9  ;;  %v2104_v20 = vrot.slane %v2103_v12, 1  ;;  %v2127_v21 = vadd.f32 %v2126_v14, %v2125_v8 }
 0x25f   : > { %2687 = vlog2.f32 %v2087_v15  ;;  %v2105_v24 = vadd.f32 %v2104_v20, %v2103_v12  ;;  %v2128_v25 = vadd.f32 %v2127_v21, %v2118_v19 }
 0x260   : > { %v2686_v26 = vpop.eup %2685 }
 0x261   : > { %v2089_v27 = vmul.f32 %v2686_v26, %v2081_v23  ;;  %v2106_v28 = vadd.f32 %v2105_v24, %v2096_v22  ;;  %2129 = vst [vmem:[#allocation2 + $0x2] sm:$0x1] %v2128_v25 }
 0x263   : > { %2689 = vlog2.f32 %v2089_v27  ;;  %2107 = vst [vmem:[#allocation2] sm:$0x1] %v2106_v28 }
 0x26c   : > { %v2688_v29 = vpop.eup %2687 }
 0x26d   : > { %v2091_v30 = vmul.f32 0.6931472, %v2688_v29 }
 0x26f   : > { %v2094_v33 = vand.u32 2147483647, %v2091_v30 }
 0x270   : > { %v2690_v31 = vpop.eup %2689 }
 0x271   : > { %v2093_v32 = vmul.f32 0.6931472, %v2690_v31 }
 0x273   : > { %v2095_v57 = vand.u32 2147483647, %v2093_v32 }
 0x275   : > { %v2109_v34 = vadd.f32 %v2095_v57, %v2094_v33 }
 0x277   : > { %v2110_v53 = vrot.slane %v2109_v34, 4 }
 0x279   : > { %v2111_v35 = vadd.f32 %v2110_v53, %v2109_v34 }
 0x27b   : > { %v2112_v36 = vrot.slane %v2111_v35, 2 }
 0x27d   : > { %v2113_v13 = vadd.f32 %v2112_v36, %v2111_v35 }
 0x27f   : > { %v2114_v16 = vrot.slane %v2113_v13, 1 }
 0x281   : > { %v2115_v17 = vadd.f32 %v2114_v16, %v2113_v13  ;;  %2133 = sbr.rel (%p2420_p12) target bundleno = 654 (0x28e), region = 78 }
 0x283   : > { %v2116_v18 = vadd.f32 %v2115_v17, %v2108_v37 }
 0x285   : > { %2117 = vst [vmem:[#allocation2 + $0x1] sm:$0x1] %v2116_v18 }
 0x28c   : > { %v2134_v55 = vld [vmem:[#allocation2] sm:$0xff] }
 0x28d   : > { %2135 = vst [vmem:[%s3103_s26] sm:$0xff] %v2134_v55 }
 0x28e PF: > { %s13_s18 = sadd.s32 1, %s2745_s18   ;;  %s4061_s12 = smov %s2725_s13 }
 0x28f   : > { %p10_p13 = scmp.ge.s32.totalorder %s13_s18, 12   ;;  %s4062_s13 = smov %s2817_s23 }
 0x290   : > { %s4063_s14 = smov %s2737_s16  ;;  %s4064_s15 = smov %s2741_s17 }
 0x291   : > { %s4065_s16 = smov %s4068_s19  ;;  %s4066_s17 = smov %s4072_s20 }
 0x292   :  { %12 = sbr.rel (!%p10_p13) target bundleno = 4 (0x4), region = 119 }

// kernel: calc_convergence_loss.6
= control target key start
LH: loop header
LB: loop body
LE: loop exit
PB: predicated region body
PF: predicated region fallthrough
CT: control target
= control target key end

     0   :  { %v91_v0 = vlaneseq  ;;  %v240_v3 = vmov 1983009808   ;;  %vm188_vm0 = vcmask 1041408   ;;  %s299_s0 = inlined_call_operand.vmem [shape: f32[2,2048], index: 0, kind: input, shape index: {}]   ;;  %s300_s1 = inlined_call_operand.vmem [shape: f32[2,2048], index: 1, kind: input, shape index: {}]   ;;  %s301_s2 = inlined_call_operand.vmem [shape: f32[8,128], index: 2, kind: output, shape index: {}]  }
   0x1   :  { %v67_v1 = vld [vmem:[%s299_s0] sm:$0xff]  ;;  %v68_v2 = vld [vmem:[%s299_s0 + $0x8] sm:$0xff]  ;;  %v89_v4 = vunpack.c.l.s4 %v240_v3  ;;  %v69_v11 = vld [vmem:[%s299_s0 + $0x10] sm:$0xff] }
   0x2   :  { %v71_v5 = vld [vmem:[%s300_s1] sm:$0xff]  ;;  %v72_v6 = vld [vmem:[%s300_s1 + $0x8] sm:$0xff]  ;;  %v92_v7 = vshrl.u32 %v91_v0, 7  ;;  %v73_v12 = vld [vmem:[%s300_s1 + $0x10] sm:$0xff] }
   0x3   :  { %v75_v8 = vsub.f32 %v67_v1, %v71_v5  ;;  %v76_v9 = vsub.f32 %v68_v2, %v72_v6  ;;  %v90_v10 = vunpack.c.0.s8 %v89_v4  ;;  %v77_v18 = vsub.f32 %v69_v11, %v73_v12  ;;  %v70_v28 = vld [vmem:[%s299_s0 + $0x18] sm:$0xff] }
   0x4   :  { %v74_v29 = vld [vmem:[%s300_s1 + $0x18] sm:$0xff] }
   0x5   :  { %v79_v13 = vand.u32 2147483647, %v75_v8  ;;  %v80_v14 = vand.u32 2147483647, %v76_v9  ;;  %v93_v15 = vsub.s32 %v90_v10, %v92_v7  ;;  %v81_v30 = vand.u32 2147483647, %v77_v18 }
   0x6   :  { %v78_v36 = vsub.f32 %v70_v28, %v74_v29 }
   0x7   :  { %v87_v16 = vcombine.high %v79_v13, %v79_v13  ;;  %v94_v17 = vrot.slane %v79_v13, %v93_v15  ;;  %v104_v21 = vcombine.high %v80_v14, %v80_v14  ;;  %v111_v22 = vrot.slane %v80_v14, %v93_v15 }
   0x8   :  { %v121_v39 = vcombine.high %v81_v30, %v81_v30  ;;  %v128_v40 = vrot.slane %v81_v30, %v93_v15  ;;  %v82_v45 = vand.u32 2147483647, %v78_v36 }
   0x9   :  { %v101_v19 = vrot.slane %v87_v16, %v93_v15  ;;  %v102_v20 = vcombine.high %v94_v17, %v94_v17  ;;  %v189_v24 = vsel %vm188_vm0, %v94_v17, 0.0  ;;  %v118_v31 = vrot.slane %v104_v21, %v93_v15 }
   0xa   :  { %v119_v32 = vcombine.high %v111_v22, %v111_v22  ;;  %v196_v35 = vsel %vm188_vm0, %v111_v22, 0.0  ;;  %v135_v46 = vrot.slane %v121_v39, %v93_v15  ;;  %v136_v47 = vcombine.high %v128_v40, %v128_v40 }
   0xb   :  { %v103_v23 = vcombine.high %v101_v19, %v101_v19  ;;  %v190_v25 = vsel %vm188_vm0, %v102_v20, 0.0  ;;  %v192_v27 = vsel %vm188_vm0, %v101_v19, 0.0  ;;  %v120_v38 = vcombine.high %v118_v31, %v118_v31 }
   0xc   :  { %v191_v26 = vadd.f32 %v190_v25, %v189_v24  ;;  %v198_v41 = vsel %vm188_vm0, %v119_v32, 0.0  ;;  %v200_v43 = vsel %vm188_vm0, %v118_v31, 0.0  ;;  %v204_v50 = vsel %vm188_vm0, %v128_v40, 0.0 }
   0xd   :  { %v194_v33 = vsel %vm188_vm0, %v103_v23, 0.0  ;;  %v202_v48 = vsel %vm188_vm0, %v120_v38, 0.0  ;;  %v137_v52 = vcombine.high %v135_v46, %v135_v46  ;;  %v138_v53 = vcombine.high %v82_v45, %v82_v45 }
   0xe   :  { %v193_v34 = vadd.f32 %v192_v27, %v191_v26  ;;  %v145_v54 = vrot.slane %v82_v45, %v93_v15  ;;  %v206_v55 = vsel %vm188_vm0, %v136_v47, 0.0  ;;  %v208_v57 = vsel %vm188_vm0, %v135_v46, 0.0 }
   0xf   :  { %v152_v59 = vrot.slane %v138_v53, %v93_v15  ;;  %v210_v61 = vsel %vm188_vm0, %v137_v52, 0.0 }
  0x10   :  { %v195_v37 = vadd.f32 %v194_v33, %v193_v34  ;;  %v153_v60 = vcombine.high %v145_v54, %v145_v54  ;;  %v212_v63 = vsel %vm188_vm0, %v145_v54, 0.0 }
  0x11   :  { %v154_v1 = vcombine.high %v152_v59, %v152_v59  ;;  %v216_v4 = vsel %vm188_vm0, %v152_v59, 0.0 }
  0x12   :  { %v197_v42 = vadd.f32 %v196_v35, %v195_v37  ;;  %v214_v2 = vsel %vm188_vm0, %v153_v60, 0.0 }
  0x13   :  { %v218_v6 = vsel %vm188_vm0, %v154_v1, 0.0 }
  0x14   :  { %v199_v44 = vadd.f32 %v198_v41, %v197_v42 }
  0x16   :  { %v201_v49 = vadd.f32 %v200_v43, %v199_v44 }
  0x18   :  { %v203_v51 = vadd.f32 %v202_v48, %v201_v49 }
  0x1a   :  { %v205_v56 = vadd.f32 %v204_v50, %v203_v51 }
  0x1c   :  { %v207_v58 = vadd.f32 %v206_v55, %v205_v56 }
  0x1e   :  { %v209_v62 = vadd.f32 %v208_v57, %v207_v58 }
  0x20   :  { %v211_v0 = vadd.f32 %v210_v61, %v209_v62 }
  0x22   :  { %v213_v3 = vadd.f32 %v212_v63, %v211_v0 }
  0x24   :  { %v215_v5 = vadd.f32 %v214_v2, %v213_v3 }
  0x26   :  { %v217_v7 = vadd.f32 %v216_v4, %v215_v5 }
  0x28   :  { %v219_v8 = vadd.f32 %v218_v6, %v217_v7 }
  0x2a   :  { %220 = vadd.xlane.f32.xlu0 %v219_v8 }
  0xb3   :  { %v221_v9 = vpop.xlane.xlu0 %220 }
  0xb4   :  { %v222_v10 = vrot.slane %v221_v9, 4 }
  0xb6   :  { %v223_v11 = vadd.f32 %v222_v10, %v221_v9 }
  0xb8   :  { %v224_v12 = vrot.slane %v223_v11, 2 }
  0xba   :  { %v225_v13 = vadd.f32 %v224_v12, %v223_v11 }
  0xbc   :  { %v226_v14 = vrot.slane %v225_v13, 1 }
  0xbe   :  { %v227_v15 = vadd.f32 %v226_v14, %v225_v13 }
  0xc0   :  { %236 = vpush %v227_v15 }
  0xf1   :  { %s237_s0 = spop %236 }
  0xf2   :  { %v229_v16 = vstv %s237_s0 }
  0xf3   :  { %231 = vst [vmem:[%s301_s2] sm:$0xff] %v229_v16 }

// kernel: calc_convergence_loss.11
= control target key start
LH: loop header
LB: loop body
LE: loop exit
PB: predicated region body
PF: predicated region fallthrough
CT: control target
= control target key end

     0   :  { %s5795_s15 = smov 0   ;;  %s5797_s16 = smov 0   ;;  %s7564_s0 = inlined_call_operand.vmem [shape: bf16[2,32,2048], index: 0, kind: input, shape index: {}]   ;;  %s7565_s1 = inlined_call_operand.vmem [shape: bf16[2,32,2048], index: 1, kind: input, shape index: {}]   ;;  %s7566_s2 = inlined_call_operand.vmem [shape: bf16[2048,2304], index: 2, kind: input, shape index: {}]   ;;  %s7567_s3 = inlined_call_operand.vmem [shape: bf16[1152,128], index: 3, kind: input, shape index: {}]   ;;  %s7568_s4 = inlined_call_operand.vmem [shape: f32[2,1,8,128], index: 4, kind: output, shape index: {}]  }
   0x1   :  { %s5799_s17 = smov 0   ;;  %s5801_s18 = smov 0  }
   0x2   :  { %s5803_s19 = smov 0   ;;  %s5805_s20 = smov 0  }
   0x3   :  { %s5807_s21 = smov 0  }
   0x4 LB: > { %s26_s22 = sadd.s32 1, %s5758_s19  ;;  %s33_s23 = sadd.s32 1, %s5762_s20  ;;  %s5766_s21 = sphi %s5807_s21, %s14_s21   ;;  %s5762_s20 = sphi %s5805_s20, %s7748_s20   ;;  %s5758_s19 = sphi %s5803_s19, %s7747_s19   ;;  %s5754_s18 = sphi %s5801_s18, %s7746_s18   ;;  %s5750_s17 = sphi %s5799_s17, %s7745_s17   ;;  %s5746_s16 = sphi %s5797_s16, %s7744_s16   ;;  %s5742_s15 = sphi %s5795_s15, %s7743_s15  }
   0x5   : > { %p27_p0 = scmp.ge.s32.totalorder %s26_s22, 9  ;;  %s96_s24 = sadd.s32 1, %s5746_s16 }
   0x6   : > { %p103_p1 = scmp.ne.s32.totalorder %s5746_s16, %s5742_s15  ;;  %p104_p2 = scmp.eq.s32.totalorder %s5766_s21, 0 }
   0x7   : > { %s7750_s22 = smov (%p27_p0, %s26_s22), 0  ;;  %s7752_s23 = smov (!%p27_p0, %s33_s23), %s5762_s20 }
   0x8   : > { %s93_s25 = ssub.s32 %s5758_s19, %s7750_s22  ;;  %p105_p3 = por %p104_p2, %p103_p1 }
   0x9   : > { %p35_p4 = scmp.ge.s32.totalorder %s7752_s23, 2  ;;  %p94_p5 = scmp.eq.s32.totalorder %s93_s25, 0 }
   0xa   : > { %p4656_p6 = scmp.ge.s32.totalorder %s5766_s21, 18 }
   0xb   : > { %s7754_s23 = smov (%p35_p4, %s7752_s23), 0 }
   0xc   : > { %s5844_s26 = scalar_select %p94_p5, %s5746_s16, %s96_s24  }
   0xd   : > { %183 = sbr.rel (%p4656_p6) target bundleno = 150 (0x96), region = 16 }
  0x12   : > { %214 = sbr.rel (!%p105_p3) target bundleno = 150 (0x96), region = 28  ;;  %s216_s27 = sand.u32 (%p105_p3), 1, %s5746_s16  }
  0x13   : > { %s5001_s28 = sshll.u32 (%p105_p3), %s5758_s19, 3  ;;  %s4657_s29 = sshll.u32 (%p105_p3), %s216_s27, 11 }
  0x14   : > { %s5852_s6 = scalar_lea.vmem (%p105_p3), %s7566_s2, %s5001_s28  ;;  %s5857_s7 = scalar_lea.vmem (%p105_p3), [#allocation4], %s4657_s29 }
  0x15   : > { %v760_v0 = vld [vmem:[%s5852_s6] sm:$0xff] (%p105_p3)  ;;  %v762_v1 = vld [vmem:[%s5852_s6 + $0x48] sm:$0xff] (%p105_p3)  ;;  %v764_v2 = vld [vmem:[%s5852_s6 + $0x90] sm:$0xff] (%p105_p3) }
  0x16   : > { %761 = vst [vmem:[%s5857_s7] sm:$0xff] (%p105_p3), %v760_v0  ;;  %763 = vst [vmem:[%s5857_s7 + $0x8] sm:$0xff] (%p105_p3), %v762_v1  ;;  %v766_v3 = vld [vmem:[%s5852_s6 + $0xd8] sm:$0xff] (%p105_p3)  ;;  %v768_v4 = vld [vmem:[%s5852_s6 + $0x120] sm:$0xff] (%p105_p3) }
  0x17   : > { %765 = vst [vmem:[%s5857_s7 + $0x10] sm:$0xff] %v764_v2  ;;  %v770_v5 = vld [vmem:[%s5852_s6 + $0x168] sm:$0xff]  ;;  %767 = vst [vmem:[%s5857_s7 + $0x18] sm:$0xff] %v766_v3  ;;  %v772_v6 = vld [vmem:[%s5852_s6 + $0x1b0] sm:$0xff] }
  0x18   : > { %769 = vst [vmem:[%s5857_s7 + $0x20] sm:$0xff] %v768_v4  ;;  %771 = vst [vmem:[%s5857_s7 + $0x28] sm:$0xff] %v770_v5  ;;  %v774_v7 = vld [vmem:[%s5852_s6 + $0x1f8] sm:$0xff]  ;;  %v776_v8 = vld [vmem:[%s5852_s6 + $0x240] sm:$0xff] }
  0x19   : > { %773 = vst [vmem:[%s5857_s7 + $0x30] sm:$0xff] %v772_v6  ;;  %775 = vst [vmem:[%s5857_s7 + $0x38] sm:$0xff] %v774_v7  ;;  %v778_v9 = vld [vmem:[%s5852_s6 + $0x288] sm:$0xff]  ;;  %v780_v10 = vld [vmem:[%s5852_s6 + $0x2d0] sm:$0xff] }
  0x1a   : > { %777 = vst [vmem:[%s5857_s7 + $0x40] sm:$0xff] %v776_v8  ;;  %v782_v11 = vld [vmem:[%s5852_s6 + $0x318] sm:$0xff]  ;;  %779 = vst [vmem:[%s5857_s7 + $0x48] sm:$0xff] %v778_v9  ;;  %v784_v12 = vld [vmem:[%s5852_s6 + $0x360] sm:$0xff] }
  0x1b   : > { %781 = vst [vmem:[%s5857_s7 + $0x50] sm:$0xff] %v780_v10  ;;  %783 = vst [vmem:[%s5857_s7 + $0x58] sm:$0xff] %v782_v11  ;;  %v786_v13 = vld [vmem:[%s5852_s6 + $0x3a8] sm:$0xff]  ;;  %v788_v14 = vld [vmem:[%s5852_s6 + $0x3f0] sm:$0xff] }
  0x1c   : > { %785 = vst [vmem:[%s5857_s7 + $0x60] sm:$0xff] %v784_v12  ;;  %787 = vst [vmem:[%s5857_s7 + $0x68] sm:$0xff] %v786_v13  ;;  %v790_v15 = vld [vmem:[%s5852_s6 + $0x438] sm:$0xff]  ;;  %v792_v16 = vld [vmem:[%s5852_s6 + $0x480] sm:$0xff] }
  0x1d   : > { %789 = vst [vmem:[%s5857_s7 + $0x70] sm:$0xff] %v788_v14  ;;  %v794_v17 = vld [vmem:[%s5852_s6 + $0x4c8] sm:$0xff]  ;;  %791 = vst [vmem:[%s5857_s7 + $0x78] sm:$0xff] %v790_v15  ;;  %v796_v18 = vld [vmem:[%s5852_s6 + $0x510] sm:$0xff] }
  0x1e   : > { %793 = vst [vmem:[%s5857_s7 + $0x80] sm:$0xff] %v792_v16  ;;  %795 = vst [vmem:[%s5857_s7 + $0x88] sm:$0xff] %v794_v17  ;;  %v798_v19 = vld [vmem:[%s5852_s6 + $0x558] sm:$0xff]  ;;  %v800_v20 = vld [vmem:[%s5852_s6 + $0x5a0] sm:$0xff] }
  0x1f   : > { %797 = vst [vmem:[%s5857_s7 + $0x90] sm:$0xff] %v796_v18  ;;  %799 = vst [vmem:[%s5857_s7 + $0x98] sm:$0xff] %v798_v19  ;;  %v802_v21 = vld [vmem:[%s5852_s6 + $0x5e8] sm:$0xff]  ;;  %v804_v22 = vld [vmem:[%s5852_s6 + $0x630] sm:$0xff] }
  0x20   : > { %801 = vst [vmem:[%s5857_s7 + $0xa0] sm:$0xff] %v800_v20  ;;  %v806_v23 = vld [vmem:[%s5852_s6 + $0x678] sm:$0xff]  ;;  %803 = vst [vmem:[%s5857_s7 + $0xa8] sm:$0xff] %v802_v21  ;;  %v808_v24 = vld [vmem:[%s5852_s6 + $0x6c0] sm:$0xff] }
  0x21   : > { %805 = vst [vmem:[%s5857_s7 + $0xb0] sm:$0xff] %v804_v22  ;;  %807 = vst [vmem:[%s5857_s7 + $0xb8] sm:$0xff] %v806_v23  ;;  %v810_v25 = vld [vmem:[%s5852_s6 + $0x708] sm:$0xff]  ;;  %v812_v26 = vld [vmem:[%s5852_s6 + $0x750] sm:$0xff] }
  0x22   : > { %809 = vst [vmem:[%s5857_s7 + $0xc0] sm:$0xff] %v808_v24  ;;  %811 = vst [vmem:[%s5857_s7 + $0xc8] sm:$0xff] %v810_v25  ;;  %v814_v27 = vld [vmem:[%s5852_s6 + $0x798] sm:$0xff]  ;;  %v816_v28 = vld [vmem:[%s5852_s6 + $0x7e0] sm:$0xff] }
  0x23   : > { %813 = vst [vmem:[%s5857_s7 + $0xd0] sm:$0xff] %v812_v26  ;;  %v818_v29 = vld [vmem:[%s5852_s6 + $0x828] sm:$0xff]  ;;  %815 = vst [vmem:[%s5857_s7 + $0xd8] sm:$0xff] %v814_v27  ;;  %v820_v30 = vld [vmem:[%s5852_s6 + $0x870] sm:$0xff] }
  0x24   : > { %817 = vst [vmem:[%s5857_s7 + $0xe0] sm:$0xff] %v816_v28  ;;  %819 = vst [vmem:[%s5857_s7 + $0xe8] sm:$0xff] %v818_v29  ;;  %v822_v31 = vld [vmem:[%s5852_s6 + $0x8b8] sm:$0xff]  ;;  %v824_v32 = vld [vmem:[%s5852_s6 + $0x900] sm:$0xff] }
  0x25   : > { %821 = vst [vmem:[%s5857_s7 + $0xf0] sm:$0xff] %v820_v30  ;;  %823 = vst [vmem:[%s5857_s7 + $0xf8] sm:$0xff] %v822_v31  ;;  %v826_v33 = vld [vmem:[%s5852_s6 + $0x948] sm:$0xff]  ;;  %v828_v34 = vld [vmem:[%s5852_s6 + $0x990] sm:$0xff] }
  0x26   : > { %825 = vst [vmem:[%s5857_s7 + $0x100] sm:$0xff] %v824_v32  ;;  %v830_v35 = vld [vmem:[%s5852_s6 + $0x9d8] sm:$0xff]  ;;  %827 = vst [vmem:[%s5857_s7 + $0x108] sm:$0xff] %v826_v33  ;;  %v832_v36 = vld [vmem:[%s5852_s6 + $0xa20] sm:$0xff] }
  0x27   : > { %829 = vst [vmem:[%s5857_s7 + $0x110] sm:$0xff] %v828_v34  ;;  %831 = vst [vmem:[%s5857_s7 + $0x118] sm:$0xff] %v830_v35  ;;  %v834_v37 = vld [vmem:[%s5852_s6 + $0xa68] sm:$0xff]  ;;  %v836_v38 = vld [vmem:[%s5852_s6 + $0xab0] sm:$0xff] }
  0x28   : > { %833 = vst [vmem:[%s5857_s7 + $0x120] sm:$0xff] %v832_v36  ;;  %835 = vst [vmem:[%s5857_s7 + $0x128] sm:$0xff] %v834_v37  ;;  %v838_v39 = vld [vmem:[%s5852_s6 + $0xaf8] sm:$0xff]  ;;  %v840_v40 = vld [vmem:[%s5852_s6 + $0xb40] sm:$0xff] }
  0x29   : > { %837 = vst [vmem:[%s5857_s7 + $0x130] sm:$0xff] %v836_v38  ;;  %v842_v41 = vld [vmem:[%s5852_s6 + $0xb88] sm:$0xff]  ;;  %839 = vst [vmem:[%s5857_s7 + $0x138] sm:$0xff] %v838_v39  ;;  %v844_v42 = vld [vmem:[%s5852_s6 + $0xbd0] sm:$0xff] }
  0x2a   : > { %841 = vst [vmem:[%s5857_s7 + $0x140] sm:$0xff] %v840_v40  ;;  %843 = vst [vmem:[%s5857_s7 + $0x148] sm:$0xff] %v842_v41  ;;  %v846_v43 = vld [vmem:[%s5852_s6 + $0xc18] sm:$0xff]  ;;  %v848_v44 = vld [vmem:[%s5852_s6 + $0xc60] sm:$0xff] }
  0x2b   : > { %845 = vst [vmem:[%s5857_s7 + $0x150] sm:$0xff] %v844_v42  ;;  %847 = vst [vmem:[%s5857_s7 + $0x158] sm:$0xff] %v846_v43  ;;  %v850_v45 = vld [vmem:[%s5852_s6 + $0xca8] sm:$0xff]  ;;  %v852_v46 = vld [vmem:[%s5852_s6 + $0xcf0] sm:$0xff] }
  0x2c   : > { %849 = vst [vmem:[%s5857_s7 + $0x160] sm:$0xff] %v848_v44  ;;  %v854_v47 = vld [vmem:[%s5852_s6 + $0xd38] sm:$0xff]  ;;  %851 = vst [vmem:[%s5857_s7 + $0x168] sm:$0xff] %v850_v45  ;;  %v856_v48 = vld [vmem:[%s5852_s6 + $0xd80] sm:$0xff] }
  0x2d   : > { %853 = vst [vmem:[%s5857_s7 + $0x170] sm:$0xff] %v852_v46  ;;  %855 = vst [vmem:[%s5857_s7 + $0x178] sm:$0xff] %v854_v47  ;;  %v858_v49 = vld [vmem:[%s5852_s6 + $0xdc8] sm:$0xff]  ;;  %v860_v50 = vld [vmem:[%s5852_s6 + $0xe10] sm:$0xff] }
  0x2e   : > { %857 = vst [vmem:[%s5857_s7 + $0x180] sm:$0xff] %v856_v48  ;;  %859 = vst [vmem:[%s5857_s7 + $0x188] sm:$0xff] %v858_v49  ;;  %v862_v51 = vld [vmem:[%s5852_s6 + $0xe58] sm:$0xff]  ;;  %v864_v52 = vld [vmem:[%s5852_s6 + $0xea0] sm:$0xff] }
  0x2f   : > { %861 = vst [vmem:[%s5857_s7 + $0x190] sm:$0xff] %v860_v50  ;;  %v866_v53 = vld [vmem:[%s5852_s6 + $0xee8] sm:$0xff]  ;;  %863 = vst [vmem:[%s5857_s7 + $0x198] sm:$0xff] %v862_v51  ;;  %v868_v54 = vld [vmem:[%s5852_s6 + $0xf30] sm:$0xff] }
  0x30   : > { %865 = vst [vmem:[%s5857_s7 + $0x1a0] sm:$0xff] %v864_v52  ;;  %867 = vst [vmem:[%s5857_s7 + $0x1a8] sm:$0xff] %v866_v53  ;;  %v870_v55 = vld [vmem:[%s5852_s6 + $0xf78] sm:$0xff]  ;;  %v872_v56 = vld [vmem:[%s5852_s6 + $0xfc0] sm:$0xff] }
  0x31   : > { %869 = vst [vmem:[%s5857_s7 + $0x1b0] sm:$0xff] %v868_v54  ;;  %871 = vst [vmem:[%s5857_s7 + $0x1b8] sm:$0xff] %v870_v55  ;;  %v874_v57 = vld [vmem:[%s5852_s6 + $0x1008] sm:$0xff]  ;;  %v876_v58 = vld [vmem:[%s5852_s6 + $0x1050] sm:$0xff] }
  0x32   : > { %873 = vst [vmem:[%s5857_s7 + $0x1c0] sm:$0xff] %v872_v56  ;;  %v878_v59 = vld [vmem:[%s5852_s6 + $0x1098] sm:$0xff]  ;;  %875 = vst [vmem:[%s5857_s7 + $0x1c8] sm:$0xff] %v874_v57  ;;  %v880_v60 = vld [vmem:[%s5852_s6 + $0x10e0] sm:$0xff] }
  0x33   : > { %877 = vst [vmem:[%s5857_s7 + $0x1d0] sm:$0xff] %v876_v58  ;;  %879 = vst [vmem:[%s5857_s7 + $0x1d8] sm:$0xff] %v878_v59  ;;  %v882_v61 = vld [vmem:[%s5852_s6 + $0x1128] sm:$0xff]  ;;  %v884_v62 = vld [vmem:[%s5852_s6 + $0x1170] sm:$0xff] }
  0x34   : > { %881 = vst [vmem:[%s5857_s7 + $0x1e0] sm:$0xff] %v880_v60  ;;  %883 = vst [vmem:[%s5857_s7 + $0x1e8] sm:$0xff] %v882_v61  ;;  %v886_v63 = vld [vmem:[%s5852_s6 + $0x11b8] sm:$0xff]  ;;  %v888_v0 = vld [vmem:[%s5852_s6 + $0x1200] sm:$0xff] }
  0x35   : > { %885 = vst [vmem:[%s5857_s7 + $0x1f0] sm:$0xff] %v884_v62  ;;  %v890_v1 = vld [vmem:[%s5852_s6 + $0x1248] sm:$0xff]  ;;  %887 = vst [vmem:[%s5857_s7 + $0x1f8] sm:$0xff] %v886_v63  ;;  %v892_v2 = vld [vmem:[%s5852_s6 + $0x1290] sm:$0xff] }
  0x36   : > { %889 = vst [vmem:[%s5857_s7 + $0x200] sm:$0xff] %v888_v0  ;;  %891 = vst [vmem:[%s5857_s7 + $0x208] sm:$0xff] %v890_v1  ;;  %v894_v3 = vld [vmem:[%s5852_s6 + $0x12d8] sm:$0xff]  ;;  %v896_v4 = vld [vmem:[%s5852_s6 + $0x1320] sm:$0xff] }
  0x37   : > { %893 = vst [vmem:[%s5857_s7 + $0x210] sm:$0xff] %v892_v2  ;;  %895 = vst [vmem:[%s5857_s7 + $0x218] sm:$0xff] %v894_v3  ;;  %v898_v5 = vld [vmem:[%s5852_s6 + $0x1368] sm:$0xff]  ;;  %v900_v6 = vld [vmem:[%s5852_s6 + $0x13b0] sm:$0xff] }
  0x38   : > { %897 = vst [vmem:[%s5857_s7 + $0x220] sm:$0xff] %v896_v4  ;;  %v902_v7 = vld [vmem:[%s5852_s6 + $0x13f8] sm:$0xff]  ;;  %899 = vst [vmem:[%s5857_s7 + $0x228] sm:$0xff] %v898_v5  ;;  %v904_v8 = vld [vmem:[%s5852_s6 + $0x1440] sm:$0xff] }
  0x39   : > { %901 = vst [vmem:[%s5857_s7 + $0x230] sm:$0xff] %v900_v6  ;;  %903 = vst [vmem:[%s5857_s7 + $0x238] sm:$0xff] %v902_v7  ;;  %v906_v9 = vld [vmem:[%s5852_s6 + $0x1488] sm:$0xff]  ;;  %v908_v10 = vld [vmem:[%s5852_s6 + $0x14d0] sm:$0xff] }
  0x3a   : > { %905 = vst [vmem:[%s5857_s7 + $0x240] sm:$0xff] %v904_v8  ;;  %907 = vst [vmem:[%s5857_s7 + $0x248] sm:$0xff] %v906_v9  ;;  %v910_v11 = vld [vmem:[%s5852_s6 + $0x1518] sm:$0xff]  ;;  %v912_v12 = vld [vmem:[%s5852_s6 + $0x1560] sm:$0xff] }
  0x3b   : > { %909 = vst [vmem:[%s5857_s7 + $0x250] sm:$0xff] %v908_v10  ;;  %v914_v13 = vld [vmem:[%s5852_s6 + $0x15a8] sm:$0xff]  ;;  %911 = vst [vmem:[%s5857_s7 + $0x258] sm:$0xff] %v910_v11  ;;  %v916_v14 = vld [vmem:[%s5852_s6 + $0x15f0] sm:$0xff] }
  0x3c   : > { %913 = vst [vmem:[%s5857_s7 + $0x260] sm:$0xff] %v912_v12  ;;  %915 = vst [vmem:[%s5857_s7 + $0x268] sm:$0xff] %v914_v13  ;;  %v918_v15 = vld [vmem:[%s5852_s6 + $0x1638] sm:$0xff]  ;;  %v920_v16 = vld [vmem:[%s5852_s6 + $0x1680] sm:$0xff] }
  0x3d   : > { %917 = vst [vmem:[%s5857_s7 + $0x270] sm:$0xff] %v916_v14  ;;  %919 = vst [vmem:[%s5857_s7 + $0x278] sm:$0xff] %v918_v15  ;;  %v922_v17 = vld [vmem:[%s5852_s6 + $0x16c8] sm:$0xff]  ;;  %v924_v18 = vld [vmem:[%s5852_s6 + $0x1710] sm:$0xff] }
  0x3e   : > { %921 = vst [vmem:[%s5857_s7 + $0x280] sm:$0xff] %v920_v16  ;;  %v926_v19 = vld [vmem:[%s5852_s6 + $0x1758] sm:$0xff]  ;;  %923 = vst [vmem:[%s5857_s7 + $0x288] sm:$0xff] %v922_v17  ;;  %v928_v20 = vld [vmem:[%s5852_s6 + $0x17a0] sm:$0xff] }
  0x3f   : > { %925 = vst [vmem:[%s5857_s7 + $0x290] sm:$0xff] %v924_v18  ;;  %927 = vst [vmem:[%s5857_s7 + $0x298] sm:$0xff] %v926_v19  ;;  %v930_v21 = vld [vmem:[%s5852_s6 + $0x17e8] sm:$0xff]  ;;  %v932_v22 = vld [vmem:[%s5852_s6 + $0x1830] sm:$0xff] }
  0x40   : > { %929 = vst [vmem:[%s5857_s7 + $0x2a0] sm:$0xff] %v928_v20  ;;  %931 = vst [vmem:[%s5857_s7 + $0x2a8] sm:$0xff] %v930_v21  ;;  %v934_v23 = vld [vmem:[%s5852_s6 + $0x1878] sm:$0xff]  ;;  %v936_v24 = vld [vmem:[%s5852_s6 + $0x18c0] sm:$0xff] }
  0x41   : > { %933 = vst [vmem:[%s5857_s7 + $0x2b0] sm:$0xff] %v932_v22  ;;  %v938_v25 = vld [vmem:[%s5852_s6 + $0x1908] sm:$0xff]  ;;  %935 = vst [vmem:[%s5857_s7 + $0x2b8] sm:$0xff] %v934_v23  ;;  %v940_v26 = vld [vmem:[%s5852_s6 + $0x1950] sm:$0xff] }
  0x42   : > { %937 = vst [vmem:[%s5857_s7 + $0x2c0] sm:$0xff] %v936_v24  ;;  %939 = vst [vmem:[%s5857_s7 + $0x2c8] sm:$0xff] %v938_v25  ;;  %v942_v27 = vld [vmem:[%s5852_s6 + $0x1998] sm:$0xff]  ;;  %v944_v28 = vld [vmem:[%s5852_s6 + $0x19e0] sm:$0xff] }
  0x43   : > { %941 = vst [vmem:[%s5857_s7 + $0x2d0] sm:$0xff] %v940_v26  ;;  %943 = vst [vmem:[%s5857_s7 + $0x2d8] sm:$0xff] %v942_v27  ;;  %v946_v29 = vld [vmem:[%s5852_s6 + $0x1a28] sm:$0xff]  ;;  %v948_v30 = vld [vmem:[%s5852_s6 + $0x1a70] sm:$0xff] }
  0x44   : > { %945 = vst [vmem:[%s5857_s7 + $0x2e0] sm:$0xff] %v944_v28  ;;  %v950_v31 = vld [vmem:[%s5852_s6 + $0x1ab8] sm:$0xff]  ;;  %947 = vst [vmem:[%s5857_s7 + $0x2e8] sm:$0xff] %v946_v29  ;;  %v952_v32 = vld [vmem:[%s5852_s6 + $0x1b00] sm:$0xff] }
  0x45   : > { %949 = vst [vmem:[%s5857_s7 + $0x2f0] sm:$0xff] %v948_v30  ;;  %951 = vst [vmem:[%s5857_s7 + $0x2f8] sm:$0xff] %v950_v31  ;;  %v954_v33 = vld [vmem:[%s5852_s6 + $0x1b48] sm:$0xff]  ;;  %v956_v34 = vld [vmem:[%s5852_s6 + $0x1b90] sm:$0xff] }
  0x46   : > { %953 = vst [vmem:[%s5857_s7 + $0x300] sm:$0xff] %v952_v32  ;;  %955 = vst [vmem:[%s5857_s7 + $0x308] sm:$0xff] %v954_v33  ;;  %v958_v35 = vld [vmem:[%s5852_s6 + $0x1bd8] sm:$0xff]  ;;  %v960_v36 = vld [vmem:[%s5852_s6 + $0x1c20] sm:$0xff] }
  0x47   : > { %957 = vst [vmem:[%s5857_s7 + $0x310] sm:$0xff] %v956_v34  ;;  %v962_v37 = vld [vmem:[%s5852_s6 + $0x1c68] sm:$0xff]  ;;  %959 = vst [vmem:[%s5857_s7 + $0x318] sm:$0xff] %v958_v35  ;;  %v964_v38 = vld [vmem:[%s5852_s6 + $0x1cb0] sm:$0xff] }
  0x48   : > { %961 = vst [vmem:[%s5857_s7 + $0x320] sm:$0xff] %v960_v36  ;;  %963 = vst [vmem:[%s5857_s7 + $0x328] sm:$0xff] %v962_v37  ;;  %v966_v39 = vld [vmem:[%s5852_s6 + $0x1cf8] sm:$0xff]  ;;  %v968_v40 = vld [vmem:[%s5852_s6 + $0x1d40] sm:$0xff] }
  0x49   : > { %965 = vst [vmem:[%s5857_s7 + $0x330] sm:$0xff] %v964_v38  ;;  %967 = vst [vmem:[%s5857_s7 + $0x338] sm:$0xff] %v966_v39  ;;  %v970_v41 = vld [vmem:[%s5852_s6 + $0x1d88] sm:$0xff]  ;;  %v972_v42 = vld [vmem:[%s5852_s6 + $0x1dd0] sm:$0xff] }
  0x4a   : > { %969 = vst [vmem:[%s5857_s7 + $0x340] sm:$0xff] %v968_v40  ;;  %v974_v43 = vld [vmem:[%s5852_s6 + $0x1e18] sm:$0xff]  ;;  %971 = vst [vmem:[%s5857_s7 + $0x348] sm:$0xff] %v970_v41  ;;  %v976_v44 = vld [vmem:[%s5852_s6 + $0x1e60] sm:$0xff] }
  0x4b   : > { %973 = vst [vmem:[%s5857_s7 + $0x350] sm:$0xff] %v972_v42  ;;  %975 = vst [vmem:[%s5857_s7 + $0x358] sm:$0xff] %v974_v43  ;;  %v978_v45 = vld [vmem:[%s5852_s6 + $0x1ea8] sm:$0xff]  ;;  %v980_v46 = vld [vmem:[%s5852_s6 + $0x1ef0] sm:$0xff] }
  0x4c   : > { %977 = vst [vmem:[%s5857_s7 + $0x360] sm:$0xff] %v976_v44  ;;  %979 = vst [vmem:[%s5857_s7 + $0x368] sm:$0xff] %v978_v45  ;;  %v982_v47 = vld [vmem:[%s5852_s6 + $0x1f38] sm:$0xff]  ;;  %v984_v48 = vld [vmem:[%s5852_s6 + $0x1f80] sm:$0xff] }
  0x4d   : > { %981 = vst [vmem:[%s5857_s7 + $0x370] sm:$0xff] %v980_v46  ;;  %v986_v49 = vld [vmem:[%s5852_s6 + $0x1fc8] sm:$0xff]  ;;  %983 = vst [vmem:[%s5857_s7 + $0x378] sm:$0xff] %v982_v47  ;;  %v988_v50 = vld [vmem:[%s5852_s6 + $0x2010] sm:$0xff] }
  0x4e   : > { %985 = vst [vmem:[%s5857_s7 + $0x380] sm:$0xff] %v984_v48  ;;  %987 = vst [vmem:[%s5857_s7 + $0x388] sm:$0xff] %v986_v49  ;;  %v990_v51 = vld [vmem:[%s5852_s6 + $0x2058] sm:$0xff]  ;;  %v992_v52 = vld [vmem:[%s5852_s6 + $0x20a0] sm:$0xff] }
  0x4f   : > { %989 = vst [vmem:[%s5857_s7 + $0x390] sm:$0xff] %v988_v50  ;;  %991 = vst [vmem:[%s5857_s7 + $0x398] sm:$0xff] %v990_v51  ;;  %v994_v53 = vld [vmem:[%s5852_s6 + $0x20e8] sm:$0xff]  ;;  %v996_v54 = vld [vmem:[%s5852_s6 + $0x2130] sm:$0xff] }
  0x50   : > { %993 = vst [vmem:[%s5857_s7 + $0x3a0] sm:$0xff] %v992_v52  ;;  %v998_v55 = vld [vmem:[%s5852_s6 + $0x2178] sm:$0xff]  ;;  %995 = vst [vmem:[%s5857_s7 + $0x3a8] sm:$0xff] %v994_v53  ;;  %v1000_v56 = vld [vmem:[%s5852_s6 + $0x21c0] sm:$0xff] }
  0x51   : > { %997 = vst [vmem:[%s5857_s7 + $0x3b0] sm:$0xff] %v996_v54  ;;  %999 = vst [vmem:[%s5857_s7 + $0x3b8] sm:$0xff] %v998_v55  ;;  %v1002_v57 = vld [vmem:[%s5852_s6 + $0x2208] sm:$0xff]  ;;  %v1004_v58 = vld [vmem:[%s5852_s6 + $0x2250] sm:$0xff] }
  0x52   : > { %1001 = vst [vmem:[%s5857_s7 + $0x3c0] sm:$0xff] %v1000_v56  ;;  %1003 = vst [vmem:[%s5857_s7 + $0x3c8] sm:$0xff] %v1002_v57  ;;  %v1006_v59 = vld [vmem:[%s5852_s6 + $0x2298] sm:$0xff]  ;;  %v1008_v60 = vld [vmem:[%s5852_s6 + $0x22e0] sm:$0xff] }
  0x53   : > { %1005 = vst [vmem:[%s5857_s7 + $0x3d0] sm:$0xff] %v1004_v58  ;;  %v1010_v61 = vld [vmem:[%s5852_s6 + $0x2328] sm:$0xff]  ;;  %1007 = vst [vmem:[%s5857_s7 + $0x3d8] sm:$0xff] %v1006_v59  ;;  %v1012_v62 = vld [vmem:[%s5852_s6 + $0x2370] sm:$0xff] }
  0x54   : > { %1009 = vst [vmem:[%s5857_s7 + $0x3e0] sm:$0xff] %v1008_v60  ;;  %1011 = vst [vmem:[%s5857_s7 + $0x3e8] sm:$0xff] %v1010_v61  ;;  %v1014_v63 = vld [vmem:[%s5852_s6 + $0x23b8] sm:$0xff]  ;;  %v1016_v0 = vld [vmem:[%s5852_s6 + $0x2400] sm:$0xff] }
  0x55   : > { %1013 = vst [vmem:[%s5857_s7 + $0x3f0] sm:$0xff] %v1012_v62  ;;  %1015 = vst [vmem:[%s5857_s7 + $0x3f8] sm:$0xff] %v1014_v63  ;;  %v1018_v1 = vld [vmem:[%s5852_s6 + $0x2448] sm:$0xff]  ;;  %v1020_v2 = vld [vmem:[%s5852_s6 + $0x2490] sm:$0xff] }
  0x56   : > { %1017 = vst [vmem:[%s5857_s7 + $0x400] sm:$0xff] %v1016_v0  ;;  %v1022_v3 = vld [vmem:[%s5852_s6 + $0x24d8] sm:$0xff]  ;;  %1019 = vst [vmem:[%s5857_s7 + $0x408] sm:$0xff] %v1018_v1  ;;  %v1024_v4 = vld [vmem:[%s5852_s6 + $0x2520] sm:$0xff] }
  0x57   : > { %1021 = vst [vmem:[%s5857_s7 + $0x410] sm:$0xff] %v1020_v2  ;;  %1023 = vst [vmem:[%s5857_s7 + $0x418] sm:$0xff] %v1022_v3  ;;  %v1026_v5 = vld [vmem:[%s5852_s6 + $0x2568] sm:$0xff]  ;;  %v1028_v6 = vld [vmem:[%s5852_s6 + $0x25b0] sm:$0xff] }
  0x58   : > { %1025 = vst [vmem:[%s5857_s7 + $0x420] sm:$0xff] %v1024_v4  ;;  %1027 = vst [vmem:[%s5857_s7 + $0x428] sm:$0xff] %v1026_v5  ;;  %v1030_v7 = vld [vmem:[%s5852_s6 + $0x25f8] sm:$0xff]  ;;  %v1032_v8 = vld [vmem:[%s5852_s6 + $0x2640] sm:$0xff] }
  0x59   : > { %1029 = vst [vmem:[%s5857_s7 + $0x430] sm:$0xff] %v1028_v6  ;;  %v1034_v9 = vld [vmem:[%s5852_s6 + $0x2688] sm:$0xff]  ;;  %1031 = vst [vmem:[%s5857_s7 + $0x438] sm:$0xff] %v1030_v7  ;;  %v1036_v10 = vld [vmem:[%s5852_s6 + $0x26d0] sm:$0xff] }
  0x5a   : > { %1033 = vst [vmem:[%s5857_s7 + $0x440] sm:$0xff] %v1032_v8  ;;  %1035 = vst [vmem:[%s5857_s7 + $0x448] sm:$0xff] %v1034_v9  ;;  %v1038_v11 = vld [vmem:[%s5852_s6 + $0x2718] sm:$0xff]  ;;  %v1040_v12 = vld [vmem:[%s5852_s6 + $0x2760] sm:$0xff] }
  0x5b   : > { %1037 = vst [vmem:[%s5857_s7 + $0x450] sm:$0xff] %v1036_v10  ;;  %1039 = vst [vmem:[%s5857_s7 + $0x458] sm:$0xff] %v1038_v11  ;;  %v1042_v13 = vld [vmem:[%s5852_s6 + $0x27a8] sm:$0xff]  ;;  %v1044_v14 = vld [vmem:[%s5852_s6 + $0x27f0] sm:$0xff] }
  0x5c   : > { %1041 = vst [vmem:[%s5857_s7 + $0x460] sm:$0xff] %v1040_v12  ;;  %v1046_v15 = vld [vmem:[%s5852_s6 + $0x2838] sm:$0xff]  ;;  %1043 = vst [vmem:[%s5857_s7 + $0x468] sm:$0xff] %v1042_v13  ;;  %v1048_v16 = vld [vmem:[%s5852_s6 + $0x2880] sm:$0xff] }
  0x5d   : > { %1045 = vst [vmem:[%s5857_s7 + $0x470] sm:$0xff] %v1044_v14  ;;  %1047 = vst [vmem:[%s5857_s7 + $0x478] sm:$0xff] %v1046_v15  ;;  %v1050_v17 = vld [vmem:[%s5852_s6 + $0x28c8] sm:$0xff]  ;;  %v1052_v18 = vld [vmem:[%s5852_s6 + $0x2910] sm:$0xff] }
  0x5e   : > { %1049 = vst [vmem:[%s5857_s7 + $0x480] sm:$0xff] %v1048_v16  ;;  %1051 = vst [vmem:[%s5857_s7 + $0x488] sm:$0xff] %v1050_v17  ;;  %v1054_v19 = vld [vmem:[%s5852_s6 + $0x2958] sm:$0xff]  ;;  %v1056_v20 = vld [vmem:[%s5852_s6 + $0x29a0] sm:$0xff] }
  0x5f   : > { %1053 = vst [vmem:[%s5857_s7 + $0x490] sm:$0xff] %v1052_v18  ;;  %v1058_v21 = vld [vmem:[%s5852_s6 + $0x29e8] sm:$0xff]  ;;  %1055 = vst [vmem:[%s5857_s7 + $0x498] sm:$0xff] %v1054_v19  ;;  %v1060_v22 = vld [vmem:[%s5852_s6 + $0x2a30] sm:$0xff] }
  0x60   : > { %1057 = vst [vmem:[%s5857_s7 + $0x4a0] sm:$0xff] %v1056_v20  ;;  %1059 = vst [vmem:[%s5857_s7 + $0x4a8] sm:$0xff] %v1058_v21  ;;  %v1062_v23 = vld [vmem:[%s5852_s6 + $0x2a78] sm:$0xff]  ;;  %v1064_v24 = vld [vmem:[%s5852_s6 + $0x2ac0] sm:$0xff] }
  0x61   : > { %1061 = vst [vmem:[%s5857_s7 + $0x4b0] sm:$0xff] %v1060_v22  ;;  %1063 = vst [vmem:[%s5857_s7 + $0x4b8] sm:$0xff] %v1062_v23  ;;  %v1066_v25 = vld [vmem:[%s5852_s6 + $0x2b08] sm:$0xff]  ;;  %v1068_v26 = vld [vmem:[%s5852_s6 + $0x2b50] sm:$0xff] }
  0x62   : > { %1065 = vst [vmem:[%s5857_s7 + $0x4c0] sm:$0xff] %v1064_v24  ;;  %v1070_v27 = vld [vmem:[%s5852_s6 + $0x2b98] sm:$0xff]  ;;  %1067 = vst [vmem:[%s5857_s7 + $0x4c8] sm:$0xff] %v1066_v25  ;;  %v1072_v28 = vld [vmem:[%s5852_s6 + $0x2be0] sm:$0xff] }
  0x63   : > { %1069 = vst [vmem:[%s5857_s7 + $0x4d0] sm:$0xff] %v1068_v26  ;;  %1071 = vst [vmem:[%s5857_s7 + $0x4d8] sm:$0xff] %v1070_v27  ;;  %v1074_v29 = vld [vmem:[%s5852_s6 + $0x2c28] sm:$0xff]  ;;  %v1076_v30 = vld [vmem:[%s5852_s6 + $0x2c70] sm:$0xff] }
  0x64   : > { %1073 = vst [vmem:[%s5857_s7 + $0x4e0] sm:$0xff] %v1072_v28  ;;  %1075 = vst [vmem:[%s5857_s7 + $0x4e8] sm:$0xff] %v1074_v29  ;;  %v1078_v31 = vld [vmem:[%s5852_s6 + $0x2cb8] sm:$0xff]  ;;  %v1080_v32 = vld [vmem:[%s5852_s6 + $0x2d00] sm:$0xff] }
  0x65   : > { %1077 = vst [vmem:[%s5857_s7 + $0x4f0] sm:$0xff] %v1076_v30  ;;  %v1082_v33 = vld [vmem:[%s5852_s6 + $0x2d48] sm:$0xff]  ;;  %1079 = vst [vmem:[%s5857_s7 + $0x4f8] sm:$0xff] %v1078_v31  ;;  %v1084_v34 = vld [vmem:[%s5852_s6 + $0x2d90] sm:$0xff] }
  0x66   : > { %1081 = vst [vmem:[%s5857_s7 + $0x500] sm:$0xff] %v1080_v32  ;;  %1083 = vst [vmem:[%s5857_s7 + $0x508] sm:$0xff] %v1082_v33  ;;  %v1086_v35 = vld [vmem:[%s5852_s6 + $0x2dd8] sm:$0xff]  ;;  %v1088_v36 = vld [vmem:[%s5852_s6 + $0x2e20] sm:$0xff] }
  0x67   : > { %1085 = vst [vmem:[%s5857_s7 + $0x510] sm:$0xff] %v1084_v34  ;;  %1087 = vst [vmem:[%s5857_s7 + $0x518] sm:$0xff] %v1086_v35  ;;  %v1090_v37 = vld [vmem:[%s5852_s6 + $0x2e68] sm:$0xff]  ;;  %v1092_v38 = vld [vmem:[%s5852_s6 + $0x2eb0] sm:$0xff] }
  0x68   : > { %1089 = vst [vmem:[%s5857_s7 + $0x520] sm:$0xff] %v1088_v36  ;;  %v1094_v39 = vld [vmem:[%s5852_s6 + $0x2ef8] sm:$0xff]  ;;  %1091 = vst [vmem:[%s5857_s7 + $0x528] sm:$0xff] %v1090_v37  ;;  %v1096_v40 = vld [vmem:[%s5852_s6 + $0x2f40] sm:$0xff] }
  0x69   : > { %1093 = vst [vmem:[%s5857_s7 + $0x530] sm:$0xff] %v1092_v38  ;;  %1095 = vst [vmem:[%s5857_s7 + $0x538] sm:$0xff] %v1094_v39  ;;  %v1098_v41 = vld [vmem:[%s5852_s6 + $0x2f88] sm:$0xff]  ;;  %v1100_v42 = vld [vmem:[%s5852_s6 + $0x2fd0] sm:$0xff] }
  0x6a   : > { %1097 = vst [vmem:[%s5857_s7 + $0x540] sm:$0xff] %v1096_v40  ;;  %1099 = vst [vmem:[%s5857_s7 + $0x548] sm:$0xff] %v1098_v41  ;;  %v1102_v43 = vld [vmem:[%s5852_s6 + $0x3018] sm:$0xff]  ;;  %v1104_v44 = vld [vmem:[%s5852_s6 + $0x3060] sm:$0xff] }
  0x6b   : > { %1101 = vst [vmem:[%s5857_s7 + $0x550] sm:$0xff] %v1100_v42  ;;  %v1106_v45 = vld [vmem:[%s5852_s6 + $0x30a8] sm:$0xff]  ;;  %1103 = vst [vmem:[%s5857_s7 + $0x558] sm:$0xff] %v1102_v43  ;;  %v1108_v46 = vld [vmem:[%s5852_s6 + $0x30f0] sm:$0xff] }
  0x6c   : > { %1105 = vst [vmem:[%s5857_s7 + $0x560] sm:$0xff] %v1104_v44  ;;  %1107 = vst [vmem:[%s5857_s7 + $0x568] sm:$0xff] %v1106_v45  ;;  %v1110_v47 = vld [vmem:[%s5852_s6 + $0x3138] sm:$0xff]  ;;  %v1112_v48 = vld [vmem:[%s5852_s6 + $0x3180] sm:$0xff] }
  0x6d   : > { %1109 = vst [vmem:[%s5857_s7 + $0x570] sm:$0xff] %v1108_v46  ;;  %1111 = vst [vmem:[%s5857_s7 + $0x578] sm:$0xff] %v1110_v47  ;;  %v1114_v49 = vld [vmem:[%s5852_s6 + $0x31c8] sm:$0xff]  ;;  %v1116_v50 = vld [vmem:[%s5852_s6 + $0x3210] sm:$0xff] }
  0x6e   : > { %1113 = vst [vmem:[%s5857_s7 + $0x580] sm:$0xff] %v1112_v48  ;;  %v1118_v51 = vld [vmem:[%s5852_s6 + $0x3258] sm:$0xff]  ;;  %1115 = vst [vmem:[%s5857_s7 + $0x588] sm:$0xff] %v1114_v49  ;;  %v1120_v52 = vld [vmem:[%s5852_s6 + $0x32a0] sm:$0xff] }
  0x6f   : > { %1117 = vst [vmem:[%s5857_s7 + $0x590] sm:$0xff] %v1116_v50  ;;  %1119 = vst [vmem:[%s5857_s7 + $0x598] sm:$0xff] %v1118_v51  ;;  %v1122_v53 = vld [vmem:[%s5852_s6 + $0x32e8] sm:$0xff]  ;;  %v1124_v54 = vld [vmem:[%s5852_s6 + $0x3330] sm:$0xff] }
  0x70   : > { %1121 = vst [vmem:[%s5857_s7 + $0x5a0] sm:$0xff] %v1120_v52  ;;  %1123 = vst [vmem:[%s5857_s7 + $0x5a8] sm:$0xff] %v1122_v53  ;;  %v1126_v55 = vld [vmem:[%s5852_s6 + $0x3378] sm:$0xff]  ;;  %v1128_v56 = vld [vmem:[%s5852_s6 + $0x33c0] sm:$0xff] }
  0x71   : > { %1125 = vst [vmem:[%s5857_s7 + $0x5b0] sm:$0xff] %v1124_v54  ;;  %v1130_v57 = vld [vmem:[%s5852_s6 + $0x3408] sm:$0xff]  ;;  %1127 = vst [vmem:[%s5857_s7 + $0x5b8] sm:$0xff] %v1126_v55  ;;  %v1132_v58 = vld [vmem:[%s5852_s6 + $0x3450] sm:$0xff] }
  0x72   : > { %1129 = vst [vmem:[%s5857_s7 + $0x5c0] sm:$0xff] %v1128_v56  ;;  %1131 = vst [vmem:[%s5857_s7 + $0x5c8] sm:$0xff] %v1130_v57  ;;  %v1134_v59 = vld [vmem:[%s5852_s6 + $0x3498] sm:$0xff]  ;;  %v1136_v60 = vld [vmem:[%s5852_s6 + $0x34e0] sm:$0xff] }
  0x73   : > { %1133 = vst [vmem:[%s5857_s7 + $0x5d0] sm:$0xff] %v1132_v58  ;;  %1135 = vst [vmem:[%s5857_s7 + $0x5d8] sm:$0xff] %v1134_v59  ;;  %v1138_v61 = vld [vmem:[%s5852_s6 + $0x3528] sm:$0xff]  ;;  %v1140_v62 = vld [vmem:[%s5852_s6 + $0x3570] sm:$0xff] }
  0x74   : > { %1137 = vst [vmem:[%s5857_s7 + $0x5e0] sm:$0xff] %v1136_v60  ;;  %v1142_v63 = vld [vmem:[%s5852_s6 + $0x35b8] sm:$0xff]  ;;  %1139 = vst [vmem:[%s5857_s7 + $0x5e8] sm:$0xff] %v1138_v61  ;;  %v1144_v0 = vld [vmem:[%s5852_s6 + $0x3600] sm:$0xff] }
  0x75   : > { %1141 = vst [vmem:[%s5857_s7 + $0x5f0] sm:$0xff] %v1140_v62  ;;  %1143 = vst [vmem:[%s5857_s7 + $0x5f8] sm:$0xff] %v1142_v63  ;;  %v1146_v1 = vld [vmem:[%s5852_s6 + $0x3648] sm:$0xff]  ;;  %v1148_v2 = vld [vmem:[%s5852_s6 + $0x3690] sm:$0xff] }
  0x76   : > { %1145 = vst [vmem:[%s5857_s7 + $0x600] sm:$0xff] %v1144_v0  ;;  %1147 = vst [vmem:[%s5857_s7 + $0x608] sm:$0xff] %v1146_v1  ;;  %v1150_v3 = vld [vmem:[%s5852_s6 + $0x36d8] sm:$0xff]  ;;  %v1152_v4 = vld [vmem:[%s5852_s6 + $0x3720] sm:$0xff] }
  0x77   : > { %1149 = vst [vmem:[%s5857_s7 + $0x610] sm:$0xff] %v1148_v2  ;;  %v1154_v5 = vld [vmem:[%s5852_s6 + $0x3768] sm:$0xff]  ;;  %1151 = vst [vmem:[%s5857_s7 + $0x618] sm:$0xff] %v1150_v3  ;;  %v1156_v6 = vld [vmem:[%s5852_s6 + $0x37b0] sm:$0xff] }
  0x78   : > { %1153 = vst [vmem:[%s5857_s7 + $0x620] sm:$0xff] %v1152_v4  ;;  %1155 = vst [vmem:[%s5857_s7 + $0x628] sm:$0xff] %v1154_v5  ;;  %v1158_v7 = vld [vmem:[%s5852_s6 + $0x37f8] sm:$0xff]  ;;  %v1160_v8 = vld [vmem:[%s5852_s6 + $0x3840] sm:$0xff] }
  0x79   : > { %1157 = vst [vmem:[%s5857_s7 + $0x630] sm:$0xff] %v1156_v6  ;;  %1159 = vst [vmem:[%s5857_s7 + $0x638] sm:$0xff] %v1158_v7  ;;  %v1162_v9 = vld [vmem:[%s5852_s6 + $0x3888] sm:$0xff]  ;;  %v1164_v10 = vld [vmem:[%s5852_s6 + $0x38d0] sm:$0xff] }
  0x7a   : > { %1161 = vst [vmem:[%s5857_s7 + $0x640] sm:$0xff] %v1160_v8  ;;  %v1166_v11 = vld [vmem:[%s5852_s6 + $0x3918] sm:$0xff]  ;;  %1163 = vst [vmem:[%s5857_s7 + $0x648] sm:$0xff] %v1162_v9  ;;  %v1168_v12 = vld [vmem:[%s5852_s6 + $0x3960] sm:$0xff] }
  0x7b   : > { %1165 = vst [vmem:[%s5857_s7 + $0x650] sm:$0xff] %v1164_v10  ;;  %1167 = vst [vmem:[%s5857_s7 + $0x658] sm:$0xff] %v1166_v11  ;;  %v1170_v13 = vld [vmem:[%s5852_s6 + $0x39a8] sm:$0xff]  ;;  %v1172_v14 = vld [vmem:[%s5852_s6 + $0x39f0] sm:$0xff] }
  0x7c   : > { %1169 = vst [vmem:[%s5857_s7 + $0x660] sm:$0xff] %v1168_v12  ;;  %1171 = vst [vmem:[%s5857_s7 + $0x668] sm:$0xff] %v1170_v13  ;;  %v1174_v15 = vld [vmem:[%s5852_s6 + $0x3a38] sm:$0xff]  ;;  %v1176_v16 = vld [vmem:[%s5852_s6 + $0x3a80] sm:$0xff] }
  0x7d   : > { %1173 = vst [vmem:[%s5857_s7 + $0x670] sm:$0xff] %v1172_v14  ;;  %v1178_v17 = vld [vmem:[%s5852_s6 + $0x3ac8] sm:$0xff]  ;;  %1175 = vst [vmem:[%s5857_s7 + $0x678] sm:$0xff] %v1174_v15  ;;  %v1180_v18 = vld [vmem:[%s5852_s6 + $0x3b10] sm:$0xff] }
  0x7e   : > { %1177 = vst [vmem:[%s5857_s7 + $0x680] sm:$0xff] %v1176_v16  ;;  %1179 = vst [vmem:[%s5857_s7 + $0x688] sm:$0xff] %v1178_v17  ;;  %v1182_v19 = vld [vmem:[%s5852_s6 + $0x3b58] sm:$0xff]  ;;  %v1184_v20 = vld [vmem:[%s5852_s6 + $0x3ba0] sm:$0xff] }
  0x7f   : > { %1181 = vst [vmem:[%s5857_s7 + $0x690] sm:$0xff] %v1180_v18  ;;  %1183 = vst [vmem:[%s5857_s7 + $0x698] sm:$0xff] %v1182_v19  ;;  %v1186_v21 = vld [vmem:[%s5852_s6 + $0x3be8] sm:$0xff]  ;;  %v1188_v22 = vld [vmem:[%s5852_s6 + $0x3c30] sm:$0xff] }
  0x80   : > { %1185 = vst [vmem:[%s5857_s7 + $0x6a0] sm:$0xff] %v1184_v20  ;;  %v1190_v23 = vld [vmem:[%s5852_s6 + $0x3c78] sm:$0xff]  ;;  %1187 = vst [vmem:[%s5857_s7 + $0x6a8] sm:$0xff] %v1186_v21  ;;  %v1192_v24 = vld [vmem:[%s5852_s6 + $0x3cc0] sm:$0xff] }
  0x81   : > { %1189 = vst [vmem:[%s5857_s7 + $0x6b0] sm:$0xff] %v1188_v22  ;;  %1191 = vst [vmem:[%s5857_s7 + $0x6b8] sm:$0xff] %v1190_v23  ;;  %v1194_v25 = vld [vmem:[%s5852_s6 + $0x3d08] sm:$0xff]  ;;  %v1196_v26 = vld [vmem:[%s5852_s6 + $0x3d50] sm:$0xff] }
  0x82   : > { %1193 = vst [vmem:[%s5857_s7 + $0x6c0] sm:$0xff] %v1192_v24  ;;  %1195 = vst [vmem:[%s5857_s7 + $0x6c8] sm:$0xff] %v1194_v25  ;;  %v1198_v27 = vld [vmem:[%s5852_s6 + $0x3d98] sm:$0xff]  ;;  %v1200_v28 = vld [vmem:[%s5852_s6 + $0x3de0] sm:$0xff] }
  0x83   : > { %1197 = vst [vmem:[%s5857_s7 + $0x6d0] sm:$0xff] %v1196_v26  ;;  %v1202_v29 = vld [vmem:[%s5852_s6 + $0x3e28] sm:$0xff]  ;;  %1199 = vst [vmem:[%s5857_s7 + $0x6d8] sm:$0xff] %v1198_v27  ;;  %v1204_v30 = vld [vmem:[%s5852_s6 + $0x3e70] sm:$0xff] }
  0x84   : > { %1201 = vst [vmem:[%s5857_s7 + $0x6e0] sm:$0xff] %v1200_v28  ;;  %1203 = vst [vmem:[%s5857_s7 + $0x6e8] sm:$0xff] %v1202_v29  ;;  %v1206_v31 = vld [vmem:[%s5852_s6 + $0x3eb8] sm:$0xff]  ;;  %v1208_v32 = vld [vmem:[%s5852_s6 + $0x3f00] sm:$0xff] }
  0x85   : > { %1205 = vst [vmem:[%s5857_s7 + $0x6f0] sm:$0xff] %v1204_v30  ;;  %1207 = vst [vmem:[%s5857_s7 + $0x6f8] sm:$0xff] %v1206_v31  ;;  %v1210_v33 = vld [vmem:[%s5852_s6 + $0x3f48] sm:$0xff]  ;;  %v1212_v34 = vld [vmem:[%s5852_s6 + $0x3f90] sm:$0xff] }
  0x86   : > { %1209 = vst [vmem:[%s5857_s7 + $0x700] sm:$0xff] %v1208_v32  ;;  %v1214_v35 = vld [vmem:[%s5852_s6 + $0x3fd8] sm:$0xff]  ;;  %1211 = vst [vmem:[%s5857_s7 + $0x708] sm:$0xff] %v1210_v33  ;;  %v1216_v36 = vld [vmem:[%s5852_s6 + $0x4020] sm:$0xff] }
  0x87   : > { %1213 = vst [vmem:[%s5857_s7 + $0x710] sm:$0xff] %v1212_v34  ;;  %1215 = vst [vmem:[%s5857_s7 + $0x718] sm:$0xff] %v1214_v35  ;;  %v1218_v37 = vld [vmem:[%s5852_s6 + $0x4068] sm:$0xff]  ;;  %v1220_v38 = vld [vmem:[%s5852_s6 + $0x40b0] sm:$0xff] }
  0x88   : > { %1217 = vst [vmem:[%s5857_s7 + $0x720] sm:$0xff] %v1216_v36  ;;  %1219 = vst [vmem:[%s5857_s7 + $0x728] sm:$0xff] %v1218_v37  ;;  %v1222_v39 = vld [vmem:[%s5852_s6 + $0x40f8] sm:$0xff]  ;;  %v1224_v40 = vld [vmem:[%s5852_s6 + $0x4140] sm:$0xff] }
  0x89   : > { %1221 = vst [vmem:[%s5857_s7 + $0x730] sm:$0xff] %v1220_v38  ;;  %v1226_v41 = vld [vmem:[%s5852_s6 + $0x4188] sm:$0xff]  ;;  %1223 = vst [vmem:[%s5857_s7 + $0x738] sm:$0xff] %v1222_v39  ;;  %v1228_v42 = vld [vmem:[%s5852_s6 + $0x41d0] sm:$0xff] }
  0x8a   : > { %1225 = vst [vmem:[%s5857_s7 + $0x740] sm:$0xff] %v1224_v40  ;;  %1227 = vst [vmem:[%s5857_s7 + $0x748] sm:$0xff] %v1226_v41  ;;  %v1230_v43 = vld [vmem:[%s5852_s6 + $0x4218] sm:$0xff]  ;;  %v1232_v44 = vld [vmem:[%s5852_s6 + $0x4260] sm:$0xff] }
  0x8b   : > { %1229 = vst [vmem:[%s5857_s7 + $0x750] sm:$0xff] %v1228_v42  ;;  %1231 = vst [vmem:[%s5857_s7 + $0x758] sm:$0xff] %v1230_v43  ;;  %v1234_v45 = vld [vmem:[%s5852_s6 + $0x42a8] sm:$0xff]  ;;  %v1236_v46 = vld [vmem:[%s5852_s6 + $0x42f0] sm:$0xff] }
  0x8c   : > { %1233 = vst [vmem:[%s5857_s7 + $0x760] sm:$0xff] %v1232_v44  ;;  %v1238_v47 = vld [vmem:[%s5852_s6 + $0x4338] sm:$0xff]  ;;  %1235 = vst [vmem:[%s5857_s7 + $0x768] sm:$0xff] %v1234_v45  ;;  %v1240_v48 = vld [vmem:[%s5852_s6 + $0x4380] sm:$0xff] }
  0x8d   : > { %1237 = vst [vmem:[%s5857_s7 + $0x770] sm:$0xff] %v1236_v46  ;;  %1239 = vst [vmem:[%s5857_s7 + $0x778] sm:$0xff] %v1238_v47  ;;  %v1242_v49 = vld [vmem:[%s5852_s6 + $0x43c8] sm:$0xff]  ;;  %v1244_v50 = vld [vmem:[%s5852_s6 + $0x4410] sm:$0xff] }
  0x8e   : > { %1241 = vst [vmem:[%s5857_s7 + $0x780] sm:$0xff] %v1240_v48  ;;  %1243 = vst [vmem:[%s5857_s7 + $0x788] sm:$0xff] %v1242_v49  ;;  %v1246_v51 = vld [vmem:[%s5852_s6 + $0x4458] sm:$0xff]  ;;  %v1248_v52 = vld [vmem:[%s5852_s6 + $0x44a0] sm:$0xff] }
  0x8f   : > { %1245 = vst [vmem:[%s5857_s7 + $0x790] sm:$0xff] %v1244_v50  ;;  %v1250_v53 = vld [vmem:[%s5852_s6 + $0x44e8] sm:$0xff]  ;;  %1247 = vst [vmem:[%s5857_s7 + $0x798] sm:$0xff] %v1246_v51  ;;  %v1252_v54 = vld [vmem:[%s5852_s6 + $0x4530] sm:$0xff] }
  0x90   : > { %1249 = vst [vmem:[%s5857_s7 + $0x7a0] sm:$0xff] %v1248_v52  ;;  %1251 = vst [vmem:[%s5857_s7 + $0x7a8] sm:$0xff] %v1250_v53  ;;  %v1254_v55 = vld [vmem:[%s5852_s6 + $0x4578] sm:$0xff]  ;;  %v1256_v56 = vld [vmem:[%s5852_s6 + $0x45c0] sm:$0xff] }
  0x91   : > { %1253 = vst [vmem:[%s5857_s7 + $0x7b0] sm:$0xff] %v1252_v54  ;;  %1255 = vst [vmem:[%s5857_s7 + $0x7b8] sm:$0xff] %v1254_v55  ;;  %v1258_v57 = vld [vmem:[%s5852_s6 + $0x4608] sm:$0xff]  ;;  %v1260_v58 = vld [vmem:[%s5852_s6 + $0x4650] sm:$0xff] }
  0x92   : > { %1257 = vst [vmem:[%s5857_s7 + $0x7c0] sm:$0xff] %v1256_v56  ;;  %v1262_v59 = vld [vmem:[%s5852_s6 + $0x4698] sm:$0xff]  ;;  %1259 = vst [vmem:[%s5857_s7 + $0x7c8] sm:$0xff] %v1258_v57  ;;  %v1264_v60 = vld [vmem:[%s5852_s6 + $0x46e0] sm:$0xff] }
  0x93   : > { %1261 = vst [vmem:[%s5857_s7 + $0x7d0] sm:$0xff] %v1260_v58  ;;  %1263 = vst [vmem:[%s5857_s7 + $0x7d8] sm:$0xff] %v1262_v59  ;;  %v1266_v61 = vld [vmem:[%s5852_s6 + $0x4728] sm:$0xff]  ;;  %v1268_v62 = vld [vmem:[%s5852_s6 + $0x4770] sm:$0xff] }
  0x94   : > { %1265 = vst [vmem:[%s5857_s7 + $0x7e0] sm:$0xff] %v1264_v60  ;;  %1267 = vst [vmem:[%s5857_s7 + $0x7e8] sm:$0xff] %v1266_v61  ;;  %v1270_v63 = vld [vmem:[%s5852_s6 + $0x47b8] sm:$0xff] }
  0x95   : > { %1269 = vst [vmem:[%s5857_s7 + $0x7f0] sm:$0xff] %v1268_v62  ;;  %1271 = vst [vmem:[%s5857_s7 + $0x7f8] sm:$0xff] %v1270_v63 }
  0x96 PF: > { %p4660_p7 = scmp.ge.s32.totalorder %s5766_s21, 1  ;;  %p1285_p8 = scmp.lt.s32.totalorder %s5766_s21, 19 }
  0x98   : > { %p1286_p9 = pnand %p4660_p7, %p1285_p8 }
  0x9a   : > { %1289 = sbr.rel (%p1286_p9) target bundleno = 1194 (0x4aa), region = 70 }
  0x9f   : > { %s1292_s8 = sand.u32 1, %s5742_s15   ;;  %p1345_p10 = scmp.lt.s32.totalorder %s5754_s18, 1 }
  0xa0   : > { %s4661_s9 = sshll.u32 %s1292_s8, 11  ;;  %s4666_s10 = sshll.u32 %s5750_s17, 4 }
  0xa1   : > { %p1368_p11 = scmp.lt.s32.totalorder %s4666_s10, 143  ;;  %s7756_s18 = smov (!%p1345_p10, %s5754_s18), 1 }
  0xa2   : > { %s5002_s11 = sshll.u32 %s7756_s18, 8  ;;  %s4668_s12 = sshll.u32 %s7756_s18, 3 }
  0xa3   : > { %s7758_s10 = smov (!%p1368_p11, %s4666_s10), 143  ;;  %s6377_s24 = scalar_lea.vmem %s7564_s0, %s5002_s11 }
  0xa4   : > { %s6382_s28 = scalar_lea.vmem %s7565_s1, %s5002_s11  ;;  %s4667_s29 = sshll.u32 %s7758_s10, 2 }
  0xa5   : > { %s6387_s5 = scalar_lea.vmem %s7568_s4, %s4668_s12  ;;  %s6392_s18 = scalar_lea.vmem %s7567_s3, %s4667_s29 }
  0xa6   : > { %s6394_s8 = scalar_lea.vmem [#allocation4], %s4661_s9  ;;  %p4669_p12 = scmp.ne.s32.totalorder %s5750_s17, 0 }
  0xa8   : > { %1384 = sbr.rel (%p4669_p12) target bundleno = 178 (0xb2), region = 78 }
  0xad   : > { %v5768_v0 = vmov 0.0  }
  0xae   : > { %1385 = vst [vmem:[#allocation2 + $0x10] sm:$0xff] %v5768_v0  ;;  %1386 = vst [vmem:[#allocation2] sm:$0xff] %v5768_v0 }
  0xaf   : > { %1387 = vst [vmem:[#allocation2 + $0x18] sm:$0xff] %v5768_v0  ;;  %1388 = vst [vmem:[#allocation2 + $0x8] sm:$0xff] %v5768_v0 }
  0xb0   : > { %1389 = vst [vmem:[#allocation3] sm:$0xff] %v5768_v0  ;;  %1390 = vst [vmem:[#allocation3 + $0x18] sm:$0xff] %v5768_v0 }
  0xb1   : > { %1391 = vst [vmem:[#allocation3 + $0x8] sm:$0xff] %v5768_v0  ;;  %1392 = vst [vmem:[#allocation3 + $0x10] sm:$0xff] %v5768_v0 }
  0xb2 PF: > { %v5122_v1 = vld [vmem:[%s6394_s8 + $0x74] ss:$8 sps:$4 sm:$0xff]   ;;  %v5126_v3 = vld [vmem:[%s6394_s8 + $0x70] ss:$8 sps:$4 sm:$0xff]   ;;  %v5128_v5 = vld [vmem:[%s6394_s8 + $0x64] ss:$8 sps:$4 sm:$0xff]  }
  0xb3   : > { %v5124_v2 = vld [vmem:[%s6394_s8 + $0x174] ss:$8 sps:$4 sm:$0xff]   ;;  %3121 = vmatprep.subr.bf16.mxu0 %v5122_v1  ;;  %v5127_v4 = vld [vmem:[%s6394_s8 + $0x170] ss:$8 sps:$4 sm:$0xff]   ;;  %v5130_v6 = vld [vmem:[%s6394_s8 + $0x164] ss:$8 sps:$4 sm:$0xff]  }
  0xb4   : > { %3174 = vmatprep.subr.bf16.mxu1 %v5124_v2  ;;  %3122 = vmatpush1.bf16.msra.mxu0 %v5126_v3  ;;  %v5132_v7 = vld [vmem:[%s6394_s8 + $0x60] ss:$8 sps:$4 sm:$0xff]   ;;  %v5134_v9 = vld [vmem:[%s6394_s8 + $0x54] ss:$8 sps:$4 sm:$0xff]   ;;  %v5138_v11 = vld [vmem:[%s6394_s8 + $0x50] ss:$8 sps:$4 sm:$0xff]  }
  0xb5   : > { %3175 = vmatpush1.bf16.msra.mxu1 %v5127_v4  ;;  %3123 = vmatprep.subr.bf16.mxu0 %v5128_v5  ;;  %v5133_v8 = vld [vmem:[%s6394_s8 + $0x160] ss:$8 sps:$4 sm:$0xff]   ;;  %v5136_v10 = vld [vmem:[%s6394_s8 + $0x154] ss:$8 sps:$4 sm:$0xff]   ;;  %v5139_v12 = vld [vmem:[%s6394_s8 + $0x150] ss:$8 sps:$4 sm:$0xff]  }
  0xb6   : > { %3176 = vmatprep.subr.bf16.mxu1 %v5130_v6  ;;  %v5140_v13 = vld [vmem:[%s6394_s8 + $0x44] ss:$8 sps:$4 sm:$0xff]   ;;  %v5144_v15 = vld [vmem:[%s6394_s8 + $0x40] ss:$8 sps:$4 sm:$0xff]   ;;  %v5146_v17 = vld [vmem:[%s6394_s8 + $0x34] ss:$8 sps:$4 sm:$0xff]  }
  0xb7   : > { %v5142_v14 = vld [vmem:[%s6394_s8 + $0x144] ss:$8 sps:$4 sm:$0xff]   ;;  %v5145_v16 = vld [vmem:[%s6394_s8 + $0x140] ss:$8 sps:$4 sm:$0xff]   ;;  %v5148_v18 = vld [vmem:[%s6394_s8 + $0x134] ss:$8 sps:$4 sm:$0xff]  }
  0xb8   : > { %3124 = vmatpush1.bf16.msra.mxu0 %v5132_v7  ;;  %v5150_v19 = vld [vmem:[%s6394_s8 + $0x30] ss:$8 sps:$4 sm:$0xff]   ;;  %v5152_v21 = vld [vmem:[%s6394_s8 + $0x24] ss:$8 sps:$4 sm:$0xff]   ;;  %v5156_v23 = vld [vmem:[%s6394_s8 + $0x20] ss:$8 sps:$4 sm:$0xff]  }
  0xb9   : > { %3177 = vmatpush1.bf16.msra.mxu1 %v5133_v8  ;;  %3125 = vmatprep.subr.bf16.mxu0 %v5134_v9  ;;  %v5151_v20 = vld [vmem:[%s6394_s8 + $0x130] ss:$8 sps:$4 sm:$0xff]   ;;  %v5154_v22 = vld [vmem:[%s6394_s8 + $0x124] ss:$8 sps:$4 sm:$0xff]   ;;  %v5157_v24 = vld [vmem:[%s6394_s8 + $0x120] ss:$8 sps:$4 sm:$0xff]  }
  0xba   : > { %3178 = vmatprep.subr.bf16.mxu1 %v5136_v10  ;;  %v5158_v25 = vld [vmem:[%s6394_s8 + $0x14] ss:$8 sps:$4 sm:$0xff]   ;;  %v5162_v27 = vld [vmem:[%s6394_s8 + $0x10] ss:$8 sps:$4 sm:$0xff]   ;;  %v5164_v29 = vld [vmem:[%s6394_s8 + $0x4] ss:$8 sps:$4 sm:$0xff]  }
  0xbb   : > { %v5160_v26 = vld [vmem:[%s6394_s8 + $0x114] ss:$8 sps:$4 sm:$0xff]   ;;  %v5163_v28 = vld [vmem:[%s6394_s8 + $0x110] ss:$8 sps:$4 sm:$0xff]   ;;  %v5166_v30 = vld [vmem:[%s6394_s8 + $0x104] ss:$8 sps:$4 sm:$0xff]  }
  0xbc   : > { %3126 = vmatpush1.bf16.msra.mxu0 %v5138_v11  ;;  %v5168_v31 = vld [vmem:[%s6394_s8] ss:$8 sps:$4 sm:$0xff]   ;;  %v5170_v33 = vld [vmem:[%s6394_s8 + $0xf4] ss:$8 sps:$4 sm:$0xff]   ;;  %v5174_v35 = vld [vmem:[%s6394_s8 + $0xf0] ss:$8 sps:$4 sm:$0xff]  }
  0xbd   : > { %3179 = vmatpush1.bf16.msra.mxu1 %v5139_v12  ;;  %3127 = vmatprep.subr.bf16.mxu0 %v5140_v13  ;;  %v5169_v32 = vld [vmem:[%s6394_s8 + $0x100] ss:$8 sps:$4 sm:$0xff]   ;;  %v5172_v34 = vld [vmem:[%s6394_s8 + $0x1f4] ss:$8 sps:$4 sm:$0xff]   ;;  %v5175_v36 = vld [vmem:[%s6394_s8 + $0x1f0] ss:$8 sps:$4 sm:$0xff]  }
  0xbe   : > { %3180 = vmatprep.subr.bf16.mxu1 %v5142_v14  ;;  %v5176_v37 = vld [vmem:[%s6394_s8 + $0xe4] ss:$8 sps:$4 sm:$0xff]   ;;  %v5180_v39 = vld [vmem:[%s6394_s8 + $0xe0] ss:$8 sps:$4 sm:$0xff]   ;;  %v5182_v41 = vld [vmem:[%s6394_s8 + $0xd4] ss:$8 sps:$4 sm:$0xff]  }
  0xbf   : > { %v5178_v38 = vld [vmem:[%s6394_s8 + $0x1e4] ss:$8 sps:$4 sm:$0xff]   ;;  %v5181_v40 = vld [vmem:[%s6394_s8 + $0x1e0] ss:$8 sps:$4 sm:$0xff]   ;;  %v5184_v42 = vld [vmem:[%s6394_s8 + $0x1d4] ss:$8 sps:$4 sm:$0xff]  }
  0xc0   : > { %3128 = vmatpush1.bf16.msra.mxu0 %v5144_v15  ;;  %v5186_v43 = vld [vmem:[%s6394_s8 + $0xd0] ss:$8 sps:$4 sm:$0xff]   ;;  %v5188_v45 = vld [vmem:[%s6394_s8 + $0xc4] ss:$8 sps:$4 sm:$0xff]   ;;  %v5192_v47 = vld [vmem:[%s6394_s8 + $0xc0] ss:$8 sps:$4 sm:$0xff]  }
  0xc1   : > { %3181 = vmatpush1.bf16.msra.mxu1 %v5145_v16  ;;  %3129 = vmatprep.subr.bf16.mxu0 %v5146_v17  ;;  %v5187_v44 = vld [vmem:[%s6394_s8 + $0x1d0] ss:$8 sps:$4 sm:$0xff]   ;;  %v5190_v46 = vld [vmem:[%s6394_s8 + $0x1c4] ss:$8 sps:$4 sm:$0xff]   ;;  %v5193_v48 = vld [vmem:[%s6394_s8 + $0x1c0] ss:$8 sps:$4 sm:$0xff]  }
  0xc2   : > { %3182 = vmatprep.subr.bf16.mxu1 %v5148_v18  ;;  %v1649_v49 = vld [vmem:[%s6377_s24] sm:$0xff]  ;;  %v1650_v51 = vld [vmem:[%s6377_s24 + $0x8] sm:$0xff]  ;;  %v5194_v53 = vld [vmem:[%s6394_s8 + $0xb4] ss:$8 sps:$4 sm:$0xff]   ;;  %p4998_p13 = scmp.ne.s32.totalorder %s5750_s17, 8 }
  0xc3   : > { %v1657_v50 = vld [vmem:[%s6377_s24 + $0x40] sm:$0xff]  ;;  %v1658_v52 = vld [vmem:[%s6377_s24 + $0x48] sm:$0xff]  ;;  %v5196_v55 = vld [vmem:[%s6394_s8 + $0x1b4] ss:$8 sps:$4 sm:$0xff]  }
  0xc4   : > { %3130 = vmatpush1.bf16.msra.mxu0 %v5150_v19  ;;  %v4671_v54 = vcombine.high %v1649_v49, %v1657_v50  ;;  %v4673_v56 = vcombine.high %v1650_v51, %v1658_v52  ;;  %v5198_v57 = vld [vmem:[%s6394_s8 + $0xb0] ss:$8 sps:$4 sm:$0xff]   ;;  %v5200_v59 = vld [vmem:[%s6394_s8 + $0xa4] ss:$8 sps:$4 sm:$0xff]   ;;  %v5204_v61 = vld [vmem:[%s6394_s8 + $0xa0] ss:$8 sps:$4 sm:$0xff]   ;;  %v4670_v9 = vcombine.low %v1649_v49, %v1657_v50  ;;  %v4672_v10 = vcombine.low %v1650_v51, %v1658_v52 }
  0xc5   : > { %3183 = vmatpush1.bf16.msra.mxu1 %v5151_v20  ;;  %3131 = vmatprep.subr.bf16.mxu0 %v5152_v21  ;;  %v5199_v58 = vld [vmem:[%s6394_s8 + $0x1b0] ss:$8 sps:$4 sm:$0xff]   ;;  %v5202_v60 = vld [vmem:[%s6394_s8 + $0x1a4] ss:$8 sps:$4 sm:$0xff]   ;;  %v5205_v62 = vld [vmem:[%s6394_s8 + $0x1a0] ss:$8 sps:$4 sm:$0xff]  }
  0xc6   : > { %3184 = vmatprep.subr.bf16.mxu1 %v5154_v22  ;;  %3153 = vmatprep.mubr.bf16.mxu0 %v4671_v54  ;;  %v5206_v63 = vld [vmem:[%s6394_s8 + $0x94] ss:$8 sps:$4 sm:$0xff]   ;;  %v5210_v1 = vld [vmem:[%s6394_s8 + $0x90] ss:$8 sps:$4 sm:$0xff]   ;;  %v5212_v3 = vld [vmem:[%s6394_s8 + $0x84] ss:$8 sps:$4 sm:$0xff]  }
  0xc7   : > { %3206 = vmatprep.mubr.bf16.mxu1 %v4673_v56  ;;  %v5208_v0 = vld [vmem:[%s6394_s8 + $0x194] ss:$8 sps:$4 sm:$0xff]   ;;  %v5211_v2 = vld [vmem:[%s6394_s8 + $0x190] ss:$8 sps:$4 sm:$0xff]   ;;  %v5214_v4 = vld [vmem:[%s6394_s8 + $0x184] ss:$8 sps:$4 sm:$0xff]  }
  0xc8   : > { %3132 = vmatpush1.bf16.msra.mxu0 %v5156_v23  ;;  %v5216_v5 = vld [vmem:[%s6394_s8 + $0x80] ss:$8 sps:$4 sm:$0xff]   ;;  %v5220_v7 = vld [vmem:[%s6394_s8 + $0x274] ss:$8 sps:$4 sm:$0xff]   ;;  %v5218_v11 = vld [vmem:[%s6394_s8 + $0x270] ss:$8 sps:$4 sm:$0xff]  }
  0xc9   : > { %3185 = vmatpush1.bf16.msra.mxu1 %v5157_v24  ;;  %3133 = vmatprep.subr.bf16.mxu0 %v5158_v25  ;;  %v5217_v6 = vld [vmem:[%s6394_s8 + $0x180] ss:$8 sps:$4 sm:$0xff]   ;;  %v5223_v8 = vld [vmem:[%s6394_s8 + $0x374] ss:$8 sps:$4 sm:$0xff]   ;;  %v5221_v12 = vld [vmem:[%s6394_s8 + $0x370] ss:$8 sps:$4 sm:$0xff]  }
  0xca   : > { %3186 = vmatprep.subr.bf16.mxu1 %v5160_v26  ;;  %v5226_v13 = vld [vmem:[%s6394_s8 + $0x264] ss:$8 sps:$4 sm:$0xff]   ;;  %v5224_v15 = vld [vmem:[%s6394_s8 + $0x260] ss:$8 sps:$4 sm:$0xff]   ;;  %v5232_v17 = vld [vmem:[%s6394_s8 + $0x254] ss:$8 sps:$4 sm:$0xff]  }
  0xcb   : > { %v5229_v14 = vld [vmem:[%s6394_s8 + $0x364] ss:$8 sps:$4 sm:$0xff]   ;;  %v5227_v16 = vld [vmem:[%s6394_s8 + $0x360] ss:$8 sps:$4 sm:$0xff]   ;;  %v5235_v18 = vld [vmem:[%s6394_s8 + $0x354] ss:$8 sps:$4 sm:$0xff]  }
  0xcc   : > { %3134 = vmatpush1.bf16.msra.mxu0 %v5162_v27  ;;  %v5230_v19 = vld [vmem:[%s6394_s8 + $0x250] ss:$8 sps:$4 sm:$0xff]   ;;  %v5238_v21 = vld [vmem:[%s6394_s8 + $0x244] ss:$8 sps:$4 sm:$0xff]   ;;  %v5236_v23 = vld [vmem:[%s6394_s8 + $0x240] ss:$8 sps:$4 sm:$0xff]  }
  0xcd   : > { %3187 = vmatpush1.bf16.msra.mxu1 %v5163_v28  ;;  %3135 = vmatprep.subr.bf16.mxu0 %v5164_v29  ;;  %v5233_v20 = vld [vmem:[%s6394_s8 + $0x350] ss:$8 sps:$4 sm:$0xff]   ;;  %v5241_v22 = vld [vmem:[%s6394_s8 + $0x344] ss:$8 sps:$4 sm:$0xff]   ;;  %v5239_v24 = vld [vmem:[%s6394_s8 + $0x340] ss:$8 sps:$4 sm:$0xff]  }
  0xce   : > { %3188 = vmatprep.subr.bf16.mxu1 %v5166_v30  ;;  %v5244_v25 = vld [vmem:[%s6394_s8 + $0x234] ss:$8 sps:$4 sm:$0xff]   ;;  %v5242_v27 = vld [vmem:[%s6394_s8 + $0x230] ss:$8 sps:$4 sm:$0xff]   ;;  %v1665_v29 = vld [vmem:[%s6377_s24 + $0x80] sm:$0xff] }
  0xcf   : > { %v5247_v26 = vld [vmem:[%s6394_s8 + $0x334] ss:$8 sps:$4 sm:$0xff]   ;;  %v5245_v28 = vld [vmem:[%s6394_s8 + $0x330] ss:$8 sps:$4 sm:$0xff]   ;;  %v1673_v30 = vld [vmem:[%s6377_s24 + $0xc0] sm:$0xff] }
  0xd0   : > { %3136 = vmatpush1.bf16.msra.mxu0 %v5168_v31  ;;  %v1666_v31 = vld [vmem:[%s6377_s24 + $0x88] sm:$0xff]  ;;  %v6506_v49 = vld [vmem:[%s6377_s24 + $0x18] sm:$0xff] }
  0xd1   : > { %3189 = vmatpush1.bf16.msra.mxu1 %v5169_v32  ;;  %3137 = vmatprep.subr.bf16.mxu0 %v5170_v33  ;;  %v1674_v32 = vld [vmem:[%s6377_s24 + $0xc8] sm:$0xff]  ;;  %v6511_v51 = vld [vmem:[%s6377_s24 + $0x58] sm:$0xff] }
  0xd2   : > { %3190 = vmatprep.subr.bf16.mxu1 %v5172_v34  ;;  %v5250_v33 = vld [vmem:[%s6394_s8 + $0x224] ss:$8 sps:$4 sm:$0xff]   ;;  %v4687_v34 = vcombine.high %v1665_v29, %v1673_v30  ;;  %v4677_v52 = vcombine.high %v6506_v49, %v6511_v51  ;;  %v5263_v54 = vld [vmem:[%s6394_s8 + $0x300] ss:$8 sps:$4 sm:$0xff]   ;;  %v5271_v56 = vld [vmem:[%s6394_s8 + $0x3f4] ss:$8 sps:$4 sm:$0xff]  }
  0xd4   : > { %3138 = vmatpush2.bf16.msra.mxu0 %v5174_v35  ;;  %v4689_v35 = vcombine.high %v1666_v31, %v1674_v32 }
  0xd5   : > { %3191 = vmatpush2.bf16.msra.mxu1 %v5175_v36  ;;  %3139 = vmatprep.subr.bf16.mxu0 %v5176_v37  ;;  %v4686_v36 = vcombine.low %v1665_v29, %v1673_v30  ;;  %v5253_v37 = vld [vmem:[%s6394_s8 + $0x324] ss:$8 sps:$4 sm:$0xff]   ;;  %v4676_v30 = vcombine.low %v6506_v49, %v6511_v51 }
  0xd6   : > { %3192 = vmatprep.subr.bf16.mxu1 %v5178_v38  ;;  %v4688_v38 = vcombine.low %v1666_v31, %v1674_v32  ;;  %v1668_v31 = vld [vmem:[%s6377_s24 + $0x98] sm:$0xff]  ;;  %v5334_v49 = vld [vmem:[%s6394_s8 + $0x444] ss:$8 sps:$4 sm:$0xff]  }
  0xd7   : > { %v1676_v32 = vld [vmem:[%s6377_s24 + $0xd8] sm:$0xff] }
  0xd8   : > { %3140 = vmatpush2.bf16.msra.mxu0 %v5180_v39  ;;  %v5248_v39 = vld [vmem:[%s6394_s8 + $0x220] ss:$8 sps:$4 sm:$0xff]  }
  0xd9   : > { %3193 = vmatpush2.bf16.msra.mxu1 %v5181_v40  ;;  %3141 = vmatprep.subr.bf16.mxu0 %v5182_v41  ;;  %v5251_v40 = vld [vmem:[%s6394_s8 + $0x320] ss:$8 sps:$4 sm:$0xff]   ;;  %v5256_v41 = vld [vmem:[%s6394_s8 + $0x214] ss:$8 sps:$4 sm:$0xff]  }
  0xda   : > { %3194 = vmatprep.subr.bf16.mxu1 %v5184_v42  ;;  %v5259_v42 = vld [vmem:[%s6394_s8 + $0x314] ss:$8 sps:$4 sm:$0xff]  }
  0xdc   : > { %3142 = vmatpush2.bf16.msra.mxu0 %v5186_v43  ;;  %v5254_v43 = vld [vmem:[%s6394_s8 + $0x210] ss:$8 sps:$4 sm:$0xff]  }
  0xdd   : > { %3195 = vmatpush2.bf16.msra.mxu1 %v5187_v44  ;;  %3143 = vmatprep.subr.bf16.mxu0 %v5188_v45  ;;  %v5257_v44 = vld [vmem:[%s6394_s8 + $0x310] ss:$8 sps:$4 sm:$0xff]   ;;  %v5262_v45 = vld [vmem:[%s6394_s8 + $0x204] ss:$8 sps:$4 sm:$0xff]  }
  0xde   : > { %3196 = vmatprep.subr.bf16.mxu1 %v5190_v46  ;;  %v5265_v46 = vld [vmem:[%s6394_s8 + $0x304] ss:$8 sps:$4 sm:$0xff]  }
  0xe0   : > { %3144 = vmatpush2.bf16.msra.mxu0 %v5192_v47  ;;  %v6500_v47 = vld [vmem:[%s6377_s24 + $0x10] sm:$0xff] }
  0xe1   : > { %3197 = vmatpush2.bf16.msra.mxu1 %v5193_v48  ;;  %3145 = vmatprep.subr.bf16.mxu0 %v5194_v53  ;;  %v6503_v48 = vld [vmem:[%s6377_s24 + $0x50] sm:$0xff]  ;;  %v5260_v53 = vld [vmem:[%s6394_s8 + $0x200] ss:$8 sps:$4 sm:$0xff]  }
  0xe2   : > { %3198 = vmatprep.subr.bf16.mxu1 %v5196_v55  ;;  %v4675_v50 = vcombine.high %v6500_v47, %v6503_v48  ;;  %v5268_v55 = vld [vmem:[%s6394_s8 + $0x2f4] ss:$8 sps:$4 sm:$0xff]   ;;  %v4674_v29 = vcombine.low %v6500_v47, %v6503_v48  ;;  %v6576_v47 = vld [vmem:[%s6377_s24 + $0x28] sm:$0xff] }
  0xe3   : > { %v6579_v48 = vld [vmem:[%s6377_s24 + $0x68] sm:$0xff] }
  0xe4   : > { %3146 = vmatpush2.bf16.msra.mxu0 %v5198_v57  ;;  %v5266_v57 = vld [vmem:[%s6394_s8 + $0x2f0] ss:$8 sps:$4 sm:$0xff]  }
  0xe5   : > { %3199 = vmatpush2.bf16.msra.mxu1 %v5199_v58  ;;  %3147 = vmatprep.subr.bf16.mxu0 %v5200_v59  ;;  %v5269_v58 = vld [vmem:[%s6394_s8 + $0x3f0] ss:$8 sps:$4 sm:$0xff]   ;;  %v5274_v59 = vld [vmem:[%s6394_s8 + $0x2e4] ss:$8 sps:$4 sm:$0xff]  }
  0xe6   : > { %3200 = vmatprep.subr.bf16.mxu1 %v5202_v60  ;;  %v5277_v60 = vld [vmem:[%s6394_s8 + $0x3e4] ss:$8 sps:$4 sm:$0xff]  }
  0xe8   : > { %3148 = vmatpush2.bf16.msra.mxu0 %v5204_v61  ;;  %v5272_v61 = vld [vmem:[%s6394_s8 + $0x2e0] ss:$8 sps:$4 sm:$0xff]  }
  0xe9   : > { %3201 = vmatpush2.bf16.msra.mxu1 %v5205_v62  ;;  %3149 = vmatprep.subr.bf16.mxu0 %v5206_v63  ;;  %v5275_v62 = vld [vmem:[%s6394_s8 + $0x3e0] ss:$8 sps:$4 sm:$0xff]   ;;  %v5280_v63 = vld [vmem:[%s6394_s8 + $0x2d4] ss:$8 sps:$4 sm:$0xff]  }
  0xea   : > { %3202 = vmatprep.subr.bf16.mxu1 %v5208_v0  ;;  %v5283_v0 = vld [vmem:[%s6394_s8 + $0x3d4] ss:$8 sps:$4 sm:$0xff]  }
  0xec   : > { %3150 = vmatpush2.bf16.msra.mxu0 %v5210_v1  ;;  %v5278_v1 = vld [vmem:[%s6394_s8 + $0x2d0] ss:$8 sps:$4 sm:$0xff]  }
  0xed   : > { %3203 = vmatpush2.bf16.msra.mxu1 %v5211_v2  ;;  %3151 = vmatprep.subr.bf16.mxu0 %v5212_v3  ;;  %v5281_v2 = vld [vmem:[%s6394_s8 + $0x3d0] ss:$8 sps:$4 sm:$0xff]   ;;  %v5286_v3 = vld [vmem:[%s6394_s8 + $0x2c4] ss:$8 sps:$4 sm:$0xff]  }
  0xee   : > { %3204 = vmatprep.subr.bf16.mxu1 %v5214_v4  ;;  %v5289_v4 = vld [vmem:[%s6394_s8 + $0x3c4] ss:$8 sps:$4 sm:$0xff]  }
  0xf0   : > { %3152 = vmatpush2.bf16.msra.mxu0 %v5216_v5  ;;  %v5284_v5 = vld [vmem:[%s6394_s8 + $0x2c0] ss:$8 sps:$4 sm:$0xff]  }
  0xf1   : > { %3205 = vmatpush2.bf16.msra.mxu1 %v5217_v6  ;;  %3227 = vmatprep.subr.bf16.mxu0 %v5220_v7  ;;  %v5287_v6 = vld [vmem:[%s6394_s8 + $0x3c0] ss:$8 sps:$4 sm:$0xff]   ;;  %v5292_v7 = vld [vmem:[%s6394_s8 + $0x2b4] ss:$8 sps:$4 sm:$0xff]  }
  0xf2   : > { %3280 = vmatprep.subr.bf16.mxu1 %v5223_v8  ;;  %v5295_v8 = vld [vmem:[%s6394_s8 + $0x3b4] ss:$8 sps:$4 sm:$0xff]  }
  0xf3   : > { %3154 = vmatmul.mubr.bf16.vlgmr.msra.gmra.mxu0 %v4670_v9  ;;  %v5290_v9 = vld [vmem:[%s6394_s8 + $0x2b0] ss:$8 sps:$4 sm:$0xff]  }
  0xf4   : > { %3207 = vmatmul.mubr.bf16.vlgmr.msra.gmra.mxu1 %v4672_v10  ;;  %3228 = vmatpush1.bf16.msra.mxu0 %v5218_v11  ;;  %v5293_v10 = vld [vmem:[%s6394_s8 + $0x3b0] ss:$8 sps:$4 sm:$0xff]   ;;  %v5298_v11 = vld [vmem:[%s6394_s8 + $0x2a4] ss:$8 sps:$4 sm:$0xff]  }
  0xf5   : > { %3281 = vmatpush1.bf16.msra.mxu1 %v5221_v12  ;;  %3229 = vmatprep.subr.bf16.mxu0 %v5226_v13  ;;  %v5301_v12 = vld [vmem:[%s6394_s8 + $0x3a4] ss:$8 sps:$4 sm:$0xff]   ;;  %v5296_v13 = vld [vmem:[%s6394_s8 + $0x2a0] ss:$8 sps:$4 sm:$0xff]  }
  0xf6   : > { %3282 = vmatprep.subr.bf16.mxu1 %v5229_v14  ;;  %3163 = vmatprep.mubr.bf16.mxu0 %v4687_v34  ;;  %v5299_v14 = vld [vmem:[%s6394_s8 + $0x3a0] ss:$8 sps:$4 sm:$0xff]   ;;  %v5325_v34 = vld [vmem:[%s6394_s8 + $0x564] ss:$8 sps:$4 sm:$0xff]  }
  0xf7   : > { %3216 = vmatprep.mubr.bf16.mxu1 %v4689_v35 }
  0xf8   : > { %3230 = vmatpush1.bf16.msra.mxu0 %v5224_v15  ;;  %v5304_v15 = vld [vmem:[%s6394_s8 + $0x294] ss:$8 sps:$4 sm:$0xff]  }
  0xf9   : > { %3283 = vmatpush1.bf16.msra.mxu1 %v5227_v16  ;;  %3231 = vmatprep.subr.bf16.mxu0 %v5232_v17  ;;  %v5307_v16 = vld [vmem:[%s6394_s8 + $0x394] ss:$8 sps:$4 sm:$0xff]   ;;  %v5302_v17 = vld [vmem:[%s6394_s8 + $0x290] ss:$8 sps:$4 sm:$0xff]  }
  0xfa   : > { %3284 = vmatprep.subr.bf16.mxu1 %v5235_v18  ;;  %v5305_v18 = vld [vmem:[%s6394_s8 + $0x390] ss:$8 sps:$4 sm:$0xff]  }
  0xfb   : > { %3164 = vmatmul.mubr.bf16.gmra.mxu0 %v4686_v36  ;;  %v4693_v36 = vcombine.high %v1668_v31, %v1676_v32 }
  0xfc   : > { %3232 = vmatpush1.bf16.msra.mxu0 %v5230_v19  ;;  %3217 = vmatmul.mubr.bf16.gmra.mxu1 %v4688_v38  ;;  %v5310_v19 = vld [vmem:[%s6394_s8 + $0x284] ss:$8 sps:$4 sm:$0xff]   ;;  %v5323_v38 = vld [vmem:[%s6394_s8 + $0x560] ss:$8 sps:$4 sm:$0xff]  }
  0xfd   : > { %3285 = vmatpush1.bf16.msra.mxu1 %v5233_v20  ;;  %3233 = vmatprep.subr.bf16.mxu0 %v5238_v21  ;;  %v5313_v20 = vld [vmem:[%s6394_s8 + $0x384] ss:$8 sps:$4 sm:$0xff]   ;;  %v5308_v21 = vld [vmem:[%s6394_s8 + $0x280] ss:$8 sps:$4 sm:$0xff]  }
  0xfe   : > { %3286 = vmatprep.subr.bf16.mxu1 %v5241_v22  ;;  %3259 = vmatprep.mubr.bf16.mxu0 %v4675_v50  ;;  %v5311_v22 = vld [vmem:[%s6394_s8 + $0x380] ss:$8 sps:$4 sm:$0xff]   ;;  %v5337_v50 = vld [vmem:[%s6394_s8 + $0x544] ss:$8 sps:$4 sm:$0xff]  }
  0xff   : > { %3312 = vmatprep.mubr.bf16.mxu1 %v4677_v52  ;;  %v4681_v52 = vcombine.high %v6576_v47, %v6579_v48 }
 0x100   : > { %3234 = vmatpush1.bf16.msra.mxu0 %v5236_v23  ;;  %v5316_v23 = vld [vmem:[%s6394_s8 + $0x474] ss:$8 sps:$4 sm:$0xff]  }
 0x101   : > { %3287 = vmatpush1.bf16.msra.mxu1 %v5239_v24  ;;  %3235 = vmatprep.subr.bf16.mxu0 %v5244_v25  ;;  %v5319_v24 = vld [vmem:[%s6394_s8 + $0x574] ss:$8 sps:$4 sm:$0xff]   ;;  %v5314_v25 = vld [vmem:[%s6394_s8 + $0x470] ss:$8 sps:$4 sm:$0xff]  }
 0x102   : > { %3288 = vmatprep.subr.bf16.mxu1 %v5247_v26  ;;  %v5317_v26 = vld [vmem:[%s6394_s8 + $0x570] ss:$8 sps:$4 sm:$0xff]  }
 0x104   : > { %3236 = vmatpush1.bf16.msra.mxu0 %v5242_v27  ;;  %v1667_v27 = vld [vmem:[%s6377_s24 + $0x90] sm:$0xff] }
 0x105   : > { %3289 = vmatpush1.bf16.msra.mxu1 %v5245_v28  ;;  %3237 = vmatprep.subr.bf16.mxu0 %v5250_v33  ;;  %v1675_v28 = vld [vmem:[%s6377_s24 + $0xd0] sm:$0xff]  ;;  %v5322_v33 = vld [vmem:[%s6394_s8 + $0x464] ss:$8 sps:$4 sm:$0xff]  }
 0x106   : > { %3290 = vmatprep.subr.bf16.mxu1 %v5253_v37  ;;  %v4691_v35 = vcombine.high %v1667_v27, %v1675_v28  ;;  %v5320_v37 = vld [vmem:[%s6394_s8 + $0x460] ss:$8 sps:$4 sm:$0xff]  }
 0x108   : > { %3238 = vmatpush1.bf16.msra.mxu0 %v5248_v39  ;;  %v5328_v39 = vld [vmem:[%s6394_s8 + $0x454] ss:$8 sps:$4 sm:$0xff]  }
 0x109   : > { %3291 = vmatpush1.bf16.msra.mxu1 %v5251_v40  ;;  %3239 = vmatprep.subr.bf16.mxu0 %v5256_v41  ;;  %v5331_v40 = vld [vmem:[%s6394_s8 + $0x554] ss:$8 sps:$4 sm:$0xff]   ;;  %v5326_v41 = vld [vmem:[%s6394_s8 + $0x450] ss:$8 sps:$4 sm:$0xff]  }
 0x10a   : > { %3292 = vmatprep.subr.bf16.mxu1 %v5259_v42  ;;  %v5329_v42 = vld [vmem:[%s6394_s8 + $0x550] ss:$8 sps:$4 sm:$0xff]  }
 0x10c   : > { %3240 = vmatpush1.bf16.msra.mxu0 %v5254_v43  ;;  %v6570_v43 = vld [vmem:[%s6377_s24 + $0x20] sm:$0xff] }
 0x10d   : > { %3293 = vmatpush1.bf16.msra.mxu1 %v5257_v44  ;;  %3241 = vmatprep.subr.bf16.mxu0 %v5262_v45  ;;  %v6573_v44 = vld [vmem:[%s6377_s24 + $0x60] sm:$0xff]  ;;  %v4690_v45 = vcombine.low %v1667_v27, %v1675_v28 }
 0x10e   : > { %3294 = vmatprep.subr.bf16.mxu1 %v5265_v46  ;;  %v4692_v46 = vcombine.low %v1668_v31, %v1676_v32  ;;  %v4679_v51 = vcombine.high %v6570_v43, %v6573_v44  ;;  %v6664_v27 = vld [vmem:[%s6394_s8 + $0x4a4] ss:$8 sps:$4 sm:$0xff]   ;;  %v6680_v31 = vld [vmem:[%s6394_s8 + $0x494] ss:$8 sps:$4 sm:$0xff]  }
 0x10f   : > { %v6669_v28 = vld [vmem:[%s6394_s8 + $0x5a4] ss:$8 sps:$4 sm:$0xff]   ;;  %v6685_v32 = vld [vmem:[%s6394_s8 + $0x594] ss:$8 sps:$4 sm:$0xff]  }
 0x110   : > { %3242 = vmatpush1.bf16.msra.mxu0 %v5260_v53  ;;  %v5332_v53 = vld [vmem:[%s6394_s8 + $0x440] ss:$8 sps:$4 sm:$0xff]  }
 0x111   : > { %3295 = vmatpush1.bf16.msra.mxu1 %v5263_v54  ;;  %3243 = vmatprep.subr.bf16.mxu0 %v5268_v55  ;;  %v5335_v54 = vld [vmem:[%s6394_s8 + $0x540] ss:$8 sps:$4 sm:$0xff]   ;;  %v5340_v55 = vld [vmem:[%s6394_s8 + $0x434] ss:$8 sps:$4 sm:$0xff]  }
 0x112   : > { %3296 = vmatprep.subr.bf16.mxu1 %v5271_v56  ;;  %v5343_v56 = vld [vmem:[%s6394_s8 + $0x534] ss:$8 sps:$4 sm:$0xff]  }
 0x114   : > { %3244 = vmatpush2.bf16.msra.mxu0 %v5266_v57  ;;  %v5338_v57 = vld [vmem:[%s6394_s8 + $0x430] ss:$8 sps:$4 sm:$0xff]  }
 0x115   : > { %3297 = vmatpush2.bf16.msra.mxu1 %v5269_v58  ;;  %3245 = vmatprep.subr.bf16.mxu0 %v5274_v59  ;;  %v5341_v58 = vld [vmem:[%s6394_s8 + $0x530] ss:$8 sps:$4 sm:$0xff]   ;;  %v5346_v59 = vld [vmem:[%s6394_s8 + $0x424] ss:$8 sps:$4 sm:$0xff]  }
 0x116   : > { %3298 = vmatprep.subr.bf16.mxu1 %v5277_v60  ;;  %v5349_v60 = vld [vmem:[%s6394_s8 + $0x524] ss:$8 sps:$4 sm:$0xff]  }
 0x118   : > { %3246 = vmatpush2.bf16.msra.mxu0 %v5272_v61  ;;  %v5344_v61 = vld [vmem:[%s6394_s8 + $0x420] ss:$8 sps:$4 sm:$0xff]  }
 0x119   : > { %3299 = vmatpush2.bf16.msra.mxu1 %v5275_v62  ;;  %3247 = vmatprep.subr.bf16.mxu0 %v5280_v63  ;;  %v5347_v62 = vld [vmem:[%s6394_s8 + $0x520] ss:$8 sps:$4 sm:$0xff]   ;;  %v5352_v63 = vld [vmem:[%s6394_s8 + $0x414] ss:$8 sps:$4 sm:$0xff]  }
 0x11a   : > { %3300 = vmatprep.subr.bf16.mxu1 %v5283_v0  ;;  %v5355_v0 = vld [vmem:[%s6394_s8 + $0x514] ss:$8 sps:$4 sm:$0xff]  }
 0x11c   : > { %3248 = vmatpush2.bf16.msra.mxu0 %v5278_v1  ;;  %v5350_v1 = vld [vmem:[%s6394_s8 + $0x410] ss:$8 sps:$4 sm:$0xff]  }
 0x11d   : > { %3301 = vmatpush2.bf16.msra.mxu1 %v5281_v2  ;;  %3249 = vmatprep.subr.bf16.mxu0 %v5286_v3  ;;  %v5353_v2 = vld [vmem:[%s6394_s8 + $0x510] ss:$8 sps:$4 sm:$0xff]   ;;  %v5358_v3 = vld [vmem:[%s6394_s8 + $0x404] ss:$8 sps:$4 sm:$0xff]  }
 0x11e   : > { %3302 = vmatprep.subr.bf16.mxu1 %v5289_v4  ;;  %v5361_v4 = vld [vmem:[%s6394_s8 + $0x504] ss:$8 sps:$4 sm:$0xff]  }
 0x120   : > { %3250 = vmatpush2.bf16.msra.mxu0 %v5284_v5  ;;  %v5356_v5 = vld [vmem:[%s6394_s8 + $0x400] ss:$8 sps:$4 sm:$0xff]  }
 0x121   : > { %3303 = vmatpush2.bf16.msra.mxu1 %v5287_v6  ;;  %3251 = vmatprep.subr.bf16.mxu0 %v5292_v7  ;;  %v5359_v6 = vld [vmem:[%s6394_s8 + $0x500] ss:$8 sps:$4 sm:$0xff]   ;;  %v5364_v7 = vld [vmem:[%s6394_s8 + $0x4f4] ss:$8 sps:$4 sm:$0xff]  }
 0x122   : > { %3304 = vmatprep.subr.bf16.mxu1 %v5295_v8  ;;  %v5367_v8 = vld [vmem:[%s6394_s8 + $0x5f4] ss:$8 sps:$4 sm:$0xff]  }
 0x124   : > { %3252 = vmatpush2.bf16.msra.mxu0 %v5290_v9  ;;  %v5362_v9 = vld [vmem:[%s6394_s8 + $0x4f0] ss:$8 sps:$4 sm:$0xff]  }
 0x125   : > { %3305 = vmatpush2.bf16.msra.mxu1 %v5293_v10  ;;  %3253 = vmatprep.subr.bf16.mxu0 %v5298_v11  ;;  %v5365_v10 = vld [vmem:[%s6394_s8 + $0x5f0] ss:$8 sps:$4 sm:$0xff]   ;;  %v5370_v11 = vld [vmem:[%s6394_s8 + $0x4e4] ss:$8 sps:$4 sm:$0xff]  }
 0x126   : > { %3306 = vmatprep.subr.bf16.mxu1 %v5301_v12  ;;  %v5373_v12 = vld [vmem:[%s6394_s8 + $0x5e4] ss:$8 sps:$4 sm:$0xff]  }
 0x128   : > { %3254 = vmatpush2.bf16.msra.mxu0 %v5296_v13  ;;  %v6612_v13 = vld [vmem:[%s6394_s8 + $0x4e0] ss:$8 sps:$4 sm:$0xff]  }
 0x129   : > { %3307 = vmatpush2.bf16.msra.mxu1 %v5299_v14  ;;  %3255 = vmatprep.subr.bf16.mxu0 %v5304_v15  ;;  %v6615_v14 = vld [vmem:[%s6394_s8 + $0x5e0] ss:$8 sps:$4 sm:$0xff]   ;;  %v6618_v15 = vld [vmem:[%s6394_s8 + $0x4d4] ss:$8 sps:$4 sm:$0xff]  }
 0x12a   : > { %3308 = vmatprep.subr.bf16.mxu1 %v5307_v16  ;;  %v6621_v16 = vld [vmem:[%s6394_s8 + $0x5d4] ss:$8 sps:$4 sm:$0xff]  }
 0x12c   : > { %3256 = vmatpush2.bf16.msra.mxu0 %v5302_v17  ;;  %v6624_v17 = vld [vmem:[%s6394_s8 + $0x4d0] ss:$8 sps:$4 sm:$0xff]  }
 0x12d   : > { %3309 = vmatpush2.bf16.msra.mxu1 %v5305_v18  ;;  %3257 = vmatprep.subr.bf16.mxu0 %v5310_v19  ;;  %v6627_v18 = vld [vmem:[%s6394_s8 + $0x5d0] ss:$8 sps:$4 sm:$0xff]   ;;  %v6632_v19 = vld [vmem:[%s6394_s8 + $0x4c4] ss:$8 sps:$4 sm:$0xff]  }
 0x12e   : > { %3310 = vmatprep.subr.bf16.mxu1 %v5313_v20  ;;  %v6637_v20 = vld [vmem:[%s6394_s8 + $0x5c4] ss:$8 sps:$4 sm:$0xff]  }
 0x130   : > { %3258 = vmatpush2.bf16.msra.mxu0 %v5308_v21  ;;  %v6640_v21 = vld [vmem:[%s6394_s8 + $0x4c0] ss:$8 sps:$4 sm:$0xff]  }
 0x131   : > { %3311 = vmatpush2.bf16.msra.mxu1 %v5311_v22  ;;  %3333 = vmatprep.subr.bf16.mxu0 %v5316_v23  ;;  %v6643_v22 = vld [vmem:[%s6394_s8 + $0x5c0] ss:$8 sps:$4 sm:$0xff]   ;;  %v6648_v23 = vld [vmem:[%s6394_s8 + $0x4b4] ss:$8 sps:$4 sm:$0xff]  }
 0x132   : > { %3386 = vmatprep.subr.bf16.mxu1 %v5319_v24  ;;  %v6653_v24 = vld [vmem:[%s6394_s8 + $0x5b4] ss:$8 sps:$4 sm:$0xff]  }
 0x133   : > { %3260 = vmatmul.mubr.bf16.vlgmr.msra.gmra.mxu0 %v4674_v29  ;;  %v6674_v29 = vld [vmem:[%s6394_s8 + $0x4a0] ss:$8 sps:$4 sm:$0xff]  }
 0x134   : > { %3313 = vmatmul.mubr.bf16.vlgmr.msra.gmra.mxu1 %v4676_v30  ;;  %3334 = vmatpush1.bf16.msra.mxu0 %v5314_v25  ;;  %v6656_v25 = vld [vmem:[%s6394_s8 + $0x4b0] ss:$8 sps:$4 sm:$0xff]   ;;  %v6677_v30 = vld [vmem:[%s6394_s8 + $0x5a0] ss:$8 sps:$4 sm:$0xff]  }
 0x135   : > { %3387 = vmatpush1.bf16.msra.mxu1 %v5317_v26  ;;  %3335 = vmatprep.subr.bf16.mxu0 %v5322_v33  ;;  %v6659_v26 = vld [vmem:[%s6394_s8 + $0x5b0] ss:$8 sps:$4 sm:$0xff]  }
 0x136   : > { %3388 = vmatprep.subr.bf16.mxu1 %v5325_v34  ;;  %3269 = vmatprep.mubr.bf16.mxu0 %v4691_v35  ;;  %v6688_v33 = vld [vmem:[%s6394_s8 + $0x490] ss:$8 sps:$4 sm:$0xff]   ;;  %v6694_v35 = vld [vmem:[%s6394_s8 + $0x484] ss:$8 sps:$4 sm:$0xff]  }
 0x137   : > { %3322 = vmatprep.mubr.bf16.mxu1 %v4693_v36  ;;  %v6691_v34 = vld [vmem:[%s6394_s8 + $0x590] ss:$8 sps:$4 sm:$0xff]   ;;  %v6697_v36 = vld [vmem:[%s6394_s8 + $0x584] ss:$8 sps:$4 sm:$0xff]  }
 0x138   : > { %3336 = vmatpush1.bf16.msra.mxu0 %v5320_v37  ;;  %v6706_v37 = vld [vmem:[%s6394_s8 + $0x480] ss:$8 sps:$4 sm:$0xff]  }
 0x139   : > { %3389 = vmatpush1.bf16.msra.mxu1 %v5323_v38  ;;  %3337 = vmatprep.subr.bf16.mxu0 %v5328_v39  ;;  %v6709_v38 = vld [vmem:[%s6394_s8 + $0x580] ss:$8 sps:$4 sm:$0xff]   ;;  %v6714_v39 = vld [vmem:[%s6394_s8 + $0x674] ss:$8 sps:$4 sm:$0xff]  }
 0x13a   : > { %3390 = vmatprep.subr.bf16.mxu1 %v5331_v40  ;;  %v6717_v40 = vld [vmem:[%s6394_s8 + $0x774] ss:$8 sps:$4 sm:$0xff]  }
 0x13b   : > { %3270 = vmatmul.mubr.bf16.gmra.mxu0 %v4690_v45  ;;  %v4680_v45 = vcombine.low %v6576_v47, %v6579_v48 }
 0x13c   : > { %3323 = vmatmul.mubr.bf16.gmra.mxu1 %v4692_v46  ;;  %3338 = vmatpush1.bf16.msra.mxu0 %v5326_v41  ;;  %v1669_v41 = vld [vmem:[%s6377_s24 + $0xa0] sm:$0xff] }
 0x13d   : > { %3391 = vmatpush1.bf16.msra.mxu1 %v5329_v42  ;;  %3339 = vmatprep.subr.bf16.mxu0 %v5334_v49  ;;  %v4678_v42 = vcombine.low %v6570_v43, %v6573_v44  ;;  %v1677_v46 = vld [vmem:[%s6377_s24 + $0xe0] sm:$0xff]  ;;  %v1670_v49 = vld [vmem:[%s6377_s24 + $0xa8] sm:$0xff] }
 0x13e   : > { %3392 = vmatprep.subr.bf16.mxu1 %v5337_v50  ;;  %3365 = vmatprep.mubr.bf16.mxu0 %v4679_v51  ;;  %v1678_v50 = vld [vmem:[%s6377_s24 + $0xe8] sm:$0xff]  ;;  %v6730_v51 = vld [vmem:[%s6394_s8 + $0x670] ss:$8 sps:$4 sm:$0xff]   ;;  %v4695_v47 = vcombine.high %v1669_v41, %v1677_v46 }
 0x13f   : > { %3418 = vmatprep.mubr.bf16.mxu1 %v4681_v52  ;;  %v6733_v52 = vld [vmem:[%s6394_s8 + $0x770] ss:$8 sps:$4 sm:$0xff]   ;;  %v6738_v43 = vld [vmem:[%s6394_s8 + $0x664] ss:$8 sps:$4 sm:$0xff]   ;;  %v4697_v48 = vcombine.high %v1670_v49, %v1678_v50 }
 0x140   : > { %3340 = vmatpush1.bf16.msra.mxu0 %v5332_v53  ;;  %v6741_v44 = vld [vmem:[%s6394_s8 + $0x764] ss:$8 sps:$4 sm:$0xff]   ;;  %v6746_v53 = vld [vmem:[%s6394_s8 + $0x660] ss:$8 sps:$4 sm:$0xff]  }
 0x141   : > { %3393 = vmatpush1.bf16.msra.mxu1 %v5335_v54  ;;  %3341 = vmatprep.subr.bf16.mxu0 %v5340_v55  ;;  %v6749_v54 = vld [vmem:[%s6394_s8 + $0x760] ss:$8 sps:$4 sm:$0xff]   ;;  %v6754_v55 = vld [vmem:[%s6394_s8 + $0x654] ss:$8 sps:$4 sm:$0xff]  }
 0x142   : > { %3394 = vmatprep.subr.bf16.mxu1 %v5343_v56  ;;  %v6757_v56 = vld [vmem:[%s6394_s8 + $0x754] ss:$8 sps:$4 sm:$0xff]  }
 0x144   : > { %3342 = vmatpush1.bf16.msra.mxu0 %v5338_v57  ;;  %v6760_v57 = vld [vmem:[%s6377_s24 + $0x30] sm:$0xff] }
 0x145   : > { %3395 = vmatpush1.bf16.msra.mxu1 %v5341_v58  ;;  %3343 = vmatprep.subr.bf16.mxu0 %v5346_v59  ;;  %v4694_v58 = vcombine.low %v1669_v41, %v1677_v46  ;;  %v4696_v59 = vcombine.low %v1670_v49, %v1678_v50  ;;  %v6826_v41 = vld [vmem:[%s6394_s8 + $0x620] ss:$8 sps:$4 sm:$0xff]   ;;  %v6837_v46 = vld [vmem:[%s6394_s8 + $0x714] ss:$8 sps:$4 sm:$0xff]   ;;  %v6842_v49 = vld [vmem:[%s6394_s8 + $0x610] ss:$8 sps:$4 sm:$0xff]  }
 0x146   : > { %3396 = vmatprep.subr.bf16.mxu1 %v5349_v60  ;;  %v6763_v60 = vld [vmem:[%s6377_s24 + $0x70] sm:$0xff]  ;;  %7623 = vst [vmem:[#allocation11_spill] sm:$0xff] %v6826_v41  ;;  %7626 = vst [vmem:[#allocation14_spill] sm:$0xff] %v6837_v46 }
 0x147   : > { %7627 = vst [vmem:[#allocation15_spill] sm:$0xff] %v6842_v49  ;;  %v6845_v50 = vld [vmem:[%s6394_s8 + $0x710] ss:$8 sps:$4 sm:$0xff]  }
 0x148   : > { %3344 = vmatpush1.bf16.msra.mxu0 %v5344_v61  ;;  %v6766_v61 = vld [vmem:[%s6377_s24 + $0x38] sm:$0xff]  ;;  %7628 = vst [vmem:[#allocation16_spill] sm:$0xff] %v6845_v50 }
 0x149   : > { %3397 = vmatpush1.bf16.msra.mxu1 %v5347_v62  ;;  %3345 = vmatprep.subr.bf16.mxu0 %v5352_v63  ;;  %v6769_v62 = vld [vmem:[%s6377_s24 + $0x78] sm:$0xff] }
 0x14a   : > { %3398 = vmatprep.subr.bf16.mxu1 %v5355_v0  ;;  %v6774_v63 = vld [vmem:[%s6394_s8 + $0x650] ss:$8 sps:$4 sm:$0xff]  }
 0x14b   : > { %v6777_v0 = vld [vmem:[%s6394_s8 + $0x750] ss:$8 sps:$4 sm:$0xff]  }
 0x14c   : > { %3346 = vmatpush1.bf16.msra.mxu0 %v5350_v1  ;;  %v6782_v1 = vld [vmem:[%s6394_s8 + $0x644] ss:$8 sps:$4 sm:$0xff]  }
 0x14d   : > { %3399 = vmatpush1.bf16.msra.mxu1 %v5353_v2  ;;  %3347 = vmatprep.subr.bf16.mxu0 %v5358_v3  ;;  %v6785_v2 = vld [vmem:[%s6394_s8 + $0x744] ss:$8 sps:$4 sm:$0xff]   ;;  %v4683_v3 = vcombine.high %v6760_v57, %v6763_v60 }
 0x14e   : > { %3400 = vmatprep.subr.bf16.mxu1 %v5361_v4  ;;  %v4685_v4 = vcombine.high %v6766_v61, %v6769_v62 }
 0x150   : > { %3348 = vmatpush1.bf16.msra.mxu0 %v5356_v5  ;;  %v6794_v5 = vld [vmem:[%s6394_s8 + $0x640] ss:$8 sps:$4 sm:$0xff]  }
 0x151   : > { %3401 = vmatpush1.bf16.msra.mxu1 %v5359_v6  ;;  %3349 = vmatprep.subr.bf16.mxu0 %v5364_v7  ;;  %v6797_v6 = vld [vmem:[%s6394_s8 + $0x740] ss:$8 sps:$4 sm:$0xff]   ;;  %v6802_v7 = vld [vmem:[%s6394_s8 + $0x634] ss:$8 sps:$4 sm:$0xff]  }
 0x152   : > { %3402 = vmatprep.subr.bf16.mxu1 %v5367_v8  ;;  %7617 = vst [vmem:[#allocation5_spill] sm:$0xff] %v6802_v7  ;;  %v6805_v8 = vld [vmem:[%s6394_s8 + $0x734] ss:$8 sps:$4 sm:$0xff]  }
 0x153   : > { %7618 = vst [vmem:[#allocation6_spill] sm:$0xff] %v6805_v8 }
 0x154   : > { %3350 = vmatpush2.bf16.msra.mxu0 %v5362_v9  ;;  %v6810_v9 = vld [vmem:[%s6394_s8 + $0x630] ss:$8 sps:$4 sm:$0xff]  }
 0x155   : > { %3403 = vmatpush2.bf16.msra.mxu1 %v5365_v10  ;;  %3351 = vmatprep.subr.bf16.mxu0 %v5370_v11  ;;  %7619 = vst [vmem:[#allocation7_spill] sm:$0xff] %v6810_v9  ;;  %v6813_v10 = vld [vmem:[%s6394_s8 + $0x730] ss:$8 sps:$4 sm:$0xff]   ;;  %v6818_v11 = vld [vmem:[%s6394_s8 + $0x624] ss:$8 sps:$4 sm:$0xff]  }
 0x156   : > { %3404 = vmatprep.subr.bf16.mxu1 %v5373_v12  ;;  %7620 = vst [vmem:[#allocation8_spill] sm:$0xff] %v6813_v10  ;;  %7621 = vst [vmem:[#allocation9_spill] sm:$0xff] %v6818_v11  ;;  %v6821_v12 = vld [vmem:[%s6394_s8 + $0x724] ss:$8 sps:$4 sm:$0xff]  }
 0x157   : > { %7622 = vst [vmem:[#allocation10_spill] sm:$0xff] %v6821_v12 }
 0x158   : > { %3352 = vmatpush2.bf16.msra.mxu0 %v6612_v13 }
 0x159   : > { %3405 = vmatpush2.bf16.msra.mxu1 %v6615_v14  ;;  %3353 = vmatprep.subr.bf16.mxu0 %v6618_v15 }
 0x15a   : > { %3406 = vmatprep.subr.bf16.mxu1 %v6621_v16 }
 0x15c   : > { %3354 = vmatpush2.bf16.msra.mxu0 %v6624_v17 }
 0x15d   : > { %3407 = vmatpush2.bf16.msra.mxu1 %v6627_v18  ;;  %3355 = vmatprep.subr.bf16.mxu0 %v6632_v19 }
 0x15e   : > { %3408 = vmatprep.subr.bf16.mxu1 %v6637_v20 }
 0x160   : > { %3356 = vmatpush2.bf16.msra.mxu0 %v6640_v21 }
 0x161   : > { %3409 = vmatpush2.bf16.msra.mxu1 %v6643_v22  ;;  %3357 = vmatprep.subr.bf16.mxu0 %v6648_v23 }
 0x162   : > { %3410 = vmatprep.subr.bf16.mxu1 %v6653_v24 }
 0x164   : > { %3358 = vmatpush2.bf16.msra.mxu0 %v6656_v25 }
 0x165   : > { %3411 = vmatpush2.bf16.msra.mxu1 %v6659_v26  ;;  %3359 = vmatprep.subr.bf16.mxu0 %v6664_v27 }
 0x166   : > { %3412 = vmatprep.subr.bf16.mxu1 %v6669_v28 }
 0x168   : > { %3360 = vmatpush2.bf16.msra.mxu0 %v6674_v29 }
 0x169   : > { %3413 = vmatpush2.bf16.msra.mxu1 %v6677_v30  ;;  %3361 = vmatprep.subr.bf16.mxu0 %v6680_v31 }
 0x16a   : > { %3414 = vmatprep.subr.bf16.mxu1 %v6685_v32 }
 0x16c   : > { %3362 = vmatpush2.bf16.msra.mxu0 %v6688_v33 }
 0x16d   : > { %3415 = vmatpush2.bf16.msra.mxu1 %v6691_v34  ;;  %3363 = vmatprep.subr.bf16.mxu0 %v6694_v35 }
 0x16e   : > { %3416 = vmatprep.subr.bf16.mxu1 %v6697_v36 }
 0x170   : > { %3364 = vmatpush2.bf16.msra.mxu0 %v6706_v37 }
 0x171   : > { %3417 = vmatpush2.bf16.msra.mxu1 %v6709_v38  ;;  %3439 = vmatprep.subr.bf16.mxu0 %v6714_v39 }
 0x172   : > { %3492 = vmatprep.subr.bf16.mxu1 %v6717_v40 }
 0x173   : > { %3366 = vmatmul.mubr.bf16.vlgmr.msra.gmra.mxu0 %v4678_v42  ;;  %v6829_v42 = vld [vmem:[%s6394_s8 + $0x720] ss:$8 sps:$4 sm:$0xff]  }
 0x174   : > { %3419 = vmatmul.mubr.bf16.vlgmr.msra.gmra.mxu1 %v4680_v45  ;;  %3440 = vmatpush1.bf16.msra.mxu0 %v6730_v51  ;;  %7624 = vst [vmem:[#allocation12_spill] sm:$0xff] %v6829_v42  ;;  %v6834_v45 = vld [vmem:[%s6394_s8 + $0x614] ss:$8 sps:$4 sm:$0xff]  }
 0x175   : > { %3493 = vmatpush1.bf16.msra.mxu1 %v6733_v52  ;;  %3441 = vmatprep.subr.bf16.mxu0 %v6738_v43  ;;  %7625 = vst [vmem:[#allocation13_spill] sm:$0xff] %v6834_v45 }
 0x176   : > { %3494 = vmatprep.subr.bf16.mxu1 %v6741_v44  ;;  %3375 = vmatprep.mubr.bf16.mxu0 %v4695_v47  ;;  %v6850_v47 = vld [vmem:[%s6394_s8 + $0x604] ss:$8 sps:$4 sm:$0xff]  }
 0x177   : > { %3428 = vmatprep.mubr.bf16.mxu1 %v4697_v48  ;;  %7629 = vst [vmem:[#allocation17_spill] sm:$0xff] %v6850_v47  ;;  %v6853_v48 = vld [vmem:[%s6394_s8 + $0x704] ss:$8 sps:$4 sm:$0xff]  }
 0x178   : > { %3442 = vmatpush1.bf16.msra.mxu0 %v6746_v53  ;;  %7630 = vst [vmem:[#allocation18_spill] sm:$0xff] %v6853_v48 }
 0x179   : > { %3495 = vmatpush1.bf16.msra.mxu1 %v6749_v54  ;;  %3443 = vmatprep.subr.bf16.mxu0 %v6754_v55 }
 0x17a   : > { %3496 = vmatprep.subr.bf16.mxu1 %v6757_v56 }
 0x17b   : > { %3376 = vmatmul.mubr.bf16.gmra.mxu0 %v4694_v58  ;;  %v6858_v58 = vld [vmem:[%s6394_s8 + $0x600] ss:$8 sps:$4 sm:$0xff]  }
 0x17c   : > { %3429 = vmatmul.mubr.bf16.gmra.mxu1 %v4696_v59  ;;  %3444 = vmatpush1.bf16.msra.mxu0 %v6774_v63  ;;  %7631 = vst [vmem:[#allocation19_spill] sm:$0xff] %v6858_v58  ;;  %v6861_v59 = vld [vmem:[%s6394_s8 + $0x700] ss:$8 sps:$4 sm:$0xff]  }
 0x17d   : > { %3497 = vmatpush1.bf16.msra.mxu1 %v6777_v0  ;;  %3445 = vmatprep.subr.bf16.mxu0 %v6782_v1  ;;  %7632 = vst [vmem:[#allocation20_spill] sm:$0xff] %v6861_v59 }
 0x17e   : > { %3498 = vmatprep.subr.bf16.mxu1 %v6785_v2  ;;  %3471 = vmatprep.mubr.bf16.mxu0 %v4683_v3  ;;  %v6866_v3 = vld [vmem:[%s6394_s8 + $0x6f4] ss:$8 sps:$4 sm:$0xff]  }
 0x17f   : > { %3524 = vmatprep.mubr.bf16.mxu1 %v4685_v4  ;;  %7633 = vst [vmem:[#allocation21_spill] sm:$0xff] %v6866_v3  ;;  %v6869_v4 = vld [vmem:[%s6394_s8 + $0x7f4] ss:$8 sps:$4 sm:$0xff]  }
 0x180   : > { %3446 = vmatpush1.bf16.msra.mxu0 %v6794_v5  ;;  %7634 = vst [vmem:[#allocation22_spill] sm:$0xff] %v6869_v4 }
 0x181   : > { %3499 = vmatpush1.bf16.msra.mxu1 %v6797_v6  ;;  %3447 = vmatprep.subr.bf16.mxu0 %v6802_v7 }
 0x182   : > { %3500 = vmatprep.subr.bf16.mxu1 %v6805_v8  ;;  %v5694_v8 = vld [vmem:[%s6394_s8 + $0x4e4] ss:$8 sps:$4 sm:$0xff]  }
 0x184   : > { %3448 = vmatpush1.bf16.msra.mxu0 %v6810_v9 }
 0x185   : > { %3501 = vmatpush1.bf16.msra.mxu1 %v6813_v10  ;;  %3449 = vmatprep.subr.bf16.mxu0 %v6818_v11  ;;  %v5659_v11 = vld [vmem:[%s6394_s8 + $0x574] ss:$8 sps:$4 sm:$0xff]   ;;  %v5663_v10 = vld [vmem:[%s6394_s8 + $0x564] ss:$8 sps:$4 sm:$0xff]  }
 0x186   : > { %3502 = vmatprep.subr.bf16.mxu1 %v6821_v12 }
 0x188   : > { %3450 = vmatpush1.bf16.msra.mxu0 %v6826_v41  ;;  %v3572_v41 = vld [vmem:[%s6382_s28 + $0xd8] sm:$0xff] }
 0x189   : > { %3503 = vmatpush1.bf16.msra.mxu1 %v6829_v42  ;;  %3451 = vmatprep.subr.bf16.mxu0 %v6834_v45  ;;  %v1672_v45 = vld [vmem:[%s6377_s24 + $0xb8] sm:$0xff] }
 0x18a   : > { %3504 = vmatprep.subr.bf16.mxu1 %v6837_v46  ;;  %v4684_v46 = vcombine.low %v6766_v61, %v6769_v62  ;;  %v5533_v61 = vld [vmem:[%s6394_s8 + $0x170] ss:$8 sps:$4 sm:$0xff]   ;;  %v5534_v62 = vld [vmem:[%s6394_s8 + $0x64] ss:$8 sps:$4 sm:$0xff]  }
 0x18c   : > { %3452 = vmatpush1.bf16.msra.mxu0 %v6842_v49  ;;  %v6877_v49 = vld [vmem:[%s6394_s8 + $0x7f0] ss:$8 sps:$4 sm:$0xff]  }
 0x18d   : > { %3505 = vmatpush1.bf16.msra.mxu1 %v6845_v50  ;;  %3453 = vmatprep.subr.bf16.mxu0 %v6850_v47  ;;  %v6874_v50 = vld [vmem:[%s6394_s8 + $0x6f0] ss:$8 sps:$4 sm:$0xff]   ;;  %7636 = vst [vmem:[#allocation24_spill] sm:$0xff] %v6877_v49  ;;  %v6885_v47 = vld [vmem:[%s6394_s8 + $0x7e4] ss:$8 sps:$4 sm:$0xff]  }
 0x18e   : > { %3506 = vmatprep.subr.bf16.mxu1 %v6853_v48  ;;  %7635 = vst [vmem:[#allocation23_spill] sm:$0xff] %v6874_v50  ;;  %v6882_v48 = vld [vmem:[%s6394_s8 + $0x6e4] ss:$8 sps:$4 sm:$0xff]   ;;  %7638 = vst [vmem:[#allocation26_spill] sm:$0xff] %v6885_v47 }
 0x18f   : > { %7637 = vst [vmem:[#allocation25_spill] sm:$0xff] %v6882_v48 }
 0x190   : > { %3454 = vmatpush1.bf16.msra.mxu0 %v6858_v58  ;;  %v6893_v58 = vld [vmem:[%s6394_s8 + $0x7e0] ss:$8 sps:$4 sm:$0xff]  }
 0x191   : > { %3507 = vmatpush1.bf16.msra.mxu1 %v6861_v59  ;;  %3455 = vmatprep.subr.bf16.mxu0 %v6866_v3  ;;  %v6890_v59 = vld [vmem:[%s6394_s8 + $0x6e0] ss:$8 sps:$4 sm:$0xff]   ;;  %7640 = vst [vmem:[#allocation28_spill] sm:$0xff] %v6893_v58  ;;  %v6901_v3 = vld [vmem:[%s6394_s8 + $0x7d4] ss:$8 sps:$4 sm:$0xff]  }
 0x192   : > { %3508 = vmatprep.subr.bf16.mxu1 %v6869_v4  ;;  %7639 = vst [vmem:[#allocation27_spill] sm:$0xff] %v6890_v59  ;;  %v6898_v4 = vld [vmem:[%s6394_s8 + $0x6d4] ss:$8 sps:$4 sm:$0xff]   ;;  %7642 = vst [vmem:[#allocation30_spill] sm:$0xff] %v6901_v3 }
 0x193   : > { %7641 = vst [vmem:[#allocation29_spill] sm:$0xff] %v6898_v4 }
 0x194   : > { %3456 = vmatpush2.bf16.msra.mxu0 %v6874_v50  ;;  %v6909_v50 = vld [vmem:[%s6394_s8 + $0x7d0] ss:$8 sps:$4 sm:$0xff]  }
 0x195   : > { %3509 = vmatpush2.bf16.msra.mxu1 %v6877_v49  ;;  %3457 = vmatprep.subr.bf16.mxu0 %v6882_v48  ;;  %v6906_v49 = vld [vmem:[%s6394_s8 + $0x6d0] ss:$8 sps:$4 sm:$0xff]   ;;  %7644 = vst [vmem:[#allocation32_spill] sm:$0xff] %v6909_v50  ;;  %v6917_v48 = vld [vmem:[%s6394_s8 + $0x7c4] ss:$8 sps:$4 sm:$0xff]  }
 0x196   : > { %3510 = vmatprep.subr.bf16.mxu1 %v6885_v47  ;;  %7643 = vst [vmem:[#allocation31_spill] sm:$0xff] %v6906_v49  ;;  %v6914_v47 = vld [vmem:[%s6394_s8 + $0x6c4] ss:$8 sps:$4 sm:$0xff]   ;;  %7646 = vst [vmem:[#allocation34_spill] sm:$0xff] %v6917_v48 }
 0x197   : > { %7645 = vst [vmem:[#allocation33_spill] sm:$0xff] %v6914_v47 }
 0x198   : > { %3458 = vmatpush2.bf16.msra.mxu0 %v6890_v59  ;;  %v6925_v59 = vld [vmem:[%s6394_s8 + $0x7c0] ss:$8 sps:$4 sm:$0xff]  }
 0x199   : > { %3511 = vmatpush2.bf16.msra.mxu1 %v6893_v58  ;;  %3459 = vmatprep.subr.bf16.mxu0 %v6898_v4  ;;  %v6922_v58 = vld [vmem:[%s6394_s8 + $0x6c0] ss:$8 sps:$4 sm:$0xff]   ;;  %7648 = vst [vmem:[#allocation36_spill] sm:$0xff] %v6925_v59  ;;  %v6933_v4 = vld [vmem:[%s6394_s8 + $0x7b4] ss:$8 sps:$4 sm:$0xff]  }
 0x19a   : > { %3512 = vmatprep.subr.bf16.mxu1 %v6901_v3  ;;  %7647 = vst [vmem:[#allocation35_spill] sm:$0xff] %v6922_v58  ;;  %v6930_v3 = vld [vmem:[%s6394_s8 + $0x6b4] ss:$8 sps:$4 sm:$0xff]   ;;  %7650 = vst [vmem:[#allocation38_spill] sm:$0xff] %v6933_v4 }
 0x19b   : > { %7649 = vst [vmem:[#allocation37_spill] sm:$0xff] %v6930_v3 }
 0x19c   : > { %3460 = vmatpush2.bf16.msra.mxu0 %v6906_v49  ;;  %v6941_v49 = vld [vmem:[%s6394_s8 + $0x7b0] ss:$8 sps:$4 sm:$0xff]  }
 0x19d   : > { %3513 = vmatpush2.bf16.msra.mxu1 %v6909_v50  ;;  %3461 = vmatprep.subr.bf16.mxu0 %v6914_v47  ;;  %v6938_v50 = vld [vmem:[%s6394_s8 + $0x6b0] ss:$8 sps:$4 sm:$0xff]   ;;  %7652 = vst [vmem:[#allocation40_spill] sm:$0xff] %v6941_v49  ;;  %v6949_v47 = vld [vmem:[%s6394_s8 + $0x7a4] ss:$8 sps:$4 sm:$0xff]  }
 0x19e   : > { %3514 = vmatprep.subr.bf16.mxu1 %v6917_v48  ;;  %7651 = vst [vmem:[#allocation39_spill] sm:$0xff] %v6938_v50  ;;  %v6946_v48 = vld [vmem:[%s6394_s8 + $0x6a4] ss:$8 sps:$4 sm:$0xff]   ;;  %7654 = vst [vmem:[#allocation42_spill] sm:$0xff] %v6949_v47 }
 0x19f   : > { %7653 = vst [vmem:[#allocation41_spill] sm:$0xff] %v6946_v48 }
 0x1a0   : > { %3462 = vmatpush2.bf16.msra.mxu0 %v6922_v58  ;;  %v6957_v58 = vld [vmem:[%s6394_s8 + $0x7a0] ss:$8 sps:$4 sm:$0xff]  }
 0x1a1   : > { %3515 = vmatpush2.bf16.msra.mxu1 %v6925_v59  ;;  %3463 = vmatprep.subr.bf16.mxu0 %v6930_v3  ;;  %v6954_v59 = vld [vmem:[%s6394_s8 + $0x6a0] ss:$8 sps:$4 sm:$0xff]   ;;  %7656 = vst [vmem:[#allocation44_spill] sm:$0xff] %v6957_v58  ;;  %v6965_v3 = vld [vmem:[%s6394_s8 + $0x794] ss:$8 sps:$4 sm:$0xff]  }
 0x1a2   : > { %3516 = vmatprep.subr.bf16.mxu1 %v6933_v4  ;;  %7655 = vst [vmem:[#allocation43_spill] sm:$0xff] %v6954_v59  ;;  %v6962_v4 = vld [vmem:[%s6394_s8 + $0x694] ss:$8 sps:$4 sm:$0xff]   ;;  %7658 = vst [vmem:[#allocation46_spill] sm:$0xff] %v6965_v3 }
 0x1a3   : > { %7657 = vst [vmem:[#allocation45_spill] sm:$0xff] %v6962_v4 }
 0x1a4   : > { %3464 = vmatpush2.bf16.msra.mxu0 %v6938_v50  ;;  %v6973_v50 = vld [vmem:[%s6394_s8 + $0x790] ss:$8 sps:$4 sm:$0xff]  }
 0x1a5   : > { %3517 = vmatpush2.bf16.msra.mxu1 %v6941_v49  ;;  %3465 = vmatprep.subr.bf16.mxu0 %v6946_v48  ;;  %v6970_v49 = vld [vmem:[%s6394_s8 + $0x690] ss:$8 sps:$4 sm:$0xff]   ;;  %7660 = vst [vmem:[#allocation48_spill] sm:$0xff] %v6973_v50  ;;  %v6981_v48 = vld [vmem:[%s6394_s8 + $0x784] ss:$8 sps:$4 sm:$0xff]  }
 0x1a6   : > { %3518 = vmatprep.subr.bf16.mxu1 %v6949_v47  ;;  %7659 = vst [vmem:[#allocation47_spill] sm:$0xff] %v6970_v49  ;;  %v6978_v47 = vld [vmem:[%s6394_s8 + $0x684] ss:$8 sps:$4 sm:$0xff]   ;;  %7662 = vst [vmem:[#allocation50_spill] sm:$0xff] %v6981_v48 }
 0x1a7   : > { %7661 = vst [vmem:[#allocation49_spill] sm:$0xff] %v6978_v47 }
 0x1a8   : > { %3466 = vmatpush2.bf16.msra.mxu0 %v6954_v59  ;;  %v6989_v59 = vld [vmem:[%s6394_s8 + $0x780] ss:$8 sps:$4 sm:$0xff]  }
 0x1a9   : > { %3519 = vmatpush2.bf16.msra.mxu1 %v6957_v58  ;;  %3467 = vmatprep.subr.bf16.mxu0 %v6962_v4  ;;  %v6986_v58 = vld [vmem:[%s6394_s8 + $0x680] ss:$8 sps:$4 sm:$0xff]   ;;  %7664 = vst [vmem:[#allocation52_spill] sm:$0xff] %v6989_v59  ;;  %v1671_v4 = vld [vmem:[%s6377_s24 + $0xb0] sm:$0xff] }
 0x1aa   : > { %3520 = vmatprep.subr.bf16.mxu1 %v6965_v3  ;;  %7663 = vst [vmem:[#allocation51_spill] sm:$0xff] %v6986_v58  ;;  %v4682_v3 = vcombine.low %v6760_v57, %v6763_v60  ;;  %v5532_v60 = vld [vmem:[%s6394_s8 + $0x70] ss:$8 sps:$4 sm:$0xff]  }
 0x1ac   : > { %3468 = vmatpush2.bf16.msra.mxu0 %v6970_v49  ;;  %v1679_v49 = vld [vmem:[%s6377_s24 + $0xf0] sm:$0xff] }
 0x1ad   : > { %3521 = vmatpush2.bf16.msra.mxu1 %v6973_v50  ;;  %3469 = vmatprep.subr.bf16.mxu0 %v6978_v47  ;;  %v1680_v50 = vld [vmem:[%s6377_s24 + $0xf8] sm:$0xff]  ;;  %v4699_v42 = vcombine.high %v1671_v4, %v1679_v49 }
 0x1ae   : > { %3522 = vmatprep.subr.bf16.mxu1 %v6981_v48  ;;  %v5530_v47 = vld [vmem:[%s6394_s8 + $0x74] ss:$8 sps:$4 sm:$0xff]   ;;  %v4701_v57 = vcombine.high %v1672_v45, %v1680_v50 }
 0x1af   : > { %v5531_v48 = vld [vmem:[%s6394_s8 + $0x174] ss:$8 sps:$4 sm:$0xff]  }
 0x1b0   : > { %3470 = vmatpush2.bf16.msra.mxu0 %v6986_v58  ;;  %v7016_v58 = vld [vmem:[%s6382_s28 + $0x8] sm:$0xff] }
 0x1b1   : > { %3523 = vmatpush2.bf16.msra.mxu1 %v6989_v59  ;;  %3737 = vmatprep.subr.bf16.mxu0 %v5530_v47  ;;  %v5535_v47 = vld [vmem:[%s6394_s8 + $0x164] ss:$8 sps:$4 sm:$0xff]   ;;  %v4700_v59 = vcombine.low %v1672_v45, %v1680_v50  ;;  %v5540_v50 = vld [vmem:[%s6394_s8 + $0x50] ss:$8 sps:$4 sm:$0xff]  }
 0x1b2   : > { %3790 = vmatprep.subr.bf16.mxu1 %v5531_v48  ;;  %v7010_v48 = vld [vmem:[%s6382_s28] sm:$0xff] }
 0x1b3   : > { %3472 = vmatmul.mubr.bf16.vlgmr.msra.gmra.mxu0 %v4682_v3  ;;  %v4698_v3 = vcombine.low %v1671_v4, %v1679_v49  ;;  %v5541_v4 = vld [vmem:[%s6394_s8 + $0x150] ss:$8 sps:$4 sm:$0xff]  }
 0x1b4   : > { %3525 = vmatmul.mubr.bf16.vlgmr.msra.gmra.mxu1 %v4684_v46  ;;  %3738 = vmatpush1.bf16.msra.mxu0 %v5532_v60  ;;  %v7013_v46 = vld [vmem:[%s6382_s28 + $0x40] sm:$0xff]  ;;  %v7019_v60 = vld [vmem:[%s6382_s28 + $0x48] sm:$0xff]  ;;  %v7183_v12 = vpop.f32.mrf.mxu1 }
 0x1b5   : > { %3791 = vmatpush1.bf16.msra.mxu1 %v5533_v61  ;;  %3739 = vmatprep.subr.bf16.mxu0 %v5534_v62  ;;  %v5536_v61 = vld [vmem:[%s6394_s8 + $0x60] ss:$8 sps:$4 sm:$0xff]   ;;  %v4959_v45 = vcombine.high %v7010_v48, %v7013_v46  ;;  %v4961_v49 = vcombine.high %v7016_v58, %v7019_v60  ;;  %7666 = vst [vmem:[#allocation54_spill] sm:$0xff] %v7183_v12 }
 0x1b6   : > { %3792 = vmatprep.subr.bf16.mxu1 %v5535_v47  ;;  %3481 = vmatprep.mubr.bf16.mxu0 %v4699_v42  ;;  %v5537_v62 = vld [vmem:[%s6394_s8 + $0x160] ss:$8 sps:$4 sm:$0xff]   ;;  %v5538_v42 = vld [vmem:[%s6394_s8 + $0x54] ss:$8 sps:$4 sm:$0xff]   ;;  %v5542_v47 = vld [vmem:[%s6394_s8 + $0x44] ss:$8 sps:$4 sm:$0xff]  }
 0x1b7   : > { %3534 = vmatprep.mubr.bf16.mxu1 %v4701_v57  ;;  %v5539_v57 = vld [vmem:[%s6394_s8 + $0x154] ss:$8 sps:$4 sm:$0xff]   ;;  %v7206_v12 = vld [vmem:[%s6382_s28 + $0x28] sm:$0xff] }
 0x1b8   : > { %3740 = vmatpush1.bf16.msra.mxu0 %v5536_v61  ;;  %v5543_v61 = vld [vmem:[%s6394_s8 + $0x144] ss:$8 sps:$4 sm:$0xff]  }
 0x1b9   : > { %3793 = vmatpush1.bf16.msra.mxu1 %v5537_v62  ;;  %3741 = vmatprep.subr.bf16.mxu0 %v5538_v42  ;;  %v5544_v62 = vld [vmem:[%s6394_s8 + $0x40] ss:$8 sps:$4 sm:$0xff]   ;;  %v5547_v42 = vld [vmem:[%s6394_s8 + $0x134] ss:$8 sps:$4 sm:$0xff]  }
 0x1ba   : > { %3794 = vmatprep.subr.bf16.mxu1 %v5539_v57  ;;  %v5548_v57 = vld [vmem:[%s6394_s8 + $0x30] ss:$8 sps:$4 sm:$0xff]  }
 0x1bb   : > { %3482 = vmatmul.mubr.bf16.gmra.mxu0 %v4698_v3  ;;  %v5545_v3 = vld [vmem:[%s6394_s8 + $0x140] ss:$8 sps:$4 sm:$0xff]  }
 0x1bc   : > { %3535 = vmatmul.mubr.bf16.gmra.mxu1 %v4700_v59  ;;  %3742 = vmatpush1.bf16.msra.mxu0 %v5540_v50  ;;  %v5546_v59 = vld [vmem:[%s6394_s8 + $0x34] ss:$8 sps:$4 sm:$0xff]   ;;  %v5549_v50 = vld [vmem:[%s6394_s8 + $0x130] ss:$8 sps:$4 sm:$0xff]  }
 0x1bd   : > { %3795 = vmatpush1.bf16.msra.mxu1 %v5541_v4  ;;  %3743 = vmatprep.subr.bf16.mxu0 %v5542_v47  ;;  %v5552_v4 = vld [vmem:[%s6394_s8 + $0x20] ss:$8 sps:$4 sm:$0xff]  }
 0x1be   : > { %3796 = vmatprep.subr.bf16.mxu1 %v5543_v61  ;;  %3769 = vmatprep.mubr.bf16.mxu0 %v4959_v45  ;;  %v5550_v45 = vld [vmem:[%s6394_s8 + $0x24] ss:$8 sps:$4 sm:$0xff]   ;;  %v5553_v47 = vld [vmem:[%s6394_s8 + $0x120] ss:$8 sps:$4 sm:$0xff]   ;;  %v5554_v61 = vld [vmem:[%s6394_s8 + $0x14] ss:$8 sps:$4 sm:$0xff]  }
 0x1bf   : > { %3822 = vmatprep.mubr.bf16.mxu1 %v4961_v49  ;;  %v5551_v49 = vld [vmem:[%s6394_s8 + $0x124] ss:$8 sps:$4 sm:$0xff]  }
 0x1c0   : > { %3744 = vmatpush1.bf16.msra.mxu0 %v5544_v62  ;;  %v5555_v62 = vld [vmem:[%s6394_s8 + $0x114] ss:$8 sps:$4 sm:$0xff]  }
 0x1c1   : > { %3797 = vmatpush1.bf16.msra.mxu1 %v5545_v3  ;;  %3745 = vmatprep.subr.bf16.mxu0 %v5546_v59  ;;  %v5556_v3 = vld [vmem:[%s6394_s8 + $0x10] ss:$8 sps:$4 sm:$0xff]  }
 0x1c2   : > { %3798 = vmatprep.subr.bf16.mxu1 %v5547_v42  ;;  %v5557_v59 = vld [vmem:[%s6394_s8 + $0x110] ss:$8 sps:$4 sm:$0xff]   ;;  %v5558_v42 = vld [vmem:[%s6394_s8 + $0x4] ss:$8 sps:$4 sm:$0xff]  }
 0x1c4   : > { %3746 = vmatpush1.bf16.msra.mxu0 %v5548_v57  ;;  %v5559_v57 = vld [vmem:[%s6394_s8 + $0x104] ss:$8 sps:$4 sm:$0xff]  }
 0x1c5   : > { %3799 = vmatpush1.bf16.msra.mxu1 %v5549_v50  ;;  %3747 = vmatprep.subr.bf16.mxu0 %v5550_v45  ;;  %v5560_v50 = vld [vmem:[%s6394_s8] ss:$8 sps:$4 sm:$0xff]  }
 0x1c6   : > { %3800 = vmatprep.subr.bf16.mxu1 %v5551_v49  ;;  %v5561_v45 = vld [vmem:[%s6394_s8 + $0x100] ss:$8 sps:$4 sm:$0xff]   ;;  %v5562_v49 = vld [vmem:[%s6394_s8 + $0xf4] ss:$8 sps:$4 sm:$0xff]  }
 0x1c8   : > { %3748 = vmatpush1.bf16.msra.mxu0 %v5552_v4  ;;  %v5563_v4 = vld [vmem:[%s6394_s8 + $0x1f4] ss:$8 sps:$4 sm:$0xff]  }
 0x1c9   : > { %3801 = vmatpush1.bf16.msra.mxu1 %v5553_v47  ;;  %3749 = vmatprep.subr.bf16.mxu0 %v5554_v61  ;;  %v5564_v47 = vld [vmem:[%s6394_s8 + $0xf0] ss:$8 sps:$4 sm:$0xff]  }
 0x1ca   : > { %3802 = vmatprep.subr.bf16.mxu1 %v5555_v62  ;;  %v5565_v61 = vld [vmem:[%s6394_s8 + $0x1f0] ss:$8 sps:$4 sm:$0xff]   ;;  %v5566_v62 = vld [vmem:[%s6394_s8 + $0xe4] ss:$8 sps:$4 sm:$0xff]  }
 0x1cc   : > { %3750 = vmatpush1.bf16.msra.mxu0 %v5556_v3  ;;  %v5567_v3 = vld [vmem:[%s6394_s8 + $0x1e4] ss:$8 sps:$4 sm:$0xff]  }
 0x1cd   : > { %3803 = vmatpush1.bf16.msra.mxu1 %v5557_v59  ;;  %3751 = vmatprep.subr.bf16.mxu0 %v5558_v42  ;;  %v5568_v59 = vld [vmem:[%s6394_s8 + $0xe0] ss:$8 sps:$4 sm:$0xff]  }
 0x1ce   : > { %3804 = vmatprep.subr.bf16.mxu1 %v5559_v57  ;;  %v5569_v42 = vld [vmem:[%s6394_s8 + $0x1e0] ss:$8 sps:$4 sm:$0xff]   ;;  %v5570_v57 = vld [vmem:[%s6394_s8 + $0xd4] ss:$8 sps:$4 sm:$0xff]  }
 0x1d0   : > { %3752 = vmatpush1.bf16.msra.mxu0 %v5560_v50  ;;  %v5571_v50 = vld [vmem:[%s6394_s8 + $0x1d4] ss:$8 sps:$4 sm:$0xff]  }
 0x1d1   : > { %3805 = vmatpush1.bf16.msra.mxu1 %v5561_v45  ;;  %3753 = vmatprep.subr.bf16.mxu0 %v5562_v49  ;;  %v5572_v45 = vld [vmem:[%s6394_s8 + $0xd0] ss:$8 sps:$4 sm:$0xff]  }
 0x1d2   : > { %3806 = vmatprep.subr.bf16.mxu1 %v5563_v4  ;;  %v5573_v49 = vld [vmem:[%s6394_s8 + $0x1d0] ss:$8 sps:$4 sm:$0xff]   ;;  %v5574_v4 = vld [vmem:[%s6394_s8 + $0xc4] ss:$8 sps:$4 sm:$0xff]  }
 0x1d4   : > { %3754 = vmatpush2.bf16.msra.mxu0 %v5564_v47  ;;  %v5575_v47 = vld [vmem:[%s6394_s8 + $0x1c4] ss:$8 sps:$4 sm:$0xff]  }
 0x1d5   : > { %3807 = vmatpush2.bf16.msra.mxu1 %v5565_v61  ;;  %3755 = vmatprep.subr.bf16.mxu0 %v5566_v62  ;;  %v5576_v61 = vld [vmem:[%s6394_s8 + $0xc0] ss:$8 sps:$4 sm:$0xff]  }
 0x1d6   : > { %3808 = vmatprep.subr.bf16.mxu1 %v5567_v3  ;;  %v5577_v62 = vld [vmem:[%s6394_s8 + $0x1c0] ss:$8 sps:$4 sm:$0xff]   ;;  %v5578_v3 = vld [vmem:[%s6394_s8 + $0xb4] ss:$8 sps:$4 sm:$0xff]  }
 0x1d8   : > { %3756 = vmatpush2.bf16.msra.mxu0 %v5568_v59  ;;  %v5579_v59 = vld [vmem:[%s6394_s8 + $0x1b4] ss:$8 sps:$4 sm:$0xff]  }
 0x1d9   : > { %3809 = vmatpush2.bf16.msra.mxu1 %v5569_v42  ;;  %3757 = vmatprep.subr.bf16.mxu0 %v5570_v57  ;;  %v5580_v42 = vld [vmem:[%s6394_s8 + $0xb0] ss:$8 sps:$4 sm:$0xff]  }
 0x1da   : > { %3810 = vmatprep.subr.bf16.mxu1 %v5571_v50  ;;  %v5581_v57 = vld [vmem:[%s6394_s8 + $0x1b0] ss:$8 sps:$4 sm:$0xff]   ;;  %v5582_v50 = vld [vmem:[%s6394_s8 + $0xa4] ss:$8 sps:$4 sm:$0xff]  }
 0x1dc   : > { %3758 = vmatpush2.bf16.msra.mxu0 %v5572_v45  ;;  %v5583_v45 = vld [vmem:[%s6394_s8 + $0x1a4] ss:$8 sps:$4 sm:$0xff]  }
 0x1dd   : > { %3811 = vmatpush2.bf16.msra.mxu1 %v5573_v49  ;;  %3759 = vmatprep.subr.bf16.mxu0 %v5574_v4  ;;  %v5584_v49 = vld [vmem:[%s6394_s8 + $0xa0] ss:$8 sps:$4 sm:$0xff]  }
 0x1de   : > { %3812 = vmatprep.subr.bf16.mxu1 %v5575_v47  ;;  %v5585_v4 = vld [vmem:[%s6394_s8 + $0x1a0] ss:$8 sps:$4 sm:$0xff]   ;;  %v5586_v47 = vld [vmem:[%s6394_s8 + $0x94] ss:$8 sps:$4 sm:$0xff]  }
 0x1e0   : > { %3760 = vmatpush2.bf16.msra.mxu0 %v5576_v61  ;;  %v5587_v61 = vld [vmem:[%s6394_s8 + $0x194] ss:$8 sps:$4 sm:$0xff]  }
 0x1e1   : > { %3813 = vmatpush2.bf16.msra.mxu1 %v5577_v62  ;;  %3761 = vmatprep.subr.bf16.mxu0 %v5578_v3  ;;  %v5588_v62 = vld [vmem:[%s6394_s8 + $0x90] ss:$8 sps:$4 sm:$0xff]  }
 0x1e2   : > { %3814 = vmatprep.subr.bf16.mxu1 %v5579_v59  ;;  %v5589_v3 = vld [vmem:[%s6394_s8 + $0x190] ss:$8 sps:$4 sm:$0xff]   ;;  %v5590_v59 = vld [vmem:[%s6394_s8 + $0x84] ss:$8 sps:$4 sm:$0xff]  }
 0x1e4   : > { %3762 = vmatpush2.bf16.msra.mxu0 %v5580_v42  ;;  %v5591_v42 = vld [vmem:[%s6394_s8 + $0x184] ss:$8 sps:$4 sm:$0xff]  }
 0x1e5   : > { %3815 = vmatpush2.bf16.msra.mxu1 %v5581_v57  ;;  %3763 = vmatprep.subr.bf16.mxu0 %v5582_v50  ;;  %v3561_v57 = vld [vmem:[%s6382_s28 + $0x80] sm:$0xff]  ;;  %v4958_v50 = vcombine.low %v7010_v48, %v7013_v46 }
 0x1e6   : > { %3816 = vmatprep.subr.bf16.mxu1 %v5583_v45  ;;  %v4960_v45 = vcombine.low %v7016_v58, %v7019_v60  ;;  %v5596_v58 = vld [vmem:[%s6394_s8 + $0x270] ss:$8 sps:$4 sm:$0xff]  }
 0x1e7   : > { %v5597_v60 = vld [vmem:[%s6394_s8 + $0x370] ss:$8 sps:$4 sm:$0xff]  }
 0x1e8   : > { %3764 = vmatpush2.bf16.msra.mxu0 %v5584_v49  ;;  %v3569_v49 = vld [vmem:[%s6382_s28 + $0xc0] sm:$0xff] }
 0x1e9   : > { %3817 = vmatpush2.bf16.msra.mxu1 %v5585_v4  ;;  %3765 = vmatprep.subr.bf16.mxu0 %v5586_v47  ;;  %v3562_v4 = vld [vmem:[%s6382_s28 + $0x88] sm:$0xff]  ;;  %v4975_v48 = vcombine.high %v3561_v57, %v3569_v49 }
 0x1ea   : > { %3818 = vmatprep.subr.bf16.mxu1 %v5587_v61  ;;  %v3570_v47 = vld [vmem:[%s6382_s28 + $0xc8] sm:$0xff] }
 0x1eb   : > { %v5592_v61 = vld [vmem:[%s6394_s8 + $0x80] ss:$8 sps:$4 sm:$0xff]   ;;  %v4977_v46 = vcombine.high %v3562_v4, %v3570_v47 }
 0x1ec   : > { %3766 = vmatpush2.bf16.msra.mxu0 %v5588_v62  ;;  %v5593_v62 = vld [vmem:[%s6394_s8 + $0x180] ss:$8 sps:$4 sm:$0xff]  }
 0x1ed   : > { %3819 = vmatpush2.bf16.msra.mxu1 %v5589_v3  ;;  %3767 = vmatprep.subr.bf16.mxu0 %v5590_v59  ;;  %v5594_v3 = vld [vmem:[%s6394_s8 + $0x274] ss:$8 sps:$4 sm:$0xff]  }
 0x1ee   : > { %3820 = vmatprep.subr.bf16.mxu1 %v5591_v42  ;;  %v5595_v59 = vld [vmem:[%s6394_s8 + $0x374] ss:$8 sps:$4 sm:$0xff]   ;;  %v5598_v42 = vld [vmem:[%s6394_s8 + $0x264] ss:$8 sps:$4 sm:$0xff]  }
 0x1f0   : > { %3768 = vmatpush2.bf16.msra.mxu0 %v5592_v61  ;;  %v5599_v61 = vld [vmem:[%s6394_s8 + $0x364] ss:$8 sps:$4 sm:$0xff]  }
 0x1f1   : > { %3821 = vmatpush2.bf16.msra.mxu1 %v5593_v62  ;;  %3843 = vmatprep.subr.bf16.mxu0 %v5594_v3  ;;  %v7098_v62 = vld [vmem:[%s6382_s28 + $0x10] sm:$0xff]  ;;  %v4976_v3 = vcombine.low %v3562_v4, %v3570_v47 }
 0x1f2   : > { %3896 = vmatprep.subr.bf16.mxu1 %v5595_v59  ;;  %v7104_v59 = vld [vmem:[%s6382_s28 + $0x18] sm:$0xff] }
 0x1f3   : > { %3770 = vmatmul.mubr.bf16.vlgmr.msra.gmra.mxu0 %v4958_v50  ;;  %v4974_v50 = vcombine.low %v3561_v57, %v3569_v49  ;;  %v5604_v4 = vld [vmem:[%s6394_s8 + $0x250] ss:$8 sps:$4 sm:$0xff]  }
 0x1f4   : > { %3823 = vmatmul.mubr.bf16.vlgmr.msra.gmra.mxu1 %v4960_v45  ;;  %3844 = vmatpush1.bf16.msra.mxu0 %v5596_v58  ;;  %v7101_v45 = vld [vmem:[%s6382_s28 + $0x50] sm:$0xff]  ;;  %v7107_v58 = vld [vmem:[%s6382_s28 + $0x58] sm:$0xff] }
 0x1f5   : > { %3897 = vmatpush1.bf16.msra.mxu1 %v5597_v60  ;;  %3845 = vmatprep.subr.bf16.mxu0 %v5598_v42  ;;  %v5600_v60 = vld [vmem:[%s6394_s8 + $0x260] ss:$8 sps:$4 sm:$0xff]   ;;  %v4963_v57 = vcombine.high %v7098_v62, %v7101_v45  ;;  %v4965_v49 = vcombine.high %v7104_v59, %v7107_v58  ;;  %v5605_v47 = vld [vmem:[%s6394_s8 + $0x350] ss:$8 sps:$4 sm:$0xff]  }
 0x1f6   : > { %3898 = vmatprep.subr.bf16.mxu1 %v5599_v61  ;;  %3779 = vmatprep.mubr.bf16.mxu0 %v4975_v48  ;;  %v5601_v42 = vld [vmem:[%s6394_s8 + $0x360] ss:$8 sps:$4 sm:$0xff]   ;;  %v5602_v48 = vld [vmem:[%s6394_s8 + $0x254] ss:$8 sps:$4 sm:$0xff]   ;;  %v5606_v61 = vld [vmem:[%s6394_s8 + $0x244] ss:$8 sps:$4 sm:$0xff]  }
 0x1f7   : > { %3832 = vmatprep.mubr.bf16.mxu1 %v4977_v46  ;;  %v5603_v46 = vld [vmem:[%s6394_s8 + $0x354] ss:$8 sps:$4 sm:$0xff]  }
 0x1f8   : > { %3846 = vmatpush1.bf16.msra.mxu0 %v5600_v60  ;;  %v5607_v60 = vld [vmem:[%s6394_s8 + $0x344] ss:$8 sps:$4 sm:$0xff]  }
 0x1f9   : > { %3899 = vmatpush1.bf16.msra.mxu1 %v5601_v42  ;;  %3847 = vmatprep.subr.bf16.mxu0 %v5602_v48  ;;  %v5608_v42 = vld [vmem:[%s6394_s8 + $0x240] ss:$8 sps:$4 sm:$0xff]   ;;  %v5611_v48 = vld [vmem:[%s6394_s8 + $0x334] ss:$8 sps:$4 sm:$0xff]  }
 0x1fa   : > { %3900 = vmatprep.subr.bf16.mxu1 %v5603_v46  ;;  %v5612_v46 = vld [vmem:[%s6394_s8 + $0x230] ss:$8 sps:$4 sm:$0xff]  }
 0x1fb   : > { %3780 = vmatmul.mubr.bf16.gmra.mxu0 %v4974_v50  ;;  %v5609_v50 = vld [vmem:[%s6394_s8 + $0x340] ss:$8 sps:$4 sm:$0xff]  }
 0x1fc   : > { %3833 = vmatmul.mubr.bf16.gmra.mxu1 %v4976_v3  ;;  %3848 = vmatpush1.bf16.msra.mxu0 %v5604_v4  ;;  %v5610_v3 = vld [vmem:[%s6394_s8 + $0x234] ss:$8 sps:$4 sm:$0xff]   ;;  %v5613_v4 = vld [vmem:[%s6394_s8 + $0x330] ss:$8 sps:$4 sm:$0xff]  }
 0x1fd   : > { %3901 = vmatpush1.bf16.msra.mxu1 %v5605_v47  ;;  %3849 = vmatprep.subr.bf16.mxu0 %v5606_v61  ;;  %v5616_v47 = vld [vmem:[%s6394_s8 + $0x220] ss:$8 sps:$4 sm:$0xff]  }
 0x1fe   : > { %3902 = vmatprep.subr.bf16.mxu1 %v5607_v60  ;;  %3875 = vmatprep.mubr.bf16.mxu0 %v4963_v57  ;;  %v5614_v57 = vld [vmem:[%s6394_s8 + $0x224] ss:$8 sps:$4 sm:$0xff]   ;;  %v5617_v61 = vld [vmem:[%s6394_s8 + $0x320] ss:$8 sps:$4 sm:$0xff]   ;;  %v5618_v60 = vld [vmem:[%s6394_s8 + $0x214] ss:$8 sps:$4 sm:$0xff]  }
 0x1ff   : > { %3928 = vmatprep.mubr.bf16.mxu1 %v4965_v49  ;;  %v5615_v49 = vld [vmem:[%s6394_s8 + $0x324] ss:$8 sps:$4 sm:$0xff]  }
 0x200   : > { %3850 = vmatpush1.bf16.msra.mxu0 %v5608_v42  ;;  %v5619_v42 = vld [vmem:[%s6394_s8 + $0x314] ss:$8 sps:$4 sm:$0xff]  }
 0x201   : > { %3903 = vmatpush1.bf16.msra.mxu1 %v5609_v50  ;;  %3851 = vmatprep.subr.bf16.mxu0 %v5610_v3  ;;  %v5620_v50 = vld [vmem:[%s6394_s8 + $0x210] ss:$8 sps:$4 sm:$0xff]  }
 0x202   : > { %3904 = vmatprep.subr.bf16.mxu1 %v5611_v48  ;;  %v5621_v3 = vld [vmem:[%s6394_s8 + $0x310] ss:$8 sps:$4 sm:$0xff]   ;;  %v5622_v48 = vld [vmem:[%s6394_s8 + $0x204] ss:$8 sps:$4 sm:$0xff]  }
 0x204   : > { %3852 = vmatpush1.bf16.msra.mxu0 %v5612_v46  ;;  %v5623_v46 = vld [vmem:[%s6394_s8 + $0x304] ss:$8 sps:$4 sm:$0xff]  }
 0x205   : > { %3905 = vmatpush1.bf16.msra.mxu1 %v5613_v4  ;;  %3853 = vmatprep.subr.bf16.mxu0 %v5614_v57  ;;  %v5624_v4 = vld [vmem:[%s6394_s8 + $0x200] ss:$8 sps:$4 sm:$0xff]  }
 0x206   : > { %3906 = vmatprep.subr.bf16.mxu1 %v5615_v49  ;;  %v5625_v57 = vld [vmem:[%s6394_s8 + $0x300] ss:$8 sps:$4 sm:$0xff]   ;;  %v5626_v49 = vld [vmem:[%s6394_s8 + $0x2f4] ss:$8 sps:$4 sm:$0xff]  }
 0x208   : > { %3854 = vmatpush1.bf16.msra.mxu0 %v5616_v47  ;;  %v5627_v47 = vld [vmem:[%s6394_s8 + $0x3f4] ss:$8 sps:$4 sm:$0xff]  }
 0x209   : > { %3907 = vmatpush1.bf16.msra.mxu1 %v5617_v61  ;;  %3855 = vmatprep.subr.bf16.mxu0 %v5618_v60  ;;  %v5628_v61 = vld [vmem:[%s6394_s8 + $0x2f0] ss:$8 sps:$4 sm:$0xff]  }
 0x20a   : > { %3908 = vmatprep.subr.bf16.mxu1 %v5619_v42  ;;  %v5629_v60 = vld [vmem:[%s6394_s8 + $0x3f0] ss:$8 sps:$4 sm:$0xff]   ;;  %v5630_v42 = vld [vmem:[%s6394_s8 + $0x2e4] ss:$8 sps:$4 sm:$0xff]  }
 0x20c   : > { %3856 = vmatpush1.bf16.msra.mxu0 %v5620_v50  ;;  %v5631_v50 = vld [vmem:[%s6394_s8 + $0x3e4] ss:$8 sps:$4 sm:$0xff]  }
 0x20d   : > { %3909 = vmatpush1.bf16.msra.mxu1 %v5621_v3  ;;  %3857 = vmatprep.subr.bf16.mxu0 %v5622_v48  ;;  %v5632_v3 = vld [vmem:[%s6394_s8 + $0x2e0] ss:$8 sps:$4 sm:$0xff]  }
 0x20e   : > { %3910 = vmatprep.subr.bf16.mxu1 %v5623_v46  ;;  %v5633_v48 = vld [vmem:[%s6394_s8 + $0x3e0] ss:$8 sps:$4 sm:$0xff]   ;;  %v5634_v46 = vld [vmem:[%s6394_s8 + $0x2d4] ss:$8 sps:$4 sm:$0xff]  }
 0x210   : > { %3858 = vmatpush1.bf16.msra.mxu0 %v5624_v4  ;;  %v5635_v4 = vld [vmem:[%s6394_s8 + $0x3d4] ss:$8 sps:$4 sm:$0xff]  }
 0x211   : > { %3911 = vmatpush1.bf16.msra.mxu1 %v5625_v57  ;;  %3859 = vmatprep.subr.bf16.mxu0 %v5626_v49  ;;  %v5636_v57 = vld [vmem:[%s6394_s8 + $0x2d0] ss:$8 sps:$4 sm:$0xff]  }
 0x212   : > { %3912 = vmatprep.subr.bf16.mxu1 %v5627_v47  ;;  %v5637_v49 = vld [vmem:[%s6394_s8 + $0x3d0] ss:$8 sps:$4 sm:$0xff]   ;;  %v5638_v47 = vld [vmem:[%s6394_s8 + $0x2c4] ss:$8 sps:$4 sm:$0xff]  }
 0x214   : > { %3860 = vmatpush2.bf16.msra.mxu0 %v5628_v61  ;;  %v5639_v61 = vld [vmem:[%s6394_s8 + $0x3c4] ss:$8 sps:$4 sm:$0xff]  }
 0x215   : > { %3913 = vmatpush2.bf16.msra.mxu1 %v5629_v60  ;;  %3861 = vmatprep.subr.bf16.mxu0 %v5630_v42  ;;  %v5640_v60 = vld [vmem:[%s6394_s8 + $0x2c0] ss:$8 sps:$4 sm:$0xff]  }
 0x216   : > { %3914 = vmatprep.subr.bf16.mxu1 %v5631_v50  ;;  %v5641_v42 = vld [vmem:[%s6394_s8 + $0x3c0] ss:$8 sps:$4 sm:$0xff]   ;;  %v5642_v50 = vld [vmem:[%s6394_s8 + $0x2b4] ss:$8 sps:$4 sm:$0xff]  }
 0x218   : > { %3862 = vmatpush2.bf16.msra.mxu0 %v5632_v3  ;;  %v5643_v3 = vld [vmem:[%s6394_s8 + $0x3b4] ss:$8 sps:$4 sm:$0xff]  }
 0x219   : > { %3915 = vmatpush2.bf16.msra.mxu1 %v5633_v48  ;;  %3863 = vmatprep.subr.bf16.mxu0 %v5634_v46  ;;  %v5644_v48 = vld [vmem:[%s6394_s8 + $0x2b0] ss:$8 sps:$4 sm:$0xff]  }
 0x21a   : > { %3916 = vmatprep.subr.bf16.mxu1 %v5635_v4  ;;  %v5645_v46 = vld [vmem:[%s6394_s8 + $0x3b0] ss:$8 sps:$4 sm:$0xff]   ;;  %v5646_v4 = vld [vmem:[%s6394_s8 + $0x2a4] ss:$8 sps:$4 sm:$0xff]  }
 0x21c   : > { %3864 = vmatpush2.bf16.msra.mxu0 %v5636_v57  ;;  %v5647_v57 = vld [vmem:[%s6394_s8 + $0x3a4] ss:$8 sps:$4 sm:$0xff]  }
 0x21d   : > { %3917 = vmatpush2.bf16.msra.mxu1 %v5637_v49  ;;  %3865 = vmatprep.subr.bf16.mxu0 %v5638_v47  ;;  %v7161_v49 = vpop.f32.mrf.mxu0  ;;  %v5648_v47 = vld [vmem:[%s6394_s8 + $0x2a0] ss:$8 sps:$4 sm:$0xff]  }
 0x21e   : > { %3918 = vmatprep.subr.bf16.mxu1 %v5639_v61  ;;  %7665 = vst [vmem:[#allocation53_spill] sm:$0xff] %v7161_v49  ;;  %v5649_v61 = vld [vmem:[%s6394_s8 + $0x3a0] ss:$8 sps:$4 sm:$0xff]  }
 0x21f   : > { %v5664_v49 = vld [vmem:[%s6394_s8 + $0x460] ss:$8 sps:$4 sm:$0xff]  }
 0x220   : > { %3866 = vmatpush2.bf16.msra.mxu0 %v5640_v60  ;;  %v5650_v60 = vld [vmem:[%s6394_s8 + $0x294] ss:$8 sps:$4 sm:$0xff]  }
 0x221   : > { %3919 = vmatpush2.bf16.msra.mxu1 %v5641_v42  ;;  %3867 = vmatprep.subr.bf16.mxu0 %v5642_v50  ;;  %v5651_v42 = vld [vmem:[%s6394_s8 + $0x394] ss:$8 sps:$4 sm:$0xff]   ;;  %v7167_v50 = vpop.f32.mrf.mxu0 }
 0x222   : > { %3920 = vmatprep.subr.bf16.mxu1 %v5643_v3  ;;  %v5652_v3 = vld [vmem:[%s6394_s8 + $0x290] ss:$8 sps:$4 sm:$0xff]  }
 0x224   : > { %3868 = vmatpush2.bf16.msra.mxu0 %v5644_v48  ;;  %v5653_v48 = vld [vmem:[%s6394_s8 + $0x390] ss:$8 sps:$4 sm:$0xff]  }
 0x225   : > { %3921 = vmatpush2.bf16.msra.mxu1 %v5645_v46  ;;  %3869 = vmatprep.subr.bf16.mxu0 %v5646_v4  ;;  %v5654_v46 = vld [vmem:[%s6394_s8 + $0x284] ss:$8 sps:$4 sm:$0xff]  }
 0x226   : > { %3922 = vmatprep.subr.bf16.mxu1 %v5647_v57  ;;  %v5655_v4 = vld [vmem:[%s6394_s8 + $0x384] ss:$8 sps:$4 sm:$0xff]   ;;  %v7173_v57 = vpop.f32.mrf.mxu0 }
 0x228   : > { %3870 = vmatpush2.bf16.msra.mxu0 %v5648_v47  ;;  %v3563_v47 = vld [vmem:[%s6382_s28 + $0x90] sm:$0xff] }
 0x229   : > { %3923 = vmatpush2.bf16.msra.mxu1 %v5649_v61  ;;  %3871 = vmatprep.subr.bf16.mxu0 %v5650_v60  ;;  %v4962_v61 = vcombine.low %v7098_v62, %v7101_v45  ;;  %v4964_v60 = vcombine.low %v7104_v59, %v7107_v58  ;;  %v7189_v62 = vpop.f32.mrf.mxu0  ;;  %v7191_v58 = vpop.f32.mrf.mxu1 }
 0x22a   : > { %3924 = vmatprep.subr.bf16.mxu1 %v5651_v42  ;;  %v3571_v42 = vld [vmem:[%s6382_s28 + $0xd0] sm:$0xff] }
 0x22b   : > { %v4979_v45 = vcombine.high %v3563_v47, %v3571_v42 }
 0x22c   : > { %3872 = vmatpush2.bf16.msra.mxu0 %v5652_v3  ;;  %v3564_v3 = vld [vmem:[%s6382_s28 + $0x98] sm:$0xff] }
 0x22d   : > { %3925 = vmatpush2.bf16.msra.mxu1 %v5653_v48  ;;  %3873 = vmatprep.subr.bf16.mxu0 %v5654_v46  ;;  %v5656_v48 = vld [vmem:[%s6394_s8 + $0x280] ss:$8 sps:$4 sm:$0xff]   ;;  %v4981_v59 = vcombine.high %v3564_v3, %v3572_v41  ;;  %v4980_v9 = vcombine.low %v3564_v3, %v3572_v41  ;;  %v5667_v41 = vld [vmem:[%s6394_s8 + $0x554] ss:$8 sps:$4 sm:$0xff]  }
 0x22e   : > { %3926 = vmatprep.subr.bf16.mxu1 %v5655_v4  ;;  %v5657_v46 = vld [vmem:[%s6394_s8 + $0x380] ss:$8 sps:$4 sm:$0xff]   ;;  %v5658_v4 = vld [vmem:[%s6394_s8 + $0x474] ss:$8 sps:$4 sm:$0xff]  }
 0x230   : > { %3874 = vmatpush2.bf16.msra.mxu0 %v5656_v48  ;;  %v7193_v48 = vpop.f32.mrf.mxu0 }
 0x231   : > { %3927 = vmatpush2.bf16.msra.mxu1 %v5657_v46  ;;  %3949 = vmatprep.subr.bf16.mxu0 %v5658_v4  ;;  %7667 = vst [vmem:[#allocation55_spill] sm:$0xff] %v7193_v48  ;;  %v5660_v46 = vld [vmem:[%s6394_s8 + $0x470] ss:$8 sps:$4 sm:$0xff]   ;;  %v7203_v48 = vld [vmem:[%s6382_s28 + $0x60] sm:$0xff] }
 0x232   : > { %4002 = vmatprep.subr.bf16.mxu1 %v5659_v11  ;;  %v5661_v4 = vld [vmem:[%s6394_s8 + $0x570] ss:$8 sps:$4 sm:$0xff]   ;;  %v5662_v11 = vld [vmem:[%s6394_s8 + $0x464] ss:$8 sps:$4 sm:$0xff]  }
 0x233   : > { %3876 = vmatmul.mubr.bf16.vlgmr.msra.gmra.mxu0 %v4962_v61  ;;  %v7200_v61 = vld [vmem:[%s6382_s28 + $0x20] sm:$0xff] }
 0x234   : > { %3929 = vmatmul.mubr.bf16.vlgmr.msra.gmra.mxu1 %v4964_v60  ;;  %3950 = vmatpush1.bf16.msra.mxu0 %v5660_v46  ;;  %v4978_v60 = vcombine.low %v3563_v47, %v3571_v42  ;;  %v7209_v46 = vld [vmem:[%s6382_s28 + $0x68] sm:$0xff]  ;;  %v4967_v47 = vcombine.high %v7200_v61, %v7203_v48 }
 0x235   : > { %4003 = vmatpush1.bf16.msra.mxu1 %v5661_v4  ;;  %3951 = vmatprep.subr.bf16.mxu0 %v5662_v11  ;;  %v7211_v4 = vpop.f32.mrf.mxu1  ;;  %v7213_v11 = vpop.f32.mrf.mxu0  ;;  %v4969_v42 = vcombine.high %v7206_v12, %v7209_v46 }
 0x236   : > { %4004 = vmatprep.subr.bf16.mxu1 %v5663_v10  ;;  %3885 = vmatprep.mubr.bf16.mxu0 %v4979_v45  ;;  %7668 = vst [vmem:[#allocation56_spill] sm:$0xff] %v7213_v11  ;;  %v5665_v10 = vld [vmem:[%s6394_s8 + $0x560] ss:$8 sps:$4 sm:$0xff]   ;;  %v5666_v45 = vld [vmem:[%s6394_s8 + $0x454] ss:$8 sps:$4 sm:$0xff]  }
 0x237   : > { %3938 = vmatprep.mubr.bf16.mxu1 %v4981_v59  ;;  %v7223_v3 = vpop.f32.mrf.mxu1  ;;  %v5668_v59 = vld [vmem:[%s6394_s8 + $0x450] ss:$8 sps:$4 sm:$0xff]  }
 0x238   : > { %3952 = vmatpush1.bf16.msra.mxu0 %v5664_v49  ;;  %v7225_v49 = vpop.f32.mrf.mxu0 }
 0x239   : > { %4005 = vmatpush1.bf16.msra.mxu1 %v5665_v10  ;;  %3953 = vmatprep.subr.bf16.mxu0 %v5666_v45  ;;  %7669 = vst [vmem:[#allocation57_spill] sm:$0xff] %v7225_v49  ;;  %v5669_v10 = vld [vmem:[%s6394_s8 + $0x550] ss:$8 sps:$4 sm:$0xff]   ;;  %v5670_v45 = vld [vmem:[%s6394_s8 + $0x444] ss:$8 sps:$4 sm:$0xff]   ;;  %v7231_v11 = vpop.f32.mrf.mxu1 }
 0x23a   : > { %4006 = vmatprep.subr.bf16.mxu1 %v5667_v41  ;;  %v5671_v41 = vld [vmem:[%s6394_s8 + $0x544] ss:$8 sps:$4 sm:$0xff]   ;;  %7670 = vst [vmem:[#allocation58_spill] sm:$0xff] %v7231_v11  ;;  %v5674_v49 = vld [vmem:[%s6394_s8 + $0x434] ss:$8 sps:$4 sm:$0xff]  }
 0x23b   : > { %3886 = vmatmul.mubr.bf16.gmra.mxu0 %v4978_v60  ;;  %v5672_v60 = vld [vmem:[%s6394_s8 + $0x440] ss:$8 sps:$4 sm:$0xff]   ;;  %v5678_v11 = vld [vmem:[%s6394_s8 + $0x424] ss:$8 sps:$4 sm:$0xff]  }
 0x23c   : > { %3939 = vmatmul.mubr.bf16.gmra.mxu1 %v4980_v9  ;;  %3954 = vmatpush1.bf16.msra.mxu0 %v5668_v59  ;;  %v7233_v9 = vpop.f32.mrf.mxu0  ;;  %v5673_v59 = vld [vmem:[%s6394_s8 + $0x540] ss:$8 sps:$4 sm:$0xff]  }
 0x23d   : > { %4007 = vmatpush1.bf16.msra.mxu1 %v5669_v10  ;;  %3955 = vmatprep.subr.bf16.mxu0 %v5670_v45  ;;  %7671 = vst [vmem:[#allocation59_spill] sm:$0xff] %v7233_v9  ;;  %v5675_v10 = vld [vmem:[%s6394_s8 + $0x534] ss:$8 sps:$4 sm:$0xff]   ;;  %v7239_v45 = vpop.f32.mrf.mxu1 }
 0x23e   : > { %4008 = vmatprep.subr.bf16.mxu1 %v5671_v41  ;;  %3981 = vmatprep.mubr.bf16.mxu0 %v4967_v47  ;;  %7672 = vst [vmem:[#allocation60_spill] sm:$0xff] %v7239_v45  ;;  %v7241_v41 = vpop.f32.mrf.mxu0  ;;  %v5676_v47 = vld [vmem:[%s6394_s8 + $0x430] ss:$8 sps:$4 sm:$0xff]   ;;  %v5681_v45 = vld [vmem:[%s6394_s8 + $0x520] ss:$8 sps:$4 sm:$0xff]  }
 0x23f   : > { %4034 = vmatprep.mubr.bf16.mxu1 %v4969_v42  ;;  %7673 = vst [vmem:[#allocation61_spill] sm:$0xff] %v7241_v41  ;;  %v5677_v42 = vld [vmem:[%s6394_s8 + $0x530] ss:$8 sps:$4 sm:$0xff]   ;;  %v5682_v9 = vld [vmem:[%s6394_s8 + $0x414] ss:$8 sps:$4 sm:$0xff]  }
 0x240   : > { %3956 = vmatpush1.bf16.msra.mxu0 %v5672_v60  ;;  %v5679_v60 = vld [vmem:[%s6394_s8 + $0x524] ss:$8 sps:$4 sm:$0xff]  }
 0x241   : > { %4009 = vmatpush1.bf16.msra.mxu1 %v5673_v59  ;;  %3957 = vmatprep.subr.bf16.mxu0 %v5674_v49  ;;  %v7247_v49 = vpop.f32.mrf.mxu1  ;;  %v7249_v59 = vpop.f32.mrf.mxu0  ;;  %v5686_v41 = vld [vmem:[%s6394_s8 + $0x404] ss:$8 sps:$4 sm:$0xff]  }
 0x242   : > { %4010 = vmatprep.subr.bf16.mxu1 %v5675_v10  ;;  %7674 = vst [vmem:[#allocation62_spill] sm:$0xff] %v7247_v49  ;;  %7675 = vst [vmem:[#allocation63_spill] sm:$0xff] %v7249_v59  ;;  %v5680_v10 = vld [vmem:[%s6394_s8 + $0x420] ss:$8 sps:$4 sm:$0xff]   ;;  %v5684_v49 = vld [vmem:[%s6394_s8 + $0x410] ss:$8 sps:$4 sm:$0xff]  }
 0x243   : > { %v5692_v59 = vld [vmem:[%s6394_s8 + $0x4f0] ss:$8 sps:$4 sm:$0xff]  }
 0x244   : > { %3958 = vmatpush1.bf16.msra.mxu0 %v5676_v47  ;;  %v5683_v47 = vld [vmem:[%s6394_s8 + $0x514] ss:$8 sps:$4 sm:$0xff]  }
 0x245   : > { %4011 = vmatpush1.bf16.msra.mxu1 %v5677_v42  ;;  %3959 = vmatprep.subr.bf16.mxu0 %v5678_v11  ;;  %v7255_v11 = vpop.f32.mrf.mxu1  ;;  %v7257_v42 = vpop.f32.mrf.mxu0 }
 0x246   : > { %4012 = vmatprep.subr.bf16.mxu1 %v5679_v60  ;;  %7676 = vst [vmem:[#allocation64_spill] sm:$0xff] %v7255_v11  ;;  %7677 = vst [vmem:[#allocation65_spill] sm:$0xff] %v7257_v42  ;;  %v5688_v11 = vld [vmem:[%s6394_s8 + $0x400] ss:$8 sps:$4 sm:$0xff]   ;;  %v5690_v42 = vld [vmem:[%s6394_s8 + $0x4f4] ss:$8 sps:$4 sm:$0xff]  }
 0x247   : > { %v7259_v60 = vpop.f32.mrf.mxu1 }
 0x248   : > { %3960 = vmatpush1.bf16.msra.mxu0 %v5680_v10  ;;  %7678 = vst [vmem:[#allocation66_spill] sm:$0xff] %v7259_v60  ;;  %v5685_v10 = vld [vmem:[%s6394_s8 + $0x510] ss:$8 sps:$4 sm:$0xff]   ;;  %v5689_v60 = vld [vmem:[%s6394_s8 + $0x500] ss:$8 sps:$4 sm:$0xff]  }
 0x249   : > { %4013 = vmatpush1.bf16.msra.mxu1 %v5681_v45  ;;  %3961 = vmatprep.subr.bf16.mxu0 %v5682_v9  ;;  %v5687_v9 = vld [vmem:[%s6394_s8 + $0x504] ss:$8 sps:$4 sm:$0xff]   ;;  %v7265_v45 = vpop.f32.mrf.mxu0 }
 0x24a   : > { %4014 = vmatprep.subr.bf16.mxu1 %v5683_v47  ;;  %v7267_v47 = vpop.f32.mrf.mxu1 }
 0x24b   : > { %7679 = vst [vmem:[#allocation67_spill] sm:$0xff] %v7267_v47  ;;  %v5695_v47 = vld [vmem:[%s6394_s8 + $0x5e4] ss:$8 sps:$4 sm:$0xff]  }
 0x24c   : > { %3962 = vmatpush1.bf16.msra.mxu0 %v5684_v49  ;;  %v5691_v49 = vld [vmem:[%s6394_s8 + $0x5f4] ss:$8 sps:$4 sm:$0xff]  }
 0x24d   : > { %4015 = vmatpush1.bf16.msra.mxu1 %v5685_v10  ;;  %3963 = vmatprep.subr.bf16.mxu0 %v5686_v41  ;;  %v7273_v10 = vpop.f32.mrf.mxu0  ;;  %v7275_v41 = vpop.f32.mrf.mxu1 }
 0x24e   : > { %4016 = vmatprep.subr.bf16.mxu1 %v5687_v9  ;;  %v5693_v9 = vld [vmem:[%s6394_s8 + $0x5f0] ss:$8 sps:$4 sm:$0xff]  }
 0x24f   : > { %v7281_v7 = vpop.f32.mrf.mxu0 }
 0x250   : > { %3964 = vmatpush1.bf16.msra.mxu0 %v5688_v11  ;;  %v7283_v11 = vpop.f32.mrf.mxu1 }
 0x251   : > { %4017 = vmatpush1.bf16.msra.mxu1 %v5689_v60  ;;  %3965 = vmatprep.subr.bf16.mxu0 %v5690_v42 }
 0x252   : > { %4018 = vmatprep.subr.bf16.mxu1 %v5691_v49  ;;  %v7289_v42 = vpop.f32.mrf.mxu1  ;;  %v7688_v49 = vld [vmem:[#allocation8_spill] sm:$0xff] }
 0x254   : > { %3966 = vmatpush2.bf16.msra.mxu0 %v5692_v59  ;;  %v7291_v59 = vpop.f32.mrf.mxu0 }
 0x255   : > { %4019 = vmatpush2.bf16.msra.mxu1 %v5693_v9  ;;  %3967 = vmatprep.subr.bf16.mxu0 %v5694_v8  ;;  %v7297_v8 = vpop.f32.mrf.mxu1  ;;  %v7689_v9 = vld [vmem:[#allocation9_spill] sm:$0xff] }
 0x256   : > { %4020 = vmatprep.subr.bf16.mxu1 %v5695_v47 }
 0x258   : > { %3968 = vmatpush2.bf16.msra.mxu0 %v6612_v13  ;;  %v7299_v13 = vpop.f32.mrf.mxu0 }
 0x259   : > { %4021 = vmatpush2.bf16.msra.mxu1 %v6615_v14  ;;  %3969 = vmatprep.subr.bf16.mxu0 %v6618_v15  ;;  %v7307_v15 = vpop.f32.mrf.mxu1 }
 0x25a   : > { %4022 = vmatprep.subr.bf16.mxu1 %v6621_v16  ;;  %v7301_v14 = vpop.f32.mrf.mxu0 }
 0x25c   : > { %3970 = vmatpush2.bf16.msra.mxu0 %v6624_v17  ;;  %v7309_v16 = vpop.f32.mrf.mxu0  ;;  %v7315_v17 = vpop.f32.mrf.mxu1 }
 0x25d   : > { %4023 = vmatpush2.bf16.msra.mxu1 %v6627_v18  ;;  %3971 = vmatprep.subr.bf16.mxu0 %v6632_v19 }
 0x25e   : > { %4024 = vmatprep.subr.bf16.mxu1 %v6637_v20  ;;  %v7317_v18 = vpop.f32.mrf.mxu1  ;;  %v7319_v19 = vpop.f32.mrf.mxu0 }
 0x260   : > { %3972 = vmatpush2.bf16.msra.mxu0 %v6640_v21  ;;  %v7325_v20 = vpop.f32.mrf.mxu1  ;;  %v7327_v21 = vpop.f32.mrf.mxu0 }
 0x261   : > { %4025 = vmatpush2.bf16.msra.mxu1 %v6643_v22  ;;  %3973 = vmatprep.subr.bf16.mxu0 %v6648_v23  ;;  %v3565_v22 = vld [vmem:[%s6382_s28 + $0xa0] sm:$0xff]  ;;  %v4966_v23 = vcombine.low %v7200_v61, %v7203_v48  ;;  %v7681_v61 = vld [vmem:[#allocation6_spill] sm:$0xff] }
 0x262   : > { %4026 = vmatprep.subr.bf16.mxu1 %v6653_v24  ;;  %v4968_v24 = vcombine.low %v7206_v12, %v7209_v46  ;;  %v3211_v12 = vadd.f32 %v7191_v58, %v7167_v50  ;;  %v7683_v46 = vld [vmem:[#allocation54_spill] sm:$0xff]  ;;  %v7685_v50 = vld [vmem:[#allocation65_spill] sm:$0xff] }
 0x264   : > { %3974 = vmatpush2.bf16.msra.mxu0 %v6656_v25  ;;  %v3573_v25 = vld [vmem:[%s6382_s28 + $0xe0] sm:$0xff] }
 0x265   : > { %4027 = vmatpush2.bf16.msra.mxu1 %v6659_v26  ;;  %3975 = vmatprep.subr.bf16.mxu0 %v6664_v27  ;;  %v3566_v26 = vld [vmem:[%s6382_s28 + $0xa8] sm:$0xff] }
 0x266   : > { %4028 = vmatprep.subr.bf16.mxu1 %v6669_v28  ;;  %v3574_v27 = vld [vmem:[%s6382_s28 + $0xe8] sm:$0xff]  ;;  %v7341_v28 = vpop.f32.mrf.mxu1 }
 0x268   : > { %3976 = vmatpush2.bf16.msra.mxu0 %v6674_v29  ;;  %v7343_v29 = vpop.f32.mrf.mxu0 }
 0x269   : > { %4029 = vmatpush2.bf16.msra.mxu1 %v6677_v30  ;;  %3977 = vmatprep.subr.bf16.mxu0 %v6680_v31  ;;  %v4983_v30 = vcombine.high %v3565_v22, %v3573_v25  ;;  %v4985_v31 = vcombine.high %v3566_v26, %v3574_v27 }
 0x26a   : > { %4030 = vmatprep.subr.bf16.mxu1 %v6685_v32  ;;  %v7349_v32 = vpop.f32.mrf.mxu1 }
 0x26c   : > { %3978 = vmatpush2.bf16.msra.mxu0 %v6688_v33  ;;  %v7351_v33 = vpop.f32.mrf.mxu0 }
 0x26d   : > { %4031 = vmatpush2.bf16.msra.mxu1 %v6691_v34  ;;  %3979 = vmatprep.subr.bf16.mxu0 %v6694_v35  ;;  %v7357_v34 = vpop.f32.mrf.mxu1  ;;  %v4982_v35 = vcombine.low %v3565_v22, %v3573_v25 }
 0x26e   : > { %4032 = vmatprep.subr.bf16.mxu1 %v6697_v36  ;;  %v4984_v36 = vcombine.low %v3566_v26, %v3574_v27 }
 0x270   : > { %3980 = vmatpush2.bf16.msra.mxu0 %v6706_v37  ;;  %v7360_v37 = vld [vmem:[%s6382_s28 + $0x30] sm:$0xff] }
 0x271   : > { %4033 = vmatpush2.bf16.msra.mxu1 %v6709_v38  ;;  %4055 = vmatprep.subr.bf16.mxu0 %v6714_v39  ;;  %v7363_v38 = vld [vmem:[%s6382_s28 + $0x70] sm:$0xff]  ;;  %v7365_v39 = vpop.f32.mrf.mxu0 }
 0x272   : > { %4108 = vmatprep.subr.bf16.mxu1 %v6717_v40  ;;  %v7370_v40 = vld [vmem:[%s6382_s28 + $0x38] sm:$0xff] }
 0x273   : > { %3982 = vmatmul.mubr.bf16.vlgmr.msra.gmra.mxu0 %v4966_v23  ;;  %v7690_v23 = vld [vmem:[#allocation10_spill] sm:$0xff] }
 0x274   : > { %4035 = vmatmul.mubr.bf16.vlgmr.msra.gmra.mxu1 %v4968_v24  ;;  %4056 = vmatpush1.bf16.msra.mxu0 %v6730_v51  ;;  %v7373_v51 = vld [vmem:[%s6382_s28 + $0x78] sm:$0xff]  ;;  %v7691_v24 = vld [vmem:[#allocation67_spill] sm:$0xff] }
 0x275   : > { %4109 = vmatpush1.bf16.msra.mxu1 %v6733_v52  ;;  %4057 = vmatprep.subr.bf16.mxu0 %v6738_v43  ;;  %v7377_v52 = vpop.f32.mrf.mxu1  ;;  %v4971_v43 = vcombine.high %v7360_v37, %v7363_v38 }
 0x276   : > { %4110 = vmatprep.subr.bf16.mxu1 %v6741_v44  ;;  %3991 = vmatprep.mubr.bf16.mxu0 %v4983_v30  ;;  %v4973_v44 = vcombine.high %v7370_v40, %v7373_v51 }
 0x277   : > { %4044 = vmatprep.mubr.bf16.mxu1 %v4985_v31  ;;  %v7692_v31 = vld [vmem:[#allocation11_spill] sm:$0xff] }
 0x278   : > { %4058 = vmatpush1.bf16.msra.mxu0 %v6746_v53  ;;  %v7383_v53 = vpop.f32.mrf.mxu0 }
 0x279   : > { %4111 = vmatpush1.bf16.msra.mxu1 %v6749_v54  ;;  %4059 = vmatprep.subr.bf16.mxu0 %v6754_v55  ;;  %v7388_v54 = vpop.f32.mrf.mxu1 }
 0x27a   : > { %4112 = vmatprep.subr.bf16.mxu1 %v6757_v56  ;;  %v3473_v55 = vpop.f32.mrf.mxu0  ;;  %v3215_v56 = vadd.f32 %v7223_v3, %v7189_v62  ;;  %v7682_v62 = vld [vmem:[#allocation53_spill] sm:$0xff]  ;;  %v7684_v3 = vld [vmem:[#allocation63_spill] sm:$0xff] }
 0x27b   : > { %3992 = vmatmul.mubr.bf16.gmra.mxu0 %v4982_v35  ;;  %v3264_v60 = vadd.f32 %v7684_v3, %v3211_v12  ;;  %v7693_v35 = vld [vmem:[#allocation66_spill] sm:$0xff] }
 0x27c   : > { %4045 = vmatmul.mubr.bf16.gmra.mxu1 %v4984_v36  ;;  %4060 = vmatpush1.bf16.msra.mxu0 %v6774_v63  ;;  %v3213_v63 = vadd.f32 %v7211_v4, %v7173_v57  ;;  %v3475_v48 = vpop.f32.mrf.mxu0  ;;  %v7686_v57 = vld [vmem:[#allocation7_spill] sm:$0xff]  ;;  %v7687_v4 = vld [vmem:[#allocation61_spill] sm:$0xff] }
 0x27d   : > { %4113 = vmatpush1.bf16.msra.mxu1 %v6777_v0  ;;  %4061 = vmatprep.subr.bf16.mxu0 %v6782_v1  ;;  %v3268_v0 = vadd.f32 %v7265_v45, %v3215_v56  ;;  %v7680_v1 = vld [vmem:[#allocation5_spill] sm:$0xff]  ;;  %v3317_v25 = vadd.f32 %v7691_v24, %v3264_v60 }
 0x27e   : > { %4114 = vmatprep.subr.bf16.mxu1 %v6785_v2  ;;  %4087 = vmatprep.mubr.bf16.mxu0 %v4971_v43  ;;  %v7401_v2 = vpop.f32.mrf.mxu1  ;;  %v3266_v58 = vadd.f32 %v7685_v50, %v3213_v63  ;;  %v3477_v22 = vpop.f32.mrf.mxu0  ;;  %v7695_v56 = vld [vmem:[#allocation13_spill] sm:$0xff]  ;;  %v7696_v63 = vld [vmem:[#allocation14_spill] sm:$0xff] }
 0x27f   : > { %4140 = vmatprep.mubr.bf16.mxu1 %v4973_v44  ;;  %v7694_v44 = vld [vmem:[#allocation12_spill] sm:$0xff] }
 0x280   : > { %4062 = vmatpush1.bf16.msra.mxu0 %v6794_v5  ;;  %v3209_v5 = vadd.f32 %v7683_v46, %v7682_v62  ;;  %v3526_v47 = vpop.f32.mrf.mxu1  ;;  %v3319_v26 = vadd.f32 %v7275_v41, %v3266_v58  ;;  %v3479_v12 = vpop.f32.mrf.mxu0  ;;  %v7699_v46 = vld [vmem:[#allocation17_spill] sm:$0xff] }
 0x281   : > { %4115 = vmatpush1.bf16.msra.mxu1 %v6797_v6  ;;  %4063 = vmatprep.subr.bf16.mxu0 %v7680_v1  ;;  %v3321_v6 = vadd.f32 %v7283_v11, %v3268_v0  ;;  %v3370_v11 = vadd.f32 %v7309_v16, %v3317_v25  ;;  %v7697_v1 = vld [vmem:[#allocation15_spill] sm:$0xff]  ;;  %v7708_v25 = vld [vmem:[#allocation24_spill] sm:$0xff] }
 0x282   : > { %4116 = vmatprep.subr.bf16.mxu1 %v7681_v61  ;;  %v3262_v45 = vadd.f32 %v7687_v4, %v3209_v5  ;;  %v3528_v30 = vpop.f32.mrf.mxu1  ;;  %v3372_v43 = vadd.f32 %v7319_v19, %v3319_v26  ;;  %v7698_v19 = vld [vmem:[#allocation16_spill] sm:$0xff]  ;;  %v7700_v5 = vld [vmem:[#allocation18_spill] sm:$0xff] }
 0x283   : > { %v3374_v27 = vadd.f32 %v7327_v21, %v3321_v6  ;;  %v3423_v61 = vadd.f32 %v7325_v20, %v3370_v11  ;;  %v7702_v4 = vld [vmem:[#allocation20_spill] sm:$0xff]  ;;  %v7703_v20 = vld [vmem:[#allocation21_spill] sm:$0xff] }
 0x284   : > { %4064 = vmatpush1.bf16.msra.mxu0 %v7686_v57  ;;  %v3315_v36 = vadd.f32 %v7693_v35, %v3262_v45  ;;  %v3530_v0 = vpop.f32.mrf.mxu1  ;;  %v3425_v16 = vadd.f32 %v7341_v28, %v3372_v43  ;;  %v7704_v28 = vld [vmem:[#allocation22_spill] sm:$0xff]  ;;  %v7710_v26 = vld [vmem:[#allocation56_spill] sm:$0xff] }
 0x285   : > { %4117 = vmatpush1.bf16.msra.mxu1 %v7688_v49  ;;  %4065 = vmatprep.subr.bf16.mxu0 %v7689_v9  ;;  %v3427_v21 = vadd.f32 %v7349_v32, %v3374_v27  ;;  %v3476_v60 = vadd.f32 %v3475_v48, %v3423_v61  ;;  %v7701_v32 = vld [vmem:[#allocation19_spill] sm:$0xff]  ;;  %v3483_v49 = vpop.f32.mrf.mxu0  ;;  %v7711_v27 = vld [vmem:[#allocation60_spill] sm:$0xff]  ;;  %v7712_v35 = vld [vmem:[#allocation26_spill] sm:$0xff] }
 0x286   : > { %4118 = vmatprep.subr.bf16.mxu1 %v7690_v23  ;;  %v3368_v41 = vadd.f32 %v7301_v14, %v3315_v36  ;;  %v3478_v14 = vadd.f32 %v3477_v22, %v3425_v16  ;;  %v3532_v50 = vpop.f32.mrf.mxu1  ;;  %v7705_v9 = vld [vmem:[#allocation23_spill] sm:$0xff]  ;;  %v7713_v36 = vld [vmem:[#allocation57_spill] sm:$0xff] }
 0x287   : > { %v3480_v62 = vadd.f32 %v3479_v12, %v3427_v21  ;;  %v3529_v45 = vadd.f32 %v3528_v30, %v3476_v60  ;;  %v7706_v23 = vld [vmem:[#allocation59_spill] sm:$0xff]  ;;  %v7714_v30 = vld [vmem:[#allocation62_spill] sm:$0xff]  ;;  %v3485_v21 = vpop.f32.mrf.mxu0 }
 0x288   : > { %4066 = vmatpush1.bf16.msra.mxu0 %v7692_v31  ;;  %v3421_v3 = vadd.f32 %v7317_v18, %v3368_v41  ;;  %v3531_v6 = vadd.f32 %v3530_v0, %v3478_v14  ;;  %v7707_v18 = vld [vmem:[#allocation64_spill] sm:$0xff]  ;;  %v3221_v31 = vadd.f32 %v7711_v27, %v7710_v26  ;;  %v3223_v11 = vadd.f32 %v7714_v30, %v7713_v36  ;;  %v7715_v12 = vld [vmem:[#allocation55_spill] sm:$0xff]  ;;  %v3536_v0 = vpop.f32.mrf.mxu1  ;;  %v7731_v27 = vld [vmem:[#allocation41_spill] sm:$0xff] }
 0x289   : > { %4119 = vmatpush1.bf16.msra.mxu1 %v7694_v44  ;;  %4067 = vmatprep.subr.bf16.mxu0 %v7695_v56  ;;  %v3533_v57 = vadd.f32 %v3532_v50, %v3480_v62  ;;  %v3225_v48 = vadd.f32 %v7707_v18, %v7706_v23  ;;  %v4165_v44 = vmul.f32 %v3529_v45, %v3529_v45  ;;  %v7721_v50 = vld [vmem:[#allocation31_spill] sm:$0xff]  ;;  %v7726_v18 = vld [vmem:[#allocation36_spill] sm:$0xff] }
 0x28a   : > { %4120 = vmatprep.subr.bf16.mxu1 %v7696_v63  ;;  %v3474_v58 = vadd.f32 %v3473_v55, %v3421_v3  ;;  %v7709_v55 = vld [vmem:[#allocation25_spill] sm:$0xff]  ;;  %v4162_v56 = vmul.f32 %v3531_v6, %v3531_v6  ;;  %v7716_v63 = vld [vmem:[#allocation58_spill] sm:$0xff]  ;;  %v3274_v41 = vadd.f32 %v7281_v7, %v3221_v31  ;;  %v3276_v61 = vadd.f32 %v7291_v59, %v3223_v11  ;;  %v3487_v7 = vpop.f32.mrf.mxu0  ;;  %v3538_v14 = vpop.f32.mrf.mxu1  ;;  %v7730_v26 = vld [vmem:[#allocation40_spill] sm:$0xff] }
 0x28b   : > { %v4166_v24 = vmul.f32 %v3533_v57, %v3533_v57  ;;  %v3278_v43 = vadd.f32 %v7299_v13, %v3225_v48  ;;  %v7720_v13 = vld [vmem:[#allocation30_spill] sm:$0xff]  ;;  %v7727_v48 = vld [vmem:[#allocation37_spill] sm:$0xff]  ;;  %v7734_v11 = vld [vmem:[#allocation44_spill] sm:$0xff] }
 0x28c   : > { %4068 = vmatpush1.bf16.msra.mxu0 %v7697_v1  ;;  %v3527_v22 = vadd.f32 %v3526_v47, %v3474_v58  ;;  %v3219_v47 = vadd.f32 %v7716_v63, %v7715_v12  ;;  %v7717_v1 = vld [vmem:[#allocation27_spill] sm:$0xff]  ;;  %v3329_v59 = vadd.f32 %v7307_v15, %v3276_v61  ;;  %v3540_v15 = vpop.f32.mrf.mxu1  ;;  %v7732_v31 = vld [vmem:[#allocation42_spill] sm:$0xff] }
 0x28d   : > { %4121 = vmatpush1.bf16.msra.mxu1 %v7698_v19  ;;  %4069 = vmatprep.subr.bf16.mxu0 %v7699_v46  ;;  %v4170_v62 = vadd.f32 %v4166_v24, %v4162_v56  ;;  %v7718_v19 = vld [vmem:[#allocation28_spill] sm:$0xff]  ;;  %v7719_v46 = vld [vmem:[#allocation29_spill] sm:$0xff]  ;;  %v3331_v3 = vadd.f32 %v7315_v17, %v3278_v43  ;;  %v7736_v43 = vld [vmem:[#allocation46_spill] sm:$0xff] }
 0x28e   : > { %4122 = vmatprep.subr.bf16.mxu1 %v7700_v5  ;;  %v4161_v16 = vmul.f32 %v3527_v22, %v3527_v22  ;;  %v3272_v5 = vadd.f32 %v7273_v10, %v3219_v47  ;;  %v7724_v10 = vld [vmem:[#allocation34_spill] sm:$0xff]  ;;  %v3382_v45 = vadd.f32 %v7365_v39, %v3329_v59  ;;  %v3542_v24 = vpop.f32.mrf.mxu1  ;;  %v7737_v12 = vld [vmem:[#allocation47_spill] sm:$0xff]  ;;  %v7738_v47 = vld [vmem:[#allocation48_spill] sm:$0xff] }
 0x28f   : > { %v3384_v58 = vadd.f32 %v7383_v53, %v3331_v3  ;;  %v7462_v57 = vadd.f32 1e-24, %v4170_v62  ;;  %v7740_v61 = vld [vmem:[#allocation50_spill] sm:$0xff]  ;;  %v3575_v62 = vld [vmem:[%s6382_s28 + $0xf0] sm:$0xff] }
 0x290   : > { %4070 = vmatpush1.bf16.msra.mxu0 %v7701_v32  ;;  %v4169_v60 = vadd.f32 %v4165_v44, %v4161_v16  ;;  %v3327_v32 = vadd.f32 %v7297_v8, %v3274_v41  ;;  %v3325_v17 = vadd.f32 %v7289_v42, %v3272_v5  ;;  %v3489_v8 = vpop.f32.mrf.mxu0  ;;  %v7728_v42 = vld [vmem:[#allocation38_spill] sm:$0xff]  ;;  %v3435_v39 = vadd.f32 %v7388_v54, %v3382_v45  ;;  %v7733_v54 = vld [vmem:[#allocation43_spill] sm:$0xff]  ;;  %v7739_v41 = vld [vmem:[#allocation49_spill] sm:$0xff] }
 0x291   : > { %4123 = vmatpush1.bf16.msra.mxu1 %v7702_v4  ;;  %4071 = vmatprep.subr.bf16.mxu0 %v7703_v20  ;;  %v7722_v4 = vld [vmem:[#allocation32_spill] sm:$0xff]  ;;  %v7723_v20 = vld [vmem:[#allocation33_spill] sm:$0xff]  ;;  %v3437_v23 = vadd.f32 %v7401_v2, %v3384_v58  ;;  %5514 = vrsqrt.f32 %v7462_v57  ;;  %v3567_v16 = vld [vmem:[%s6382_s28 + $0xb0] sm:$0xff]  ;;  %vm4186_vm0 = vcmp.eq.f32.partialorder %v7462_v57, inf  ;;  %vm4188_vm2 = vcmp.eq.f32.partialorder %v7462_v57, 0.0 }
 0x292   : > { %4124 = vmatprep.subr.bf16.mxu1 %v7704_v28  ;;  %v3380_v28 = vadd.f32 %v7351_v33, %v3327_v32  ;;  %v7470_v6 = vadd.f32 1e-24, %v4169_v60  ;;  %v3378_v53 = vadd.f32 %v7343_v29, %v3325_v17  ;;  %v3576_v5 = vld [vmem:[%s6382_s28 + $0xf8] sm:$0xff]  ;;  %v7741_v60 = vld [vmem:[#allocation51_spill] sm:$0xff]  ;;  %v4987_v59 = vcombine.high %v3567_v16, %v3575_v62 }
 0x293   : > { %v3490_v22 = vadd.f32 %v3489_v8, %v3437_v23  ;;  %v5507_v32 = vld [vmem:[%s6392_s18 + $0x30] sm:$0xff]   ;;  %v4986_v17 = vcombine.low %v3567_v16, %v3575_v62 }
 0x294   : > { %4072 = vmatpush2.bf16.msra.mxu0 %v7705_v9  ;;  %v7725_v9 = vld [vmem:[#allocation35_spill] sm:$0xff]  ;;  %v3433_v33 = vadd.f32 %v7377_v52, %v3380_v28  ;;  %5516 = vrsqrt.f32 %v7470_v6  ;;  %v3431_v29 = vadd.f32 %v7357_v34, %v3378_v53  ;;  %v7735_v34 = vld [vmem:[#allocation45_spill] sm:$0xff]  ;;  %vm4179_vm1 = vcmp.eq.f32.partialorder %v7470_v6, inf }
 0x295   : > { %4125 = vmatpush2.bf16.msra.mxu1 %v7708_v25  ;;  %4073 = vmatprep.subr.bf16.mxu0 %v7709_v55  ;;  %v7729_v25 = vld [vmem:[#allocation39_spill] sm:$0xff]  ;;  %v3488_v55 = vadd.f32 %v3487_v7, %v3435_v39  ;;  %v4972_v7 = vcombine.low %v7370_v40, %v7373_v51  ;;  %v5508_v51 = vld [vmem:[%s6392_s18 + $0x28] sm:$0xff]   ;;  %v4182_v8 = vand.u32 2147483648, %v7470_v6  ;;  %vm4181_vm3 = vcmp.eq.f32.partialorder %v7470_v6, 0.0  ;;  %v5513_v39 = vld [vmem:[%s6392_s18] sm:$0xff]  }
 0x296   : > { %4126 = vmatprep.subr.bf16.mxu1 %v7712_v35  ;;  %v3486_v2 = vadd.f32 %v3485_v21, %v3433_v33  ;;  %v3484_v52 = vadd.f32 %v3483_v49, %v3431_v29  ;;  %v3543_v35 = vadd.f32 %v3542_v24, %v3490_v22  ;;  %v5506_v21 = vld [vmem:[%s6392_s18 + $0x38] sm:$0xff]  }
 0x297   : > { %v3541_v30 = vadd.f32 %v3540_v15, %v3488_v55 }
 0x298   : > { %4074 = vmatpush2.bf16.msra.mxu0 %v7717_v1  ;;  %v3539_v36 = vadd.f32 %v3538_v14, %v3486_v2  ;;  %v3537_v44 = vadd.f32 %v3536_v0, %v3484_v52  ;;  %v4168_v56 = vmul.f32 %v3543_v35, %v3543_v35  ;;  %v4970_v0 = vcombine.low %v7360_v37, %v7363_v38 }
 0x299   : > { %4127 = vmatpush2.bf16.msra.mxu1 %v7718_v19  ;;  %4075 = vmatprep.subr.bf16.mxu0 %v7719_v46  ;;  %v4164_v63 = vmul.f32 %v3541_v30, %v3541_v30 }
 0x29a   : > { %4128 = vmatprep.subr.bf16.mxu1 %v7720_v13  ;;  %v4167_v49 = vmul.f32 %v3539_v36, %v3539_v36  ;;  %v4163_v19 = vmul.f32 %v3537_v44, %v3537_v44  ;;  %v3568_v13 = vld [vmem:[%s6382_s28 + $0xb8] sm:$0xff] }
 0x29b   : > { %v4172_v46 = vadd.f32 %v4168_v56, %v4164_v63  ;;  %v4988_v45 = vcombine.low %v3568_v13, %v3576_v5 }
 0x29c   : > { %4076 = vmatpush2.bf16.msra.mxu0 %v7721_v50  ;;  %v4171_v14 = vadd.f32 %v4167_v49, %v4163_v19  ;;  %v7742_v50 = vld [vmem:[#allocation52_spill] sm:$0xff] }
 0x29d   : > { %4129 = vmatpush2.bf16.msra.mxu1 %v7722_v4  ;;  %4077 = vmatprep.subr.bf16.mxu0 %v7723_v20  ;;  %v4989_v4 = vcombine.high %v3568_v13, %v3576_v5  ;;  %v7508_v37 = vadd.f32 1e-24, %v4172_v46 }
 0x29e   : > { %4130 = vmatprep.subr.bf16.mxu1 %v7724_v10  ;;  %v5515_v1 = vpop.eup %5514  ;;  %v7512_v40 = vadd.f32 1e-24, %v4171_v14  ;;  %v4189_v10 = vand.u32 2147483648, %v7462_v57 }
 0x29f   : > { %v4185_v58 = vmul.f32 %v5515_v1, %v7462_v57  ;;  %5518 = vrsqrt.f32 %v7508_v37  ;;  %vm4200_vm4 = vcmp.eq.f32.partialorder %v7508_v37, inf  ;;  %vm4202_vm6 = vcmp.eq.f32.partialorder %v7508_v37, 0.0 }
 0x2a0   : > { %4078 = vmatpush2.bf16.msra.mxu0 %v7725_v9  ;;  %5520 = vrsqrt.f32 %v7512_v40  ;;  %v5509_v9 = vld [vmem:[%s6392_s18 + $0x20] sm:$0xff]   ;;  %vm4193_vm5 = vcmp.eq.f32.partialorder %v7512_v40, inf  ;;  %v4196_v2 = vand.u32 2147483648, %v7512_v40  ;;  %vm4195_vm7 = vcmp.eq.f32.partialorder %v7512_v40, 0.0 }
 0x2a1   : > { %4131 = vmatpush2.bf16.msra.mxu1 %v7726_v18  ;;  %4079 = vmatprep.subr.bf16.mxu0 %v7727_v48  ;;  %v5517_v3 = vpop.eup %5516  ;;  %v4187_v20 = vsel %vm4186_vm0, %v7462_v57, %v4185_v58  ;;  %v5510_v57 = vld [vmem:[%s6392_s18 + $0x18] sm:$0xff]   ;;  %v5511_v18 = vld [vmem:[%s6392_s18 + $0x10] sm:$0xff]   ;;  %v5512_v48 = vld [vmem:[%s6392_s18 + $0x8] sm:$0xff]  }
 0x2a2   : > { %4132 = vmatprep.subr.bf16.mxu1 %v7728_v42  ;;  %v4178_v38 = vmul.f32 %v5517_v3, %v7470_v6  ;;  %v4190_v15 = vsel %vm4188_vm2, %v4189_v10, %v4187_v20 }
 0x2a4   : > { %4080 = vmatpush2.bf16.msra.mxu0 %v7729_v25  ;;  %v4180_v28 = vsel %vm4179_vm1, %v7470_v6, %v4178_v38  ;;  %v4203_v25 = vand.u32 2147483648, %v7508_v37 }
 0x2a5   : > { %4133 = vmatpush2.bf16.msra.mxu1 %v7730_v26  ;;  %4081 = vmatprep.subr.bf16.mxu0 %v7731_v27  ;;  %v4183_v53 = vsel %vm4181_vm3, %v4182_v8, %v4180_v28 }
 0x2a6   : > { %4134 = vmatprep.subr.bf16.mxu1 %v7732_v31  ;;  %v4269_v23 = vpack.c.bf16 %v4190_v15, %v4183_v53 }
 0x2a8   : > { %4082 = vmatpush2.bf16.msra.mxu0 %v7733_v54 }
 0x2a9   : > { %4135 = vmatpush2.bf16.msra.mxu1 %v7734_v11  ;;  %4083 = vmatprep.subr.bf16.mxu0 %v7735_v34 }
 0x2aa   : > { %4136 = vmatprep.subr.bf16.mxu1 %v7736_v43 }
 0x2ac   : > { %4084 = vmatpush2.bf16.msra.mxu0 %v7737_v12  ;;  %v5519_v6 = vpop.eup %5518 }
 0x2ad   : > { %4137 = vmatpush2.bf16.msra.mxu1 %v7738_v47  ;;  %4085 = vmatprep.subr.bf16.mxu0 %v7739_v41  ;;  %v5521_v42 = vpop.eup %5520  ;;  %v4199_v33 = vmul.f32 %v5519_v6, %v7508_v37 }
 0x2ae   : > { %4138 = vmatprep.subr.bf16.mxu1 %v7740_v61  ;;  %v4192_v22 = vmul.f32 %v5521_v42, %v7512_v40 }
 0x2af   : > { %v4201_v24 = vsel %vm4200_vm4, %v7508_v37, %v4199_v33 }
 0x2b0   : > { %4086 = vmatpush2.bf16.msra.mxu0 %v7741_v60  ;;  %v4194_v29 = vsel %vm4193_vm5, %v7512_v40, %v4192_v22  ;;  %v4204_v55 = vsel %vm4202_vm6, %v4203_v25, %v4201_v24 }
 0x2b1   : > { %4139 = vmatpush2.bf16.msra.mxu1 %v7742_v50  ;;  %5024 = vmatprep.subr.bf16.mxu0 %v5506_v21  ;;  %v4197_v26 = vsel %vm4195_vm7, %v4196_v2, %v4194_v29 }
 0x2b2   : > { %5044 = vmatprep.subr.bf16.mxu1 %v5506_v21  ;;  %v4270_v27 = vpack.c.bf16 %v4204_v55, %v4197_v26 }
 0x2b3   : > { %4088 = vmatmul.mubr.bf16.vlgmr.msra.gmra.mxu0 %v4970_v0  ;;  %v3771_v31 = vpop.f32.mrf.mxu0 }
 0x2b4   : > { %4141 = vmatmul.mubr.bf16.vlgmr.msra.gmra.mxu1 %v4972_v7  ;;  %5025 = vmatpush3.bf16.msra.mxu0 %v5506_v21  ;;  %v3824_v35 = vpop.f32.mrf.mxu1 }
 0x2b5   : > { %5026 = vmatprep.subr.bf16.mxu0 %v5507_v32  ;;  %4097 = vmatprep.mubr.bf16.mxu0 %v4987_v59  ;;  %v3773_v52 = vpop.f32.mrf.mxu0 }
 0x2b6   : > { %4150 = vmatprep.mubr.bf16.mxu1 %v4989_v4  ;;  %5045 = vmatpush3.bf16.msra.mxu1 %v5506_v21  ;;  %v3826_v36 = vpop.f32.mrf.mxu1 }
 0x2b7   : > { %5046 = vmatprep.subr.bf16.mxu1 %v5507_v32  ;;  %v3775_v54 = vpop.f32.mrf.mxu0 }
 0x2b8   : > { %5027 = vmatpush3.bf16.msra.mxu0 %v5507_v32  ;;  %v3828_v11 = vpop.f32.mrf.mxu1 }
 0x2b9   : > { %5028 = vmatprep.subr.bf16.mxu0 %v5508_v51  ;;  %v3777_v30 = vpop.f32.mrf.mxu0 }
 0x2ba   : > { %5047 = vmatpush3.bf16.msra.mxu1 %v5507_v32  ;;  %v3830_v43 = vpop.f32.mrf.mxu1 }
 0x2bb   : > { %4098 = vmatmul.mubr.bf16.gmra.mxu0 %v4986_v17  ;;  %5048 = vmatprep.subr.bf16.mxu1 %v5508_v51  ;;  %v3781_v34 = vpop.f32.mrf.mxu0  ;;  %v3825_v17 = vadd.f32 %v3824_v35, %v3771_v31 }
 0x2bc   : > { %4151 = vmatmul.mubr.bf16.gmra.mxu1 %v4988_v45  ;;  %5029 = vmatpush3.bf16.msra.mxu0 %v5508_v51  ;;  %v3834_v56 = vpop.f32.mrf.mxu1  ;;  %v3827_v45 = vadd.f32 %v3826_v36, %v3773_v52 }
 0x2bd   : > { %5040 = vmatprep.mubr.bf16.mxu0 %v4269_v23  ;;  %5030 = vmatprep.subr.bf16.mxu0 %v5509_v9  ;;  %v3783_v44 = vpop.f32.mrf.mxu0 }
 0x2be   : > { %5049 = vmatpush3.bf16.msra.mxu1 %v5508_v51  ;;  %v3836_v49 = vpop.f32.mrf.mxu1 }
 0x2bf   : > { %5050 = vmatprep.subr.bf16.mxu1 %v5509_v9  ;;  %v3785_v12 = vpop.f32.mrf.mxu0  ;;  %v3837_v25 = vadd.f32 %v3836_v49, %v3783_v44 }
 0x2c0   : > { %5031 = vmatpush3.bf16.msra.mxu0 %v5509_v9  ;;  %v3838_v47 = vpop.f32.mrf.mxu1 }
 0x2c1   : > { %5032 = vmatprep.subr.bf16.mxu0 %v5510_v57  ;;  %v3787_v63 = vpop.f32.mrf.mxu0  ;;  %v3839_v36 = vadd.f32 %v3838_v47, %v3785_v12 }
 0x2c2   : > { %5051 = vmatpush3.bf16.msra.mxu1 %v5509_v9  ;;  %v3840_v21 = vpop.f32.mrf.mxu1  ;;  %v3829_v9 = vadd.f32 %v3828_v11, %v3775_v54 }
 0x2c3   : > { %5052 = vmatprep.subr.bf16.mxu1 %v5510_v57 }
 0x2c4   : > { %5033 = vmatpush3.bf16.msra.mxu0 %v5510_v57 }
 0x2c5   : > { %5034 = vmatprep.subr.bf16.mxu0 %v5511_v18 }
 0x2c6   : > { %5053 = vmatpush3.bf16.msra.mxu1 %v5510_v57  ;;  %v3831_v57 = vadd.f32 %v3830_v43, %v3777_v30  ;;  %v3841_v30 = vadd.f32 %v3840_v21, %v3787_v63 }
 0x2c7   : > { %5054 = vmatprep.subr.bf16.mxu1 %v5511_v18 }
 0x2c8   : > { %5035 = vmatpush3.bf16.msra.mxu0 %v5511_v18 }
 0x2c9   : > { %5036 = vmatprep.subr.bf16.mxu0 %v5512_v48 }
 0x2ca   : > { %5055 = vmatpush3.bf16.msra.mxu1 %v5511_v18 }
 0x2cb   : > { %5056 = vmatprep.subr.bf16.mxu1 %v5512_v48 }
 0x2cc   : > { %5037 = vmatpush3.bf16.msra.mxu0 %v5512_v48 }
 0x2cd   : > { %5038 = vmatprep.subr.bf16.mxu0 %v5513_v39 }
 0x2ce   : > { %5057 = vmatpush3.bf16.msra.mxu1 %v5512_v48  ;;  %v3835_v48 = vadd.f32 %v3834_v56, %v3781_v34 }
 0x2cf   : > { %5058 = vmatprep.subr.bf16.mxu1 %v5513_v39 }
 0x2d0   : > { %5039 = vmatpush3.bf16.msra.mxu0 %v5513_v39 }
 0x2d2   : > { %5059 = vmatpush3.bf16.msra.mxu1 %v5513_v39 }
 0x2d3   : > { %5041 = vmatmul.mubr.bf16.vlgmr.msra.gmra.mxu0 %v4270_v27 }
 0x2f3   : > { %v3877_v41 = vpop.f32.mrf.mxu0 }
 0x2f4   : > { %v3930_v61 = vpop.f32.mrf.mxu1  ;;  %v3878_v8 = vadd.f32 %v3877_v41, %v3825_v17 }
 0x2f5   : > { %v3879_v1 = vpop.f32.mrf.mxu0 }
 0x2f6   : > { %v3932_v62 = vpop.f32.mrf.mxu1  ;;  %v3880_v53 = vadd.f32 %v3879_v1, %v3827_v45  ;;  %v3931_v18 = vadd.f32 %v3930_v61, %v3878_v8 }
 0x2f7   : > { %v3881_v16 = vpop.f32.mrf.mxu0 }
 0x2f8   : > { %v3934_v46 = vpop.f32.mrf.mxu1  ;;  %v3882_v6 = vadd.f32 %v3881_v16, %v3829_v9  ;;  %v3933_v33 = vadd.f32 %v3932_v62, %v3880_v53 }
 0x2f9   : > { %v3883_v19 = vpop.f32.mrf.mxu0 }
 0x2fa   : > { %v3936_v13 = vpop.f32.mrf.mxu1  ;;  %v3884_v39 = vadd.f32 %v3883_v19, %v3831_v57  ;;  %v3935_v2 = vadd.f32 %v3934_v46, %v3882_v6 }
 0x2fb   : > { %v3887_v0 = vpop.f32.mrf.mxu0 }
 0x2fc   : > { %v3940_v5 = vpop.f32.mrf.mxu1  ;;  %v3888_v29 = vadd.f32 %v3887_v0, %v3835_v48  ;;  %v3937_v31 = vadd.f32 %v3936_v13, %v3884_v39 }
 0x2fd   : > { %v3889_v3 = vpop.f32.mrf.mxu0 }
 0x2fe   : > { %v3942_v60 = vpop.f32.mrf.mxu1  ;;  %v3890_v26 = vadd.f32 %v3889_v3, %v3837_v25  ;;  %v3941_v11 = vadd.f32 %v3940_v5, %v3888_v29 }
 0x2ff   : > { %v3891_v7 = vpop.f32.mrf.mxu0 }
 0x300   : > { %v3944_v14 = vpop.f32.mrf.mxu1  ;;  %v3892_v61 = vadd.f32 %v3891_v7, %v3839_v36  ;;  %v3943_v16 = vadd.f32 %v3942_v60, %v3890_v26 }
 0x301   : > { %v3893_v50 = vpop.f32.mrf.mxu0 }
 0x302   : > { %v3946_v59 = vpop.f32.mrf.mxu1  ;;  %v3894_v44 = vadd.f32 %v3893_v50, %v3841_v30  ;;  %v3945_v21 = vadd.f32 %v3944_v14, %v3892_v61 }
 0x304   : > { %v3947_v5 = vadd.f32 %v3946_v59, %v3894_v44 }
 0x333   : > { %v3983_v32 = vpop.f32.mrf.mxu0 }
 0x334   : > { %v4036_v58 = vpop.f32.mrf.mxu1  ;;  %v3984_v22 = vadd.f32 %v3983_v32, %v3931_v18 }
 0x335   : > { %v3985_v4 = vpop.f32.mrf.mxu0 }
 0x336   : > { %v4038_v37 = vpop.f32.mrf.mxu1  ;;  %v3986_v55 = vadd.f32 %v3985_v4, %v3933_v33  ;;  %v4037_v52 = vadd.f32 %v4036_v58, %v3984_v22 }
 0x337   : > { %v3987_v38 = vpop.f32.mrf.mxu0 }
 0x338   : > { %v4040_v40 = vpop.f32.mrf.mxu1  ;;  %v3988_v35 = vadd.f32 %v3987_v38, %v3935_v2  ;;  %v4039_v34 = vadd.f32 %v4038_v37, %v3986_v55 }
 0x339   : > { %v3989_v51 = vpop.f32.mrf.mxu0 }
 0x33a   : > { %v4042_v20 = vpop.f32.mrf.mxu1  ;;  %v3990_v56 = vadd.f32 %v3989_v51, %v3937_v31  ;;  %v4041_v19 = vadd.f32 %v4040_v40, %v3988_v35 }
 0x33b   : > { %v3993_v10 = vpop.f32.mrf.mxu0 }
 0x33c   : > { %v4046_v28 = vpop.f32.mrf.mxu1  ;;  %v3994_v49 = vadd.f32 %v3993_v10, %v3941_v11  ;;  %v4043_v58 = vadd.f32 %v4042_v20, %v3990_v56 }
 0x33d   : > { %v3995_v15 = vpop.f32.mrf.mxu0 }
 0x33e   : > { %v4048_v23 = vpop.f32.mrf.mxu1  ;;  %v3996_v3 = vadd.f32 %v3995_v15, %v3943_v16  ;;  %v4047_v4 = vadd.f32 %v4046_v28, %v3994_v49  ;;  %v4265_v49 = vld [vmem:[#allocation2 + $0x10] sm:$0xff] }
 0x33f   : > { %v3997_v42 = vpop.f32.mrf.mxu0 }
 0x340   : > { %v4050_v24 = vpop.f32.mrf.mxu1  ;;  %v3998_v10 = vadd.f32 %v3997_v42, %v3945_v21  ;;  %v4049_v40 = vadd.f32 %v4048_v23, %v3996_v3 }
 0x341   : > { %v3999_v27 = vpop.f32.mrf.mxu0 }
 0x342   : > { %v4052_v54 = vpop.f32.mrf.mxu1  ;;  %v4000_v45 = vadd.f32 %v3999_v27, %v3947_v5  ;;  %v4051_v48 = vadd.f32 %v4050_v24, %v3998_v10 }
 0x344   : > { %v4053_v39 = vadd.f32 %v4052_v54, %v4000_v45 }
 0x373   : > { %v4089_v43 = vpop.f32.mrf.mxu0 }
 0x374   : > { %v4090_v41 = vadd.f32 %v4089_v43, %v4037_v52  ;;  %v4142_v1 = vpop.f32.mrf.mxu1 }
 0x375   : > { %v4091_v62 = vpop.f32.mrf.mxu0 }
 0x376   : > { %v4143_v46 = vadd.f32 %v4142_v1, %v4090_v41  ;;  %v4092_v0 = vadd.f32 %v4091_v62, %v4039_v34  ;;  %v4144_v13 = vpop.f32.mrf.mxu1  ;;  %v4267_v1 = vld [vmem:[#allocation2 + $0x18] sm:$0xff] }
 0x377   : > { %v4093_v32 = vpop.f32.mrf.mxu0 }
 0x378   : > { %v4145_v12 = vadd.f32 %v4144_v13, %v4092_v0  ;;  %v4094_v63 = vadd.f32 %v4093_v32, %v4041_v19  ;;  %v4146_v47 = vpop.f32.mrf.mxu1  ;;  %v4205_v38 = vmul.f32 %v4143_v46, %v4143_v46  ;;  %v4268_v32 = vld [vmem:[#allocation2 + $0x8] sm:$0xff] }
 0x379   : > { %v4095_v37 = vpop.f32.mrf.mxu0 }
 0x37a   : > { %v4209_v7 = vmul.f32 %v4145_v12, %v4145_v12  ;;  %v4147_v60 = vadd.f32 %v4146_v47, %v4094_v63  ;;  %v4096_v50 = vadd.f32 %v4095_v37, %v4043_v58  ;;  %v4148_v51 = vpop.f32.mrf.mxu1 }
 0x37b   : > { %v4099_v17 = vpop.f32.mrf.mxu0 }
 0x37c   : > { %v4213_v8 = vadd.f32 %v4209_v7, %v4205_v38  ;;  %v4149_v15 = vadd.f32 %v4148_v51, %v4096_v50  ;;  %v4100_v9 = vadd.f32 %v4099_v17, %v4047_v4  ;;  %v4152_v20 = vpop.f32.mrf.mxu1  ;;  %v4206_v53 = vmul.f32 %v4147_v60, %v4147_v60  ;;  %v4266_v4 = vld [vmem:[#allocation2] sm:$0xff] }
 0x37d   : > { %v4101_v57 = vpop.f32.mrf.mxu0 }
 0x37e   : > { %v4217_v18 = vadd.f32 1e-24, %v4213_v8  ;;  %v4210_v14 = vmul.f32 %v4149_v15, %v4149_v15  ;;  %v4153_v59 = vadd.f32 %v4152_v20, %v4100_v9  ;;  %v4102_v28 = vadd.f32 %v4101_v57, %v4049_v40  ;;  %v4154_v6 = vpop.f32.mrf.mxu1  ;;  %v4378_v9 = vld [vmem:[#allocation3 + $0x8] sm:$0xff] }
 0x37f   : > { %v4103_v33 = vpop.f32.mrf.mxu0 }
 0x380   : > { %5522 = vrsqrt.f32 %v4217_v18  ;;  %v4214_v22 = vadd.f32 %v4210_v14, %v4206_v53  ;;  %v4155_v42 = vadd.f32 %v4154_v6, %v4102_v28  ;;  %v4156_v23 = vpop.f32.mrf.mxu1  ;;  %v4104_v25 = vadd.f32 %v4103_v33, %v4051_v48  ;;  %v4376_v53 = vld [vmem:[#allocation3] sm:$0xff]  ;;  %v4379_v14 = vld [vmem:[#allocation3 + $0x10] sm:$0xff]  ;;  %v4377_v6 = vld [vmem:[#allocation3 + $0x18] sm:$0xff] }
 0x381   : > { %v4105_v29 = vpop.f32.mrf.mxu0  ;;  %v4207_v55 = vmul.f32 %v4153_v59, %v4153_v59  ;;  %vm4223_vm8 = vcmp.eq.f32.partialorder %v4217_v18, inf  ;;  %v4226_v62 = vand.u32 2147483648, %v4217_v18  ;;  %vm4225_vm10 = vcmp.eq.f32.partialorder %v4217_v18, 0.0 }
 0x382   : > { %v4218_v2 = vadd.f32 1e-24, %v4214_v22  ;;  %v4211_v26 = vmul.f32 %v4155_v42, %v4155_v42  ;;  %v4106_v27 = vadd.f32 %v4105_v29, %v4053_v39  ;;  %v4157_v31 = vadd.f32 %v4156_v23, %v4104_v25  ;;  %v4158_v52 = vpop.f32.mrf.mxu1 }
 0x384   : > { %5524 = vrsqrt.f32 %v4218_v2  ;;  %v4215_v35 = vadd.f32 %v4211_v26, %v4207_v55  ;;  %v4159_v36 = vadd.f32 %v4158_v52, %v4106_v27  ;;  %v4208_v11 = vmul.f32 %v4157_v31, %v4157_v31 }
 0x385   : > { %vm4230_vm9 = vcmp.eq.f32.partialorder %v4218_v2, inf  ;;  %v4233_v19 = vand.u32 2147483648, %v4218_v2  ;;  %vm4232_vm11 = vcmp.eq.f32.partialorder %v4218_v2, 0.0 }
 0x386   : > { %v4219_v30 = vadd.f32 1e-24, %v4215_v35  ;;  %v4212_v24 = vmul.f32 %v4159_v36, %v4159_v36 }
 0x388   : > { %5526 = vrsqrt.f32 %v4219_v30  ;;  %v4216_v54 = vadd.f32 %v4212_v24, %v4208_v11  ;;  %vm4237_vm12 = vcmp.eq.f32.partialorder %v4219_v30, inf  ;;  %v4240_v10 = vand.u32 2147483648, %v4219_v30 }
 0x389   : > { %vm4239_vm14 = vcmp.eq.f32.partialorder %v4219_v30, 0.0 }
 0x38a   : > { %v4220_v43 = vadd.f32 1e-24, %v4216_v54 }
 0x38c   : > { %5528 = vrsqrt.f32 %v4220_v43  ;;  %vm4244_vm13 = vcmp.eq.f32.partialorder %v4220_v43, inf  ;;  %v4247_v40 = vand.u32 2147483648, %v4220_v43  ;;  %vm4246_vm15 = vcmp.eq.f32.partialorder %v4220_v43, 0.0 }
 0x38d   : > { %v5523_v34 = vpop.eup %5522 }
 0x38e   : > { %v4222_v56 = vmul.f32 %v5523_v34, %v4217_v18 }
 0x390   : > { %v4224_v61 = vsel %vm4223_vm8, %v4217_v18, %v4222_v56 }
 0x391   : > { %v5525_v41 = vpop.eup %5524  ;;  %v4227_v58 = vsel %vm4225_vm10, %v4226_v62, %v4224_v61 }
 0x392   : > { %v4229_v16 = vmul.f32 %v5525_v41, %v4218_v2 }
 0x393   : > { %v5042_v44 = vpop.f32.mrf.mxu0 }
 0x394   : > { %v4370_v46 = vadd.f32 %v5042_v44, %v4267_v1  ;;  %v4231_v0 = vsel %vm4230_vm9, %v4218_v2, %v4229_v16 }
 0x395   : > { %v5527_v13 = vpop.eup %5526  ;;  %v4353_v3 = vpop.f32.mrf.mxu0  ;;  %v4234_v12 = vsel %vm4232_vm11, %v4233_v19, %v4231_v0 }
 0x396   : > { %4374 = vst [vmem:[#allocation2 + $0x18] sm:$0xff] %v4370_v46  ;;  %v4368_v63 = vadd.f32 %v4353_v3, %v4265_v49  ;;  %v4380_v47 = vpack.c.bf16 %v4234_v12, %v4227_v58  ;;  %v4236_v21 = vmul.f32 %v5527_v13, %v4219_v30 }
 0x397   : > { %v5043_v5 = vpop.f32.mrf.mxu0 }
 0x398   : > { %4372 = vst [vmem:[#allocation2 + $0x10] sm:$0xff] %v4368_v63  ;;  %v4371_v37 = vadd.f32 %v5043_v5, %v4268_v32  ;;  %5060 = vmatprep.mubr.bf16.mxu1 %v4380_v47  ;;  %v4238_v50 = vsel %vm4237_vm12, %v4219_v30, %v4236_v21 }
 0x399   : > { %v5529_v38 = vpop.eup %5528  ;;  %v4356_v7 = vpop.f32.mrf.mxu0  ;;  %v4241_v45 = vsel %vm4239_vm14, %v4240_v10, %v4238_v50 }
 0x39a   : > { %4375 = vst [vmem:[#allocation2 + $0x8] sm:$0xff] %v4371_v37  ;;  %v4369_v60 = vadd.f32 %v4356_v7, %v4266_v4  ;;  %v4243_v51 = vmul.f32 %v5529_v38, %v4220_v43 }
 0x39c   : > { %4373 = vst [vmem:[#allocation2] sm:$0xff] %v4369_v60  ;;  %v4245_v17 = vsel %vm4244_vm13, %v4220_v43, %v4243_v51 }
 0x39d   : > { %v4248_v8 = vsel %vm4246_vm15, %v4247_v40, %v4245_v17 }
 0x39e   : > { %v4381_v15 = vpack.c.bf16 %v4248_v8, %v4241_v45 }
 0x3a0   : > { %5061 = vmatmul.mubr.bf16.vlgmr.msra.gmra.mxu1 %v4381_v15 }
 0x460   : > { %v5062_v20 = vpop.f32.mrf.mxu1 }
 0x461   : > { %v4433_v57 = vadd.f32 %v5062_v20, %v4378_v9 }
 0x462   : > { %v4416_v18 = vpop.f32.mrf.mxu1 }
 0x463   : > { %4437 = vst [vmem:[#allocation3 + $0x8] sm:$0xff] %v4433_v57  ;;  %v4431_v59 = vadd.f32 %v4416_v18, %v4376_v53 }
 0x464   : > { %v5063_v28 = vpop.f32.mrf.mxu1 }
 0x465   : > { %4435 = vst [vmem:[#allocation3] sm:$0xff] %v4431_v59  ;;  %v4434_v48 = vadd.f32 %v5063_v28, %v4379_v14  ;;  %4442 = sbr.rel (%p4998_p13) target bundleno = 1194 (0x4aa), region = 82 }
 0x466   : > { %v4419_v33 = vpop.f32.mrf.mxu1 }
 0x467   : > { %4438 = vst [vmem:[#allocation3 + $0x10] sm:$0xff] %v4434_v48  ;;  %v4432_v39 = vadd.f32 %v4419_v33, %v4377_v6 }
 0x469   : > { %4436 = vst [vmem:[#allocation3 + $0x18] sm:$0xff] %v4432_v39 }
 0x46a   : > { %v4443_v22 = vld [vmem:[#allocation2 + $0x10] sm:$0xff]  ;;  %v4444_v42 = vld [vmem:[#allocation2] sm:$0xff]  ;;  %v5769_v23 = vmov 0.0   ;;  %v4445_v25 = vld [vmem:[#allocation2 + $0x18] sm:$0xff] }
 0x46b   : > { %4491 = vst [vmem:[%s6387_s5] sm:$0xff] %v5769_v23  ;;  %v4446_v55 = vld [vmem:[#allocation2 + $0x8] sm:$0xff]  ;;  %v4455_v46 = vmul.f32 32768.0, %v4443_v22  ;;  %v4456_v13 = vmul.f32 32768.0, %v4444_v42  ;;  %v4457_v3 = vmul.f32 32768.0, %v4445_v25 }
 0x46c   : > { %v4447_v29 = vld [vmem:[#allocation3] sm:$0xff]  ;;  %v4449_v26 = vld [vmem:[#allocation3 + $0x8] sm:$0xff]  ;;  %v4458_v58 = vmul.f32 32768.0, %v4446_v55 }
 0x46d   : > { %v4451_v31 = vsub.f32 %v4443_v22, %v4447_v29  ;;  %v4463_v35 = vmul.f32 32768.0, %v4447_v29  ;;  %v4453_v36 = vsub.f32 %v4445_v25, %v4449_v26  ;;  %v4465_v24 = vmul.f32 32768.0, %v4449_v26 }
 0x46e   : > { %v4450_v27 = vld [vmem:[#allocation3 + $0x10] sm:$0xff]  ;;  %v4459_v12 = vadd.f32 1e-06, %v4455_v46  ;;  %v4460_v47 = vadd.f32 1e-06, %v4456_v13 }
 0x46f   : > { %v4454_v30 = vsub.f32 %v4446_v55, %v4450_v27  ;;  %v4466_v54 = vmul.f32 32768.0, %v4450_v27  ;;  %v4467_v43 = vadd.f32 1e-06, %v4463_v35  ;;  %v4492_v34 = vmul.f32 %v4451_v31, %v4451_v31 }
 0x470   : > { %v4448_v2 = vld [vmem:[#allocation3 + $0x18] sm:$0xff]  ;;  %v4469_v1 = vadd.f32 1e-06, %v4465_v24  ;;  %v4494_v61 = vmul.f32 %v4453_v36, %v4453_v36  ;;  %v4461_v21 = vadd.f32 1e-06, %v4457_v3 }
 0x471   : > { %v4452_v52 = vsub.f32 %v4444_v42, %v4448_v2  ;;  %v4464_v11 = vmul.f32 32768.0, %v4448_v2  ;;  %v4470_v16 = vadd.f32 1e-06, %v4466_v54  ;;  %5696 = vrcp.f32 %v4467_v43 }
 0x472   : > { %v4495_v44 = vmul.f32 %v4454_v30, %v4454_v30  ;;  %v4462_v37 = vadd.f32 1e-06, %v4458_v58 }
 0x473   : > { %v4493_v56 = vmul.f32 %v4452_v52, %v4452_v52  ;;  %v4468_v41 = vadd.f32 1e-06, %v4464_v11 }
 0x475   : > { %v4496_v49 = vadd.f32 %v4493_v56, %v4492_v34  ;;  %5698 = vrcp.f32 %v4468_v41 }
 0x476   : > { %5700 = vrcp.f32 %v4469_v1 }
 0x477   : > { %v4497_v62 = vadd.f32 %v4496_v49, %v4494_v61  ;;  %5702 = vrcp.f32 %v4470_v16 }
 0x479   : > { %v4498_v19 = vadd.f32 %v4497_v62, %v4495_v44 }
 0x47b   : > { %v4499_v0 = vrot.slane %v4498_v19, 4 }
 0x47d   : > { %v4500_v32 = vadd.f32 %v4499_v0, %v4498_v19 }
 0x47e   : > { %v5697_v4 = vpop.eup %5696 }
 0x47f   : > { %v4501_v63 = vrot.slane %v4500_v32, 2  ;;  %v4472_v60 = vmul.f32 %v5697_v4, %v4459_v12 }
 0x481   : > { %v4502_v5 = vadd.f32 %v4501_v63, %v4500_v32  ;;  %5704 = vlog2.f32 %v4472_v60 }
 0x482   : > { %v5699_v38 = vpop.eup %5698 }
 0x483   : > { %v4503_v7 = vrot.slane %v4502_v5, 1  ;;  %v5701_v50 = vpop.eup %5700  ;;  %v4474_v51 = vmul.f32 %v5699_v38, %v4460_v47 }
 0x484   : > { %v5703_v10 = vpop.eup %5702  ;;  %v4476_v17 = vmul.f32 %v5701_v50, %v4461_v21 }
 0x485   : > { %v4504_v40 = vadd.f32 %v4503_v7, %v4502_v5  ;;  %v4478_v45 = vmul.f32 %v5703_v10, %v4462_v37  ;;  %5706 = vlog2.f32 %v4474_v51 }
 0x486   : > { %5708 = vlog2.f32 %v4476_v17 }
 0x487   : > { %4505 = vst [vmem:[%s6387_s5] sm:$0x1] %v4504_v40  ;;  %5710 = vlog2.f32 %v4478_v45 }
 0x48e   : > { %v5705_v8 = vpop.eup %5704 }
 0x48f   : > { %v4480_v9 = vmul.f32 0.6931472, %v5705_v8 }
 0x491   : > { %v4487_v14 = vand.u32 2147483647, %v4480_v9 }
 0x492   : > { %v5707_v15 = vpop.eup %5706 }
 0x493   : > { %v5709_v20 = vpop.eup %5708  ;;  %v4482_v53 = vmul.f32 0.6931472, %v5707_v15 }
 0x494   : > { %v5711_v57 = vpop.eup %5710  ;;  %v4484_v18 = vmul.f32 0.6931472, %v5709_v20 }
 0x495   : > { %v4486_v59 = vmul.f32 0.6931472, %v5711_v57  ;;  %v4488_v28 = vand.u32 2147483647, %v4482_v53 }
 0x496   : > { %v4489_v6 = vand.u32 2147483647, %v4484_v18 }
 0x497   : > { %v4490_v48 = vand.u32 2147483647, %v4486_v59  ;;  %v4506_v33 = vadd.f32 %v4488_v28, %v4487_v14 }
 0x499   : > { %v4507_v39 = vadd.f32 %v4506_v33, %v4489_v6 }
 0x49b   : > { %v4508_v22 = vadd.f32 %v4507_v39, %v4490_v48 }
 0x49d   : > { %v4509_v42 = vrot.slane %v4508_v22, 4 }
 0x49f   : > { %v4510_v23 = vadd.f32 %v4509_v42, %v4508_v22 }
 0x4a1   : > { %v4511_v25 = vrot.slane %v4510_v23, 2 }
 0x4a3   : > { %v4512_v29 = vadd.f32 %v4511_v25, %v4510_v23 }
 0x4a5   : > { %v4513_v2 = vrot.slane %v4512_v29, 1 }
 0x4a7   : > { %v4514_v55 = vadd.f32 %v4513_v2, %v4512_v29 }
 0x4a9   : > { %4515 = vst [vmem:[%s6387_s5 + $0x1] sm:$0x1] %v4514_v55 }
 0x4aa PF: > { %s14_s21 = sadd.s32 1, %s5766_s21   ;;  %s7743_s15 = smov %s5746_s16 }
 0x4ab   : > { %p11_p0 = scmp.ge.s32.totalorder %s14_s21, 20   ;;  %s7744_s16 = smov %s5844_s26 }
 0x4ac   : > { %s7745_s17 = smov %s5758_s19  ;;  %s7746_s18 = smov %s5762_s20 }
 0x4ad   : > { %s7747_s19 = smov %s7750_s22  ;;  %s7748_s20 = smov %s7754_s23 }
 0x4ae   :  { %13 = sbr.rel (!%p11_p0) target bundleno = 4 (0x4), region = 126 }

</bundles_post_ra>
